<compile_context>
chip_gen: v7x
topology: tpu7x:2x2x1
jax: 0.10.0
libtpu: 0.0.40
codegen_flags: <defaults>
</compile_context>

<pallas_src>
import functools

import jax
import jax.numpy as jnp
import numpy as np
from jax.experimental import pallas as pl
from jax.experimental.pallas import tpu as pltpu


# ---------------------------------------------------------------------------
# Host-side helpers
# ---------------------------------------------------------------------------
def _round_up(x: int, m: int) -> int:
    return ((x + m - 1) // m) * m


def _centered_dft_matrix(n: int):
    """(real, imag) of the centered, ortho-normalized forward DFT matrix.

    Column j = fftshift(fft(ifftshift(e_j), norm='ortho')).  The centered ortho
    IFFT matrix is the elementwise conjugate of this one.
    """
    eye = np.eye(n, dtype=np.complex64)
    f = np.fft.fftshift(
        np.fft.fft(np.fft.ifftshift(eye, axes=0), axis=0, norm="ortho"), axes=0)
    return np.real(f).astype(np.float32), np.imag(f).astype(np.float32)


# ---------------------------------------------------------------------------
# Pallas kernel: one (batch, coil-split, coil-block) tile per grid step
# ---------------------------------------------------------------------------
def _mri_loglik_kernel(img_ref,           # (1, 2, Hp, Wp)        f32, pre-scaled
                       sens_ref,          # (1, 2, Hp, CB*Wp)     transport dtype, W-stacked
                       ksp_ref,           # (1, 2, CB*Hp, Wp)     transport dtype, H-stacked,
                                          #                       = scale * mask * kspace
                       mask_ref,          # (1, Hp, Wp)           f32
                       fh_r_ref, fh_i_ref, fh_s_ref, fh_d_ref,      # (Hp, Hp)
                       fwt_r_ref, fwt_i_ref, fwt_s_ref, fwt_d_ref,  # (Wp, Wp)
                       out_ref,           # (1, 2, Hp, Wp)        f32
                       acc_ref,           # (2, Hp, Wp)           f32 scratch accumulator
                       *, cb: int):
    c = pl.program_id(2)
    nc = pl.num_programs(2)
    f32 = jnp.float32
    mm_dt = fh_r_ref.dtype
    hp, wp = img_ref.shape[2], img_ref.shape[3]

    def mm(x):
        return x.astype(mm_dt)

    def dot(a, b):
        return jnp.dot(a, b, preferred_element_type=f32)

    # --- lane/sublane-aligned coil re-stacking helpers (VMEM copies only) ---
    def w_to_h(x):          # (hp, cb*wp) -> (cb*hp, wp)
        if cb == 1:
            return x
        return jnp.concatenate([x[:, i * wp:(i + 1) * wp] for i in range(cb)], axis=0)

    def h_to_w(x):          # (cb*hp, wp) -> (hp, cb*wp)
        if cb == 1:
            return x
        return jnp.concatenate([x[i * hp:(i + 1) * hp, :] for i in range(cb)], axis=1)

    def tile_w(x):          # (hp, wp) -> (hp, cb*wp)
        if cb == 1:
            return x
        return jnp.concatenate([x] * cb, axis=1)

    def tile_h(x):          # (hp, wp) -> (cb*hp, wp)
        if cb == 1:
            return x
        return jnp.concatenate([x] * cb, axis=0)

    def coil_sum_w(x):      # (hp, cb*wp) -> (hp, wp)
        if cb == 1:
            return x
        s = x[:, 0:wp]
        for i in range(1, cb):
            s = s + x[:, i * wp:(i + 1) * wp]
        return s

    # --- constant DFT matrices (single-buffered blocks) ---
    fh_r = fh_r_ref[...]
    fh_i = fh_i_ref[...]
    fh_s = fh_s_ref[...]
    fh_d = fh_d_ref[...]
    fwt_r = fwt_r_ref[...]
    fwt_i = fwt_i_ref[...]
    fwt_s = fwt_s_ref[...]
    fwt_d = fwt_d_ref[...]

    xr_w = tile_w(img_ref[0, 0])          # pre-scaled image, W-stacked per coil
    xi_w = tile_w(img_ref[0, 1])
    m_h = tile_h(mask_ref[0])             # sampling mask, H-stacked per coil

    sr = sens_ref[0, 0]                   # (hp, cb*wp) W-stacked
    si = sens_ref[0, 1]
    yr = ksp_ref[0, 0]                    # (cb*hp, wp) H-stacked (already scale*mask*y)
    yi = ksp_ref[0, 1]

    # step 1: mul = S * (scale * x)                               [W-stacked]
    mr = sr * xr_w - si * xi_w
    mi = sr * xi_w + si * xr_w

    # step 2a: forward H-stage  A = Fh @ M  (Gauss 3-mult)        [W-stacked]
    p1 = dot(fh_r, mm(mr))
    p2 = dot(fh_i, mm(mi))
    p3 = dot(fh_s, mm(mr + mi))
    ar = p1 - p2
    ai = p3 - p1 - p2

    ar_h = w_to_h(ar)
    ai_h = w_to_h(ai)

    # step 2b: forward W-stage  K = A @ FwT                       [H-stacked]
    p1 = dot(mm(ar_h), fwt_r)
    p2 = dot(mm(ai_h), fwt_i)
    p3 = dot(mm(ar_h + ai_h), fwt_s)
    kr = p1 - p2
    ki = p3 - p1 - p2

    # step 3: error = mask * K - scale * mask * y                 [H-stacked]
    er = m_h * kr - yr
    ei = m_h * ki - yi

    # step 4a: backward W-stage  G = E @ conj(FwT)                [H-stacked]
    p1 = dot(mm(er), fwt_r)
    p2 = dot(mm(ei), fwt_i)
    p3 = dot(mm(er + ei), fwt_d)
    gr = p1 + p2
    gi = p3 - p1 + p2

    gr_w = h_to_w(gr)
    gi_w = h_to_w(gi)

    # step 4b: backward H-stage  B = conj(Fh) @ G                 [W-stacked]
    p1 = dot(fh_r, mm(gr_w))
    p2 = dot(fh_i, mm(gi_w))
    p3 = dot(fh_d, mm(gr_w + gi_w))
    br = p1 + p2
    bi = p3 - p1 + p2

    # step 5: conj(S) * B, summed over this coil block
    acc_r = coil_sum_w(sr * br + si * bi)
    acc_i = coil_sum_w(sr * bi - si * br)

    @pl.when(c == 0)
    def _():
        acc_ref[0] = acc_r
        acc_ref[1] = acc_i

    @pl.when(c != 0)
    def _():
        acc_ref[0] += acc_r
        acc_ref[1] += acc_i

    @pl.when(c == nc - 1)
    def _():
        out_ref[0, 0] = acc_ref[0]
        out_ref[0, 1] = acc_ref[1]


# ---------------------------------------------------------------------------
# Wrapper
# ---------------------------------------------------------------------------
def mri_log_likelihood(input_image, masked_kspace, sensitivity_map,
                       sampling_mask, loglikelihood_scaling=None, *,
                       matmul_dtype=jnp.bfloat16, transport_dtype=None,
                       max_coil_block=None, coil_splits=None):
    f32 = jnp.float32
    N, _, H, W = input_image.shape
    C = sensitivity_map.shape[1]

    if transport_dtype is None:
        transport_dtype = matmul_dtype      # bf16 transport on the bf16-MXU path

    # MXU/lane-friendly padding; zero padding is exact for this operator.
    Hp = _round_up(max(H, 128), 128)
    Wp = _round_up(max(W, 128), 128)

    # ---- generation-aware VMEM capacity ----
    try:
        vmem_cap = int(pltpu.get_tpu_info().vmem_capacity_bytes)
    except Exception:
        vmem_cap = 64 * 1024 * 1024         # conservative (v7x per-core)
    usable = vmem_cap - 8 * 1024 * 1024     # leave Mosaic scratch headroom

    # ---- coil split over a second parallel grid axis (v7x 2nd TC when N==1) ----
    if coil_splits is None:
        coil_splits = 2 if (N == 1 and C % 2 == 0) else 1
    assert C % coil_splits == 0, "coil_splits must divide the coil count"
    cps = C // coil_splits                  # coils per split

    if max_coil_block is None:
        max_coil_block = 8 if vmem_cap >= 96 * 1024 * 1024 else 4

    mm_bytes = np.dtype(matmul_dtype).itemsize
    tr_bytes = np.dtype(transport_dtype).itemsize

    def est_bytes(cb):
        blk = 4 * Hp * Wp * (2 + 1 + 2)                 # img + mask + out (f32)
        blk += tr_bytes * Hp * Wp * 2 * cb * 2          # sens + ksp coil blocks
        blk *= 2                                        # double-buffered pipeline
        consts = mm_bytes * 4 * (Hp * Hp + Wp * Wp)     # 8 single-buffered matrices
        scratch = 4 * 2 * Hp * Wp                       # accumulator scratch
        tmps = 4 * Hp * Wp * cb * 16                    # live f32 temps (scale with CB)
        return blk + consts + scratch + tmps

    CB = 1
    for cb in range(min(cps, max_coil_block), 0, -1):
        if cps % cb == 0 and est_bytes(cb) <= int(0.75 * usable):
            CB = cb
            break
    NCBLK = cps // CB
    vmem_limit = int(min(max(int(1.25 * est_bytes(CB)), 32 * 1024 * 1024), usable))

    # ---- per-batch scaling, folded host-side (scalar or shape (N,)) ----
    if loglikelihood_scaling is None:
        scale = jnp.ones((N,), f32)
    else:
        scale = jnp.broadcast_to(
            jnp.asarray(loglikelihood_scaling, f32).reshape(-1), (N,))

    mask = jnp.broadcast_to(jnp.asarray(sampling_mask), (N, 1, H, W, 1))
    mask = (mask[:, 0, :, :, 0] != 0).astype(f32)                    # (N, H, W)

    img = input_image.astype(f32) * scale[:, None, None, None]       # (N, 2, H, W)
    img = jnp.pad(img, ((0, 0), (0, 0), (0, Hp - H), (0, Wp - W)))

    mask_p = jnp.pad(mask, ((0, 0), (0, Hp - H), (0, Wp - W)))       # (N, Hp, Wp)

    # sensitivity maps, coil-stacked along W: (N, 2, Hp, C*Wp)
    sens = jnp.moveaxis(sensitivity_map.astype(f32), -1, 1)          # (N, 2, C, H, W)
    sens = jnp.pad(sens.astype(transport_dtype),
                   ((0, 0), (0, 0), (0, 0), (0, Hp - H), (0, Wp - W)))
    sens_w = jnp.transpose(sens, (0, 1, 3, 2, 4)).reshape(N, 2, Hp, C * Wp)

    # pre-scaled, pre-masked k-space, coil-stacked along H: (N, 2, C*Hp, Wp)
    ksp = (masked_kspace.astype(f32)
           * scale[:, None, None, None, None]
           * mask[:, None, :, :, None])
    ksp = jnp.moveaxis(ksp, -1, 1).astype(transport_dtype)           # (N, 2, C, H, W)
    ksp = jnp.pad(ksp, ((0, 0), (0, 0), (0, 0), (0, Hp - H), (0, Wp - W)))
    ksp_h = ksp.reshape(N, 2, C * Hp, Wp)

    # ---- forward centered ortho DFT matrices + Gauss helper sums (f32 -> cast) ----
    fh_r, fh_i = _centered_dft_matrix(H)
    fw_r, fw_i = _centered_dft_matrix(W)

    def pad_cast(m, d):
        p = np.zeros((d, d), np.float32)
        p[:m.shape[0], :m.shape[1]] = m
        return jnp.asarray(p, dtype=matmul_dtype)

    mats = [pad_cast(fh_r, Hp), pad_cast(fh_i, Hp),
            pad_cast(fh_r + fh_i, Hp), pad_cast(fh_r - fh_i, Hp),
            pad_cast(fw_r.T, Wp), pad_cast(fw_i.T, Wp),
            pad_cast(fw_r.T + fw_i.T, Wp), pad_cast(fw_r.T - fw_i.T, Wp)]

    # ---- specs ----
    img_spec = pl.BlockSpec((1, 2, Hp, Wp), lambda n, s, c: (n, 0, 0, 0))
    sens_spec = pl.BlockSpec((1, 2, Hp, CB * Wp),
                             lambda n, s, c: (n, 0, 0, s * NCBLK + c))
    ksp_spec = pl.BlockSpec((1, 2, CB * Hp, Wp),
                            lambda n, s, c: (n, 0, s * NCBLK + c, 0))
    mask_spec = pl.BlockSpec((1, Hp, Wp), lambda n, s, c: (n, 0, 0))
    out_spec = pl.BlockSpec((1, 2, Hp, Wp),
                            lambda n, s, c: (n * coil_splits + s, 0, 0, 0))

    def mat_spec(d):
        # Constant block (0, 0): single-buffer — no point double-buffering.
        return pl.BlockSpec((d, d), lambda n, s, c: (0, 0),
                            pipeline_mode=pl.Buffered(1))

    grid_spec = pltpu.PrefetchScalarGridSpec(
        num_scalar_prefetch=0,
        grid=(N, coil_splits, NCBLK),
        in_specs=[img_spec, sens_spec, ksp_spec, mask_spec,
                  mat_spec(Hp), mat_spec(Hp), mat_spec(Hp), mat_spec(Hp),
                  mat_spec(Wp), mat_spec(Wp), mat_spec(Wp), mat_spec(Wp)],
        out_specs=out_spec,
        scratch_shapes=[pltpu.VMEM((2, Hp, Wp), f32)],
    )

    flops = int(2 * 12 * N * C * Hp * Wp * (Hp + Wp))
    bytes_accessed = int(img.size * 4 + mask_p.size * 4
                         + sens_w.size * tr_bytes + ksp_h.size * tr_bytes
                         + N * coil_splits * 2 * Hp * Wp * 4
                         + sum(int(m.size) * mm_bytes for m in mats))

    out = pl.pallas_call(
        functools.partial(_mri_loglik_kernel, cb=CB),
        grid_spec=grid_spec,
        out_shape=jax.ShapeDtypeStruct((N * coil_splits, 2, Hp, Wp), f32),
        compiler_params=pltpu.CompilerParams(
            dimension_semantics=("parallel", "parallel", "arbitrary"),
            vmem_limit_bytes=vmem_limit),
        cost_estimate=pl.CostEstimate(flops=flops, transcendentals=0,
                                      bytes_accessed=bytes_accessed),
    )(img, sens_w, ksp_h, mask_p, *mats)

    out = out.reshape(N, coil_splits, 2, Hp, Wp).sum(axis=1)
    return out[:, :, :H, :W]                                         # (N, 2, H, W)


# ---------------------------------------------------------------------------
# Pure-JAX reference (same semantics as the PyTorch module with the DIRECT
# centered ortho FFT2 / IFFT2 as forward / backward operators).
# ---------------------------------------------------------------------------
def _reference(input_image, masked_kspace, sensitivity_map, sampling_mask, scaling):
    img = jnp.transpose(input_image, (0, 2, 3, 1))
    img_c = img[..., 0] + 1j * img[..., 1]                           # (N,H,W)
    sens_c = sensitivity_map[..., 0] + 1j * sensitivity_map[..., 1]  # (N,C,H,W)
    ksp_c = masked_kspace[..., 0] + 1j * masked_kspace[..., 1]
    mask = (sampling_mask[..., 0] != 0)                              # (N,1,H,W)
    s = jnp.asarray(scaling, jnp.float32).reshape(-1, 1, 1, 1)

    def fft2c(x):
        return jnp.fft.fftshift(
            jnp.fft.fft2(jnp.fft.ifftshift(x, axes=(-2, -1)),
                         axes=(-2, -1), norm="ortho"), axes=(-2, -1))

    def ifft2c(x):
        return jnp.fft.fftshift(
            jnp.fft.ifft2(jnp.fft.ifftshift(x, axes=(-2, -1)),
                          axes=(-2, -1), norm="ortho"), axes=(-2, -1))

    mul = s * sens_c * img_c[:, None]
    mr_forward = jnp.where(mask, fft2c(mul), 0.0 + 0.0j)
    error = mr_forward - s * jnp.where(mask, ksp_c, 0.0 + 0.0j)
    mr_backward = ifft2c(error)
    out = (jnp.conj(sens_c) * mr_backward).sum(axis=1)               # (N,H,W)
    return jnp.stack([jnp.real(out), jnp.imag(out)], axis=1)         # (N,2,H,W)


if __name__ == "__main__":
    N, C, H, W = 2, 4, 16, 16
    key = jax.random.PRNGKey(0)
    k1, k2, k3, k4 = jax.random.split(key, 4)

    input_image = jax.random.normal(k1, (N, 2, H, W), dtype=jnp.float32)
    masked_kspace = jax.random.normal(k2, (N, C, H, W, 2), dtype=jnp.float32)
    sensitivity_map = jax.random.normal(k3, (N, C, H, W, 2), dtype=jnp.float32)
    sampling_mask = jax.random.bernoulli(k4, 0.5, (N, 1, H, W, 1))
    loglikelihood_scaling = jnp.array([0.7], dtype=jnp.float32)

    ref = np.asarray(jax.block_until_ready(
        _reference(input_image, masked_kspace, sensitivity_map,
                   sampling_mask, loglikelihood_scaling)))

    # f32-MXU path: tight elementwise check of the kernel math.
    run_f32 = jax.jit(functools.partial(
        mri_log_likelihood, matmul_dtype=jnp.float32, transport_dtype=jnp.float32))
    out_f32 = np.asarray(jax.block_until_ready(
        run_f32(input_image, masked_kspace, sensitivity_map,
                sampling_mask, loglikelihood_scaling)))
    np.testing.assert_allclose(out_f32, ref, rtol=2e-3, atol=2e-3)

    # single-batch case exercises the coil-split (second TensorCore) path.
    out_n1 = np.asarray(jax.block_until_ready(
        run_f32(input_image[:1], masked_kspace[:1], sensitivity_map[:1],
                sampling_mask[:1], loglikelihood_scaling)))
    np.testing.assert_allclose(out_n1, ref[:1], rtol=2e-3, atol=2e-3)

    # Default bf16-MXU + bf16-transport path (f32 accumulation): relative L2.
    # TODO(synk): re-validate the bf16 path at production MRI sizes (256-640);
    #             switch matmul_dtype / transport_dtype to f32 if it drifts.
    run_bf16 = jax.jit(mri_log_likelihood)
    out_bf16 = np.asarray(jax.block_until_ready(
        run_bf16(input_image, masked_kspace, sensitivity_map,
                 sampling_mask, loglikelihood_scaling)))
    rel_l2 = np.linalg.norm(out_bf16 - ref) / np.linalg.norm(ref)
    assert rel_l2 < 5e-2, f"bf16 path relative L2 error too large: {rel_l2}"

    print("KERNEL_OK")
</pallas_src>

<mosaic_0001>
module attributes {stable_mosaic.version = 11 : i64} {
  func.func @_mri_loglik_kernel(%arg0: i32, %arg1: i32, %arg2: i32, %arg3: memref<1x2x128x128xf32, #tpu.memory_space<vmem>>, %arg4: memref<1x2x128x512xf32, #tpu.memory_space<vmem>>, %arg5: memref<1x2x512x128xf32, #tpu.memory_space<vmem>>, %arg6: memref<1x128x128xf32, #tpu.memory_space<vmem>>, %arg7: memref<128x128xf32, #tpu.memory_space<vmem>>, %arg8: memref<128x128xf32, #tpu.memory_space<vmem>>, %arg9: memref<128x128xf32, #tpu.memory_space<vmem>>, %arg10: memref<128x128xf32, #tpu.memory_space<vmem>>, %arg11: memref<128x128xf32, #tpu.memory_space<vmem>>, %arg12: memref<128x128xf32, #tpu.memory_space<vmem>>, %arg13: memref<128x128xf32, #tpu.memory_space<vmem>>, %arg14: memref<128x128xf32, #tpu.memory_space<vmem>>, %arg15: memref<1x2x128x128xf32, #tpu.memory_space<vmem>>, %arg16: memref<2x128x128xf32, #tpu.memory_space<vmem>>) attributes {dimension_semantics = [#tpu.dimension_semantics<parallel>, #tpu.dimension_semantics<parallel>, #tpu.dimension_semantics<arbitrary>], iteration_bounds = array<i64: 2, 1, 1>, scalar_prefetch = 0 : i64, scratch_operands = 1 : i64, tpu.core_type = #tpu.core_type<tc>, window_params = [{transform_indices = @transform_0, window_bounds = array<i64: 1, 2, 128, 128>}, {transform_indices = @transform_1, window_bounds = array<i64: 1, 2, 128, 512>}, {transform_indices = @transform_2, window_bounds = array<i64: 1, 2, 512, 128>}, {transform_indices = @transform_3, window_bounds = array<i64: 1, 128, 128>}, {pipeline_mode = #tpu.pipeline_mode<synchronous>, transform_indices = @transform_4, window_bounds = array<i64: 128, 128>}, {pipeline_mode = #tpu.pipeline_mode<synchronous>, transform_indices = @transform_5, window_bounds = array<i64: 128, 128>}, {pipeline_mode = #tpu.pipeline_mode<synchronous>, transform_indices = @transform_6, window_bounds = array<i64: 128, 128>}, {pipeline_mode = #tpu.pipeline_mode<synchronous>, transform_indices = @transform_7, window_bounds = array<i64: 128, 128>}, {pipeline_mode = #tpu.pipeline_mode<synchronous>, transform_indices = @transform_8, window_bounds = array<i64: 128, 128>}, {pipeline_mode = #tpu.pipeline_mode<synchronous>, transform_indices = @transform_9, window_bounds = array<i64: 128, 128>}, {pipeline_mode = #tpu.pipeline_mode<synchronous>, transform_indices = @transform_10, window_bounds = array<i64: 128, 128>}, {pipeline_mode = #tpu.pipeline_mode<synchronous>, transform_indices = @transform_11, window_bounds = array<i64: 128, 128>}, {transform_indices = @transform_12, window_bounds = array<i64: 1, 2, 128, 128>}]} {
    %c0 = arith.constant 0 : index
    %c0_0 = arith.constant 0 : index
    %0 = vector.load %arg7[%c0, %c0_0] : memref<128x128xf32, #tpu.memory_space<vmem>>, vector<128x128xf32>
    %c0_1 = arith.constant 0 : index
    %c0_2 = arith.constant 0 : index
    %1 = vector.load %arg8[%c0_1, %c0_2] : memref<128x128xf32, #tpu.memory_space<vmem>>, vector<128x128xf32>
    %c0_3 = arith.constant 0 : index
    %c0_4 = arith.constant 0 : index
    %2 = vector.load %arg9[%c0_3, %c0_4] : memref<128x128xf32, #tpu.memory_space<vmem>>, vector<128x128xf32>
    %c0_5 = arith.constant 0 : index
    %c0_6 = arith.constant 0 : index
    %3 = vector.load %arg10[%c0_5, %c0_6] : memref<128x128xf32, #tpu.memory_space<vmem>>, vector<128x128xf32>
    %c0_7 = arith.constant 0 : index
    %c0_8 = arith.constant 0 : index
    %4 = vector.load %arg11[%c0_7, %c0_8] : memref<128x128xf32, #tpu.memory_space<vmem>>, vector<128x128xf32>
    %c0_9 = arith.constant 0 : index
    %c0_10 = arith.constant 0 : index
    %5 = vector.load %arg12[%c0_9, %c0_10] : memref<128x128xf32, #tpu.memory_space<vmem>>, vector<128x128xf32>
    %c0_11 = arith.constant 0 : index
    %c0_12 = arith.constant 0 : index
    %6 = vector.load %arg13[%c0_11, %c0_12] : memref<128x128xf32, #tpu.memory_space<vmem>>, vector<128x128xf32>
    %c0_13 = arith.constant 0 : index
    %c0_14 = arith.constant 0 : index
    %7 = vector.load %arg14[%c0_13, %c0_14] : memref<128x128xf32, #tpu.memory_space<vmem>>, vector<128x128xf32>
    %c0_15 = arith.constant 0 : index
    %c0_16 = arith.constant 0 : index
    %c0_17 = arith.constant 0 : index
    %c0_18 = arith.constant 0 : index
    %8 = vector.load %arg3[%c0_15, %c0_16, %c0_17, %c0_18] : memref<1x2x128x128xf32, #tpu.memory_space<vmem>>, vector<1x1x128x128xf32>
    %9 = vector.shape_cast %8 : vector<1x1x128x128xf32> to vector<128x128xf32>
    %10 = tpu.concatenate %9, %9, %9, %9 in 1 : vector<128x128xf32>, vector<128x128xf32>, vector<128x128xf32>, vector<128x128xf32> -> vector<128x512xf32>
    %c0_19 = arith.constant 0 : index
    %c1 = arith.constant 1 : index
    %c0_20 = arith.constant 0 : index
    %c0_21 = arith.constant 0 : index
    %11 = vector.load %arg3[%c0_19, %c1, %c0_20, %c0_21] : memref<1x2x128x128xf32, #tpu.memory_space<vmem>>, vector<1x1x128x128xf32>
    %12 = vector.shape_cast %11 : vector<1x1x128x128xf32> to vector<128x128xf32>
    %13 = tpu.concatenate %12, %12, %12, %12 in 1 : vector<128x128xf32>, vector<128x128xf32>, vector<128x128xf32>, vector<128x128xf32> -> vector<128x512xf32>
    %c0_22 = arith.constant 0 : index
    %c0_23 = arith.constant 0 : index
    %c0_24 = arith.constant 0 : index
    %14 = vector.load %arg6[%c0_22, %c0_23, %c0_24] : memref<1x128x128xf32, #tpu.memory_space<vmem>>, vector<1x128x128xf32>
    %15 = vector.shape_cast %14 : vector<1x128x128xf32> to vector<128x128xf32>
    %16 = tpu.concatenate %15, %15, %15, %15 in 0 : vector<128x128xf32>, vector<128x128xf32>, vector<128x128xf32>, vector<128x128xf32> -> vector<512x128xf32>
    %c0_25 = arith.constant 0 : index
    %c0_26 = arith.constant 0 : index
    %c0_27 = arith.constant 0 : index
    %c0_28 = arith.constant 0 : index
    %17 = vector.load %arg4[%c0_25, %c0_26, %c0_27, %c0_28] : memref<1x2x128x512xf32, #tpu.memory_space<vmem>>, vector<1x1x128x512xf32>
    %18 = vector.shape_cast %17 : vector<1x1x128x512xf32> to vector<128x512xf32>
    %c0_29 = arith.constant 0 : index
    %c1_30 = arith.constant 1 : index
    %c0_31 = arith.constant 0 : index
    %c0_32 = arith.constant 0 : index
    %19 = vector.load %arg4[%c0_29, %c1_30, %c0_31, %c0_32] : memref<1x2x128x512xf32, #tpu.memory_space<vmem>>, vector<1x1x128x512xf32>
    %20 = vector.shape_cast %19 : vector<1x1x128x512xf32> to vector<128x512xf32>
    %c0_33 = arith.constant 0 : index
    %c0_34 = arith.constant 0 : index
    %c0_35 = arith.constant 0 : index
    %c0_36 = arith.constant 0 : index
    %21 = vector.load %arg5[%c0_33, %c0_34, %c0_35, %c0_36] : memref<1x2x512x128xf32, #tpu.memory_space<vmem>>, vector<1x1x512x128xf32>
    %22 = vector.shape_cast %21 : vector<1x1x512x128xf32> to vector<512x128xf32>
    %c0_37 = arith.constant 0 : index
    %c1_38 = arith.constant 1 : index
    %c0_39 = arith.constant 0 : index
    %c0_40 = arith.constant 0 : index
    %23 = vector.load %arg5[%c0_37, %c1_38, %c0_39, %c0_40] : memref<1x2x512x128xf32, #tpu.memory_space<vmem>>, vector<1x1x512x128xf32>
    %24 = vector.shape_cast %23 : vector<1x1x512x128xf32> to vector<512x128xf32>
    %25 = arith.mulf %18, %10 : vector<128x512xf32>
    %26 = arith.mulf %20, %13 : vector<128x512xf32>
    %27 = arith.subf %25, %26 : vector<128x512xf32>
    %28 = arith.mulf %18, %13 : vector<128x512xf32>
    %29 = arith.mulf %20, %10 : vector<128x512xf32>
    %30 = arith.addf %28, %29 : vector<128x512xf32>
    %cst = arith.constant dense<0.000000e+00> : vector<128x512xf32>
    %31 = tpu.matmul %0, %27, %cst {dimension_numbers = #tpu.dot_dimension_numbers<[1], [0], [0], [1], [0, 0, 1, 1], [], []>} : vector<128x128xf32>, vector<128x512xf32>, vector<128x512xf32> -> vector<128x512xf32>
    %cst_41 = arith.constant dense<0.000000e+00> : vector<128x512xf32>
    %32 = tpu.matmul %1, %30, %cst_41 {dimension_numbers = #tpu.dot_dimension_numbers<[1], [0], [0], [1], [0, 0, 1, 1], [], []>} : vector<128x128xf32>, vector<128x512xf32>, vector<128x512xf32> -> vector<128x512xf32>
    %33 = arith.addf %27, %30 : vector<128x512xf32>
    %cst_42 = arith.constant dense<0.000000e+00> : vector<128x512xf32>
    %34 = tpu.matmul %2, %33, %cst_42 {dimension_numbers = #tpu.dot_dimension_numbers<[1], [0], [0], [1], [0, 0, 1, 1], [], []>} : vector<128x128xf32>, vector<128x512xf32>, vector<128x512xf32> -> vector<128x512xf32>
    %35 = arith.subf %31, %32 : vector<128x512xf32>
    %36 = arith.subf %34, %31 : vector<128x512xf32>
    %37 = arith.subf %36, %32 : vector<128x512xf32>
    %38 = vector.extract_strided_slice %35 {offsets = [0, 0], sizes = [128, 128], strides = [1, 1]} : vector<128x512xf32> to vector<128x128xf32>
    %39 = vector.extract_strided_slice %35 {offsets = [0, 128], sizes = [128, 128], strides = [1, 1]} : vector<128x512xf32> to vector<128x128xf32>
    %40 = vector.extract_strided_slice %35 {offsets = [0, 256], sizes = [128, 128], strides = [1, 1]} : vector<128x512xf32> to vector<128x128xf32>
    %41 = vector.extract_strided_slice %35 {offsets = [0, 384], sizes = [128, 128], strides = [1, 1]} : vector<128x512xf32> to vector<128x128xf32>
    %42 = tpu.concatenate %38, %39, %40, %41 in 0 : vector<128x128xf32>, vector<128x128xf32>, vector<128x128xf32>, vector<128x128xf32> -> vector<512x128xf32>
    %43 = vector.extract_strided_slice %37 {offsets = [0, 0], sizes = [128, 128], strides = [1, 1]} : vector<128x512xf32> to vector<128x128xf32>
    %44 = vector.extract_strided_slice %37 {offsets = [0, 128], sizes = [128, 128], strides = [1, 1]} : vector<128x512xf32> to vector<128x128xf32>
    %45 = vector.extract_strided_slice %37 {offsets = [0, 256], sizes = [128, 128], strides = [1, 1]} : vector<128x512xf32> to vector<128x128xf32>
    %46 = vector.extract_strided_slice %37 {offsets = [0, 384], sizes = [128, 128], strides = [1, 1]} : vector<128x512xf32> to vector<128x128xf32>
    %47 = tpu.concatenate %43, %44, %45, %46 in 0 : vector<128x128xf32>, vector<128x128xf32>, vector<128x128xf32>, vector<128x128xf32> -> vector<512x128xf32>
    %cst_43 = arith.constant dense<0.000000e+00> : vector<512x128xf32>
    %48 = tpu.matmul %42, %4, %cst_43 {dimension_numbers = #tpu.dot_dimension_numbers<[1], [0], [0], [1], [0, 0, 1, 1], [], []>} : vector<512x128xf32>, vector<128x128xf32>, vector<512x128xf32> -> vector<512x128xf32>
    %cst_44 = arith.constant dense<0.000000e+00> : vector<512x128xf32>
    %49 = tpu.matmul %47, %5, %cst_44 {dimension_numbers = #tpu.dot_dimension_numbers<[1], [0], [0], [1], [0, 0, 1, 1], [], []>} : vector<512x128xf32>, vector<128x128xf32>, vector<512x128xf32> -> vector<512x128xf32>
    %50 = arith.addf %42, %47 : vector<512x128xf32>
    %cst_45 = arith.constant dense<0.000000e+00> : vector<512x128xf32>
    %51 = tpu.matmul %50, %6, %cst_45 {dimension_numbers = #tpu.dot_dimension_numbers<[1], [0], [0], [1], [0, 0, 1, 1], [], []>} : vector<512x128xf32>, vector<128x128xf32>, vector<512x128xf32> -> vector<512x128xf32>
    %52 = arith.subf %48, %49 : vector<512x128xf32>
    %53 = arith.subf %51, %48 : vector<512x128xf32>
    %54 = arith.subf %53, %49 : vector<512x128xf32>
    %55 = arith.mulf %16, %52 : vector<512x128xf32>
    %56 = arith.subf %55, %22 : vector<512x128xf32>
    %57 = arith.mulf %16, %54 : vector<512x128xf32>
    %58 = arith.subf %57, %24 : vector<512x128xf32>
    %cst_46 = arith.constant dense<0.000000e+00> : vector<512x128xf32>
    %59 = tpu.matmul %56, %4, %cst_46 {dimension_numbers = #tpu.dot_dimension_numbers<[1], [0], [0], [1], [0, 0, 1, 1], [], []>} : vector<512x128xf32>, vector<128x128xf32>, vector<512x128xf32> -> vector<512x128xf32>
    %cst_47 = arith.constant dense<0.000000e+00> : vector<512x128xf32>
    %60 = tpu.matmul %58, %5, %cst_47 {dimension_numbers = #tpu.dot_dimension_numbers<[1], [0], [0], [1], [0, 0, 1, 1], [], []>} : vector<512x128xf32>, vector<128x128xf32>, vector<512x128xf32> -> vector<512x128xf32>
    %61 = arith.addf %56, %58 : vector<512x128xf32>
    %cst_48 = arith.constant dense<0.000000e+00> : vector<512x128xf32>
    %62 = tpu.matmul %61, %7, %cst_48 {dimension_numbers = #tpu.dot_dimension_numbers<[1], [0], [0], [1], [0, 0, 1, 1], [], []>} : vector<512x128xf32>, vector<128x128xf32>, vector<512x128xf32> -> vector<512x128xf32>
    %63 = arith.addf %59, %60 : vector<512x128xf32>
    %64 = arith.subf %62, %59 : vector<512x128xf32>
    %65 = arith.addf %64, %60 : vector<512x128xf32>
    %66 = vector.extract_strided_slice %63 {offsets = [0, 0], sizes = [128, 128], strides = [1, 1]} : vector<512x128xf32> to vector<128x128xf32>
    %67 = vector.extract_strided_slice %63 {offsets = [128, 0], sizes = [128, 128], strides = [1, 1]} : vector<512x128xf32> to vector<128x128xf32>
    %68 = vector.extract_strided_slice %63 {offsets = [256, 0], sizes = [128, 128], strides = [1, 1]} : vector<512x128xf32> to vector<128x128xf32>
    %69 = vector.extract_strided_slice %63 {offsets = [384, 0], sizes = [128, 128], strides = [1, 1]} : vector<512x128xf32> to vector<128x128xf32>
    %70 = tpu.concatenate %66, %67, %68, %69 in 1 : vector<128x128xf32>, vector<128x128xf32>, vector<128x128xf32>, vector<128x128xf32> -> vector<128x512xf32>
    %71 = vector.extract_strided_slice %65 {offsets = [0, 0], sizes = [128, 128], strides = [1, 1]} : vector<512x128xf32> to vector<128x128xf32>
    %72 = vector.extract_strided_slice %65 {offsets = [128, 0], sizes = [128, 128], strides = [1, 1]} : vector<512x128xf32> to vector<128x128xf32>
    %73 = vector.extract_strided_slice %65 {offsets = [256, 0], sizes = [128, 128], strides = [1, 1]} : vector<512x128xf32> to vector<128x128xf32>
    %74 = vector.extract_strided_slice %65 {offsets = [384, 0], sizes = [128, 128], strides = [1, 1]} : vector<512x128xf32> to vector<128x128xf32>
    %75 = tpu.concatenate %71, %72, %73, %74 in 1 : vector<128x128xf32>, vector<128x128xf32>, vector<128x128xf32>, vector<128x128xf32> -> vector<128x512xf32>
    %cst_49 = arith.constant dense<0.000000e+00> : vector<128x512xf32>
    %76 = tpu.matmul %0, %70, %cst_49 {dimension_numbers = #tpu.dot_dimension_numbers<[1], [0], [0], [1], [0, 0, 1, 1], [], []>} : vector<128x128xf32>, vector<128x512xf32>, vector<128x512xf32> -> vector<128x512xf32>
    %cst_50 = arith.constant dense<0.000000e+00> : vector<128x512xf32>
    %77 = tpu.matmul %1, %75, %cst_50 {dimension_numbers = #tpu.dot_dimension_numbers<[1], [0], [0], [1], [0, 0, 1, 1], [], []>} : vector<128x128xf32>, vector<128x512xf32>, vector<128x512xf32> -> vector<128x512xf32>
    %78 = arith.addf %70, %75 : vector<128x512xf32>
    %cst_51 = arith.constant dense<0.000000e+00> : vector<128x512xf32>
    %79 = tpu.matmul %3, %78, %cst_51 {dimension_numbers = #tpu.dot_dimension_numbers<[1], [0], [0], [1], [0, 0, 1, 1], [], []>} : vector<128x128xf32>, vector<128x512xf32>, vector<128x512xf32> -> vector<128x512xf32>
    %80 = arith.addf %76, %77 : vector<128x512xf32>
    %81 = arith.subf %79, %76 : vector<128x512xf32>
    %82 = arith.addf %81, %77 : vector<128x512xf32>
    %83 = arith.mulf %18, %80 : vector<128x512xf32>
    %84 = arith.mulf %20, %82 : vector<128x512xf32>
    %85 = arith.addf %83, %84 : vector<128x512xf32>
    %86 = vector.extract_strided_slice %85 {offsets = [0, 0], sizes = [128, 128], strides = [1, 1]} : vector<128x512xf32> to vector<128x128xf32>
    %87 = vector.extract_strided_slice %85 {offsets = [0, 128], sizes = [128, 128], strides = [1, 1]} : vector<128x512xf32> to vector<128x128xf32>
    %88 = arith.addf %86, %87 : vector<128x128xf32>
    %89 = vector.extract_strided_slice %85 {offsets = [0, 256], sizes = [128, 128], strides = [1, 1]} : vector<128x512xf32> to vector<128x128xf32>
    %90 = arith.addf %88, %89 : vector<128x128xf32>
    %91 = vector.extract_strided_slice %85 {offsets = [0, 384], sizes = [128, 128], strides = [1, 1]} : vector<128x512xf32> to vector<128x128xf32>
    %92 = arith.addf %90, %91 : vector<128x128xf32>
    %93 = arith.mulf %18, %82 : vector<128x512xf32>
    %94 = arith.mulf %20, %80 : vector<128x512xf32>
    %95 = arith.subf %93, %94 : vector<128x512xf32>
    %96 = vector.extract_strided_slice %95 {offsets = [0, 0], sizes = [128, 128], strides = [1, 1]} : vector<128x512xf32> to vector<128x128xf32>
    %97 = vector.extract_strided_slice %95 {offsets = [0, 128], sizes = [128, 128], strides = [1, 1]} : vector<128x512xf32> to vector<128x128xf32>
    %98 = arith.addf %96, %97 : vector<128x128xf32>
    %99 = vector.extract_strided_slice %95 {offsets = [0, 256], sizes = [128, 128], strides = [1, 1]} : vector<128x512xf32> to vector<128x128xf32>
    %100 = arith.addf %98, %99 : vector<128x128xf32>
    %101 = vector.extract_strided_slice %95 {offsets = [0, 384], sizes = [128, 128], strides = [1, 1]} : vector<128x512xf32> to vector<128x128xf32>
    %102 = arith.addf %100, %101 : vector<128x128xf32>
    %c0_i32 = arith.constant 0 : i32
    %103 = arith.cmpi eq, %arg2, %c0_i32 : i32
    %104 = arith.extui %103 : i1 to i32
    %c0_i32_52 = arith.constant 0 : i32
    %105 = arith.cmpi ne, %104, %c0_i32_52 : i32
    scf.if %105 {
      %c0_57 = arith.constant 0 : index
      %c0_58 = arith.constant 0 : index
      %c0_59 = arith.constant 0 : index
      %112 = vector.load %arg16[%c0_57, %c0_58, %c0_59] : memref<2x128x128xf32, #tpu.memory_space<vmem>>, vector<1x128x128xf32>
      %113 = vector.shape_cast %112 : vector<1x128x128xf32> to vector<128x128xf32>
      %114 = vector.shape_cast %92 : vector<128x128xf32> to vector<1x128x128xf32>
      tpu.vector_store %arg16[%c0_57, %c0_58, %c0_59], %114 {strides = array<i32>} : memref<2x128x128xf32, #tpu.memory_space<vmem>>, vector<1x128x128xf32>,
      %c1_60 = arith.constant 1 : index
      %c0_61 = arith.constant 0 : index
      %c0_62 = arith.constant 0 : index
      %115 = vector.load %arg16[%c1_60, %c0_61, %c0_62] : memref<2x128x128xf32, #tpu.memory_space<vmem>>, vector<1x128x128xf32>
      %116 = vector.shape_cast %115 : vector<1x128x128xf32> to vector<128x128xf32>
      %117 = vector.shape_cast %102 : vector<128x128xf32> to vector<1x128x128xf32>
      tpu.vector_store %arg16[%c1_60, %c0_61, %c0_62], %117 {strides = array<i32>} : memref<2x128x128xf32, #tpu.memory_space<vmem>>, vector<1x128x128xf32>,
    } else {
    }
    %c0_i32_53 = arith.constant 0 : i32
    %106 = arith.cmpi ne, %arg2, %c0_i32_53 : i32
    %107 = arith.extui %106 : i1 to i32
    %c0_i32_54 = arith.constant 0 : i32
    %108 = arith.cmpi ne, %107, %c0_i32_54 : i32
    scf.if %108 {
      %c0_57 = arith.constant 0 : index
      %c0_58 = arith.constant 0 : index
      %c0_59 = arith.constant 0 : index
      %112 = vector.load %arg16[%c0_57, %c0_58, %c0_59] : memref<2x128x128xf32, #tpu.memory_space<vmem>>, vector<1x128x128xf32>
      %113 = vector.shape_cast %112 : vector<1x128x128xf32> to vector<128x128xf32>
      %114 = arith.addf %113, %92 : vector<128x128xf32>
      %c0_60 = arith.constant 0 : index
      %c0_61 = arith.constant 0 : index
      %c0_62 = arith.constant 0 : index
      %115 = vector.load %arg16[%c0_60, %c0_61, %c0_62] : memref<2x128x128xf32, #tpu.memory_space<vmem>>, vector<1x128x128xf32>
      %116 = vector.shape_cast %115 : vector<1x128x128xf32> to vector<128x128xf32>
      %117 = vector.shape_cast %114 : vector<128x128xf32> to vector<1x128x128xf32>
      tpu.vector_store %arg16[%c0_60, %c0_61, %c0_62], %117 {strides = array<i32>} : memref<2x128x128xf32, #tpu.memory_space<vmem>>, vector<1x128x128xf32>,
      %c1_63 = arith.constant 1 : index
      %c0_64 = arith.constant 0 : index
      %c0_65 = arith.constant 0 : index
      %118 = vector.load %arg16[%c1_63, %c0_64, %c0_65] : memref<2x128x128xf32, #tpu.memory_space<vmem>>, vector<1x128x128xf32>
      %119 = vector.shape_cast %118 : vector<1x128x128xf32> to vector<128x128xf32>
      %120 = arith.addf %119, %102 : vector<128x128xf32>
      %c1_66 = arith.constant 1 : index
      %c0_67 = arith.constant 0 : index
      %c0_68 = arith.constant 0 : index
      %121 = vector.load %arg16[%c1_66, %c0_67, %c0_68] : memref<2x128x128xf32, #tpu.memory_space<vmem>>, vector<1x128x128xf32>
      %122 = vector.shape_cast %121 : vector<1x128x128xf32> to vector<128x128xf32>
      %123 = vector.shape_cast %120 : vector<128x128xf32> to vector<1x128x128xf32>
      tpu.vector_store %arg16[%c1_66, %c0_67, %c0_68], %123 {strides = array<i32>} : memref<2x128x128xf32, #tpu.memory_space<vmem>>, vector<1x128x128xf32>,
    } else {
    }
    %c0_i32_55 = arith.constant 0 : i32
    %109 = arith.cmpi eq, %arg2, %c0_i32_55 : i32
    %110 = arith.extui %109 : i1 to i32
    %c0_i32_56 = arith.constant 0 : i32
    %111 = arith.cmpi ne, %110, %c0_i32_56 : i32
    scf.if %111 {
      %c0_57 = arith.constant 0 : index
      %c0_58 = arith.constant 0 : index
      %c0_59 = arith.constant 0 : index
      %112 = vector.load %arg16[%c0_57, %c0_58, %c0_59] : memref<2x128x128xf32, #tpu.memory_space<vmem>>, vector<1x128x128xf32>
      %113 = vector.shape_cast %112 : vector<1x128x128xf32> to vector<128x128xf32>
      %c0_60 = arith.constant 0 : index
      %c0_61 = arith.constant 0 : index
      %c0_62 = arith.constant 0 : index
      %c0_63 = arith.constant 0 : index
      %114 = vector.load %arg15[%c0_60, %c0_61, %c0_62, %c0_63] : memref<1x2x128x128xf32, #tpu.memory_space<vmem>>, vector<1x1x128x128xf32>
      %115 = vector.shape_cast %114 : vector<1x1x128x128xf32> to vector<128x128xf32>
      %116 = vector.shape_cast %113 : vector<128x128xf32> to vector<1x1x128x128xf32>
      tpu.vector_store %arg15[%c0_60, %c0_61, %c0_62, %c0_63], %116 {strides = array<i32>} : memref<1x2x128x128xf32, #tpu.memory_space<vmem>>, vector<1x1x128x128xf32>,
      %c1_64 = arith.constant 1 : index
      %c0_65 = arith.constant 0 : index
      %c0_66 = arith.constant 0 : index
      %117 = vector.load %arg16[%c1_64, %c0_65, %c0_66] : memref<2x128x128xf32, #tpu.memory_space<vmem>>, vector<1x128x128xf32>
      %118 = vector.shape_cast %117 : vector<1x128x128xf32> to vector<128x128xf32>
      %c0_67 = arith.constant 0 : index
      %c1_68 = arith.constant 1 : index
      %c0_69 = arith.constant 0 : index
      %c0_70 = arith.constant 0 : index
      %119 = vector.load %arg15[%c0_67, %c1_68, %c0_69, %c0_70] : memref<1x2x128x128xf32, #tpu.memory_space<vmem>>, vector<1x1x128x128xf32>
      %120 = vector.shape_cast %119 : vector<1x1x128x128xf32> to vector<128x128xf32>
      %121 = vector.shape_cast %118 : vector<128x128xf32> to vector<1x1x128x128xf32>
      tpu.vector_store %arg15[%c0_67, %c1_68, %c0_69, %c0_70], %121 {strides = array<i32>} : memref<1x2x128x128xf32, #tpu.memory_space<vmem>>, vector<1x1x128x128xf32>,
    } else {
    }
    return
  }
  func.func @transform_0(%arg0: i32, %arg1: i32, %arg2: i32) -> (i32, i32, i32, i32) {
    %c0_i32 = arith.constant 0 : i32
    %c0_i32_0 = arith.constant 0 : i32
    %c0_i32_1 = arith.constant 0 : i32
    %c0_i32_2 = arith.constant 0 : i32
    return %arg0, %c0_i32, %c0_i32_0, %c0_i32_1 : i32, i32, i32, i32
  }
  func.func @transform_1(%arg0: i32, %arg1: i32, %arg2: i32) -> (i32, i32, i32, i32) {
    %c1_i32 = arith.constant 1 : i32
    %0 = arith.muli %arg1, %c1_i32 : i32
    %1 = arith.addi %0, %arg2 : i32
    %c0_i32 = arith.constant 0 : i32
    %c0_i32_0 = arith.constant 0 : i32
    %c0_i32_1 = arith.constant 0 : i32
    return %arg0, %c0_i32, %c0_i32_0, %1 : i32, i32, i32, i32
  }
  func.func @transform_2(%arg0: i32, %arg1: i32, %arg2: i32) -> (i32, i32, i32, i32) {
    %c1_i32 = arith.constant 1 : i32
    %0 = arith.muli %arg1, %c1_i32 : i32
    %1 = arith.addi %0, %arg2 : i32
    %c0_i32 = arith.constant 0 : i32
    %c0_i32_0 = arith.constant 0 : i32
    %c0_i32_1 = arith.constant 0 : i32
    return %arg0, %c0_i32, %1, %c0_i32_0 : i32, i32, i32, i32
  }
  func.func @transform_3(%arg0: i32, %arg1: i32, %arg2: i32) -> (i32, i32, i32) {
    %c0_i32 = arith.constant 0 : i32
    %c0_i32_0 = arith.constant 0 : i32
    %c0_i32_1 = arith.constant 0 : i32
    return %arg0, %c0_i32, %c0_i32_0 : i32, i32, i32
  }
  func.func @transform_4(%arg0: i32, %arg1: i32, %arg2: i32) -> (i32, i32) {
    %c0_i32 = arith.constant 0 : i32
    %c0_i32_0 = arith.constant 0 : i32
    %c0_i32_1 = arith.constant 0 : i32
    return %c0_i32, %c0_i32_0 : i32, i32
  }
  func.func @transform_5(%arg0: i32, %arg1: i32, %arg2: i32) -> (i32, i32) {
    %c0_i32 = arith.constant 0 : i32
    %c0_i32_0 = arith.constant 0 : i32
    %c0_i32_1 = arith.constant 0 : i32
    return %c0_i32, %c0_i32_0 : i32, i32
  }
  func.func @transform_6(%arg0: i32, %arg1: i32, %arg2: i32) -> (i32, i32) {
    %c0_i32 = arith.constant 0 : i32
    %c0_i32_0 = arith.constant 0 : i32
    %c0_i32_1 = arith.constant 0 : i32
    return %c0_i32, %c0_i32_0 : i32, i32
  }
  func.func @transform_7(%arg0: i32, %arg1: i32, %arg2: i32) -> (i32, i32) {
    %c0_i32 = arith.constant 0 : i32
    %c0_i32_0 = arith.constant 0 : i32
    %c0_i32_1 = arith.constant 0 : i32
    return %c0_i32, %c0_i32_0 : i32, i32
  }
  func.func @transform_8(%arg0: i32, %arg1: i32, %arg2: i32) -> (i32, i32) {
    %c0_i32 = arith.constant 0 : i32
    %c0_i32_0 = arith.constant 0 : i32
    %c0_i32_1 = arith.constant 0 : i32
    return %c0_i32, %c0_i32_0 : i32, i32
  }
  func.func @transform_9(%arg0: i32, %arg1: i32, %arg2: i32) -> (i32, i32) {
    %c0_i32 = arith.constant 0 : i32
    %c0_i32_0 = arith.constant 0 : i32
    %c0_i32_1 = arith.constant 0 : i32
    return %c0_i32, %c0_i32_0 : i32, i32
  }
  func.func @transform_10(%arg0: i32, %arg1: i32, %arg2: i32) -> (i32, i32) {
    %c0_i32 = arith.constant 0 : i32
    %c0_i32_0 = arith.constant 0 : i32
    %c0_i32_1 = arith.constant 0 : i32
    return %c0_i32, %c0_i32_0 : i32, i32
  }
  func.func @transform_11(%arg0: i32, %arg1: i32, %arg2: i32) -> (i32, i32) {
    %c0_i32 = arith.constant 0 : i32
    %c0_i32_0 = arith.constant 0 : i32
    %c0_i32_1 = arith.constant 0 : i32
    return %c0_i32, %c0_i32_0 : i32, i32
  }
  func.func @transform_12(%arg0: i32, %arg1: i32, %arg2: i32) -> (i32, i32, i32, i32) {
    %c1_i32 = arith.constant 1 : i32
    %0 = arith.muli %arg0, %c1_i32 : i32
    %1 = arith.addi %0, %arg1 : i32
    %c0_i32 = arith.constant 0 : i32
    %c0_i32_0 = arith.constant 0 : i32
    %c0_i32_1 = arith.constant 0 : i32
    %c0_i32_2 = arith.constant 0 : i32
    return %1, %c0_i32, %c0_i32_0, %c0_i32_1 : i32, i32, i32, i32
  }
}

</mosaic_0001>

<bundles_post_ra>
// kernel: mri_log_likelihood.1
= control target key start
LH: loop header
LB: loop body
LE: loop exit
PB: predicated region body
PF: predicated region fallthrough
CT: control target
= control target key end

     0   :  { %s9987_s21 = smov 0   ;;  %s9989_s22 = smov 0   ;;  %s17966_s0 = inlined_call_operand.vmem [shape: f32[2,2,128,128], index: 0, kind: input, shape index: {}]   ;;  %s17967_s1 = inlined_call_operand.vmem [shape: f32[2,2,128,512], index: 1, kind: input, shape index: {}]   ;;  %s17968_s2 = inlined_call_operand.vmem [shape: f32[2,2,512,128], index: 2, kind: input, shape index: {}]   ;;  %s17969_s3 = inlined_call_operand.vmem [shape: f32[2,128,128], index: 3, kind: input, shape index: {}]   ;;  %s17970_s4 = inlined_call_operand.vmem [shape: f32[128,128], index: 4, kind: input, shape index: {}]   ;;  %s17971_s5 = inlined_call_operand.vmem [shape: f32[128,128], index: 5, kind: input, shape index: {}]   ;;  %s17972_s6 = inlined_call_operand.vmem [shape: f32[128,128], index: 6, kind: input, shape index: {}]   ;;  %s17973_s7 = inlined_call_operand.vmem [shape: f32[128,128], index: 7, kind: input, shape index: {}]   ;;  %s17974_s8 = inlined_call_operand.vmem [shape: f32[128,128], index: 8, kind: input, shape index: {}]   ;;  %s17975_s9 = inlined_call_operand.vmem [shape: f32[128,128], index: 9, kind: input, shape index: {}]   ;;  %s17976_s10 = inlined_call_operand.vmem [shape: f32[128,128], index: 10, kind: input, shape index: {}]   ;;  %s17977_s11 = inlined_call_operand.vmem [shape: f32[128,128], index: 11, kind: input, shape index: {}]   ;;  %s17978_s12 = inlined_call_operand.vmem [shape: f32[2,2,128,128], index: 12, kind: output, shape index: {}]  }
   0x1   :  { %s9991_s23 = smov 0  }
   0x2 LB: > { %s41_s24 = sadd.s32 1, %s9915_s22  ;;  %p7694_p0 = scmp.ge.s32.totalorder %s9919_s23, 1  ;;  %s9919_s23 = sphi %s9991_s23, %s22_s23   ;;  %s9915_s22 = sphi %s9989_s22, %s21114_s22   ;;  %s9911_s21 = sphi %s9987_s21, %s21113_s21  }
   0x3   : > { %p43_p1 = scmp.ge.s32.totalorder %s41_s24, 2  ;;  %p435_p2 = scmp.lt.s32.totalorder %s9919_s23, 3 }
   0x5   : > { %s21116_s24 = smov (%p43_p1, %s41_s24), 0  ;;  %p436_p3 = pnand %p7694_p0, %p435_p2 }
   0x7   : > { %439 = sbr.rel (%p436_p3) target bundleno = 1644 (0x66c), region = 68 }
   0xe   : > { %p503_p4 = scmp.lt.s32.totalorder %s9911_s21, 1  ;;  %v17979_v0 = vmov 0.0  }
   0xf   : > { %1427 = vmatprep.mubr.f32.mxu0 %v17979_v0  ;;  %1588 = vmatprep.mubr.f32.mxu1 %v17979_v0 }
  0x10   : > { %s21118_s21 = smov (!%p503_p4, %s9911_s21), 1 }
  0x11   : > { %s7867_s25 = sshll.u32 %s21118_s21, 8  ;;  %s7868_s26 = sshll.u32 %s21118_s21, 10 }
  0x12   : > { %s10016_s29 = scalar_lea.vmem %s17966_s0, %s7867_s25  ;;  %s10023_s14 = scalar_lea.vmem %s17967_s1, %s7868_s26 }
  0x13   : > { %v10026_v1 = vld [vmem:[%s10016_s29] sm:$0xff]  ;;  %v10029_v2 = vld [vmem:[%s10016_s29 + $0x8] sm:$0xff]  ;;  %v724_v13 = vld [vmem:[%s10023_s14 + $0x18] sm:$0xff]  ;;  %s7870_s20 = sshll.u32 %s21118_s21, 7  ;;  %s13090_s15 = scalar_lea.vmem %s17968_s2, %s7868_s26 }
  0x14   : > { %v10032_v3 = vld [vmem:[%s10016_s29 + $0x80] sm:$0xff]  ;;  %v10035_v4 = vld [vmem:[%s10016_s29 + $0x88] sm:$0xff]  ;;  %v728_v18 = vld [vmem:[%s10023_s14 + $0x38] sm:$0xff]  ;;  %v982_v21 = vmul.f32 %v724_v13, %v10026_v1  ;;  %s17592_s17 = scalar_lea.vmem %s17978_s12, %s7867_s25 }
  0x15   : > { %v722_v5 = vld [vmem:[%s10023_s14 + $0x8] sm:$0xff]  ;;  %v7724_v19 = vld [vmem:[%s10023_s14 + $0x218] sm:$0xff]  ;;  %v986_v22 = vmul.f32 %v728_v18, %v10029_v2  ;;  %v721_v29 = vld [vmem:[%s10023_s14] sm:$0xff]  ;;  %v1174_v33 = vmul.f32 %v10032_v3, %v724_v13  ;;  %v1178_v34 = vmul.f32 %v10035_v4, %v728_v18 }
  0x16   : > { %v726_v6 = vld [vmem:[%s10023_s14 + $0x28] sm:$0xff]  ;;  %v980_v9 = vmul.f32 %v722_v5, %v10026_v1  ;;  %v1172_v11 = vmul.f32 %v10032_v3, %v722_v5  ;;  %v7728_v20 = vld [vmem:[%s10023_s14 + $0x238] sm:$0xff]  ;;  %v1046_v23 = vmul.f32 %v7724_v19, %v10032_v3  ;;  %v725_v30 = vld [vmem:[%s10023_s14 + $0x20] sm:$0xff]  ;;  %v1238_v40 = vmul.f32 %v7724_v19, %v10026_v1 }
  0x17   : > { %v7722_v7 = vld [vmem:[%s10023_s14 + $0x208] sm:$0xff]  ;;  %v984_v10 = vmul.f32 %v726_v6, %v10029_v2  ;;  %v1176_v12 = vmul.f32 %v10035_v4, %v726_v6  ;;  %v1050_v24 = vmul.f32 %v7728_v20, %v10035_v4  ;;  %v7721_v35 = vld [vmem:[%s10023_s14 + $0x200] sm:$0xff]  ;;  %v1242_v41 = vmul.f32 %v7728_v20, %v10029_v2  ;;  %v723_v45 = vld [vmem:[%s10023_s14 + $0x10] sm:$0xff] }
  0x18   : > { %v7726_v8 = vld [vmem:[%s10023_s14 + $0x228] sm:$0xff]  ;;  %v1044_v14 = vmul.f32 %v7722_v7, %v10032_v3  ;;  %v1236_v16 = vmul.f32 %v7722_v7, %v10026_v1  ;;  %v1110_v31 = vsub.f32 %v982_v21, %v1046_v23  ;;  %v7725_v36 = vld [vmem:[%s10023_s14 + $0x220] sm:$0xff]  ;;  %v979_v43 = vmul.f32 %v721_v29, %v10026_v1  ;;  %v727_v50 = vld [vmem:[%s10023_s14 + $0x30] sm:$0xff] }
  0x19   : > { %v1048_v15 = vmul.f32 %v7726_v8, %v10035_v4  ;;  %v1240_v17 = vmul.f32 %v7726_v8, %v10029_v2  ;;  %v1114_v32 = vsub.f32 %v986_v22, %v1050_v24  ;;  %v983_v44 = vmul.f32 %v725_v30, %v10029_v2  ;;  %v7723_v55 = vld [vmem:[%s10023_s14 + $0x210] sm:$0xff]  ;;  %v10099_v62 = vld [vmem:[%s10016_s29 + $0x18] sm:$0xff] }
  0x1a   : > { %v1108_v25 = vsub.f32 %v980_v9, %v1044_v14  ;;  %v10057_v27 = vadd.f32 %v1236_v16, %v1172_v11  ;;  %v10078_v46 = vadd.f32 %v1238_v40, %v1174_v33  ;;  %v1043_v47 = vmul.f32 %v7721_v35, %v10032_v3  ;;  %v7727_v56 = vld [vmem:[%s10023_s14 + $0x230] sm:$0xff]  ;;  %v10113_v9 = vld [vmem:[%s10016_s29 + $0x98] sm:$0xff]  ;;  %v10125_v16 = vld [vmem:[%s10023_s14 + $0x248] sm:$0xff] }
  0x1b   : > { %v1112_v26 = vsub.f32 %v984_v10, %v1048_v15  ;;  %v10059_v28 = vadd.f32 %v1240_v17, %v1176_v12  ;;  %v9152_v42 = vpack.c.bf16 %v1114_v32, %v1110_v31  ;;  %v1047_v48 = vmul.f32 %v7725_v36, %v10035_v4  ;;  %v10096_v61 = vld [vmem:[%s10016_s29 + $0x10] sm:$0xff]  ;;  %v10116_v10 = vld [vmem:[%s10023_s14 + $0x48] sm:$0xff]  ;;  %v10142_v22 = vld [vmem:[%s10023_s14 + $0x78] sm:$0xff] }
  0x1c   : > { %v10068_v38 = vadd.f32 %v10057_v27, %v1108_v25  ;;  %v1171_v49 = vmul.f32 %v10032_v3, %v721_v29  ;;  %v10084_v51 = vadd.f32 %v1242_v41, %v1178_v34  ;;  %v1175_v52 = vmul.f32 %v10035_v4, %v725_v30  ;;  %v10110_v8 = vld [vmem:[%s10016_s29 + $0x90] sm:$0xff]  ;;  %v10122_v15 = vld [vmem:[%s10023_s14 + $0x68] sm:$0xff]  ;;  %v10148_v29 = vld [vmem:[%s10023_s14 + $0x258] sm:$0xff] }
  0x1d   : > { %v9120_v37 = vpack.c.bf16 %v1112_v26, %v1108_v25  ;;  %v10071_v39 = vadd.f32 %v10059_v28, %v1112_v26  ;;  %9153 = vmatprep.subr.bf16.mxu1 %v9152_v42  ;;  %v1235_v53 = vmul.f32 %v7721_v35, %v10026_v1  ;;  %v1239_v54 = vmul.f32 %v7725_v36, %v10029_v2  ;;  %v10128_v17 = vld [vmem:[%s10023_s14 + $0x268] sm:$0xff]  ;;  %v729_v33 = vld [vmem:[%s10023_s14 + $0x40] sm:$0xff] }
  0x1e   : > { %18883 = vst [vmem:[#allocation3_spill] sm:$0xff] %v10068_v38  ;;  %v10092_v57 = vadd.f32 %v10078_v46, %v1110_v31  ;;  %v1107_v58 = vsub.f32 %v979_v43, %v1043_v47  ;;  %v1111_v59 = vsub.f32 %v983_v44, %v1047_v48  ;;  %v981_v60 = vmul.f32 %v723_v45, %v10026_v1  ;;  %v7729_v40 = vld [vmem:[%s10023_s14 + $0x240] sm:$0xff] }
  0x1f   : > { %18884 = vst [vmem:[#allocation4_spill] sm:$0xff] %v10071_v39  ;;  %9121 = vmatprep.subr.bf16.mxu0 %v9120_v37  ;;  %v10102_v63 = vadd.f32 %v10084_v51, %v1114_v32  ;;  %v10104_v5 = vadd.f32 %v1235_v53, %v1171_v49  ;;  %v10106_v6 = vadd.f32 %v1239_v54, %v1175_v52  ;;  %v10159_v32 = vld [vmem:[%s10023_s14 + $0x278] sm:$0xff]  ;;  %v7733_v41 = vld [vmem:[%s10023_s14 + $0x260] sm:$0xff]  ;;  %v10188_v52 = vld [vmem:[%s10023_s14 + $0x50] sm:$0xff] }
  0x20   : > { %18885 = vst [vmem:[#allocation5_spill] sm:$0xff] %v10092_v57  ;;  %v985_v7 = vmul.f32 %v727_v50, %v10029_v2  ;;  %v9122_v11 = vpack.c.bf16 %v1111_v59, %v1107_v58  ;;  %v1045_v12 = vmul.f32 %v7723_v55, %v10032_v3  ;;  %v1049_v13 = vmul.f32 %v7727_v56, %v10035_v4 }
  0x21   : > { %18886 = vst [vmem:[#allocation6_spill] sm:$0xff] %v10102_v63  ;;  %v1173_v14 = vmul.f32 %v10032_v3, %v723_v45  ;;  %v10131_v18 = vadd.f32 %v10104_v5, %v1107_v58  ;;  %v10134_v19 = vadd.f32 %v10106_v6, %v1111_v59  ;;  %v1177_v20 = vmul.f32 %v10035_v4, %v727_v50  ;;  %v10139_v3 = vld [vmem:[%s10023_s14 + $0x58] sm:$0xff]  ;;  %v735_v58 = vld [vmem:[%s10023_s14 + $0x70] sm:$0xff] }
  0x22   : > { %v1237_v21 = vmul.f32 %v7723_v55, %v10026_v1  ;;  %9123 = vmatpush1.bf16.msra.mxu0 %v9122_v11  ;;  %v1109_v23 = vsub.f32 %v981_v60, %v1045_v12  ;;  %v1113_v24 = vsub.f32 %v985_v7, %v1049_v13  ;;  %v1241_v25 = vmul.f32 %v7727_v56, %v10029_v2  ;;  %v733_v2 = vld [vmem:[%s10023_s14 + $0x60] sm:$0xff]  ;;  %v7731_v59 = vld [vmem:[%s10023_s14 + $0x250] sm:$0xff] }
  0x23   : > { %18887 = vst [vmem:[#allocation7_spill] sm:$0xff] %v10131_v18  ;;  %18888 = vst [vmem:[#allocation8_spill] sm:$0xff] %v10134_v19  ;;  %v988_v26 = vmul.f32 %v10116_v10, %v10096_v61  ;;  %v992_v1 = vmul.f32 %v10122_v15, %v10099_v62  ;;  %v1052_v30 = vmul.f32 %v10125_v16, %v10110_v8  ;;  %v7735_v7 = vld [vmem:[%s10023_s14 + $0x270] sm:$0xff] }
  0x24   : > { %v10150_v4 = vadd.f32 %v1237_v21, %v1173_v14  ;;  %v1056_v31 = vmul.f32 %v10128_v17, %v10113_v9  ;;  %18889 = vst [vmem:[#allocation9_spill] sm:$0xff] %v10159_v32  ;;  %v10163_v34 = vadd.f32 %v1241_v25, %v1177_v20  ;;  %v9154_v35 = vpack.c.bf16 %v1113_v24, %v1109_v23  ;;  %v10208_v14 = vld [vmem:[%s10016_s29 + $0x20] sm:$0xff]  ;;  %v10211_v20 = vld [vmem:[%s10016_s29 + $0x28] sm:$0xff] }
  0x25   : > { %v990_v36 = vmul.f32 %v10139_v3, %v10096_v61  ;;  %v994_v37 = vmul.f32 %v10142_v22, %v10099_v62  ;;  %v10174_v43 = vsub.f32 %v988_v26, %v1052_v30  ;;  %v1054_v45 = vmul.f32 %v10148_v29, %v10110_v8  ;;  %18896 = vst [vmem:[#allocation16_spill] sm:$0xff] %v10208_v14  ;;  %v10218_v25 = vld [vmem:[%s10016_s29 + $0xa0] sm:$0xff]  ;;  %v10221_v26 = vld [vmem:[%s10016_s29 + $0xa8] sm:$0xff] }
  0x26   : > { %v10172_v42 = vadd.f32 %v10150_v4, %v1109_v23  ;;  %v10176_v44 = vsub.f32 %v992_v1, %v1056_v31  ;;  %9155 = vmatpush1.bf16.msra.mxu1 %v9154_v35  ;;  %v10181_v47 = vadd.f32 %v10163_v34, %v1113_v24  ;;  %v1058_v48 = vmul.f32 %v10159_v32, %v10113_v9  ;;  %v10224_v1 = vld [vmem:[%s10023_s14 + $0x88] sm:$0xff] }
  0x27   : > { %18891 = vst [vmem:[#allocation11_spill] sm:$0xff] %v10174_v43  ;;  %v987_v49 = vmul.f32 %v729_v33, %v10096_v61  ;;  %v991_v50 = vmul.f32 %v733_v2, %v10099_v62  ;;  %v10192_v54 = vsub.f32 %v990_v36, %v1054_v45  ;;  %v1051_v55 = vmul.f32 %v7729_v40, %v10110_v8  ;;  %v10230_v35 = vld [vmem:[%s10023_s14 + $0xa8] sm:$0xff] }
  0x28   : > { %18890 = vst [vmem:[#allocation10_spill] sm:$0xff] %v10172_v42  ;;  %18892 = vst [vmem:[#allocation12_spill] sm:$0xff] %v10176_v44  ;;  %v9124_v53 = vpack.c.bf16 %v10176_v44, %v10174_v43  ;;  %v1055_v56 = vmul.f32 %v7733_v41, %v10113_v9  ;;  %v10198_v60 = vsub.f32 %v994_v37, %v1058_v48  ;;  %v10233_v36 = vld [vmem:[%s10023_s14 + $0x288] sm:$0xff]  ;;  %v10241_v48 = vld [vmem:[%s10023_s14 + $0x98] sm:$0xff] }
  0x29   : > { %18893 = vst [vmem:[#allocation13_spill] sm:$0xff] %v10181_v47  ;;  %18894 = vst [vmem:[#allocation14_spill] sm:$0xff] %v10192_v54  ;;  %v10201_v11 = vsub.f32 %v987_v49, %v1051_v55  ;;  %v989_v13 = vmul.f32 %v10188_v52, %v10096_v61  ;;  %v993_v23 = vmul.f32 %v735_v58, %v10099_v62  ;;  %v10236_v37 = vld [vmem:[%s10023_s14 + $0x2a8] sm:$0xff]  ;;  %v10244_v49 = vld [vmem:[%s10023_s14 + $0xb8] sm:$0xff] }
  0x2a   : > { %18895 = vst [vmem:[#allocation15_spill] sm:$0xff] %v10198_v60  ;;  %9125 = vmatprep.subr.bf16.mxu0 %v9124_v53  ;;  %v10203_v12 = vsub.f32 %v991_v50, %v1055_v56  ;;  %18897 = vst [vmem:[#allocation17_spill] sm:$0xff] %v10211_v20  ;;  %v9156_v21 = vpack.c.bf16 %v10198_v60, %v10192_v54  ;;  %v1053_v24 = vmul.f32 %v7731_v59, %v10110_v8  ;;  %v10251_v55 = vld [vmem:[%s10023_s14 + $0x298] sm:$0xff]  ;;  %v10275_v44 = vld [vmem:[%s10023_s14 + $0x280] sm:$0xff] }
  0x2b   : > { %18898 = vst [vmem:[#allocation18_spill] sm:$0xff] %v10218_v25  ;;  %18899 = vst [vmem:[#allocation19_spill] sm:$0xff] %v10221_v26  ;;  %v1057_v31 = vmul.f32 %v7735_v7, %v10113_v9  ;;  %v996_v53 = vmul.f32 %v10224_v1, %v10208_v14  ;;  %v1179_v56 = vmul.f32 %v10110_v8, %v729_v33  ;;  %v10278_v43 = vld [vmem:[%s10023_s14 + $0x2a0] sm:$0xff] }
  0x2c   : > { %18900 = vst [vmem:[#allocation20_spill] sm:$0xff] %v10224_v1  ;;  %v9126_v30 = vpack.c.bf16 %v10203_v12, %v10201_v11  ;;  %18901 = vst [vmem:[#allocation21_spill] sm:$0xff] %v10230_v35  ;;  %9157 = vmatprep.subr.bf16.mxu1 %v9156_v21  ;;  %v10238_v45 = vsub.f32 %v989_v13, %v1053_v24  ;;  %v1000_v13 = vmul.f32 %v10230_v35, %v10211_v20  ;;  %v10374_v35 = vld [vmem:[%s10023_s14 + $0xf8] sm:$0xff] }
  0x2d   : > { %18902 = vst [vmem:[#allocation22_spill] sm:$0xff] %v10233_v36  ;;  %18903 = vst [vmem:[#allocation23_spill] sm:$0xff] %v10236_v37  ;;  %v10246_v50 = vsub.f32 %v993_v23, %v1057_v31  ;;  %v1060_v21 = vmul.f32 %v10233_v36, %v10218_v25  ;;  %v1064_v24 = vmul.f32 %v10236_v37, %v10221_v26  ;;  %v737_v23 = vld [vmem:[%s10023_s14 + $0x80] sm:$0xff]  ;;  %v10371_v36 = vld [vmem:[%s10023_s14 + $0xd8] sm:$0xff] }
  0x2e   : > { %18904 = vst [vmem:[#allocation24_spill] sm:$0xff] %v10241_v48  ;;  %18905 = vst [vmem:[#allocation25_spill] sm:$0xff] %v10244_v49  ;;  %9127 = vmatpush1.bf16.msra.mxu0 %v9126_v30  ;;  %v10261_v30 = vld [vmem:[%s10023_s14 + $0x2b8] sm:$0xff]  ;;  %v10265_v31 = vld [vmem:[%s10023_s14 + $0xa0] sm:$0xff]  ;;  %v1183_v0 = vmul.f32 %v10113_v9, %v733_v2  ;;  %v998_v60 = vmul.f32 %v10241_v48, %v10208_v14  ;;  %v1002_v54 = vmul.f32 %v10244_v49, %v10211_v20 }
  0x2f   : > { %18906 = vst [vmem:[#allocation26_spill] sm:$0xff] %v10251_v55  ;;  %18907 = vst [vmem:[#allocation27_spill] sm:$0xff] %v10261_v30  ;;  %v9158_v33 = vpack.c.bf16 %v10246_v50, %v10238_v45  ;;  %v1243_v47 = vmul.f32 %v7729_v40, %v10096_v61  ;;  %v10281_v42 = vsub.f32 %v996_v53, %v1060_v21  ;;  %v10294_v40 = vld [vmem:[%s10023_s14 + $0x90] sm:$0xff] }
  0x30   : > { %v10283_v2 = vsub.f32 %v1000_v13, %v1064_v24  ;;  %v1062_v19 = vmul.f32 %v10251_v55, %v10218_v25  ;;  %v1247_v18 = vmul.f32 %v7733_v41, %v10099_v62  ;;  %v1066_v63 = vmul.f32 %v10261_v30, %v10221_v26  ;;  %v10305_v24 = vld [vmem:[%s10023_s14 + $0xb0] sm:$0xff]  ;;  %18920 = vst [vmem:[#allocation40_spill] sm:$0xff] %v10371_v36 }
  0x31   : > { %18908 = vst [vmem:[#allocation28_spill] sm:$0xff] %v10281_v42  ;;  %9159 = vmatpush1.bf16.msra.mxu1 %v9158_v33  ;;  %v995_v57 = vmul.f32 %v737_v23, %v10208_v14  ;;  %v999_v39 = vmul.f32 %v10265_v31, %v10211_v20  ;;  %v1059_v41 = vmul.f32 %v10275_v44, %v10218_v25  ;;  %v10308_v33 = vld [vmem:[%s10023_s14 + $0x290] sm:$0xff]  ;;  %18921 = vst [vmem:[#allocation41_spill] sm:$0xff] %v10374_v35 }
  0x32   : > { %18909 = vst [vmem:[#allocation29_spill] sm:$0xff] %v10283_v2  ;;  %v9128_v53 = vpack.c.bf16 %v10283_v2, %v10281_v42  ;;  %v10298_v13 = vsub.f32 %v998_v60, %v1062_v19  ;;  %v1063_v21 = vmul.f32 %v10278_v43, %v10221_v26  ;;  %v1181_v38 = vmul.f32 %v10110_v8, %v10188_v52  ;;  %v10317_v42 = vld [vmem:[%s10023_s14 + $0x2b0] sm:$0xff] }
  0x33   : > { %v1185_v2 = vmul.f32 %v10113_v9, %v735_v58  ;;  %v1245_v19 = vmul.f32 %v7731_v59, %v10096_v61  ;;  %v10314_v60 = vsub.f32 %v1002_v54, %v1066_v63  ;;  %v1249_v30 = vmul.f32 %v7735_v7, %v10099_v62  ;;  %v10327_v49 = vld [vmem:[%s10016_s29 + $0x30] sm:$0xff]  ;;  %v10330_v59 = vld [vmem:[%s10016_s29 + $0x38] sm:$0xff] }
  0x34   : > { %18910 = vst [vmem:[#allocation30_spill] sm:$0xff] %v10298_v13  ;;  %9129 = vmatprep.subr.bf16.mxu0 %v9128_v53  ;;  %v10320_v55 = vsub.f32 %v995_v57, %v1059_v41  ;;  %v10322_v52 = vsub.f32 %v999_v39, %v1063_v21  ;;  %v997_v58 = vmul.f32 %v10294_v40, %v10208_v14  ;;  %18913 = vst [vmem:[#allocation33_spill] sm:$0xff] %v10330_v59  ;;  %v10341_v7 = vld [vmem:[%s10016_s29 + $0xb0] sm:$0xff]  ;;  %v10344_v53 = vld [vmem:[%s10016_s29 + $0xb8] sm:$0xff] }
  0x35   : > { %18911 = vst [vmem:[#allocation31_spill] sm:$0xff] %v10314_v60  ;;  %v10332_v63 = vadd.f32 %v1243_v47, %v1179_v56  ;;  %v9160_v54 = vpack.c.bf16 %v10314_v60, %v10298_v13  ;;  %v1001_v57 = vmul.f32 %v10305_v24, %v10211_v20  ;;  %v1061_v39 = vmul.f32 %v10308_v33, %v10218_v25  ;;  %v10347_v41 = vld [vmem:[%s10023_s14 + $0xc8] sm:$0xff] }
  0x36   : > { %18912 = vst [vmem:[#allocation32_spill] sm:$0xff] %v10322_v52  ;;  %18914 = vst [vmem:[#allocation34_spill] sm:$0xff] %v10347_v41  ;;  %v9130_v47 = vpack.c.bf16 %v10322_v52, %v10320_v55  ;;  %v1065_v56 = vmul.f32 %v10317_v42, %v10221_v26  ;;  %v10354_v21 = vld [vmem:[%s10023_s14 + $0xe8] sm:$0xff]  ;;  %v10362_v48 = vadd.f32 %v1247_v18, %v1183_v0 }
  0x37   : > { %18915 = vst [vmem:[#allocation35_spill] sm:$0xff] %v10354_v21  ;;  %v10357_v60 = vld [vmem:[%s10023_s14 + $0x2c8] sm:$0xff]  ;;  %v10366_v37 = vadd.f32 %v10332_v63, %v10201_v11  ;;  %9161 = vmatprep.subr.bf16.mxu1 %v9160_v54  ;;  %v10368_v52 = vsub.f32 %v997_v58, %v1061_v39  ;;  %v10376_v1 = vadd.f32 %v1245_v19, %v1181_v38  ;;  %v10385_v11 = vld [vmem:[%s10023_s14 + $0x2d8] sm:$0xff]  ;;  %v745_v19 = vld [vmem:[%s10023_s14 + $0xc0] sm:$0xff] }
  0x38   : > { %18916 = vst [vmem:[#allocation36_spill] sm:$0xff] %v10357_v60  ;;  %v10360_v13 = vld [vmem:[%s10023_s14 + $0x2e8] sm:$0xff]  ;;  %v10378_v32 = vadd.f32 %v1249_v30, %v1185_v2  ;;  %9131 = vmatpush1.bf16.msra.mxu0 %v9130_v47  ;;  %v10380_v0 = vsub.f32 %v1001_v57, %v1065_v56  ;;  %v1004_v18 = vmul.f32 %v10347_v41, %v10327_v49  ;;  %18924 = vst [vmem:[#allocation44_spill] sm:$0xff] %v10385_v11  ;;  %v10395_v2 = vld [vmem:[%s10023_s14 + $0x2f8] sm:$0xff] }
  0x39   : > { %18917 = vst [vmem:[#allocation37_spill] sm:$0xff] %v10360_v13  ;;  %18918 = vst [vmem:[#allocation38_spill] sm:$0xff] %v10366_v37  ;;  %v1187_v58 = vmul.f32 %v10218_v25, %v737_v23  ;;  %v1008_v54 = vmul.f32 %v10354_v21, %v10330_v59  ;;  %v1068_v38 = vmul.f32 %v10357_v60, %v10341_v7  ;;  %v749_v57 = vld [vmem:[%s10023_s14 + $0xe0] sm:$0xff] }
  0x3a   : > { %18919 = vst [vmem:[#allocation39_spill] sm:$0xff] %v10368_v52  ;;  %18922 = vst [vmem:[#allocation42_spill] sm:$0xff] %v10378_v32  ;;  %v1072_v30 = vmul.f32 %v10360_v13, %v10344_v53  ;;  %v1191_v39 = vmul.f32 %v10221_v26, %v10265_v31  ;;  %v9162_v23 = vpack.c.bf16 %v10380_v0, %v10368_v52  ;;  %v7745_v37 = vld [vmem:[%s10023_s14 + $0x2c0] sm:$0xff] }
  0x3b   : > { %18923 = vst [vmem:[#allocation43_spill] sm:$0xff] %v10380_v0  ;;  %18925 = vst [vmem:[#allocation45_spill] sm:$0xff] %v10395_v2  ;;  %v1006_v47 = vmul.f32 %v10371_v36, %v10327_v49  ;;  %v1010_v56 = vmul.f32 %v10374_v35, %v10330_v59  ;;  %v10409_v13 = vld [vmem:[%s10023_s14 + $0x2e0] sm:$0xff]  ;;  %v1251_v60 = vmul.f32 %v10275_v44, %v10208_v14  ;;  %v747_v44 = vld [vmem:[%s10023_s14 + $0xd0] sm:$0xff] }
  0x3c   : > { %v10413_v21 = vsub.f32 %v1004_v18, %v1068_v38  ;;  %v10415_v31 = vsub.f32 %v1008_v54, %v1072_v30  ;;  %v1070_v0 = vmul.f32 %v10385_v11, %v10341_v7  ;;  %v1255_v52 = vmul.f32 %v10278_v43, %v10211_v20  ;;  %9163 = vmatpush1.bf16.msra.mxu1 %v9162_v23  ;;  %v10434_v30 = vld [vmem:[%s10023_s14 + $0xf0] sm:$0xff] }
  0x3d   : > { %v1074_v35 = vmul.f32 %v10395_v2, %v10344_v53  ;;  %v1003_v36 = vmul.f32 %v745_v19, %v10327_v49  ;;  %v1007_v41 = vmul.f32 %v749_v57, %v10330_v59  ;;  %v1067_v38 = vmul.f32 %v7745_v37, %v10341_v7  ;;  %v7747_v23 = vld [vmem:[%s10023_s14 + $0x2d0] sm:$0xff] }
  0x3e   : > { %18926 = vst [vmem:[#allocation46_spill] sm:$0xff] %v10413_v21  ;;  %18927 = vst [vmem:[#allocation47_spill] sm:$0xff] %v10415_v31  ;;  %v9132_v18 = vpack.c.bf16 %v10415_v31, %v10413_v21  ;;  %v10428_v54 = vsub.f32 %v1006_v47, %v1070_v0  ;;  %v1071_v43 = vmul.f32 %v10409_v13, %v10344_v53  ;;  %v10452_v21 = vld [vmem:[%s10023_s14 + $0x2f0] sm:$0xff] }
  0x3f   : > { %v10439_v2 = vadd.f32 %v10362_v48, %v10203_v12  ;;  %v10443_v31 = vadd.f32 %v10376_v1, %v10238_v45  ;;  %v10447_v0 = vadd.f32 %v10378_v32, %v10246_v50  ;;  %v10449_v47 = vsub.f32 %v1010_v56, %v1074_v35  ;;  %v10465_v50 = vld [vmem:[%s10016_s29 + $0x48] sm:$0xff]  ;;  %v755_v32 = vld [vmem:[%s10023_s14 + $0x110] sm:$0xff] }
  0x40   : > { %18928 = vst [vmem:[#allocation48_spill] sm:$0xff] %v10428_v54  ;;  %v10454_v11 = vadd.f32 %v1251_v60, %v1187_v58  ;;  %9133 = vmatprep.subr.bf16.mxu0 %v9132_v18  ;;  %v10456_v12 = vsub.f32 %v1003_v36, %v1067_v38  ;;  %v1005_v45 = vmul.f32 %v747_v44, %v10327_v49  ;;  %18937 = vst [vmem:[#allocation57_spill] sm:$0xff] %v10465_v50  ;;  %v10478_v56 = vld [vmem:[%s10016_s29 + $0xc8] sm:$0xff] }
  0x41   : > { %18929 = vst [vmem:[#allocation49_spill] sm:$0xff] %v10439_v2  ;;  %18930 = vst [vmem:[#allocation50_spill] sm:$0xff] %v10443_v31  ;;  %v10458_v2 = vsub.f32 %v1007_v41, %v1071_v43  ;;  %v10462_v31 = vld [vmem:[%s10016_s29 + $0x40] sm:$0xff]  ;;  %v10467_v35 = vadd.f32 %v1255_v52, %v1191_v39  ;;  %v9164_v60 = vpack.c.bf16 %v10449_v47, %v10428_v54  ;;  %v10481_v18 = vld [vmem:[%s10023_s14 + $0x108] sm:$0xff] }
  0x42   : > { %18931 = vst [vmem:[#allocation51_spill] sm:$0xff] %v10447_v0  ;;  %18932 = vst [vmem:[#allocation52_spill] sm:$0xff] %v10449_v47  ;;  %v1009_v36 = vmul.f32 %v10434_v30, %v10330_v59  ;;  %v1069_v58 = vmul.f32 %v7747_v23, %v10341_v7  ;;  %v10475_v41 = vld [vmem:[%s10016_s29 + $0xc0] sm:$0xff]  ;;  %v10485_v52 = vadd.f32 %v10454_v11, %v10320_v55  ;;  %v10494_v47 = vld [vmem:[%s10023_s14 + $0x128] sm:$0xff] }
  0x43   : > { %18933 = vst [vmem:[#allocation53_spill] sm:$0xff] %v10454_v11  ;;  %18934 = vst [vmem:[#allocation54_spill] sm:$0xff] %v10456_v12  ;;  %v1189_v39 = vmul.f32 %v10218_v25, %v10294_v40  ;;  %v9134_v38 = vpack.c.bf16 %v10458_v2, %v10456_v12  ;;  %v1073_v43 = vmul.f32 %v10452_v21, %v10344_v53  ;;  %v10497_v54 = vld [vmem:[%s10023_s14 + $0x308] sm:$0xff]  ;;  %9165 = vmatprep.subr.bf16.mxu1 %v9164_v60  ;;  %v10511_v12 = vld [vmem:[%s10023_s14 + $0x118] sm:$0xff] }
  0x44   : > { %18935 = vst [vmem:[#allocation55_spill] sm:$0xff] %v10458_v2  ;;  %18936 = vst [vmem:[#allocation56_spill] sm:$0xff] %v10462_v31  ;;  %v10500_v0 = vld [vmem:[%s10023_s14 + $0x328] sm:$0xff]  ;;  %v1193_v55 = vmul.f32 %v10221_v26, %v10305_v24  ;;  %v1257_v40 = vmul.f32 %v10317_v42, %v10211_v20  ;;  %v10508_v2 = vsub.f32 %v1005_v45, %v1069_v58  ;;  %v10523_v60 = vld [vmem:[%s10023_s14 + $0x318] sm:$0xff] }
  0x45   : > { %18938 = vst [vmem:[#allocation58_spill] sm:$0xff] %v10467_v35  ;;  %18939 = vst [vmem:[#allocation59_spill] sm:$0xff] %v10475_v41  ;;  %v10514_v35 = vld [vmem:[%s10023_s14 + $0x138] sm:$0xff]  ;;  %v1195_v11 = vmul.f32 %v10341_v7, %v745_v19  ;;  %v1199_v24 = vmul.f32 %v10344_v53, %v749_v57  ;;  %9135 = vmatpush1.bf16.msra.mxu0 %v9134_v38  ;;  %v1012_v42 = vmul.f32 %v10481_v18, %v10462_v31  ;;  %v7753_v20 = vld [vmem:[%s10023_s14 + $0x300] sm:$0xff] }
  0x46   : > { %18940 = vst [vmem:[#allocation60_spill] sm:$0xff] %v10481_v18  ;;  %18941 = vst [vmem:[#allocation61_spill] sm:$0xff] %v10485_v52  ;;  %v1253_v52 = vmul.f32 %v10308_v33, %v10208_v14  ;;  %v10518_v33 = vsub.f32 %v1009_v36, %v1073_v43  ;;  %v1259_v45 = vmul.f32 %v7745_v37, %v10327_v49  ;;  %v10533_v38 = vld [vmem:[%s10023_s14 + $0x338] sm:$0xff]  ;;  %v753_v36 = vld [vmem:[%s10023_s14 + $0x100] sm:$0xff] }
  0x47   : > { %18942 = vst [vmem:[#allocation62_spill] sm:$0xff] %v10494_v47  ;;  %18943 = vst [vmem:[#allocation63_spill] sm:$0xff] %v10497_v54  ;;  %v1016_v58 = vmul.f32 %v10494_v47, %v10465_v50  ;;  %v1076_v19 = vmul.f32 %v10497_v54, %v10475_v41  ;;  %v1080_v57 = vmul.f32 %v10500_v0, %v10478_v56  ;;  %v757_v43 = vld [vmem:[%s10023_s14 + $0x120] sm:$0xff] }
  0x48   : > { %18944 = vst [vmem:[#allocation64_spill] sm:$0xff] %v10500_v0  ;;  %18945 = vst [vmem:[#allocation65_spill] sm:$0xff] %v10508_v2  ;;  %v1263_v18 = vmul.f32 %v10409_v13, %v10330_v59  ;;  %v9166_v37 = vpack.c.bf16 %v10518_v33, %v10508_v2  ;;  %v1014_v47 = vmul.f32 %v10511_v12, %v10462_v31  ;;  %v7757_v0 = vld [vmem:[%s10023_s14 + $0x320] sm:$0xff] }
  0x49   : > { %18946 = vst [vmem:[#allocation66_spill] sm:$0xff] %v10511_v12  ;;  %18947 = vst [vmem:[#allocation67_spill] sm:$0xff] %v10514_v35  ;;  %v1018_v54 = vmul.f32 %v10514_v35, %v10465_v50  ;;  %v1197_v14 = vmul.f32 %v10341_v7, %v747_v44  ;;  %v10548_v26 = vsub.f32 %v1012_v42, %v1076_v19  ;;  %v10567_v19 = vld [vmem:[%s10023_s14 + $0x130] sm:$0xff] }
  0x4a   : > { %18948 = vst [vmem:[#allocation68_spill] sm:$0xff] %v10518_v33  ;;  %18949 = vst [vmem:[#allocation69_spill] sm:$0xff] %v10523_v60  ;;  %v10550_v25 = vsub.f32 %v1016_v58, %v1080_v57  ;;  %v1078_v13 = vmul.f32 %v10523_v60, %v10475_v41  ;;  %v1261_v33 = vmul.f32 %v7747_v23, %v10327_v49  ;;  %9167 = vmatpush1.bf16.msra.mxu1 %v9166_v37  ;;  %v7755_v57 = vld [vmem:[%s10023_s14 + $0x310] sm:$0xff] }
  0x4b   : > { %18950 = vst [vmem:[#allocation70_spill] sm:$0xff] %v10533_v38  ;;  %18951 = vst [vmem:[#allocation71_spill] sm:$0xff] %v10548_v26  ;;  %v1082_v2 = vmul.f32 %v10533_v38, %v10478_v56  ;;  %v1011_v35 = vmul.f32 %v753_v36, %v10462_v31  ;;  %v1015_v12 = vmul.f32 %v757_v43, %v10465_v50 }
  0x4c   : > { %18952 = vst [vmem:[#allocation72_spill] sm:$0xff] %v10550_v25  ;;  %v9136_v44 = vpack.c.bf16 %v10550_v25, %v10548_v26  ;;  %v10562_v42 = vsub.f32 %v1014_v47, %v1078_v13  ;;  %v1075_v58 = vmul.f32 %v7753_v20, %v10475_v41  ;;  %v1079_v23 = vmul.f32 %v7757_v0, %v10478_v56  ;;  %v10579_v13 = vld [vmem:[%s10023_s14 + $0x330] sm:$0xff] }
  0x4d   : > { %v10570_v37 = vadd.f32 %v1253_v52, %v1189_v39  ;;  %v1201_v38 = vmul.f32 %v10344_v53, %v10434_v30  ;;  %v1265_v25 = vmul.f32 %v10452_v21, %v10330_v59  ;;  %v10576_v47 = vsub.f32 %v1018_v54, %v1082_v2  ;;  %v10589_v39 = vld [vmem:[%s10016_s29 + $0x50] sm:$0xff]  ;;  %v10592_v21 = vld [vmem:[%s10016_s29 + $0x58] sm:$0xff] }
  0x4e   : > { %18953 = vst [vmem:[#allocation73_spill] sm:$0xff] %v10562_v42  ;;  %v10581_v26 = vadd.f32 %v1257_v40, %v1193_v55  ;;  %9137 = vmatprep.subr.bf16.mxu0 %v9136_v44  ;;  %v10583_v60 = vsub.f32 %v1011_v35, %v1075_v58  ;;  %v10585_v52 = vsub.f32 %v1015_v12, %v1079_v23  ;;  %18957 = vst [vmem:[#allocation77_spill] sm:$0xff] %v10589_v39  ;;  %v10602_v12 = vld [vmem:[%s10016_s29 + $0xd0] sm:$0xff]  ;;  %v10605_v40 = vld [vmem:[%s10016_s29 + $0xd8] sm:$0xff] }
  0x4f   : > { %18954 = vst [vmem:[#allocation74_spill] sm:$0xff] %v10576_v47  ;;  %v1013_v30 = vmul.f32 %v755_v32, %v10462_v31  ;;  %18958 = vst [vmem:[#allocation78_spill] sm:$0xff] %v10592_v21  ;;  %v10594_v2 = vadd.f32 %v1259_v45, %v1195_v11  ;;  %v9168_v54 = vpack.c.bf16 %v10576_v47, %v10562_v42  ;;  %v10608_v44 = vld [vmem:[%s10023_s14 + $0x148] sm:$0xff] }
  0x50   : > { %18955 = vst [vmem:[#allocation75_spill] sm:$0xff] %v10583_v60  ;;  %18956 = vst [vmem:[#allocation76_spill] sm:$0xff] %v10585_v52  ;;  %v1017_v35 = vmul.f32 %v10567_v19, %v10465_v50  ;;  %v1077_v55 = vmul.f32 %v7755_v57, %v10475_v41  ;;  %v10610_v58 = vadd.f32 %v1263_v18, %v1199_v24  ;;  %v10619_v47 = vld [vmem:[%s10023_s14 + $0x168] sm:$0xff] }
  0x51   : > { %18959 = vst [vmem:[#allocation79_spill] sm:$0xff] %v10594_v2  ;;  %18960 = vst [vmem:[#allocation80_spill] sm:$0xff] %v10608_v44  ;;  %v10612_v11 = vadd.f32 %v1261_v33, %v1197_v14  ;;  %v9138_v45 = vpack.c.bf16 %v10585_v52, %v10583_v60  ;;  %v1081_v23 = vmul.f32 %v10579_v13, %v10478_v56  ;;  %v10622_v42 = vld [vmem:[%s10023_s14 + $0x348] sm:$0xff]  ;;  %9169 = vmatprep.subr.bf16.mxu1 %v9168_v54  ;;  %v10634_v33 = vld [vmem:[%s10023_s14 + $0x158] sm:$0xff] }
  0x52   : > { %18962 = vst [vmem:[#allocation82_spill] sm:$0xff] %v10619_v47  ;;  %18963 = vst [vmem:[#allocation83_spill] sm:$0xff] %v10622_v42  ;;  %v10625_v2 = vld [vmem:[%s10023_s14 + $0x368] sm:$0xff]  ;;  %v10627_v59 = vadd.f32 %v1265_v25, %v1201_v38  ;;  %v1203_v14 = vmul.f32 %v10475_v41, %v753_v36  ;;  %v1267_v18 = vmul.f32 %v7753_v20, %v10462_v31  ;;  %v10637_v52 = vld [vmem:[%s10023_s14 + $0x178] sm:$0xff] }
  0x53   : > { %18961 = vst [vmem:[#allocation81_spill] sm:$0xff] %v10612_v11  ;;  %18964 = vst [vmem:[#allocation84_spill] sm:$0xff] %v10625_v2  ;;  %v10631_v24 = vsub.f32 %v1013_v30, %v1077_v55  ;;  %v1207_v60 = vmul.f32 %v10478_v56, %v757_v43  ;;  %v1271_v11 = vmul.f32 %v7757_v0, %v10465_v50  ;;  %9139 = vmatpush1.bf16.msra.mxu0 %v9138_v45  ;;  %v10646_v20 = vld [vmem:[%s10023_s14 + $0x358] sm:$0xff]  ;;  %v765_v55 = vld [vmem:[%s10023_s14 + $0x160] sm:$0xff] }
  0x54   : > { %18965 = vst [vmem:[#allocation85_spill] sm:$0xff] %v10627_v59  ;;  %18967 = vst [vmem:[#allocation87_spill] sm:$0xff] %v10634_v33  ;;  %v10641_v25 = vsub.f32 %v1017_v35, %v1081_v23  ;;  %v1020_v38 = vmul.f32 %v10608_v44, %v10589_v39  ;;  %v1205_v36 = vmul.f32 %v10475_v41, %v755_v32  ;;  %v10656_v54 = vld [vmem:[%s10023_s14 + $0x378] sm:$0xff]  ;;  %v761_v35 = vld [vmem:[%s10023_s14 + $0x140] sm:$0xff] }
  0x55   : > { %18966 = vst [vmem:[#allocation86_spill] sm:$0xff] %v10631_v24  ;;  %18968 = vst [vmem:[#allocation88_spill] sm:$0xff] %v10637_v52  ;;  %v1024_v30 = vmul.f32 %v10619_v47, %v10592_v21  ;;  %v1084_v43 = vmul.f32 %v10622_v42, %v10602_v12  ;;  %v1088_v0 = vmul.f32 %v10625_v2, %v10605_v40  ;;  %v7761_v42 = vld [vmem:[%s10023_s14 + $0x340] sm:$0xff] }
  0x56   : > { %18969 = vst [vmem:[#allocation89_spill] sm:$0xff] %v10641_v25  ;;  %18970 = vst [vmem:[#allocation90_spill] sm:$0xff] %v10646_v20  ;;  %v1269_v45 = vmul.f32 %v7755_v57, %v10462_v31  ;;  %v9170_v23 = vpack.c.bf16 %v10641_v25, %v10631_v24  ;;  %v1022_v32 = vmul.f32 %v10634_v33, %v10589_v39  ;;  %v7765_v44 = vld [vmem:[%s10023_s14 + $0x360] sm:$0xff] }
  0x57   : > { %18971 = vst [vmem:[#allocation91_spill] sm:$0xff] %v10656_v54  ;;  %v1026_v47 = vmul.f32 %v10637_v52, %v10592_v21  ;;  %v10669_v2 = vadd.f32 %v1267_v18, %v1203_v14  ;;  %v10671_v41 = vsub.f32 %v1020_v38, %v1084_v43  ;;  %v10673_v59 = vsub.f32 %v1024_v30, %v1088_v0  ;;  %v763_v14 = vld [vmem:[%s10023_s14 + $0x150] sm:$0xff] }
  0x58   : > { %v1086_v57 = vmul.f32 %v10646_v20, %v10602_v12  ;;  %v10677_v25 = vadd.f32 %v1271_v11, %v1207_v60  ;;  %9171 = vmatpush1.bf16.msra.mxu1 %v9170_v23  ;;  %v1090_v24 = vmul.f32 %v10656_v54, %v10605_v40  ;;  %v1019_v52 = vmul.f32 %v761_v35, %v10589_v39  ;;  %v767_v30 = vld [vmem:[%s10023_s14 + $0x170] sm:$0xff] }
  0x59   : > { %18972 = vst [vmem:[#allocation92_spill] sm:$0xff] %v10669_v2  ;;  %18973 = vst [vmem:[#allocation93_spill] sm:$0xff] %v10671_v41  ;;  %v1023_v33 = vmul.f32 %v765_v55, %v10592_v21  ;;  %v9140_v18 = vpack.c.bf16 %v10673_v59, %v10671_v41  ;;  %v1083_v60 = vmul.f32 %v7761_v42, %v10602_v12  ;;  %v7763_v43 = vld [vmem:[%s10023_s14 + $0x350] sm:$0xff] }
  0x5a   : > { %18974 = vst [vmem:[#allocation94_spill] sm:$0xff] %v10673_v59  ;;  %18975 = vst [vmem:[#allocation95_spill] sm:$0xff] %v10677_v25  ;;  %v10686_v38 = vsub.f32 %v1022_v32, %v1086_v57  ;;  %v1087_v11 = vmul.f32 %v7765_v44, %v10605_v40  ;;  %v1209_v0 = vmul.f32 %v10478_v56, %v10567_v19  ;;  %v7767_v57 = vld [vmem:[%s10023_s14 + $0x370] sm:$0xff]  ;;  %v10739_v25 = vld [vmem:[%s10023_s14 + $0x3a8] sm:$0xff] }
  0x5b   : > { %v1273_v23 = vmul.f32 %v10579_v13, %v10465_v50  ;;  %v10696_v54 = vadd.f32 %v1269_v45, %v1205_v36  ;;  %v10698_v32 = vsub.f32 %v1026_v47, %v1090_v24  ;;  %9141 = vmatprep.subr.bf16.mxu0 %v9140_v18  ;;  %v10701_v59 = vsub.f32 %v1019_v52, %v1083_v60  ;;  %v10708_v13 = vld [vmem:[%s10016_s29 + $0x60] sm:$0xff]  ;;  %v10711_v36 = vld [vmem:[%s10016_s29 + $0x68] sm:$0xff] }
  0x5c   : > { %18976 = vst [vmem:[#allocation96_spill] sm:$0xff] %v10686_v38  ;;  %v10703_v41 = vsub.f32 %v1023_v33, %v1087_v11  ;;  %v1211_v20 = vmul.f32 %v10602_v12, %v761_v35  ;;  %v1021_v19 = vmul.f32 %v763_v14, %v10589_v39  ;;  %18981 = vst [vmem:[#allocation101_spill] sm:$0xff] %v10711_v36  ;;  %v10719_v45 = vld [vmem:[%s10016_s29 + $0xe0] sm:$0xff]  ;;  %v10722_v35 = vld [vmem:[%s10016_s29 + $0xe8] sm:$0xff] }
  0x5d   : > { %18977 = vst [vmem:[#allocation97_spill] sm:$0xff] %v10696_v54  ;;  %18978 = vst [vmem:[#allocation98_spill] sm:$0xff] %v10698_v32  ;;  %v9172_v47 = vpack.c.bf16 %v10698_v32, %v10686_v38  ;;  %v1275_v24 = vmul.f32 %v7761_v42, %v10589_v39  ;;  %v1025_v52 = vmul.f32 %v767_v30, %v10592_v21  ;;  %v10725_v18 = vld [vmem:[%s10023_s14 + $0x188] sm:$0xff] }
  0x5e   : > { %18979 = vst [vmem:[#allocation99_spill] sm:$0xff] %v10701_v59  ;;  %18980 = vst [vmem:[#allocation100_spill] sm:$0xff] %v10703_v41  ;;  %v1085_v33 = vmul.f32 %v7763_v43, %v10602_v12  ;;  %v1215_v60 = vmul.f32 %v10605_v40, %v765_v55  ;;  %v1279_v11 = vmul.f32 %v7765_v44, %v10592_v21  ;;  %v10733_v38 = vld [vmem:[%s10023_s14 + $0x1a8] sm:$0xff] }
  0x5f   : > { %18982 = vst [vmem:[#allocation102_spill] sm:$0xff] %v10719_v45  ;;  %18983 = vst [vmem:[#allocation103_spill] sm:$0xff] %v10725_v18  ;;  %v9142_v32 = vpack.c.bf16 %v10703_v41, %v10701_v59  ;;  %v1089_v42 = vmul.f32 %v7767_v57, %v10605_v40  ;;  %v10736_v54 = vld [vmem:[%s10023_s14 + $0x388] sm:$0xff]  ;;  %v10741_v2 = vadd.f32 %v1273_v23, %v1209_v0  ;;  %9173 = vmatprep.subr.bf16.mxu1 %v9172_v47  ;;  %v10748_v41 = vld [vmem:[%s10023_s14 + $0x198] sm:$0xff] }
  0x60   : > { %18984 = vst [vmem:[#allocation104_spill] sm:$0xff] %v10733_v38  ;;  %18985 = vst [vmem:[#allocation105_spill] sm:$0xff] %v10736_v54  ;;  %v10743_v50 = vsub.f32 %v1021_v19, %v1085_v33  ;;  %v1213_v44 = vmul.f32 %v10602_v12, %v763_v14  ;;  %v1277_v55 = vmul.f32 %v7763_v43, %v10589_v39  ;;  %v10751_v59 = vld [vmem:[%s10023_s14 + $0x1b8] sm:$0xff]  ;;  %v769_v33 = vld [vmem:[%s10023_s14 + $0x180] sm:$0xff] }
  0x61   : > { %18986 = vst [vmem:[#allocation106_spill] sm:$0xff] %v10739_v25  ;;  %18988 = vst [vmem:[#allocation108_spill] sm:$0xff] %v10748_v41  ;;  %9143 = vmatpush1.bf16.msra.mxu0 %v9142_v32  ;;  %v10753_v31 = vsub.f32 %v1025_v52, %v1089_v42  ;;  %v1217_v0 = vmul.f32 %v10605_v40, %v767_v30  ;;  %v1281_v23 = vmul.f32 %v7767_v57, %v10592_v21  ;;  %v10760_v14 = vld [vmem:[%s10023_s14 + $0x398] sm:$0xff]  ;;  %v773_v57 = vld [vmem:[%s10023_s14 + $0x1a0] sm:$0xff] }
  0x62   : > { %18987 = vst [vmem:[#allocation107_spill] sm:$0xff] %v10743_v50  ;;  %18989 = vst [vmem:[#allocation109_spill] sm:$0xff] %v10751_v59  ;;  %v1028_v19 = vmul.f32 %v10725_v18, %v10708_v13  ;;  %v10762_v47 = vadd.f32 %v1275_v24, %v1211_v20  ;;  %v1032_v43 = vmul.f32 %v10733_v38, %v10711_v36  ;;  %v10771_v30 = vld [vmem:[%s10023_s14 + $0x3b8] sm:$0xff]  ;;  %v7773_v18 = vld [vmem:[%s10023_s14 + $0x3a0] sm:$0xff] }
  0x63   : > { %18990 = vst [vmem:[#allocation110_spill] sm:$0xff] %v10753_v31  ;;  %18991 = vst [vmem:[#allocation111_spill] sm:$0xff] %v10760_v14  ;;  %v1092_v32 = vmul.f32 %v10736_v54, %v10719_v45  ;;  %v1096_v52 = vmul.f32 %v10739_v25, %v10722_v35  ;;  %v10775_v42 = vadd.f32 %v1279_v11, %v1215_v60  ;;  %v7769_v54 = vld [vmem:[%s10023_s14 + $0x380] sm:$0xff] }
  0x64   : > { %18992 = vst [vmem:[#allocation112_spill] sm:$0xff] %v10762_v47  ;;  %18993 = vst [vmem:[#allocation113_spill] sm:$0xff] %v10771_v30  ;;  %v9174_v20 = vpack.c.bf16 %v10753_v31, %v10743_v50  ;;  %v1030_v24 = vmul.f32 %v10748_v41, %v10708_v13  ;;  %v1034_v38 = vmul.f32 %v10751_v59, %v10711_v36 }
  0x65   : > { %18994 = vst [vmem:[#allocation114_spill] sm:$0xff] %v10775_v42  ;;  %v10785_v25 = vadd.f32 %v1277_v55, %v1213_v44  ;;  %v10787_v47 = vsub.f32 %v1028_v19, %v1092_v32  ;;  %v10789_v21 = vsub.f32 %v1032_v43, %v1096_v52  ;;  %v1094_v60 = vmul.f32 %v10760_v14, %v10719_v45  ;;  %v771_v44 = vld [vmem:[%s10023_s14 + $0x190] sm:$0xff] }
  0x66   : > { %v10793_v11 = vadd.f32 %v1281_v23, %v1217_v0  ;;  %9175 = vmatpush1.bf16.msra.mxu1 %v9174_v20  ;;  %v1098_v31 = vmul.f32 %v10771_v30, %v10722_v35  ;;  %v1027_v50 = vmul.f32 %v769_v33, %v10708_v13  ;;  %v1031_v59 = vmul.f32 %v773_v57, %v10711_v36  ;;  %v775_v43 = vld [vmem:[%s10023_s14 + $0x1b0] sm:$0xff] }
  0x67   : > { %18995 = vst [vmem:[#allocation115_spill] sm:$0xff] %v10785_v25  ;;  %18996 = vst [vmem:[#allocation116_spill] sm:$0xff] %v10787_v47  ;;  %v9144_v55 = vpack.c.bf16 %v10789_v21, %v10787_v47  ;;  %v10802_v19 = vsub.f32 %v1030_v24, %v1094_v60  ;;  %v1091_v0 = vmul.f32 %v7769_v54, %v10719_v45  ;;  %v7771_v32 = vld [vmem:[%s10023_s14 + $0x390] sm:$0xff] }
  0x68   : > { %18997 = vst [vmem:[#allocation117_spill] sm:$0xff] %v10789_v21  ;;  %18998 = vst [vmem:[#allocation118_spill] sm:$0xff] %v10793_v11  ;;  %v1095_v23 = vmul.f32 %v7773_v18, %v10722_v35  ;;  %v10808_v52 = vsub.f32 %v1034_v38, %v1098_v31  ;;  %v1219_v20 = vmul.f32 %v10719_v45, %v769_v33  ;;  %v7775_v24 = vld [vmem:[%s10023_s14 + $0x3b0] sm:$0xff]  ;;  %v10820_v33 = vld [vmem:[%s10016_s29 + $0x78] sm:$0xff] }
  0x69   : > { %18999 = vst [vmem:[#allocation119_spill] sm:$0xff] %v10802_v19  ;;  %v1223_v30 = vmul.f32 %v10722_v35, %v773_v57  ;;  %v1283_v21 = vmul.f32 %v7769_v54, %v10708_v13  ;;  %9145 = vmatprep.subr.bf16.mxu0 %v9144_v55  ;;  %v1155_v60 = vsub.f32 %v1027_v50, %v1091_v0  ;;  %v10817_v38 = vld [vmem:[%s10016_s29 + $0x70] sm:$0xff]  ;;  %v10835_v55 = vld [vmem:[%s10023_s14 + $0x1c8] sm:$0xff] }
  0x6a   : > { %19000 = vst [vmem:[#allocation120_spill] sm:$0xff] %v10808_v52  ;;  %v1159_v47 = vsub.f32 %v1031_v59, %v1095_v23  ;;  %v1287_v14 = vmul.f32 %v7773_v18, %v10711_v36  ;;  %v1029_v31 = vmul.f32 %v771_v44, %v10708_v13  ;;  %v9176_v57 = vpack.c.bf16 %v10808_v52, %v10802_v19  ;;  %v10829_v50 = vld [vmem:[%s10016_s29 + $0xf0] sm:$0xff]  ;;  %v10832_v18 = vld [vmem:[%s10016_s29 + $0xf8] sm:$0xff]  ;;  %v10845_v52 = vld [vmem:[%s10023_s14 + $0x3c8] sm:$0xff]  ;;  %s13078_s29 = scalar_lea.vmem %s17969_s3, %s7870_s20 }
  0x6b   : > { %v10824_v41 = vadd.f32 %v1283_v21, %v1219_v20  ;;  %v1033_v54 = vmul.f32 %v775_v43, %v10711_v36  ;;  %v1093_v59 = vmul.f32 %v7771_v32, %v10719_v45  ;;  %19002 = vst [vmem:[#allocation122_spill] sm:$0xff] %v10835_v55  ;;  %v1097_v11 = vmul.f32 %v7775_v24, %v10722_v35  ;;  %v10842_v20 = vld [vmem:[%s10023_s14 + $0x1e8] sm:$0xff] }
  0x6c   : > { %v10837_v0 = vadd.f32 %v1287_v14, %v1223_v30  ;;  %v9146_v23 = vpack.c.bf16 %v1159_v47, %v1155_v60  ;;  %v1221_v21 = vmul.f32 %v10719_v45, %v771_v44  ;;  %19004 = vst [vmem:[#allocation124_spill] sm:$0xff] %v10842_v20  ;;  %19005 = vst [vmem:[#allocation125_spill] sm:$0xff] %v10845_v52  ;;  %v10848_v19 = vld [vmem:[%s10023_s14 + $0x3e8] sm:$0xff]  ;;  %9177 = vmatprep.subr.bf16.mxu1 %v9176_v57  ;;  %v10856_v44 = vld [vmem:[%s10023_s14 + $0x1d8] sm:$0xff] }
  0x6d   : > { %19001 = vst [vmem:[#allocation121_spill] sm:$0xff] %v10824_v41  ;;  %19006 = vst [vmem:[#allocation126_spill] sm:$0xff] %v10848_v19  ;;  %v10851_v25 = vadd.f32 %v10824_v41, %v1155_v60  ;;  %v1157_v42 = vsub.f32 %v1029_v31, %v1093_v59  ;;  %v1225_v14 = vmul.f32 %v10722_v35, %v775_v43  ;;  %v10859_v45 = vld [vmem:[%s10023_s14 + $0x1f8] sm:$0xff] }
  0x6e   : > { %19003 = vst [vmem:[#allocation123_spill] sm:$0xff] %v10837_v0  ;;  %v1285_v30 = vmul.f32 %v7771_v32, %v10708_v13  ;;  %19008 = vst [vmem:[#allocation128_spill] sm:$0xff] %v10856_v44  ;;  %9147 = vmatpush1.bf16.msra.mxu0 %v9146_v23  ;;  %v10862_v39 = vadd.f32 %v10837_v0, %v1159_v47  ;;  %v1161_v57 = vsub.f32 %v1033_v54, %v1097_v11  ;;  %v10868_v43 = vld [vmem:[%s10023_s14 + $0x3d8] sm:$0xff]  ;;  %v777_v54 = vld [vmem:[%s10023_s14 + $0x1c0] sm:$0xff] }
  0x6f   : > { %19007 = vst [vmem:[#allocation127_spill] sm:$0xff] %v10851_v25  ;;  %19009 = vst [vmem:[#allocation129_spill] sm:$0xff] %v10859_v45  ;;  %v1289_v60 = vmul.f32 %v7775_v24, %v10711_v36  ;;  %v1036_v31 = vmul.f32 %v10835_v55, %v10817_v38  ;;  %v1040_v32 = vmul.f32 %v10842_v20, %v10820_v33  ;;  %v10879_v11 = vld [vmem:[%s10023_s14 + $0x3f8] sm:$0xff]  ;;  %v781_v24 = vld [vmem:[%s10023_s14 + $0x1e0] sm:$0xff] }
  0x70   : > { %19010 = vst [vmem:[#allocation130_spill] sm:$0xff] %v10862_v39  ;;  %19011 = vst [vmem:[#allocation131_spill] sm:$0xff] %v10868_v43  ;;  %v10870_v59 = vadd.f32 %v1285_v30, %v1221_v21  ;;  %v1100_v23 = vmul.f32 %v10845_v52, %v10829_v50  ;;  %v1104_v47 = vmul.f32 %v10848_v19, %v10832_v18  ;;  %v7777_v20 = vld [vmem:[%s10023_s14 + $0x3c0] sm:$0xff] }
  0x71   : > { %19013 = vst [vmem:[#allocation133_spill] sm:$0xff] %v10879_v11  ;;  %v10883_v39 = vadd.f32 %v1289_v60, %v1225_v14  ;;  %v9178_v25 = vpack.c.bf16 %v1161_v57, %v1157_v42  ;;  %v1038_v21 = vmul.f32 %v10856_v44, %v10817_v38  ;;  %v1042_v30 = vmul.f32 %v10859_v45, %v10820_v33  ;;  %v7781_v52 = vld [vmem:[%s10023_s14 + $0x3e0] sm:$0xff] }
  0x72   : > { %19012 = vst [vmem:[#allocation132_spill] sm:$0xff] %v10870_v59  ;;  %v10892_v19 = vadd.f32 %v10870_v59, %v1157_v42  ;;  %v10894_v55 = vsub.f32 %v1036_v31, %v1100_v23  ;;  %v10896_v0 = vsub.f32 %v1040_v32, %v1104_v47  ;;  %v1102_v14 = vmul.f32 %v10868_v43, %v10829_v50  ;;  %v783_v47 = vld [vmem:[%s10023_s14 + $0x1f0] sm:$0xff] }
  0x73   : > { %19014 = vst [vmem:[#allocation134_spill] sm:$0xff] %v10883_v39  ;;  %9179 = vmatpush1.bf16.msra.mxu1 %v9178_v25  ;;  %v10901_v60 = vadd.f32 %v10883_v39, %v1161_v57  ;;  %v1106_v45 = vmul.f32 %v10879_v11, %v10832_v18  ;;  %v1035_v44 = vmul.f32 %v777_v54, %v10817_v38  ;;  %v7779_v57 = vld [vmem:[%s10023_s14 + $0x3d0] sm:$0xff] }
  0x74   : > { %19015 = vst [vmem:[#allocation135_spill] sm:$0xff] %v10892_v19  ;;  %19016 = vst [vmem:[#allocation136_spill] sm:$0xff] %v10894_v55  ;;  %v1039_v42 = vmul.f32 %v781_v24, %v10820_v33  ;;  %v779_v19 = vld [vmem:[%s10023_s14 + $0x1d0] sm:$0xff]  ;;  %v9148_v31 = vpack.c.bf16 %v10896_v0, %v10894_v55  ;;  %v10910_v32 = vsub.f32 %v1038_v21, %v1102_v14 }
  0x75   : > { %19017 = vst [vmem:[#allocation137_spill] sm:$0xff] %v10896_v0  ;;  %19018 = vst [vmem:[#allocation138_spill] sm:$0xff] %v10901_v60  ;;  %v1099_v23 = vmul.f32 %v7777_v20, %v10829_v50  ;;  %v1103_v25 = vmul.f32 %v7781_v52, %v10832_v18  ;;  %v10916_v60 = vsub.f32 %v1042_v30, %v1106_v45  ;;  %v7783_v59 = vld [vmem:[%s10023_s14 + $0x3f0] sm:$0xff] }
  0x76   : > { %v1227_v11 = vmul.f32 %v10829_v50, %v777_v54  ;;  %v1231_v43 = vmul.f32 %v10832_v18, %v781_v24  ;;  %v1291_v39 = vmul.f32 %v7777_v20, %v10817_v38  ;;  %9149 = vmatprep.subr.bf16.mxu0 %v9148_v31  ;;  %v1295_v21 = vmul.f32 %v7781_v52, %v10820_v33 }
  0x77   : > { %v1163_v41 = vsub.f32 %v1035_v44, %v1099_v23  ;;  %v1167_v0 = vsub.f32 %v1039_v42, %v1103_v25  ;;  %v1037_v14 = vmul.f32 %v779_v19, %v10817_v38  ;;  %v9180_v55 = vpack.c.bf16 %v10916_v60, %v10910_v32 }
  0x78   : > { %v10926_v36 = vadd.f32 %v1291_v39, %v1227_v11  ;;  %v1041_v45 = vmul.f32 %v783_v47, %v10820_v33  ;;  %v1101_v54 = vmul.f32 %v7779_v57, %v10829_v50  ;;  %v10930_v24 = vadd.f32 %v1295_v21, %v1231_v43 }
  0x79   : > { %v9150_v20 = vpack.c.bf16 %v1167_v0, %v1163_v41  ;;  %v1105_v30 = vmul.f32 %v7783_v59, %v10832_v18  ;;  %v1229_v44 = vmul.f32 %v10829_v50, %v779_v19  ;;  %9181 = vmatprep.subr.bf16.mxu1 %v9180_v55  ;;  %v1233_v31 = vmul.f32 %v10832_v18, %v783_v47  ;;  %v544_v19 = vld [vmem:[%s17970_s4] sm:$0xff] }
  0x7a   : > { %v10935_v52 = vadd.f32 %v10926_v36, %v1163_v41  ;;  %v1165_v42 = vsub.f32 %v1037_v14, %v1101_v54  ;;  %v1293_v39 = vmul.f32 %v7779_v57, %v10817_v38  ;;  %v10940_v11 = vadd.f32 %v10930_v24, %v1167_v0  ;;  %v19021_v54 = vld [vmem:[#allocation42_spill] sm:$0xff] }
  0x7b   : > { %9151 = vmatpush1.bf16.msra.mxu0 %v9150_v20  ;;  %v1169_v43 = vsub.f32 %v1041_v45, %v1105_v30  ;;  %v1297_v23 = vmul.f32 %v7783_v59, %v10820_v33  ;;  %v9184_v41 = vpack.c.bf16 %v10059_v28, %v10057_v27  ;;  %v9216_v25 = vpack.c.bf16 %v10084_v51, %v10078_v46  ;;  %v19023_v20 = vld [vmem:[#allocation18_spill] sm:$0xff] }
  0x7c   : > { %v10948_v55 = vadd.f32 %v1293_v39, %v1229_v44  ;;  %v9186_v47 = vpack.c.bf16 %v10106_v6, %v10104_v5  ;;  %v9218_v0 = vpack.c.bf16 %v10163_v34, %v10150_v4  ;;  %v1180_v21 = vmul.f32 %v10110_v8, %v10116_v10  ;;  %v19024_v44 = vld [vmem:[#allocation21_spill] sm:$0xff] }
  0x7d   : > { %v10956_v57 = vadd.f32 %v1297_v23, %v1233_v31  ;;  %v9182_v59 = vpack.c.bf16 %v1169_v43, %v1165_v42  ;;  %9185 = vmatprep.subr.bf16.mxu0 %v9184_v41  ;;  %v1184_v27 = vmul.f32 %v10113_v9, %v10122_v15  ;;  %v1244_v46 = vmul.f32 %v10125_v16, %v10096_v61  ;;  %v545_v15 = vld [vmem:[%s17970_s4 + $0x8] sm:$0xff]  ;;  %v19028_v39 = vld [vmem:[#allocation17_spill] sm:$0xff] }
  0x7e   : > { %v10963_v28 = vadd.f32 %v10948_v55, %v1165_v42  ;;  %1428 = vmatmul.mubr.f32.vlgmr.msra.gmra.mrb[0].mxu0 %v544_v19  ;;  %v1248_v51 = vmul.f32 %v10128_v17, %v10099_v62  ;;  %v1182_v5 = vmul.f32 %v10110_v8, %v10139_v3  ;;  %v19019_v10 = vmov 0.0   ;;  %v19020_v3 = vld [vmem:[#allocation9_spill] sm:$0xff] }
  0x7f   : > { %9183 = vmatpush1.bf16.msra.mxu1 %v9182_v59  ;;  %v10972_v6 = vadd.f32 %v10956_v57, %v1169_v43  ;;  %1433 = vmatprep.mubr.f32.mxu0 %v19019_v10  ;;  %v1186_v4 = vmul.f32 %v10113_v9, %v10142_v22  ;;  %v1246_v16 = vmul.f32 %v10148_v29, %v10096_v61  ;;  %v19022_v22 = vld [vmem:[#allocation20_spill] sm:$0xff]  ;;  %v19029_v43 = vld [vmem:[#allocation23_spill] sm:$0xff] }
  0x80   : > { %9217 = vmatprep.subr.bf16.mxu1 %v9216_v25  ;;  %9187 = vmatpush1.bf16.msra.mxu0 %v9186_v47  ;;  %v10982_v17 = vadd.f32 %v1244_v46, %v1180_v21  ;;  %v10984_v8 = vadd.f32 %v1248_v51, %v1184_v27  ;;  %v1250_v34 = vmul.f32 %v19020_v3, %v10099_v62  ;;  %v19025_v62 = vld [vmem:[#allocation19_spill] sm:$0xff]  ;;  %v19031_v47 = vld [vmem:[#allocation25_spill] sm:$0xff]  ;;  %v19032_v21 = vld [vmem:[#allocation26_spill] sm:$0xff] }
  0x81   : > { %v10988_v14 = vadd.f32 %v1246_v16, %v1182_v5  ;;  %v9190_v45 = vpack.c.bf16 %v10362_v48, %v10332_v63  ;;  %v9222_v9 = vpack.c.bf16 %v19021_v54, %v10376_v1  ;;  %v1188_v61 = vmul.f32 %v19023_v20, %v19022_v22  ;;  %v546_v1 = vld [vmem:[%s17970_s4 + $0x10] sm:$0xff]  ;;  %v19026_v48 = vld [vmem:[#allocation16_spill] sm:$0xff]  ;;  %v19027_v63 = vld [vmem:[#allocation22_spill] sm:$0xff] }
  0x82   : > { %1589 = vmatmul.mubr.f32.vlgmr.msra.gmra.mrb[0].mxu1 %v544_v19  ;;  %1434 = vmatmul.mubr.f32.gmra.mrb[2].mxu0 %v545_v15  ;;  %v9188_v29 = vpack.c.bf16 %v10984_v8, %v10982_v17  ;;  %v10998_v30 = vadd.f32 %v1250_v34, %v1186_v4  ;;  %v1192_v42 = vmul.f32 %v19025_v62, %v19024_v44  ;;  %v19030_v19 = vld [vmem:[#allocation24_spill] sm:$0xff]  ;;  %v19033_v5 = vld [vmem:[#allocation27_spill] sm:$0xff]  ;;  %v19034_v16 = vld [vmem:[#allocation53_spill] sm:$0xff] }
  0x83   : > { %1594 = vmatprep.mubr.f32.mxu1 %v19019_v10  ;;  %1439 = vmatprep.mubr.f32.mxu0 %v19019_v10  ;;  %v1252_v31 = vmul.f32 %v19027_v63, %v19026_v48  ;;  %v1256_v23 = vmul.f32 %v19029_v43, %v19028_v39  ;;  %v1190_v41 = vmul.f32 %v19023_v20, %v19030_v19  ;;  %v19036_v22 = vld [vmem:[#allocation34_spill] sm:$0xff]  ;;  %v19041_v63 = vld [vmem:[#allocation37_spill] sm:$0xff] }
  0x84   : > { %9219 = vmatpush1.bf16.msra.mxu1 %v9218_v0  ;;  %9189 = vmatprep.subr.bf16.mxu0 %v9188_v29  ;;  %v9220_v25 = vpack.c.bf16 %v10998_v30, %v10988_v14  ;;  %v1194_v59 = vmul.f32 %v19025_v62, %v19031_v47  ;;  %v1254_v27 = vmul.f32 %v19032_v21, %v19026_v48  ;;  %v19035_v0 = vld [vmem:[#allocation58_spill] sm:$0xff]  ;;  %v19038_v29 = vld [vmem:[#allocation35_spill] sm:$0xff]  ;;  %v19039_v62 = vld [vmem:[#allocation36_spill] sm:$0xff] }
  0x85   : > { %9191 = vmatpush1.bf16.msra.mxu0 %v9190_v45  ;;  %v11019_v46 = vadd.f32 %v1252_v31, %v1188_v61  ;;  %v11021_v51 = vadd.f32 %v1256_v23, %v1192_v42  ;;  %v1258_v4 = vmul.f32 %v19033_v5, %v19028_v39  ;;  %v9194_v3 = vpack.c.bf16 %v19035_v0, %v19034_v16  ;;  %v547_v20 = vld [vmem:[%s17970_s4 + $0x18] sm:$0xff]  ;;  %v19040_v48 = vld [vmem:[#allocation33_spill] sm:$0xff]  ;;  %v19042_v39 = vld [vmem:[#allocation40_spill] sm:$0xff] }
  0x86   : > { %1595 = vmatmul.mubr.f32.gmra.mrb[2].mxu1 %v545_v15  ;;  %1440 = vmatmul.mubr.f32.gmra.mrb[4].mxu0 %v546_v1  ;;  %v11027_v34 = vadd.f32 %v1254_v27, %v1190_v41  ;;  %v9226_v54 = vpack.c.bf16 %v10581_v26, %v10570_v37  ;;  %v1196_v45 = vmul.f32 %v10341_v7, %v19036_v22  ;;  %v19043_v23 = vld [vmem:[#allocation41_spill] sm:$0xff]  ;;  %v19044_v47 = vld [vmem:[#allocation44_spill] sm:$0xff] }
  0x87   : > { %1600 = vmatprep.mubr.f32.mxu1 %v19019_v10  ;;  %1445 = vmatprep.mubr.f32.mxu0 %v19019_v10  ;;  %v9192_v15 = vpack.c.bf16 %v11021_v51, %v11019_v46  ;;  %v11040_v61 = vadd.f32 %v1258_v4, %v1194_v59  ;;  %v1200_v44 = vmul.f32 %v10344_v53, %v19038_v29  ;;  %v19045_v59 = vld [vmem:[#allocation45_spill] sm:$0xff]  ;;  %v19054_v29 = vld [vmem:[#allocation59_spill] sm:$0xff] }
  0x88   : > { %9221 = vmatprep.subr.bf16.mxu1 %v9220_v25  ;;  %v1260_v42 = vmul.f32 %v19039_v62, %v10327_v49  ;;  %v1264_v31 = vmul.f32 %v19041_v63, %v19040_v48  ;;  %v1198_v43 = vmul.f32 %v10341_v7, %v19042_v39  ;;  %v1202_v19 = vmul.f32 %v10344_v53, %v19043_v23  ;;  %v19048_v7 = vld [vmem:[#allocation79_spill] sm:$0xff]  ;;  %v19052_v16 = vld [vmem:[#allocation85_spill] sm:$0xff]  ;;  %v19055_v62 = vld [vmem:[#allocation62_spill] sm:$0xff] }
  0x89   : > { %19037 = vst [vmem:[#allocation9_spill] sm:$0xff] %v11040_v61  ;;  %9223 = vmatpush1.bf16.msra.mxu1 %v9222_v9  ;;  %9193 = vmatprep.subr.bf16.mxu0 %v9192_v15  ;;  %v9224_v41 = vpack.c.bf16 %v11040_v61, %v11027_v34  ;;  %v1262_v25 = vmul.f32 %v19044_v47, %v10327_v49  ;;  %v548_v49 = vld [vmem:[%s17970_s4 + $0x20] sm:$0xff]  ;;  %v19053_v15 = vld [vmem:[#allocation60_spill] sm:$0xff] }
  0x8a   : > { %v1266_v21 = vmul.f32 %v19045_v59, %v19040_v48  ;;  %1601 = vmatmul.mubr.f32.gmra.mrb[4].mxu1 %v546_v1  ;;  %1446 = vmatmul.mubr.f32.gmra.mrb[6].mxu0 %v547_v20  ;;  %v11058_v27 = vadd.f32 %v1260_v42, %v1196_v45  ;;  %v11060_v5 = vadd.f32 %v1264_v31, %v1200_v44  ;;  %v19051_v1 = vld [vmem:[#allocation81_spill] sm:$0xff]  ;;  %v19056_v63 = vld [vmem:[#allocation56_spill] sm:$0xff]  ;;  %v19057_v31 = vld [vmem:[#allocation63_spill] sm:$0xff] }
  0x8b   : > { %v9198_v53 = vpack.c.bf16 %v10610_v58, %v19048_v7  ;;  %1606 = vmatprep.mubr.f32.mxu1 %v19019_v10  ;;  %1451 = vmatprep.mubr.f32.mxu0 %v19019_v10  ;;  %v11069_v9 = vadd.f32 %v1262_v25, %v1198_v43  ;;  %v9230_v22 = vpack.c.bf16 %v19052_v16, %v19051_v1  ;;  %v19058_v43 = vld [vmem:[#allocation57_spill] sm:$0xff]  ;;  %v19059_v23 = vld [vmem:[#allocation64_spill] sm:$0xff]  ;;  %v19061_v47 = vld [vmem:[#allocation67_spill] sm:$0xff] }
  0x8c   : > { %19046 = vst [vmem:[#allocation42_spill] sm:$0xff] %v11058_v27  ;;  %19047 = vst [vmem:[#allocation20_spill] sm:$0xff] %v11060_v5  ;;  %v11071_v4 = vadd.f32 %v1266_v21, %v1202_v19  ;;  %9225 = vmatprep.subr.bf16.mxu1 %v9224_v41  ;;  %9195 = vmatpush1.bf16.msra.mxu0 %v9194_v3  ;;  %v9196_v45 = vpack.c.bf16 %v11060_v5, %v11058_v27  ;;  %v19060_v3 = vld [vmem:[#allocation66_spill] sm:$0xff]  ;;  %v19062_v59 = vld [vmem:[#allocation69_spill] sm:$0xff] }
  0x8d   : > { %19049 = vst [vmem:[#allocation18_spill] sm:$0xff] %v11069_v9  ;;  %v1204_v44 = vmul.f32 %v19054_v29, %v19053_v15  ;;  %v1208_v42 = vmul.f32 %v10478_v56, %v19055_v62  ;;  %9227 = vmatpush1.bf16.msra.mxu1 %v9226_v54  ;;  %v1268_v39 = vmul.f32 %v19057_v31, %v19056_v63  ;;  %v19063_v21 = vld [vmem:[#allocation70_spill] sm:$0xff]  ;;  %v549_v62 = vld [vmem:[%s17970_s4 + $0x28] sm:$0xff]  ;;  %v19099_v27 = vld [vmem:[#allocation121_spill] sm:$0xff] }
  0x8e   : > { %19050 = vst [vmem:[#allocation21_spill] sm:$0xff] %v11071_v4  ;;  %v9228_v48 = vpack.c.bf16 %v11071_v4, %v11069_v9  ;;  %v1272_v19 = vmul.f32 %v19059_v23, %v19058_v43  ;;  %v1206_v41 = vmul.f32 %v19054_v29, %v19060_v3  ;;  %1607 = vmatmul.mubr.f32.gmra.mrb[6].mxu1 %v547_v20  ;;  %v19066_v31 = vld [vmem:[#allocation92_spill] sm:$0xff]  ;;  %v19070_v3 = vld [vmem:[#allocation97_spill] sm:$0xff]  ;;  %v19100_v61 = vld [vmem:[#allocation123_spill] sm:$0xff] }
  0x8f   : > { %1452 = vmatmul.mubr.f32.gmra.mrb[8].mxu0 %v548_v49  ;;  %v1210_v25 = vmul.f32 %v10478_v56, %v19061_v47  ;;  %v1270_v54 = vmul.f32 %v19062_v59, %v19056_v63  ;;  %v1274_v15 = vmul.f32 %v19063_v21, %v19058_v43  ;;  %1612 = vmatprep.mubr.f32.mxu1 %v19019_v10  ;;  %v19067_v56 = vld [vmem:[#allocation95_spill] sm:$0xff]  ;;  %v550_v21 = vld [vmem:[%s17970_s4 + $0x30] sm:$0xff] }
  0x90   : > { %1457 = vmatprep.mubr.f32.mxu0 %v19019_v10  ;;  %v11100_v29 = vadd.f32 %v1268_v39, %v1204_v44  ;;  %v11102_v20 = vadd.f32 %v1272_v19, %v1208_v42  ;;  %v9202_v23 = vpack.c.bf16 %v19067_v56, %v19066_v31  ;;  %9197 = vmatprep.subr.bf16.mxu0 %v9196_v45  ;;  %v19071_v39 = vld [vmem:[#allocation80_spill] sm:$0xff]  ;;  %v19072_v19 = vld [vmem:[#allocation82_spill] sm:$0xff] }
  0x91   : > { %9229 = vmatprep.subr.bf16.mxu1 %v9228_v48  ;;  %v11106_v63 = vadd.f32 %v1270_v54, %v1206_v41  ;;  %v11108_v43 = vadd.f32 %v1274_v15, %v1210_v25  ;;  %v9234_v47 = vpack.c.bf16 %v10741_v2, %v19070_v3  ;;  %9199 = vmatpush1.bf16.msra.mxu0 %v9198_v53  ;;  %v19073_v48 = vld [vmem:[#allocation77_spill] sm:$0xff]  ;;  %v19074_v41 = vld [vmem:[#allocation83_spill] sm:$0xff]  ;;  %v19075_v54 = vld [vmem:[#allocation78_spill] sm:$0xff] }
  0x92   : > { %19064 = vst [vmem:[#allocation19_spill] sm:$0xff] %v11100_v29  ;;  %19065 = vst [vmem:[#allocation16_spill] sm:$0xff] %v11102_v20  ;;  %9231 = vmatpush1.bf16.msra.mxu1 %v9230_v22  ;;  %v9200_v44 = vpack.c.bf16 %v11102_v20, %v11100_v29  ;;  %v1212_v42 = vmul.f32 %v10602_v12, %v19071_v39  ;;  %v1216_v59 = vmul.f32 %v10605_v40, %v19072_v19  ;;  %v19076_v53 = vld [vmem:[#allocation84_spill] sm:$0xff]  ;;  %v19077_v15 = vld [vmem:[#allocation87_spill] sm:$0xff] }
  0x93   : > { %19068 = vst [vmem:[#allocation22_spill] sm:$0xff] %v11106_v63  ;;  %19069 = vst [vmem:[#allocation17_spill] sm:$0xff] %v11108_v43  ;;  %1613 = vmatmul.mubr.f32.gmra.mrb[8].mxu1 %v548_v49  ;;  %1458 = vmatmul.mubr.f32.gmra.mrb[10].mxu0 %v549_v62  ;;  %v9232_v45 = vpack.c.bf16 %v11108_v43, %v11106_v63  ;;  %v1276_v25 = vmul.f32 %v19074_v41, %v19073_v48  ;;  %v19078_v39 = vld [vmem:[#allocation88_spill] sm:$0xff]  ;;  %v19079_v43 = vld [vmem:[#allocation90_spill] sm:$0xff] }
  0x94   : > { %v1280_v22 = vmul.f32 %v19076_v53, %v19075_v54  ;;  %1618 = vmatprep.mubr.f32.mxu1 %v19019_v10  ;;  %1463 = vmatprep.mubr.f32.mxu0 %v19019_v10  ;;  %v1214_v49 = vmul.f32 %v10602_v12, %v19077_v15  ;;  %v1218_v19 = vmul.f32 %v10605_v40, %v19078_v39  ;;  %v19082_v20 = vld [vmem:[#allocation91_spill] sm:$0xff]  ;;  %v19084_v12 = vld [vmem:[#allocation112_spill] sm:$0xff]  ;;  %v19085_v15 = vld [vmem:[#allocation114_spill] sm:$0xff] }
  0x95   : > { %v1278_v41 = vmul.f32 %v19079_v43, %v19073_v48  ;;  %9201 = vmatprep.subr.bf16.mxu0 %v9200_v44  ;;  %9233 = vmatprep.subr.bf16.mxu1 %v9232_v45  ;;  %v11135_v53 = vadd.f32 %v1276_v25, %v1212_v42  ;;  %v1282_v29 = vmul.f32 %v19082_v20, %v19075_v54  ;;  %v19086_v40 = vld [vmem:[#allocation115_spill] sm:$0xff]  ;;  %v19087_v39 = vld [vmem:[#allocation118_spill] sm:$0xff]  ;;  %v19092_v45 = vld [vmem:[#allocation105_spill] sm:$0xff] }
  0x96   : > { %v11137_v63 = vadd.f32 %v1280_v22, %v1216_v59  ;;  %9203 = vmatpush1.bf16.msra.mxu0 %v9202_v23  ;;  %9235 = vmatpush1.bf16.msra.mxu1 %v9234_v47  ;;  %v9206_v9 = vpack.c.bf16 %v19085_v15, %v19084_v12  ;;  %v9238_v5 = vpack.c.bf16 %v19087_v39, %v19086_v40  ;;  %v19089_v42 = vld [vmem:[#allocation103_spill] sm:$0xff]  ;;  %v19090_v59 = vld [vmem:[#allocation102_spill] sm:$0xff]  ;;  %v19091_v47 = vld [vmem:[#allocation104_spill] sm:$0xff] }
  0x97   : > { %19080 = vst [vmem:[#allocation23_spill] sm:$0xff] %v11135_v53  ;;  %v11141_v4 = vadd.f32 %v1278_v41, %v1214_v49  ;;  %1619 = vmatmul.mubr.f32.gmra.mrb[10].mxu1 %v549_v62  ;;  %1464 = vmatmul.mubr.f32.gmra.mrb[12].mxu0 %v550_v21  ;;  %v11149_v44 = vadd.f32 %v1282_v29, %v1218_v19  ;;  %v551_v23 = vld [vmem:[%s17970_s4 + $0x38] sm:$0xff]  ;;  %v19093_v25 = vld [vmem:[#allocation101_spill] sm:$0xff]  ;;  %v19095_v49 = vld [vmem:[#allocation108_spill] sm:$0xff] }
  0x98   : > { %19081 = vst [vmem:[#allocation24_spill] sm:$0xff] %v11137_v63  ;;  %v9204_v43 = vpack.c.bf16 %v11137_v63, %v11135_v53  ;;  %v1220_v20 = vmul.f32 %v19090_v59, %v19089_v42  ;;  %1624 = vmatprep.mubr.f32.mxu1 %v19019_v10  ;;  %1469 = vmatprep.mubr.f32.mxu0 %v19019_v10  ;;  %v19094_v29 = vld [vmem:[#allocation106_spill] sm:$0xff]  ;;  %v19096_v41 = vld [vmem:[#allocation109_spill] sm:$0xff]  ;;  %v19097_v63 = vld [vmem:[#allocation111_spill] sm:$0xff] }
  0x99   : > { %19083 = vst [vmem:[#allocation25_spill] sm:$0xff] %v11141_v4  ;;  %19088 = vst [vmem:[#allocation26_spill] sm:$0xff] %v11149_v44  ;;  %v1224_v62 = vmul.f32 %v10722_v35, %v19091_v47  ;;  %v1284_v48 = vmul.f32 %v19092_v45, %v10708_v13  ;;  %v1288_v54 = vmul.f32 %v19094_v29, %v19093_v25  ;;  %v19098_v29 = vld [vmem:[#allocation113_spill] sm:$0xff] }
  0x9a   : > { %9205 = vmatprep.subr.bf16.mxu0 %v9204_v43  ;;  %v9236_v22 = vpack.c.bf16 %v11149_v44, %v11141_v4  ;;  %v1222_v19 = vmul.f32 %v19090_v59, %v19095_v49  ;;  %v1226_v42 = vmul.f32 %v10722_v35, %v19096_v41  ;;  %v1286_v53 = vmul.f32 %v19097_v63, %v10708_v13  ;;  %v19101_v49 = vld [vmem:[#allocation132_spill] sm:$0xff]  ;;  %v19102_v35 = vld [vmem:[#allocation134_spill] sm:$0xff] }
  0x9b   : > { %9207 = vmatpush1.bf16.msra.mxu0 %v9206_v9  ;;  %v11172_v47 = vadd.f32 %v1284_v48, %v1220_v20  ;;  %v11174_v45 = vadd.f32 %v1288_v54, %v1224_v62  ;;  %v1290_v43 = vmul.f32 %v19098_v29, %v19093_v25  ;;  %v9210_v44 = vpack.c.bf16 %v19100_v61, %v19099_v27  ;;  %v19103_v4 = vld [vmem:[#allocation122_spill] sm:$0xff]  ;;  %v552_v9 = vld [vmem:[%s17970_s4 + $0x40] sm:$0xff]  ;;  %v19104_v63 = vld [vmem:[#allocation124_spill] sm:$0xff] }
  0x9c   : > { %1625 = vmatmul.mubr.f32.gmra.mrb[12].mxu1 %v550_v21  ;;  %1470 = vmatmul.mubr.f32.gmra.mrb[14].mxu0 %v551_v23  ;;  %v11180_v59 = vadd.f32 %v1286_v53, %v1222_v19  ;;  %v9242_v41 = vpack.c.bf16 %v19102_v35, %v19101_v49  ;;  %v1228_v13 = vmul.f32 %v10829_v50, %v19103_v4  ;;  %v19105_v53 = vld [vmem:[#allocation125_spill] sm:$0xff]  ;;  %v19106_v20 = vld [vmem:[#allocation126_spill] sm:$0xff]  ;;  %v19107_v48 = vld [vmem:[#allocation128_spill] sm:$0xff] }
  0x9d   : > { %1630 = vmatprep.mubr.f32.mxu1 %v19019_v10  ;;  %1475 = vmatprep.mubr.f32.mxu0 %v19019_v10  ;;  %v9208_v61 = vpack.c.bf16 %v11174_v45, %v11172_v47  ;;  %v11193_v27 = vadd.f32 %v1290_v43, %v1226_v42  ;;  %v1232_v21 = vmul.f32 %v10832_v18, %v19104_v63  ;;  %v19108_v54 = vld [vmem:[#allocation129_spill] sm:$0xff]  ;;  %v19109_v29 = vld [vmem:[#allocation131_spill] sm:$0xff]  ;;  %v19111_v35 = vld [vmem:[#allocation32_spill] sm:$0xff] }
  0x9e   : > { %9237 = vmatprep.subr.bf16.mxu1 %v9236_v22  ;;  %v1292_v4 = vmul.f32 %v19105_v53, %v10817_v38  ;;  %v1296_v62 = vmul.f32 %v19106_v20, %v10820_v33  ;;  %v1230_v25 = vmul.f32 %v10829_v50, %v19107_v48  ;;  %v1234_v19 = vmul.f32 %v10832_v18, %v19108_v54  ;;  %v19110_v43 = vld [vmem:[#allocation133_spill] sm:$0xff] }
  0x9f   : > { %9239 = vmatpush1.bf16.msra.mxu1 %v9238_v5  ;;  %9209 = vmatprep.subr.bf16.mxu0 %v9208_v61  ;;  %v9240_v42 = vpack.c.bf16 %v11193_v27, %v11180_v59  ;;  %v1294_v22 = vmul.f32 %v19109_v29, %v10817_v38  ;;  %v1298_v49 = vmul.f32 %v19110_v43, %v10820_v33  ;;  %v553_v38 = vld [vmem:[%s17970_s4 + $0x48] sm:$0xff]  ;;  %v19114_v53 = vld [vmem:[#allocation5_spill] sm:$0xff] }
  0xa0   : > { %v11213_v63 = vadd.f32 %v19035_v0, %v19111_v35  ;;  %1631 = vmatmul.mubr.f32.gmra.mrb[14].mxu1 %v551_v23  ;;  %1476 = vmatmul.mubr.f32.gmra.mrb[16].mxu0 %v552_v9  ;;  %v11215_v50 = vadd.f32 %v1292_v4, %v1228_v13  ;;  %v11217_v18 = vadd.f32 %v1296_v62, %v1232_v21  ;;  %v19112_v13 = vld [vmem:[#allocation3_spill] sm:$0xff]  ;;  %v19113_v61 = vld [vmem:[#allocation4_spill] sm:$0xff]  ;;  %v19115_v4 = vld [vmem:[#allocation6_spill] sm:$0xff] }
  0xa1   : > { %1636 = vmatprep.mubr.f32.mxu1 %v19019_v10  ;;  %1481 = vmatprep.mubr.f32.mxu0 %v19019_v10  ;;  %v11224_v5 = vadd.f32 %v1294_v22, %v1230_v25  ;;  %v11226_v33 = vadd.f32 %v1298_v49, %v1234_v19  ;;  %v9214_v0 = vpack.c.bf16 %v10930_v24, %v10926_v36  ;;  %v19116_v25 = vld [vmem:[#allocation7_spill] sm:$0xff]  ;;  %v19117_v36 = vld [vmem:[#allocation8_spill] sm:$0xff]  ;;  %v19119_v54 = vld [vmem:[#allocation13_spill] sm:$0xff] }
  0xa2   : > { %9241 = vmatprep.subr.bf16.mxu1 %v9240_v42  ;;  %9211 = vmatpush1.bf16.msra.mxu0 %v9210_v44  ;;  %v9212_v23 = vpack.c.bf16 %v11217_v18, %v11215_v50  ;;  %v9248_v21 = vpack.c.bf16 %v19113_v61, %v19112_v13  ;;  %v9280_v20 = vpack.c.bf16 %v19115_v4, %v19114_v53  ;;  %v19118_v44 = vld [vmem:[#allocation10_spill] sm:$0xff]  ;;  %v19120_v42 = vld [vmem:[#allocation39_spill] sm:$0xff] }
  0xa3   : > { %9243 = vmatpush1.bf16.msra.mxu1 %v9242_v41  ;;  %v9244_v62 = vpack.c.bf16 %v11226_v33, %v11224_v5  ;;  %v9246_v48 = vpack.c.bf16 %v10956_v57, %v10948_v55  ;;  %v9250_v24 = vpack.c.bf16 %v19117_v36, %v19116_v25  ;;  %v11246_v29 = vadd.f32 %v10570_v37, %v19120_v42  ;;  %v19121_v22 = vld [vmem:[#allocation43_spill] sm:$0xff]  ;;  %v19122_v41 = vld [vmem:[#allocation54_spill] sm:$0xff]  ;;  %v554_v55 = vld [vmem:[%s17970_s4 + $0x50] sm:$0xff] }
  0xa4   : > { %v11250_v43 = vadd.f32 %v10581_v26, %v19121_v22  ;;  %1637 = vmatmul.mubr.f32.gmra.mrb[16].mxu1 %v552_v9  ;;  %1482 = vmatmul.mubr.f32.gmra.mrb[18].mxu0 %v553_v38  ;;  %v11254_v49 = vadd.f32 %v19048_v7, %v19122_v41  ;;  %v19123_v37 = vld [vmem:[#allocation38_spill] sm:$0xff]  ;;  %v19124_v57 = vld [vmem:[#allocation49_spill] sm:$0xff]  ;;  %v19126_v26 = vld [vmem:[#allocation51_spill] sm:$0xff]  ;;  %v19158_v25 = vpack.c.bf16 %v19119_v54, %v19118_v44 }
  0xa5   : > { %1642 = vmatprep.mubr.f32.mxu1 %v19019_v10  ;;  %1487 = vmatprep.mubr.f32.mxu0 %v19019_v10  ;;  %v19125_v13 = vld [vmem:[#allocation50_spill] sm:$0xff]  ;;  %v19127_v9 = vld [vmem:[#allocation55_spill] sm:$0xff]  ;;  %v19128_v7 = vld [vmem:[#allocation65_spill] sm:$0xff]  ;;  %v19159_v36 = vpack.c.bf16 %v19124_v57, %v19123_v37 }
  0xa6   : > { %v11267_v53 = vadd.f32 %v10610_v58, %v19127_v9  ;;  %v11271_v4 = vadd.f32 %v19051_v1, %v19128_v7  ;;  %v19129_v42 = vld [vmem:[#allocation68_spill] sm:$0xff]  ;;  %9213 = vmatprep.subr.bf16.mxu0 %v9212_v23  ;;  %9245 = vmatprep.subr.bf16.mxu1 %v9244_v62  ;;  %v19130_v41 = vld [vmem:[#allocation61_spill] sm:$0xff]  ;;  %v19131_v61 = vld [vmem:[#allocation75_spill] sm:$0xff]  ;;  %v19168_v57 = vpack.c.bf16 %v19126_v26, %v19125_v13 }
  0xa7   : > { %v11275_v22 = vadd.f32 %v19052_v16, %v19129_v42  ;;  %9215 = vmatpush1.bf16.msra.mxu0 %v9214_v0  ;;  %9247 = vmatpush1.bf16.msra.mxu1 %v9246_v48  ;;  %v9258_v35 = vpack.c.bf16 %v11213_v63, %v19130_v41  ;;  %v11281_v19 = vadd.f32 %v19066_v31, %v19131_v61  ;;  %v19132_v58 = vld [vmem:[#allocation76_spill] sm:$0xff]  ;;  %v19133_v16 = vld [vmem:[#allocation86_spill] sm:$0xff]  ;;  %v19134_v23 = vld [vmem:[#allocation89_spill] sm:$0xff] }
  0xa8   : > { %v11285_v9 = vadd.f32 %v19067_v56, %v19132_v58  ;;  %1643 = vmatmul.mubr.f32.gmra.mrb[18].mxu1 %v553_v38  ;;  %1488 = vmatmul.mubr.f32.gmra.mrb[20].mxu0 %v554_v55  ;;  %v11291_v0 = vadd.f32 %v19070_v3, %v19133_v16  ;;  %v11295_v62 = vadd.f32 %v10741_v2, %v19134_v23  ;;  %v555_v31 = vld [vmem:[%s17970_s4 + $0x58] sm:$0xff]  ;;  %v19135_v38 = vld [vmem:[#allocation99_spill] sm:$0xff]  ;;  %v19136_v48 = vld [vmem:[#allocation100_spill] sm:$0xff] }
  0xa9   : > { %1648 = vmatprep.mubr.f32.mxu1 %v19019_v10  ;;  %1493 = vmatprep.mubr.f32.mxu0 %v19019_v10  ;;  %v11308_v2 = vadd.f32 %v19084_v12, %v19135_v38  ;;  %v11312_v61 = vadd.f32 %v19085_v15, %v19136_v48  ;;  %v19137_v7 = vld [vmem:[#allocation107_spill] sm:$0xff]  ;;  %v19140_v23 = vld [vmem:[#allocation130_spill] sm:$0xff]  ;;  %v11354_v58 = vadd.f32 %v11224_v5, %v10910_v32  ;;  %v19157_v56 = vld [vmem:[#allocation20_spill] sm:$0xff] }
  0xaa   : > { %9249 = vmatprep.subr.bf16.mxu0 %v9248_v21  ;;  %9281 = vmatprep.subr.bf16.mxu1 %v9280_v20  ;;  %v11316_v42 = vadd.f32 %v19086_v40, %v19137_v7  ;;  %v19138_v21 = vld [vmem:[#allocation110_spill] sm:$0xff]  ;;  %v556_v12 = vld [vmem:[%s17970_s4 + $0x60] sm:$0xff]  ;;  %v19143_v40 = vld [vmem:[#allocation136_spill] sm:$0xff]  ;;  %v11358_v3 = vadd.f32 %v11226_v33, %v10916_v60  ;;  %v19178_v41 = vpack.c.bf16 %v11267_v53, %v11254_v49 }
  0xab   : > { %v11320_v20 = vadd.f32 %v19087_v39, %v19138_v21  ;;  %v19139_v16 = vld [vmem:[#allocation127_spill] sm:$0xff]  ;;  %v19142_v7 = vld [vmem:[#allocation138_spill] sm:$0xff]  ;;  %v11346_v15 = vadd.f32 %v11215_v50, %v19143_v40  ;;  %v558_v60 = vld [vmem:[%s17970_s4 + $0x70] sm:$0xff]  ;;  %v19185_v49 = vpack.c.bf16 %v11275_v22, %v11271_v4  ;;  %v19189_v4 = vpack.c.bf16 %v11295_v62, %v11291_v0 }
  0xac   : > { %1649 = vmatmul.mubr.f32.gmra.mrb[20].mxu1 %v554_v55  ;;  %1494 = vmatmul.mubr.f32.gmra.mrb[22].mxu0 %v555_v31  ;;  %v557_v55 = vld [vmem:[%s17970_s4 + $0x68] sm:$0xff]  ;;  %v19141_v48 = vld [vmem:[#allocation135_spill] sm:$0xff]  ;;  %v563_v37 = vld [vmem:[%s17971_s5 + $0x18] sm:$0xff]  ;;  %v19192_v0 = vpack.c.bf16 %v19140_v23, %v19139_v16 }
  0xad   : > { %1654 = vmatprep.mubr.f32.mxu1 %v19019_v10  ;;  %1499 = vmatprep.mubr.f32.mxu0 %v19019_v10  ;;  %v19145_v5 = vld [vmem:[#allocation11_spill] sm:$0xff]  ;;  %v19167_v44 = vld [vmem:[#allocation16_spill] sm:$0xff]  ;;  %v567_v22 = vld [vmem:[%s17971_s5 + $0x38] sm:$0xff] }
  0xae   : > { %v2016_v33 = vadd.f32 %v10982_v17, %v19145_v5  ;;  %v19148_v38 = vld [vmem:[#allocation15_spill] sm:$0xff]  ;;  %v19149_v5 = vld [vmem:[#allocation28_spill] sm:$0xff]  ;;  %v575_v23 = vld [vmem:[%s17971_s5 + $0x78] sm:$0xff] }
  0xaf   : > { %v2022_v17 = vadd.f32 %v10998_v30, %v19148_v38  ;;  %v19151_v30 = vld [vmem:[#allocation30_spill] sm:$0xff]  ;;  %v19152_v38 = vld [vmem:[#allocation31_spill] sm:$0xff]  ;;  %v19176_v13 = vld [vmem:[#allocation24_spill] sm:$0xff] }
  0xb0   : > { %1655 = vmatmul.mubr.f32.gmra.mrb[22].mxu1 %v555_v31  ;;  %1500 = vmatmul.mubr.f32.gmra.mrb[24].mxu0 %v556_v12  ;;  %v19144_v31 = vld [vmem:[#allocation137_spill] sm:$0xff]  ;;  %v19156_v50 = vld [vmem:[#allocation47_spill] sm:$0xff]  ;;  %v609_v16 = vld [vmem:[%s17974_s8 + $0x8] sm:$0xff] }
  0xb1   : > { %1660 = vmatprep.mubr.f32.mxu1 %v19019_v10  ;;  %1505 = vmatprep.mubr.f32.mxu0 %v19019_v10  ;;  %v11350_v39 = vadd.f32 %v11217_v18, %v19144_v31  ;;  %v559_v18 = vld [vmem:[%s17970_s4 + $0x78] sm:$0xff]  ;;  %v2036_v1 = vadd.f32 %v19157_v56, %v19156_v50  ;;  %v19160_v56 = vld [vmem:[#allocation48_spill] sm:$0xff]  ;;  %v564_v63 = vld [vmem:[%s17971_s5 + $0x20] sm:$0xff] }
  0xb2   : > { %v19147_v31 = vld [vmem:[#allocation14_spill] sm:$0xff] }
  0xb3   : > { %v2018_v21 = vadd.f32 %v10988_v14, %v19147_v31  ;;  %v561_v14 = vld [vmem:[%s17971_s5 + $0x8] sm:$0xff]  ;;  %v19154_v31 = vld [vmem:[#allocation46_spill] sm:$0xff]  ;;  %v19193_v62 = vpack.c.bf16 %v11350_v39, %v11346_v15  ;;  %v19197_v39 = vpack.c.bf16 %v10972_v6, %v10963_v28  ;;  %v572_v28 = vld [vmem:[%s17971_s5 + $0x60] sm:$0xff] }
  0xb4   : > { %1661 = vmatmul.mubr.f32.gmra.mrb[24].mxu1 %v556_v12  ;;  %1506 = vmatmul.mubr.f32.gmra.mrb[26].mxu0 %v557_v55  ;;  %v19146_v12 = vld [vmem:[#allocation12_spill] sm:$0xff] }
  0xb5   : > { %1666 = vmatprep.mubr.f32.mxu1 %v19019_v10  ;;  %1511 = vmatprep.mubr.f32.mxu0 %v19019_v10  ;;  %v2020_v40 = vadd.f32 %v10984_v8, %v19146_v12  ;;  %v2024_v8 = vadd.f32 %v11019_v46, %v19149_v5  ;;  %v2026_v46 = vadd.f32 %v11027_v34, %v19151_v30  ;;  %v19155_v5 = vld [vmem:[#allocation42_spill] sm:$0xff]  ;;  %v562_v34 = vld [vmem:[%s17971_s5 + $0x10] sm:$0xff]  ;;  %v19165_v30 = vld [vmem:[#allocation19_spill] sm:$0xff] }
  0xb6   : > { %v569_v15 = vld [vmem:[%s17971_s5 + $0x48] sm:$0xff] }
  0xb7   : > { %v9252_v32 = vpack.c.bf16 %v2020_v40, %v2016_v33  ;;  %v19153_v33 = vld [vmem:[#allocation9_spill] sm:$0xff]  ;;  %v573_v6 = vld [vmem:[%s17971_s5 + $0x68] sm:$0xff] }
  0xb8   : > { %1667 = vmatmul.mubr.f32.gmra.mrb[26].mxu1 %v557_v55  ;;  %1512 = vmatmul.mubr.f32.gmra.mrb[28].mxu0 %v558_v60  ;;  %v560_v55 = vld [vmem:[%s17971_s5] sm:$0xff] }
  0xb9   : > { %1672 = vmatprep.mubr.f32.mxu1 %v19019_v10  ;;  %1517 = vmatprep.mubr.f32.mxu0 %v19019_v10 }
  0xbc   : > { %1673 = vmatmul.mubr.f32.gmra.mrb[28].mxu1 %v558_v60  ;;  %1518 = vmatmul.mubr.f32.gmra.mrb[30].mxu0 %v559_v18  ;;  %v19150_v60 = vld [vmem:[#allocation29_spill] sm:$0xff] }
  0xbd   : > { %1678 = vmatprep.mubr.f32.mxu1 %v19019_v10  ;;  %1749 = vmatprep.mubr.f32.mxu0 %v19019_v10  ;;  %v2028_v12 = vadd.f32 %v11021_v51, %v19150_v60  ;;  %v2030_v51 = vadd.f32 %v19153_v33, %v19152_v38  ;;  %v2032_v60 = vadd.f32 %v19155_v5, %v19154_v31  ;;  %v19166_v33 = vld [vmem:[#allocation72_spill] sm:$0xff] }
  0xbe   : > { %v2044_v54 = vadd.f32 %v19167_v44, %v19166_v33  ;;  %v19187_v33 = vld [vmem:[#allocation119_spill] sm:$0xff] }
  0xbf   : > { %v9256_v40 = vpack.c.bf16 %v2028_v12, %v2024_v8  ;;  %v9260_v8 = vpack.c.bf16 %v2036_v1, %v2032_v60  ;;  %v19164_v12 = vld [vmem:[#allocation71_spill] sm:$0xff]  ;;  %v19173_v60 = vld [vmem:[#allocation93_spill] sm:$0xff]  ;;  %v2058_v44 = vadd.f32 %v11180_v59, %v19187_v33  ;;  %v19190_v59 = vpack.c.bf16 %v11312_v61, %v11308_v2  ;;  %v591_v33 = vld [vmem:[%s17972_s6 + $0x78] sm:$0xff] }
  0xc0   : > { %1679 = vmatmul.mubr.f32.gmra.mrb[30].mxu1 %v559_v18  ;;  %1750 = vmatmul.mubr.f32.vlgmr.msra.gmra.mrb[32].mxu0 %v560_v55  ;;  %v9284_v18 = vpack.c.bf16 %v2022_v17, %v2018_v21  ;;  %v19161_v21 = vld [vmem:[#allocation18_spill] sm:$0xff]  ;;  %v2040_v38 = vadd.f32 %v19165_v30, %v19164_v12  ;;  %v19183_v12 = vld [vmem:[#allocation116_spill] sm:$0xff]  ;;  %v568_v2 = vld [vmem:[%s17971_s5 + $0x40] sm:$0xff]  ;;  %v19194_v61 = vpack.c.bf16 %v19142_v7, %v19141_v48 }
  0xc1   : > { %1910 = vmatprep.mubr.f32.mxu1 %v19019_v10  ;;  %1755 = vmatprep.mubr.f32.mxu0 %v19019_v10  ;;  %v2034_v50 = vadd.f32 %v19161_v21, %v19160_v56  ;;  %v19175_v56 = vld [vmem:[#allocation94_spill] sm:$0xff]  ;;  %v19179_v21 = vld [vmem:[#allocation96_spill] sm:$0xff]  ;;  %v2056_v30 = vadd.f32 %v11172_v47, %v19183_v12  ;;  %v19186_v47 = vpack.c.bf16 %v11285_v9, %v11281_v19  ;;  %v566_v19 = vld [vmem:[%s17971_s5 + $0x30] sm:$0xff] }
  0xc2   : > { %9251 = vmatpush1.bf16.msra.mxu0 %v9250_v24  ;;  %v9288_v24 = vpack.c.bf16 %v2030_v51, %v2026_v46  ;;  %v19169_v46 = vld [vmem:[#allocation73_spill] sm:$0xff]  ;;  %v9264_v5 = vpack.c.bf16 %v2044_v54, %v2040_v38  ;;  %v2052_v26 = vadd.f32 %v19176_v13, %v19175_v56  ;;  %v19188_v54 = vld [vmem:[#allocation120_spill] sm:$0xff]  ;;  %v19191_v9 = vpack.c.bf16 %v11320_v20, %v11316_v42  ;;  %v579_v13 = vld [vmem:[%s17972_s6 + $0x18] sm:$0xff] }
  0xc3   : > { %9253 = vmatprep.subr.bf16.mxu0 %v9252_v32  ;;  %v19162_v32 = vld [vmem:[#allocation52_spill] sm:$0xff]  ;;  %v19184_v38 = vld [vmem:[#allocation117_spill] sm:$0xff]  ;;  %v19195_v42 = vpack.c.bf16 %v10940_v11, %v10935_v52  ;;  %v19196_v20 = vpack.c.bf16 %v11358_v3, %v11354_v58  ;;  %v571_v11 = vld [vmem:[%s17971_s5 + $0x58] sm:$0xff] }
  0xc4   : > { %1911 = vmatmul.mubr.f32.vlgmr.msra.gmra.mrb[32].mxu1 %v560_v55  ;;  %1756 = vmatmul.mubr.f32.gmra.mrb[34].mxu0 %v561_v14  ;;  %v19163_v55 = vld [vmem:[#allocation21_spill] sm:$0xff]  ;;  %v608_v58 = vld [vmem:[%s17974_s8] sm:$0xff]  ;;  %v617_v56 = vld [vmem:[%s17974_s8 + $0x48] sm:$0xff] }
  0xc5   : > { %1916 = vmatprep.mubr.f32.mxu1 %v19019_v10  ;;  %1761 = vmatprep.mubr.f32.mxu0 %v19019_v10  ;;  %v2038_v17 = vadd.f32 %v19163_v55, %v19162_v32  ;;  %v19181_v32 = vld [vmem:[#allocation98_spill] sm:$0xff]  ;;  %v570_v52 = vld [vmem:[%s17971_s5 + $0x50] sm:$0xff]  ;;  %v11566_v48 = vpack.c.bf16 %v609_v16, %v608_v58 }
  0xc6   : > { %9283 = vmatpush1.bf16.msra.mxu1 %v19158_v25  ;;  %9255 = vmatpush1.bf16.msra.mxu0 %v19159_v36  ;;  %v19174_v25 = vld [vmem:[#allocation23_spill] sm:$0xff]  ;;  %v19182_v55 = vld [vmem:[#allocation26_spill] sm:$0xff]  ;;  %v574_v3 = vld [vmem:[%s17971_s5 + $0x70] sm:$0xff] }
  0xc7   : > { %9285 = vmatprep.subr.bf16.mxu1 %v9284_v18  ;;  %9257 = vmatprep.subr.bf16.mxu0 %v9256_v40  ;;  %v9292_v1 = vpack.c.bf16 %v2038_v17, %v2034_v50  ;;  %v19171_v18 = vld [vmem:[#allocation74_spill] sm:$0xff]  ;;  %v19172_v40 = vld [vmem:[#allocation17_spill] sm:$0xff]  ;;  %v2048_v36 = vadd.f32 %v19174_v25, %v19173_v60  ;;  %v2054_v17 = vadd.f32 %v19182_v55, %v19181_v32 }
  0xc8   : > { %1917 = vmatmul.mubr.f32.gmra.mrb[34].mxu1 %v561_v14  ;;  %1762 = vmatmul.mubr.f32.gmra.mrb[36].mxu0 %v562_v34  ;;  %v19170_v14 = vld [vmem:[#allocation22_spill] sm:$0xff]  ;;  %v2046_v31 = vadd.f32 %v19172_v40, %v19171_v18  ;;  %19198 = vst [vmem:[#allocation27_spill] sm:$0xff] %v11566_v48  ;;  %v610_v7 = vld [vmem:[%s17974_s8 + $0x10] sm:$0xff]  ;;  %v577_v18 = vld [vmem:[%s17972_s6 + $0x8] sm:$0xff] }
  0xc9   : > { %1922 = vmatprep.mubr.f32.mxu1 %v19019_v10  ;;  %1767 = vmatprep.mubr.f32.mxu0 %v19019_v10  ;;  %v2042_v51 = vadd.f32 %v19170_v14, %v19169_v46  ;;  %v612_v14 = vld [vmem:[%s17974_s8 + $0x20] sm:$0xff]  ;;  %v578_v60 = vld [vmem:[%s17972_s6 + $0x10] sm:$0xff] }
  0xca   : > { %9287 = vmatpush1.bf16.msra.mxu1 %v19168_v57  ;;  %9259 = vmatpush1.bf16.msra.mxu0 %v9258_v35  ;;  %v19177_v35 = vpack.c.bf16 %v11250_v43, %v11246_v29  ;;  %v2060_v29 = vadd.f32 %v11174_v45, %v19184_v38  ;;  %v565_v43 = vld [vmem:[%s17971_s5 + $0x28] sm:$0xff]  ;;  %v611_v57 = vld [vmem:[%s17974_s8 + $0x18] sm:$0xff]  ;;  %v582_v55 = vld [vmem:[%s17972_s6 + $0x30] sm:$0xff] }
  0xcb   : > { %9289 = vmatprep.subr.bf16.mxu1 %v9288_v24  ;;  %9261 = vmatprep.subr.bf16.mxu0 %v9260_v8  ;;  %v9296_v24 = vpack.c.bf16 %v2046_v31, %v2042_v51  ;;  %v9268_v8 = vpack.c.bf16 %v2052_v26, %v2048_v36  ;;  %v11580_v46 = vpack.c.bf16 %v611_v57, %v610_v7  ;;  %v613_v51 = vld [vmem:[%s17974_s8 + $0x28] sm:$0xff]  ;;  %v614_v31 = vld [vmem:[%s17974_s8 + $0x30] sm:$0xff]  ;;  %v616_v36 = vld [vmem:[%s17974_s8 + $0x40] sm:$0xff] }
  0xcc   : > { %1923 = vmatmul.mubr.f32.gmra.mrb[36].mxu1 %v562_v34  ;;  %1768 = vmatmul.mubr.f32.gmra.mrb[38].mxu0 %v563_v37  ;;  %v19180_v34 = vld [vmem:[#allocation25_spill] sm:$0xff]  ;;  %v9272_v45 = vpack.c.bf16 %v2060_v29, %v2056_v30  ;;  %v11595_v40 = vpack.c.bf16 %v613_v51, %v612_v14  ;;  %v11625_v26 = vpack.c.bf16 %v617_v56, %v616_v36  ;;  %v583_v30 = vld [vmem:[%s17972_s6 + $0x38] sm:$0xff]  ;;  %v584_v38 = vld [vmem:[%s17972_s6 + $0x40] sm:$0xff] }
  0xcd   : > { %1928 = vmatprep.mubr.f32.mxu1 %v19019_v10  ;;  %1773 = vmatprep.mubr.f32.mxu0 %v19019_v10  ;;  %v2050_v50 = vadd.f32 %v19180_v34, %v19179_v21  ;;  %19199 = vst [vmem:[#allocation53_spill] sm:$0xff] %v11580_v46  ;;  %v581_v21 = vld [vmem:[%s17972_s6 + $0x28] sm:$0xff]  ;;  %v620_v34 = vld [vmem:[%s17974_s8 + $0x60] sm:$0xff]  ;;  %v639_v14 = vld [vmem:[%s17975_s9 + $0x78] sm:$0xff] }
  0xce   : > { %9291 = vmatpush1.bf16.msra.mxu1 %v19177_v35  ;;  %9263 = vmatpush1.bf16.msra.mxu0 %v19178_v41  ;;  %19200 = vst [vmem:[#allocation58_spill] sm:$0xff] %v11595_v40  ;;  %19202 = vst [vmem:[#allocation35_spill] sm:$0xff] %v11625_v26  ;;  %v619_v35 = vld [vmem:[%s17974_s8 + $0x58] sm:$0xff]  ;;  %v580_v41 = vld [vmem:[%s17972_s6 + $0x20] sm:$0xff] }
  0xcf   : > { %9293 = vmatprep.subr.bf16.mxu1 %v9292_v1  ;;  %9265 = vmatprep.subr.bf16.mxu0 %v9264_v5  ;;  %v9300_v53 = vpack.c.bf16 %v2054_v17, %v2050_v50  ;;  %v576_v1 = vld [vmem:[%s17972_s6] sm:$0xff]  ;;  %v615_v5 = vld [vmem:[%s17974_s8 + $0x38] sm:$0xff]  ;;  %v621_v50 = vld [vmem:[%s17974_s8 + $0x68] sm:$0xff] }
  0xd0   : > { %1929 = vmatmul.mubr.f32.gmra.mrb[38].mxu1 %v563_v37  ;;  %1774 = vmatmul.mubr.f32.gmra.mrb[40].mxu0 %v564_v63  ;;  %v2062_v37 = vadd.f32 %v11193_v27, %v19188_v54  ;;  %v11610_v25 = vpack.c.bf16 %v615_v5, %v614_v31  ;;  %v11655_v32 = vpack.c.bf16 %v621_v50, %v620_v34  ;;  %v622_v17 = vld [vmem:[%s17974_s8 + $0x70] sm:$0xff]  ;;  %v585_v29 = vld [vmem:[%s17972_s6 + $0x48] sm:$0xff] }
  0xd1   : > { %1934 = vmatprep.mubr.f32.mxu1 %v19019_v10  ;;  %1779 = vmatprep.mubr.f32.mxu0 %v19019_v10  ;;  %v625_v54 = vld [vmem:[%s17975_s9 + $0x8] sm:$0xff] }
  0xd2   : > { %9295 = vmatpush1.bf16.msra.mxu1 %v19185_v49  ;;  %9267 = vmatpush1.bf16.msra.mxu0 %v19186_v47  ;;  %v9304_v27 = vpack.c.bf16 %v2062_v37, %v2058_v44  ;;  %19201 = vst [vmem:[#allocation34_spill] sm:$0xff] %v11610_v25  ;;  %19204 = vst [vmem:[#allocation33_spill] sm:$0xff] %v11655_v32  ;;  %v587_v49 = vld [vmem:[%s17972_s6 + $0x58] sm:$0xff]  ;;  %v588_v47 = vld [vmem:[%s17972_s6 + $0x60] sm:$0xff] }
  0xd3   : > { %9297 = vmatprep.subr.bf16.mxu1 %v9296_v24  ;;  %9269 = vmatprep.subr.bf16.mxu0 %v9268_v8  ;;  %v623_v8 = vld [vmem:[%s17974_s8 + $0x78] sm:$0xff]  ;;  %v624_v44 = vld [vmem:[%s17975_s9] sm:$0xff] }
  0xd4   : > { %1935 = vmatmul.mubr.f32.gmra.mrb[40].mxu1 %v564_v63  ;;  %1780 = vmatmul.mubr.f32.gmra.mrb[42].mxu0 %v565_v43  ;;  %v618_v63 = vld [vmem:[%s17974_s8 + $0x50] sm:$0xff]  ;;  %v11670_v12 = vpack.c.bf16 %v623_v8, %v622_v17  ;;  %v11727_v37 = vpack.c.bf16 %v625_v54, %v624_v44 }
  0xd5   : > { %1940 = vmatprep.mubr.f32.mxu1 %v19019_v10  ;;  %1785 = vmatprep.mubr.f32.mxu0 %v19019_v10  ;;  %v11640_v24 = vpack.c.bf16 %v619_v35, %v618_v63 }
  0xd6   : > { %9299 = vmatpush1.bf16.msra.mxu1 %v19189_v4  ;;  %9271 = vmatpush1.bf16.msra.mxu0 %v19190_v59  ;;  %19205 = vst [vmem:[#allocation37_spill] sm:$0xff] %v11670_v12  ;;  %19206 = vst [vmem:[#allocation40_spill] sm:$0xff] %v11727_v37  ;;  %v627_v4 = vld [vmem:[%s17975_s9 + $0x18] sm:$0xff] }
  0xd7   : > { %9301 = vmatprep.subr.bf16.mxu1 %v9300_v53  ;;  %9273 = vmatprep.subr.bf16.mxu0 %v9272_v45  ;;  %19203 = vst [vmem:[#allocation36_spill] sm:$0xff] %v11640_v24  ;;  %v589_v53 = vld [vmem:[%s17972_s6 + $0x68] sm:$0xff]  ;;  %v590_v45 = vld [vmem:[%s17972_s6 + $0x70] sm:$0xff] }
  0xd8   : > { %1941 = vmatmul.mubr.f32.gmra.mrb[42].mxu1 %v565_v43  ;;  %1786 = vmatmul.mubr.f32.gmra.mrb[44].mxu0 %v566_v19  ;;  %v586_v43 = vld [vmem:[%s17972_s6 + $0x50] sm:$0xff] }
  0xd9   : > { %1946 = vmatprep.mubr.f32.mxu1 %v19019_v10  ;;  %1791 = vmatprep.mubr.f32.mxu0 %v19019_v10 }
  0xda   : > { %9303 = vmatpush1.bf16.msra.mxu1 %v19191_v9  ;;  %9275 = vmatpush1.bf16.msra.mxu0 %v19192_v0  ;;  %v630_v0 = vld [vmem:[%s17975_s9 + $0x30] sm:$0xff] }
  0xdb   : > { %9305 = vmatprep.subr.bf16.mxu1 %v9304_v27  ;;  %9277 = vmatprep.subr.bf16.mxu0 %v19193_v62  ;;  %v628_v27 = vld [vmem:[%s17975_s9 + $0x20] sm:$0xff]  ;;  %v631_v62 = vld [vmem:[%s17975_s9 + $0x38] sm:$0xff] }
  0xdc   : > { %1947 = vmatmul.mubr.f32.gmra.mrb[44].mxu1 %v566_v19  ;;  %1792 = vmatmul.mubr.f32.gmra.mrb[46].mxu0 %v567_v22  ;;  %v626_v19 = vld [vmem:[%s17975_s9 + $0x10] sm:$0xff] }
  0xdd   : > { %1952 = vmatprep.mubr.f32.mxu1 %v19019_v10  ;;  %1797 = vmatprep.mubr.f32.mxu0 %v19019_v10  ;;  %v11737_v59 = vpack.c.bf16 %v627_v4, %v626_v19 }
  0xde   : > { %9307 = vmatpush1.bf16.msra.mxu1 %v19194_v61  ;;  %9279 = vmatpush1.bf16.msra.mxu0 %v19195_v42  ;;  %v632_v61 = vld [vmem:[%s17975_s9 + $0x40] sm:$0xff]  ;;  %v633_v42 = vld [vmem:[%s17975_s9 + $0x48] sm:$0xff] }
  0xdf   : > { %9309 = vmatprep.subr.bf16.mxu1 %v19196_v20  ;;  %9313 = vmatprep.subr.bf16.mxu0 %v11566_v48  ;;  %19207 = vst [vmem:[#allocation41_spill] sm:$0xff] %v11737_v59  ;;  %v11767_v20 = vpack.c.bf16 %v633_v42, %v632_v61 }
  0xe0   : > { %1953 = vmatmul.mubr.f32.gmra.mrb[46].mxu1 %v567_v22  ;;  %1798 = vmatmul.mubr.f32.gmra.mrb[48].mxu0 %v568_v2  ;;  %v629_v22 = vld [vmem:[%s17975_s9 + $0x28] sm:$0xff] }
  0xe1   : > { %1958 = vmatprep.mubr.f32.mxu1 %v19019_v10  ;;  %1803 = vmatprep.mubr.f32.mxu0 %v19019_v10  ;;  %v11747_v9 = vpack.c.bf16 %v629_v22, %v628_v27  ;;  %19210 = vst [vmem:[#allocation79_spill] sm:$0xff] %v11767_v20 }
  0xe2   : > { %9311 = vmatpush1.bf16.msra.mxu1 %v19197_v39  ;;  %v635_v39 = vld [vmem:[%s17975_s9 + $0x58] sm:$0xff] }
  0xe3   : > { %9345 = vmatprep.subr.bf16.mxu1 %v11727_v37  ;;  %19208 = vst [vmem:[#allocation44_spill] sm:$0xff] %v11747_v9 }
  0xe4   : > { %1959 = vmatmul.mubr.f32.gmra.mrb[48].mxu1 %v568_v2  ;;  %1804 = vmatmul.mubr.f32.gmra.mrb[50].mxu0 %v569_v15  ;;  %v11757_v2 = vpack.c.bf16 %v631_v62, %v630_v0 }
  0xe5   : > { %1964 = vmatprep.mubr.f32.mxu1 %v19019_v10  ;;  %1809 = vmatprep.mubr.f32.mxu0 %v19019_v10 }
  0xe6   : > { %19209 = vst [vmem:[#allocation45_spill] sm:$0xff] %v11757_v2 }
  0xe8   : > { %1965 = vmatmul.mubr.f32.gmra.mrb[50].mxu1 %v569_v15  ;;  %1810 = vmatmul.mubr.f32.gmra.mrb[52].mxu0 %v570_v52  ;;  %v634_v15 = vld [vmem:[%s17975_s9 + $0x50] sm:$0xff] }
  0xe9   : > { %1970 = vmatprep.mubr.f32.mxu1 %v19019_v10  ;;  %1815 = vmatprep.mubr.f32.mxu0 %v19019_v10 }
  0xec   : > { %1971 = vmatmul.mubr.f32.gmra.mrb[52].mxu1 %v570_v52  ;;  %1816 = vmatmul.mubr.f32.gmra.mrb[54].mxu0 %v571_v11  ;;  %v11777_v52 = vpack.c.bf16 %v635_v39, %v634_v15 }
  0xed   : > { %1976 = vmatprep.mubr.f32.mxu1 %v19019_v10  ;;  %1821 = vmatprep.mubr.f32.mxu0 %v19019_v10 }
  0xee   : > { %19211 = vst [vmem:[#allocation81_spill] sm:$0xff] %v11777_v52 }
  0xf0   : > { %1977 = vmatmul.mubr.f32.gmra.mrb[54].mxu1 %v571_v11  ;;  %1822 = vmatmul.mubr.f32.gmra.mrb[56].mxu0 %v572_v28 }
  0xf1   : > { %1982 = vmatprep.mubr.f32.mxu1 %v19019_v10  ;;  %1827 = vmatprep.mubr.f32.mxu0 %v19019_v10 }
  0xf4   : > { %1983 = vmatmul.mubr.f32.gmra.mrb[56].mxu1 %v572_v28  ;;  %1828 = vmatmul.mubr.f32.gmra.mrb[58].mxu0 %v573_v6 }
  0xf5   : > { %1988 = vmatprep.mubr.f32.mxu1 %v19019_v10  ;;  %1833 = vmatprep.mubr.f32.mxu0 %v19019_v10 }
  0xf8   : > { %1989 = vmatmul.mubr.f32.gmra.mrb[58].mxu1 %v573_v6  ;;  %1834 = vmatmul.mubr.f32.gmra.mrb[60].mxu0 %v574_v3  ;;  %v636_v6 = vld [vmem:[%s17975_s9 + $0x60] sm:$0xff] }
  0xf9   : > { %1994 = vmatprep.mubr.f32.mxu1 %v19019_v10  ;;  %1839 = vmatprep.mubr.f32.mxu0 %v19019_v10 }
  0xfc   : > { %1995 = vmatmul.mubr.f32.gmra.mrb[60].mxu1 %v574_v3  ;;  %1840 = vmatmul.mubr.f32.gmra.mrb[62].mxu0 %v575_v23  ;;  %v637_v3 = vld [vmem:[%s17975_s9 + $0x68] sm:$0xff] }
  0xfd   : > { %2000 = vmatprep.mubr.f32.mxu1 %v19019_v10  ;;  %2135 = vmatprep.mubr.f32.mxu0 %v19019_v10  ;;  %v11791_v58 = vpack.c.bf16 %v637_v3, %v636_v6 }
  0xff   : > { %19214 = vst [vmem:[#allocation59_spill] sm:$0xff] %v11791_v58 }
 0x100   : > { %2001 = vmatmul.mubr.f32.gmra.mrb[62].mxu1 %v575_v23  ;;  %2136 = vmatmul.mubr.f32.vlgmr.msra.gmra.mrb[64].mxu0 %v576_v1 }
 0x101   : > { %2296 = vmatprep.mubr.f32.mxu1 %v19019_v10  ;;  %2141 = vmatprep.mubr.f32.mxu0 %v19019_v10 }
 0x102   : > { %9315 = vmatpush3.bf16.msra.mxu0 %v11566_v48 }
 0x103   : > { %9317 = vmatprep.subr.bf16.mxu0 %v11580_v46 }
 0x104   : > { %2297 = vmatmul.mubr.f32.vlgmr.msra.gmra.mrb[64].mxu1 %v576_v1  ;;  %2142 = vmatmul.mubr.f32.gmra.mrb[66].mxu0 %v577_v18  ;;  %v638_v1 = vld [vmem:[%s17975_s9 + $0x70] sm:$0xff] }
 0x105   : > { %2302 = vmatprep.mubr.f32.mxu1 %v19019_v10  ;;  %2147 = vmatprep.mubr.f32.mxu0 %v19019_v10  ;;  %v11809_v51 = vpack.c.bf16 %v639_v14, %v638_v1 }
 0x106   : > { %9319 = vmatpush3.bf16.msra.mxu0 %v11580_v46  ;;  %9347 = vmatpush3.bf16.msra.mxu1 %v11727_v37 }
 0x107   : > { %9321 = vmatprep.subr.bf16.mxu0 %v11595_v40  ;;  %9349 = vmatprep.subr.bf16.mxu1 %v11737_v59  ;;  %19216 = vst [vmem:[#allocation56_spill] sm:$0xff] %v11809_v51 }
 0x108   : > { %2303 = vmatmul.mubr.f32.gmra.mrb[66].mxu1 %v577_v18  ;;  %2148 = vmatmul.mubr.f32.gmra.mrb[68].mxu0 %v578_v60 }
 0x109   : > { %2308 = vmatprep.mubr.f32.mxu1 %v19019_v10  ;;  %2153 = vmatprep.mubr.f32.mxu0 %v19019_v10 }
 0x10a   : > { %9323 = vmatpush3.bf16.msra.mxu0 %v11595_v40  ;;  %9351 = vmatpush3.bf16.msra.mxu1 %v11737_v59 }
 0x10b   : > { %9325 = vmatprep.subr.bf16.mxu0 %v11610_v25  ;;  %9353 = vmatprep.subr.bf16.mxu1 %v11747_v9 }
 0x10c   : > { %2309 = vmatmul.mubr.f32.gmra.mrb[68].mxu1 %v578_v60  ;;  %2154 = vmatmul.mubr.f32.gmra.mrb[70].mxu0 %v579_v13 }
 0x10d   : > { %2314 = vmatprep.mubr.f32.mxu1 %v19019_v10  ;;  %2159 = vmatprep.mubr.f32.mxu0 %v19019_v10 }
 0x10e   : > { %9327 = vmatpush3.bf16.msra.mxu0 %v11610_v25  ;;  %9355 = vmatpush3.bf16.msra.mxu1 %v11747_v9 }
 0x10f   : > { %9329 = vmatprep.subr.bf16.mxu0 %v11625_v26  ;;  %9357 = vmatprep.subr.bf16.mxu1 %v11757_v2 }
 0x110   : > { %2315 = vmatmul.mubr.f32.gmra.mrb[70].mxu1 %v579_v13  ;;  %2160 = vmatmul.mubr.f32.gmra.mrb[72].mxu0 %v580_v41 }
 0x111   : > { %2320 = vmatprep.mubr.f32.mxu1 %v19019_v10  ;;  %2165 = vmatprep.mubr.f32.mxu0 %v19019_v10 }
 0x112   : > { %9331 = vmatpush3.bf16.msra.mxu0 %v11625_v26  ;;  %9359 = vmatpush3.bf16.msra.mxu1 %v11757_v2 }
 0x113   : > { %9333 = vmatprep.subr.bf16.mxu0 %v11640_v24  ;;  %9361 = vmatprep.subr.bf16.mxu1 %v11767_v20 }
 0x114   : > { %2321 = vmatmul.mubr.f32.gmra.mrb[72].mxu1 %v580_v41  ;;  %2166 = vmatmul.mubr.f32.gmra.mrb[74].mxu0 %v581_v21 }
 0x115   : > { %2326 = vmatprep.mubr.f32.mxu1 %v19019_v10  ;;  %2171 = vmatprep.mubr.f32.mxu0 %v19019_v10 }
 0x116   : > { %9335 = vmatpush3.bf16.msra.mxu0 %v11640_v24  ;;  %9363 = vmatpush3.bf16.msra.mxu1 %v11767_v20 }
 0x117   : > { %9337 = vmatprep.subr.bf16.mxu0 %v11655_v32  ;;  %9365 = vmatprep.subr.bf16.mxu1 %v11777_v52 }
 0x118   : > { %2327 = vmatmul.mubr.f32.gmra.mrb[74].mxu1 %v581_v21  ;;  %2172 = vmatmul.mubr.f32.gmra.mrb[76].mxu0 %v582_v55 }
 0x119   : > { %2332 = vmatprep.mubr.f32.mxu1 %v19019_v10  ;;  %2177 = vmatprep.mubr.f32.mxu0 %v19019_v10 }
 0x11a   : > { %9339 = vmatpush3.bf16.msra.mxu0 %v11655_v32  ;;  %9367 = vmatpush3.bf16.msra.mxu1 %v11777_v52 }
 0x11b   : > { %9341 = vmatprep.subr.bf16.mxu0 %v11670_v12  ;;  %9369 = vmatprep.subr.bf16.mxu1 %v11791_v58 }
 0x11c   : > { %2333 = vmatmul.mubr.f32.gmra.mrb[76].mxu1 %v582_v55  ;;  %2178 = vmatmul.mubr.f32.gmra.mrb[78].mxu0 %v583_v30 }
 0x11d   : > { %2338 = vmatprep.mubr.f32.mxu1 %v19019_v10  ;;  %2183 = vmatprep.mubr.f32.mxu0 %v19019_v10 }
 0x11e   : > { %9343 = vmatpush3.bf16.msra.mxu0 %v11670_v12  ;;  %9371 = vmatpush3.bf16.msra.mxu1 %v11791_v58 }
 0x11f   : > { %9373 = vmatprep.subr.bf16.mxu1 %v11809_v51 }
 0x120   : > { %2339 = vmatmul.mubr.f32.gmra.mrb[78].mxu1 %v583_v30  ;;  %2184 = vmatmul.mubr.f32.gmra.mrb[80].mxu0 %v584_v38 }
 0x121   : > { %2344 = vmatprep.mubr.f32.mxu1 %v19019_v10  ;;  %2189 = vmatprep.mubr.f32.mxu0 %v19019_v10 }
 0x122   : > { %9375 = vmatpush3.bf16.msra.mxu1 %v11809_v51 }
 0x123   : > { %9409 = vmatprep.subr.bf16.mxu1 %v11566_v48 }
 0x124   : > { %2345 = vmatmul.mubr.f32.gmra.mrb[80].mxu1 %v584_v38  ;;  %2190 = vmatmul.mubr.f32.gmra.mrb[82].mxu0 %v585_v29 }
 0x125   : > { %2350 = vmatprep.mubr.f32.mxu1 %v19019_v10  ;;  %2195 = vmatprep.mubr.f32.mxu0 %v19019_v10 }
 0x128   : > { %2351 = vmatmul.mubr.f32.gmra.mrb[82].mxu1 %v585_v29  ;;  %2196 = vmatmul.mubr.f32.gmra.mrb[84].mxu0 %v586_v43 }
 0x129   : > { %2356 = vmatprep.mubr.f32.mxu1 %v19019_v10  ;;  %2201 = vmatprep.mubr.f32.mxu0 %v19019_v10 }
 0x12c   : > { %2357 = vmatmul.mubr.f32.gmra.mrb[84].mxu1 %v586_v43  ;;  %2202 = vmatmul.mubr.f32.gmra.mrb[86].mxu0 %v587_v49 }
 0x12d   : > { %2362 = vmatprep.mubr.f32.mxu1 %v19019_v10  ;;  %2207 = vmatprep.mubr.f32.mxu0 %v19019_v10 }
 0x130   : > { %2363 = vmatmul.mubr.f32.gmra.mrb[86].mxu1 %v587_v49  ;;  %2208 = vmatmul.mubr.f32.gmra.mrb[88].mxu0 %v588_v47 }
 0x131   : > { %2368 = vmatprep.mubr.f32.mxu1 %v19019_v10  ;;  %2213 = vmatprep.mubr.f32.mxu0 %v19019_v10 }
 0x134   : > { %2369 = vmatmul.mubr.f32.gmra.mrb[88].mxu1 %v588_v47  ;;  %2214 = vmatmul.mubr.f32.gmra.mrb[90].mxu0 %v589_v53 }
 0x135   : > { %2374 = vmatprep.mubr.f32.mxu1 %v19019_v10  ;;  %2219 = vmatprep.mubr.f32.mxu0 %v19019_v10 }
 0x138   : > { %2375 = vmatmul.mubr.f32.gmra.mrb[90].mxu1 %v589_v53  ;;  %2220 = vmatmul.mubr.f32.gmra.mrb[92].mxu0 %v590_v45 }
 0x139   : > { %2380 = vmatprep.mubr.f32.mxu1 %v19019_v10  ;;  %2225 = vmatprep.mubr.f32.mxu0 %v19019_v10 }
 0x13c   : > { %2381 = vmatmul.mubr.f32.gmra.mrb[92].mxu1 %v590_v45  ;;  %2226 = vmatmul.mubr.f32.gmra.mrb[94].mxu0 %v591_v33 }
 0x13d   : > { %2386 = vmatprep.mubr.f32.mxu1 %v19019_v10 }
 0x140   : > { %2387 = vmatmul.mubr.f32.gmra.mrb[94].mxu1 %v591_v33 }
 0x151   : > { %v11779_v11 = vpop.f32.mrb[0].mxu0 }
 0x152   : > { %19212 = vst [vmem:[#allocation85_spill] sm:$0xff] %v11779_v11  ;;  %v11781_v28 = vpop.f32.mrb[1].mxu0 }
 0x153   : > { %19213 = vst [vmem:[#allocation60_spill] sm:$0xff] %v11781_v28 }
 0x155   : > { %v11793_v16 = vpop.f32.mrb[2].mxu0  ;;  %v11795_v23 = vpop.f32.mrb[0].mxu1 }
 0x156   : > { %v11797_v7 = vpop.f32.mrb[3].mxu0  ;;  %v11799_v57 = vpop.f32.mrb[1].mxu1 }
 0x157   : > { %19215 = vst [vmem:[#allocation62_spill] sm:$0xff] %v11797_v7 }
 0x159   : > { %v11811_v18 = vpop.f32.mrb[4].mxu0  ;;  %v11813_v31 = vpop.f32.mrb[2].mxu1 }
 0x15a   : > { %v11815_v5 = vpop.f32.mrb[5].mxu0  ;;  %v11817_v60 = vpop.f32.mrb[3].mxu1 }
 0x15b   : > { %19217 = vst [vmem:[#allocation63_spill] sm:$0xff] %v11815_v5 }
 0x15d   : > { %v11822_v36 = vpop.f32.mrb[6].mxu0  ;;  %v11824_v56 = vpop.f32.mrb[4].mxu1 }
 0x15e   : > { %v11826_v13 = vpop.f32.mrb[7].mxu0  ;;  %v11828_v63 = vpop.f32.mrb[5].mxu1 }
 0x15f   : > { %19218 = vst [vmem:[#allocation57_spill] sm:$0xff] %v11826_v13 }
 0x161   : > { %v11832_v41 = vpop.f32.mrb[6].mxu1 }
 0x162   : > { %v11830_v35 = vpop.f32.mrb[8].mxu0  ;;  %v11836_v34 = vpop.f32.mrb[7].mxu1 }
 0x163   : > { %v11834_v21 = vpop.f32.mrb[9].mxu0 }
 0x164   : > { %19219 = vst [vmem:[#allocation64_spill] sm:$0xff] %v11834_v21 }
 0x166   : > { %v11838_v50 = vpop.f32.mrb[10].mxu0  ;;  %v11840_v55 = vpop.f32.mrb[8].mxu1 }
 0x167   : > { %v11842_v17 = vpop.f32.mrb[11].mxu0  ;;  %v11844_v8 = vpop.f32.mrb[9].mxu1 }
 0x168   : > { %19220 = vst [vmem:[#allocation66_spill] sm:$0xff] %v11842_v17 }
 0x16a   : > { %v11846_v30 = vpop.f32.mrb[12].mxu0  ;;  %v11848_v38 = vpop.f32.mrb[10].mxu1 }
 0x16b   : > { %v11850_v29 = vpop.f32.mrb[13].mxu0  ;;  %v11852_v43 = vpop.f32.mrb[11].mxu1 }
 0x16c   : > { %19221 = vst [vmem:[#allocation67_spill] sm:$0xff] %v11850_v29 }
 0x16f   : > { %v11854_v49 = vpop.f32.mrb[14].mxu0  ;;  %v11856_v47 = vpop.f32.mrb[12].mxu1 }
 0x170   : > { %v11858_v53 = vpop.f32.mrb[15].mxu0  ;;  %v11860_v45 = vpop.f32.mrb[13].mxu1 }
 0x171   : > { %19222 = vst [vmem:[#allocation69_spill] sm:$0xff] %v11858_v53 }
 0x173   : > { %v11862_v33 = vpop.f32.mrb[16].mxu0  ;;  %v11864_v44 = vpop.f32.mrb[14].mxu1 }
 0x174   : > { %v11866_v54 = vpop.f32.mrb[17].mxu0  ;;  %v11868_v19 = vpop.f32.mrb[15].mxu1 }
 0x177   : > { %v11870_v4 = vpop.f32.mrb[18].mxu0  ;;  %v11872_v27 = vpop.f32.mrb[16].mxu1 }
 0x178   : > { %19223 = vst [vmem:[#allocation70_spill] sm:$0xff] %v11870_v4  ;;  %v11874_v22 = vpop.f32.mrb[19].mxu0  ;;  %v11876_v0 = vpop.f32.mrb[17].mxu1 }
 0x17b   : > { %v11878_v62 = vpop.f32.mrb[20].mxu0  ;;  %v11880_v61 = vpop.f32.mrb[18].mxu1 }
 0x17c   : > { %19224 = vst [vmem:[#allocation92_spill] sm:$0xff] %v11878_v62  ;;  %v11882_v42 = vpop.f32.mrb[21].mxu0  ;;  %v11884_v15 = vpop.f32.mrb[19].mxu1 }
 0x17f   : > { %v11886_v39 = vpop.f32.mrb[22].mxu0  ;;  %v11888_v6 = vpop.f32.mrb[20].mxu1 }
 0x180   : > { %19225 = vst [vmem:[#allocation95_spill] sm:$0xff] %v11886_v39  ;;  %19226 = vst [vmem:[#allocation97_spill] sm:$0xff] %v11888_v6  ;;  %v11890_v3 = vpop.f32.mrb[23].mxu0  ;;  %v11892_v1 = vpop.f32.mrb[21].mxu1 }
 0x181   : > { %19227 = vst [vmem:[#allocation80_spill] sm:$0xff] %v11890_v3  ;;  %19228 = vst [vmem:[#allocation82_spill] sm:$0xff] %v11892_v1 }
 0x183   : > { %v11894_v14 = vpop.f32.mrb[24].mxu0  ;;  %v11896_v10 = vpop.f32.mrb[22].mxu1 }
 0x184   : > { %19229 = vst [vmem:[#allocation77_spill] sm:$0xff] %v11894_v14  ;;  %19230 = vst [vmem:[#allocation83_spill] sm:$0xff] %v11896_v10  ;;  %v11898_v51 = vpop.f32.mrb[25].mxu0  ;;  %v11900_v58 = vpop.f32.mrb[23].mxu1 }
 0x185   : > { %19231 = vst [vmem:[#allocation78_spill] sm:$0xff] %v11898_v51  ;;  %19232 = vst [vmem:[#allocation84_spill] sm:$0xff] %v11900_v58 }
 0x187   : > { %v11902_v52 = vpop.f32.mrb[26].mxu0  ;;  %v11904_v20 = vpop.f32.mrb[24].mxu1 }
 0x188   : > { %19233 = vst [vmem:[#allocation87_spill] sm:$0xff] %v11902_v52  ;;  %19234 = vst [vmem:[#allocation88_spill] sm:$0xff] %v11904_v20  ;;  %v11906_v2 = vpop.f32.mrb[27].mxu0  ;;  %v11908_v9 = vpop.f32.mrb[25].mxu1 }
 0x189   : > { %19235 = vst [vmem:[#allocation90_spill] sm:$0xff] %v11906_v2  ;;  %19236 = vst [vmem:[#allocation91_spill] sm:$0xff] %v11908_v9 }
 0x18b   : > { %v11910_v59 = vpop.f32.mrb[28].mxu0  ;;  %v11912_v12 = vpop.f32.mrb[26].mxu1 }
 0x18c   : > { %19237 = vst [vmem:[#allocation112_spill] sm:$0xff] %v11910_v59  ;;  %19238 = vst [vmem:[#allocation114_spill] sm:$0xff] %v11912_v12  ;;  %v11914_v32 = vpop.f32.mrb[29].mxu0  ;;  %v11916_v24 = vpop.f32.mrb[27].mxu1 }
 0x18d   : > { %19239 = vst [vmem:[#allocation115_spill] sm:$0xff] %v11914_v32  ;;  %19240 = vst [vmem:[#allocation118_spill] sm:$0xff] %v11916_v24 }
 0x18f   : > { %v11918_v26 = vpop.f32.mrb[30].mxu0  ;;  %v11920_v25 = vpop.f32.mrb[28].mxu1 }
 0x190   : > { %19241 = vst [vmem:[#allocation103_spill] sm:$0xff] %v11918_v26  ;;  %19242 = vst [vmem:[#allocation102_spill] sm:$0xff] %v11920_v25  ;;  %v11922_v40 = vpop.f32.mrb[31].mxu0  ;;  %v11924_v46 = vpop.f32.mrb[29].mxu1 }
 0x191   : > { %19243 = vst [vmem:[#allocation104_spill] sm:$0xff] %v11922_v40  ;;  %19244 = vst [vmem:[#allocation105_spill] sm:$0xff] %v11924_v46 }
 0x193   : > { %v11926_v48 = vpop.f32.mrb[30].mxu1  ;;  %v11928_v2 = vpop.f32.mrb[32].mxu0 }
 0x194   : > { %19245 = vst [vmem:[#allocation101_spill] sm:$0xff] %v11926_v48  ;;  %19246 = vst [vmem:[#allocation106_spill] sm:$0xff] %v11928_v2  ;;  %v11930_v9 = vpop.f32.mrb[31].mxu1  ;;  %v11932_v59 = vpop.f32.mrb[33].mxu0  ;;  %v11936_v32 = vsub.f32 %v11779_v11, %v11928_v2  ;;  %v640_v48 = vld [vmem:[%s17976_s10] sm:$0xff] }
 0x195   : > { %19247 = vst [vmem:[#allocation108_spill] sm:$0xff] %v11930_v9  ;;  %19248 = vst [vmem:[#allocation109_spill] sm:$0xff] %v11932_v59  ;;  %v11940_v26 = vsub.f32 %v11781_v28, %v11932_v59  ;;  %v641_v9 = vld [vmem:[%s17976_s10 + $0x8] sm:$0xff] }
 0x196   : > { %19249 = vst [vmem:[#allocation111_spill] sm:$0xff] %v11936_v32  ;;  %8384 = vmatprep.mubr.f32.mxu0 %v11936_v32  ;;  %v9376_v2 = vpack.c.bf16 %v641_v9, %v640_v48  ;;  %v642_v48 = vld [vmem:[%s17976_s10 + $0x10] sm:$0xff]  ;;  %v643_v9 = vld [vmem:[%s17976_s10 + $0x18] sm:$0xff] }
 0x197   : > { %19250 = vst [vmem:[#allocation113_spill] sm:$0xff] %v11940_v26  ;;  %v11949_v46 = vpop.f32.mrb[32].mxu1  ;;  %v11951_v40 = vpop.f32.mrb[34].mxu0 }
 0x198   : > { %19251 = vst [vmem:[#allocation121_spill] sm:$0xff] %v11949_v46  ;;  %19252 = vst [vmem:[#allocation123_spill] sm:$0xff] %v11951_v40  ;;  %v11953_v11 = vpop.f32.mrb[33].mxu1  ;;  %v11957_v59 = vsub.f32 %v11793_v16, %v11951_v40  ;;  %v11959_v32 = vpop.f32.mrb[35].mxu0  ;;  %v11963_v28 = vsub.f32 %v11795_v23, %v11949_v46  ;;  %9377 = vmatprep.subr.bf16.mxu0 %v9376_v2 }
 0x199   : > { %19253 = vst [vmem:[#allocation132_spill] sm:$0xff] %v11953_v11  ;;  %19255 = vst [vmem:[#allocation122_spill] sm:$0xff] %v11959_v32  ;;  %v11967_v26 = vsub.f32 %v11797_v7, %v11959_v32  ;;  %v11971_v25 = vsub.f32 %v11799_v57, %v11953_v11  ;;  %v9380_v32 = vpack.c.bf16 %v643_v9, %v642_v48  ;;  %v644_v48 = vld [vmem:[%s17976_s10 + $0x20] sm:$0xff]  ;;  %v645_v9 = vld [vmem:[%s17976_s10 + $0x28] sm:$0xff] }
 0x19a   : > { %19254 = vst [vmem:[#allocation134_spill] sm:$0xff] %v11957_v59  ;;  %19256 = vst [vmem:[#allocation124_spill] sm:$0xff] %v11963_v28  ;;  %8385 = vmatmul.mubr.f32.vlgmr.msra.gmra.mrb[96].mxu0 %v11957_v59 }
 0x19b   : > { %19257 = vst [vmem:[#allocation125_spill] sm:$0xff] %v11971_v25  ;;  %v11980_v28 = vpop.f32.mrb[34].mxu1  ;;  %v11982_v46 = vpop.f32.mrb[36].mxu0  ;;  %9379 = vmatpush3.bf16.msra.mxu0 %v9376_v2 }
 0x19c   : > { %19258 = vst [vmem:[#allocation126_spill] sm:$0xff] %v11980_v28  ;;  %19259 = vst [vmem:[#allocation128_spill] sm:$0xff] %v11982_v46  ;;  %v11984_v40 = vpop.f32.mrb[35].mxu1  ;;  %v11986_v25 = vpop.f32.mrb[37].mxu0  ;;  %v11990_v59 = vsub.f32 %v11811_v18, %v11982_v46  ;;  %v11994_v11 = vsub.f32 %v11813_v31, %v11980_v28  ;;  %9381 = vmatprep.subr.bf16.mxu0 %v9380_v32 }
 0x19d   : > { %19260 = vst [vmem:[#allocation129_spill] sm:$0xff] %v11984_v40  ;;  %19261 = vst [vmem:[#allocation131_spill] sm:$0xff] %v11986_v25  ;;  %v11998_v7 = vsub.f32 %v11815_v5, %v11986_v25  ;;  %v12002_v2 = vsub.f32 %v11817_v60, %v11984_v40  ;;  %v9384_v25 = vpack.c.bf16 %v645_v9, %v644_v48  ;;  %v646_v48 = vld [vmem:[%s17976_s10 + $0x30] sm:$0xff]  ;;  %v647_v9 = vld [vmem:[%s17976_s10 + $0x38] sm:$0xff] }
 0x19e   : > { %19262 = vst [vmem:[#allocation133_spill] sm:$0xff] %v11990_v59  ;;  %19263 = vst [vmem:[#allocation32_spill] sm:$0xff] %v11994_v11  ;;  %8387 = vmatprep.mubr.f32.mxu0 %v11990_v59 }
 0x19f   : > { %19264 = vst [vmem:[#allocation3_spill] sm:$0xff] %v12002_v2  ;;  %v12011_v11 = vpop.f32.mrb[36].mxu1  ;;  %v12013_v28 = vpop.f32.mrb[38].mxu0  ;;  %9383 = vmatpush3.bf16.msra.mxu0 %v9380_v32 }
 0x1a0   : > { %19265 = vst [vmem:[#allocation4_spill] sm:$0xff] %v12011_v11  ;;  %19266 = vst [vmem:[#allocation5_spill] sm:$0xff] %v12013_v28  ;;  %v12015_v46 = vpop.f32.mrb[37].mxu1  ;;  %v12017_v2 = vpop.f32.mrb[39].mxu0  ;;  %v12021_v59 = vsub.f32 %v11822_v36, %v12013_v28  ;;  %v12025_v40 = vsub.f32 %v11824_v56, %v12011_v11  ;;  %9385 = vmatprep.subr.bf16.mxu0 %v9384_v25 }
 0x1a1   : > { %19267 = vst [vmem:[#allocation6_spill] sm:$0xff] %v12015_v46  ;;  %19268 = vst [vmem:[#allocation7_spill] sm:$0xff] %v12017_v2  ;;  %v12029_v5 = vsub.f32 %v11826_v13, %v12017_v2  ;;  %v12033_v32 = vsub.f32 %v11828_v63, %v12015_v46  ;;  %v9388_v2 = vpack.c.bf16 %v647_v9, %v646_v48  ;;  %v648_v48 = vld [vmem:[%s17976_s10 + $0x40] sm:$0xff]  ;;  %v649_v9 = vld [vmem:[%s17976_s10 + $0x48] sm:$0xff] }
 0x1a2   : > { %19269 = vst [vmem:[#allocation8_spill] sm:$0xff] %v12021_v59  ;;  %19270 = vst [vmem:[#allocation10_spill] sm:$0xff] %v12025_v40  ;;  %8388 = vmatmul.mubr.f32.gmra.mrb[98].mxu0 %v12021_v59 }
 0x1a3   : > { %19271 = vst [vmem:[#allocation13_spill] sm:$0xff] %v12033_v32  ;;  %v12042_v40 = vpop.f32.mrb[38].mxu1  ;;  %v12044_v11 = vpop.f32.mrb[40].mxu0  ;;  %9387 = vmatpush3.bf16.msra.mxu0 %v9384_v25 }
 0x1a4   : > { %19272 = vst [vmem:[#allocation39_spill] sm:$0xff] %v12042_v40  ;;  %19273 = vst [vmem:[#allocation43_spill] sm:$0xff] %v12044_v11  ;;  %v12046_v28 = vpop.f32.mrb[39].mxu1  ;;  %v12048_v32 = vpop.f32.mrb[41].mxu0  ;;  %v12052_v59 = vsub.f32 %v11830_v35, %v12044_v11  ;;  %v12056_v46 = vsub.f32 %v11832_v41, %v12042_v40  ;;  %9389 = vmatprep.subr.bf16.mxu0 %v9388_v2 }
 0x1a5   : > { %19274 = vst [vmem:[#allocation54_spill] sm:$0xff] %v12046_v28  ;;  %19275 = vst [vmem:[#allocation38_spill] sm:$0xff] %v12048_v32  ;;  %v12060_v13 = vsub.f32 %v11834_v21, %v12048_v32  ;;  %v12064_v25 = vsub.f32 %v11836_v34, %v12046_v28  ;;  %v9392_v32 = vpack.c.bf16 %v649_v9, %v648_v48  ;;  %v650_v48 = vld [vmem:[%s17976_s10 + $0x50] sm:$0xff]  ;;  %v651_v9 = vld [vmem:[%s17976_s10 + $0x58] sm:$0xff] }
 0x1a6   : > { %19276 = vst [vmem:[#allocation49_spill] sm:$0xff] %v12052_v59  ;;  %19277 = vst [vmem:[#allocation50_spill] sm:$0xff] %v12056_v46  ;;  %8390 = vmatprep.mubr.f32.mxu0 %v12052_v59 }
 0x1a7   : > { %19278 = vst [vmem:[#allocation51_spill] sm:$0xff] %v12064_v25  ;;  %v12073_v46 = vpop.f32.mrb[40].mxu1  ;;  %v12075_v40 = vpop.f32.mrb[42].mxu0  ;;  %9391 = vmatpush3.bf16.msra.mxu0 %v9388_v2 }
 0x1a8   : > { %19279 = vst [vmem:[#allocation55_spill] sm:$0xff] %v12073_v46  ;;  %19280 = vst [vmem:[#allocation65_spill] sm:$0xff] %v12075_v40  ;;  %v12077_v11 = vpop.f32.mrb[41].mxu1  ;;  %v12079_v25 = vpop.f32.mrb[43].mxu0  ;;  %v12083_v59 = vsub.f32 %v11838_v50, %v12075_v40  ;;  %v12087_v28 = vsub.f32 %v11840_v55, %v12073_v46  ;;  %9393 = vmatprep.subr.bf16.mxu0 %v9392_v32 }
 0x1a9   : > { %19281 = vst [vmem:[#allocation68_spill] sm:$0xff] %v12077_v11  ;;  %19282 = vst [vmem:[#allocation61_spill] sm:$0xff] %v12079_v25  ;;  %v12091_v21 = vsub.f32 %v11842_v17, %v12079_v25  ;;  %v12095_v2 = vsub.f32 %v11844_v8, %v12077_v11  ;;  %v9396_v25 = vpack.c.bf16 %v651_v9, %v650_v48  ;;  %v652_v48 = vld [vmem:[%s17976_s10 + $0x60] sm:$0xff]  ;;  %v653_v9 = vld [vmem:[%s17976_s10 + $0x68] sm:$0xff] }
 0x1aa   : > { %19283 = vst [vmem:[#allocation75_spill] sm:$0xff] %v12083_v59  ;;  %19284 = vst [vmem:[#allocation76_spill] sm:$0xff] %v12087_v28  ;;  %8391 = vmatmul.mubr.f32.gmra.mrb[100].mxu0 %v12083_v59 }
 0x1ab   : > { %19285 = vst [vmem:[#allocation86_spill] sm:$0xff] %v12095_v2  ;;  %v12104_v28 = vpop.f32.mrb[42].mxu1  ;;  %v12106_v46 = vpop.f32.mrb[44].mxu0  ;;  %9395 = vmatpush3.bf16.msra.mxu0 %v9392_v32 }
 0x1ac   : > { %19286 = vst [vmem:[#allocation89_spill] sm:$0xff] %v12104_v28  ;;  %19287 = vst [vmem:[#allocation99_spill] sm:$0xff] %v12106_v46  ;;  %v12108_v40 = vpop.f32.mrb[43].mxu1  ;;  %v12110_v2 = vpop.f32.mrb[45].mxu0  ;;  %v12114_v59 = vsub.f32 %v11846_v30, %v12106_v46  ;;  %v12118_v11 = vsub.f32 %v11848_v38, %v12104_v28  ;;  %9397 = vmatprep.subr.bf16.mxu0 %v9396_v25 }
 0x1ad   : > { %19288 = vst [vmem:[#allocation100_spill] sm:$0xff] %v12108_v40  ;;  %19289 = vst [vmem:[#allocation107_spill] sm:$0xff] %v12110_v2  ;;  %v12122_v17 = vsub.f32 %v11850_v29, %v12110_v2  ;;  %v12126_v32 = vsub.f32 %v11852_v43, %v12108_v40  ;;  %v9400_v2 = vpack.c.bf16 %v653_v9, %v652_v48  ;;  %v654_v48 = vld [vmem:[%s17976_s10 + $0x70] sm:$0xff]  ;;  %v655_v9 = vld [vmem:[%s17976_s10 + $0x78] sm:$0xff] }
 0x1ae   : > { %19290 = vst [vmem:[#allocation110_spill] sm:$0xff] %v12114_v59  ;;  %19291 = vst [vmem:[#allocation127_spill] sm:$0xff] %v12118_v11  ;;  %8393 = vmatprep.mubr.f32.mxu0 %v12114_v59 }
 0x1af   : > { %19292 = vst [vmem:[#allocation130_spill] sm:$0xff] %v12126_v32  ;;  %v12135_v11 = vpop.f32.mrb[44].mxu1  ;;  %v12137_v28 = vpop.f32.mrb[46].mxu0  ;;  %9399 = vmatpush3.bf16.msra.mxu0 %v9396_v25 }
 0x1b0   : > { %19293 = vst [vmem:[#allocation135_spill] sm:$0xff] %v12135_v11  ;;  %19294 = vst [vmem:[#allocation138_spill] sm:$0xff] %v12137_v28  ;;  %v12139_v46 = vpop.f32.mrb[45].mxu1  ;;  %v12141_v32 = vpop.f32.mrb[47].mxu0  ;;  %v12145_v59 = vsub.f32 %v11854_v49, %v12137_v28  ;;  %v12149_v40 = vsub.f32 %v11856_v47, %v12135_v11  ;;  %9401 = vmatprep.subr.bf16.mxu0 %v9400_v2 }
 0x1b1   : > { %19295 = vst [vmem:[#allocation136_spill] sm:$0xff] %v12139_v46  ;;  %19296 = vst [vmem:[#allocation137_spill] sm:$0xff] %v12141_v32  ;;  %v12153_v29 = vsub.f32 %v11858_v53, %v12141_v32  ;;  %v12157_v25 = vsub.f32 %v11860_v45, %v12139_v46  ;;  %v9404_v32 = vpack.c.bf16 %v655_v9, %v654_v48 }
 0x1b2   : > { %19297 = vst [vmem:[#allocation11_spill] sm:$0xff] %v12145_v59  ;;  %19298 = vst [vmem:[#allocation12_spill] sm:$0xff] %v12149_v40  ;;  %8394 = vmatmul.mubr.f32.gmra.mrb[102].mxu0 %v12145_v59 }
 0x1b3   : > { %19299 = vst [vmem:[#allocation14_spill] sm:$0xff] %v12157_v25  ;;  %v12166_v40 = vpop.f32.mrb[46].mxu1  ;;  %v12168_v11 = vpop.f32.mrb[48].mxu0  ;;  %9403 = vmatpush3.bf16.msra.mxu0 %v9400_v2 }
 0x1b4   : > { %19300 = vst [vmem:[#allocation15_spill] sm:$0xff] %v12166_v40  ;;  %19301 = vst [vmem:[#allocation28_spill] sm:$0xff] %v12168_v11  ;;  %v12170_v28 = vpop.f32.mrb[47].mxu1  ;;  %v12172_v25 = vpop.f32.mrb[49].mxu0  ;;  %v12176_v59 = vsub.f32 %v11862_v33, %v12168_v11  ;;  %v12180_v46 = vsub.f32 %v11864_v44, %v12166_v40  ;;  %9405 = vmatprep.subr.bf16.mxu0 %v9404_v32 }
 0x1b5   : > { %19302 = vst [vmem:[#allocation29_spill] sm:$0xff] %v12170_v28  ;;  %v12184_v53 = vsub.f32 %v11866_v54, %v12172_v25  ;;  %v12188_v2 = vsub.f32 %v11868_v19, %v12170_v28 }
 0x1b6   : > { %19303 = vst [vmem:[#allocation30_spill] sm:$0xff] %v12176_v59  ;;  %19304 = vst [vmem:[#allocation31_spill] sm:$0xff] %v12180_v46  ;;  %8396 = vmatprep.mubr.f32.mxu0 %v12176_v59 }
 0x1b7   : > { %19305 = vst [vmem:[#allocation9_spill] sm:$0xff] %v12188_v2  ;;  %v12191_v48 = vpop.f32.mrb[48].mxu1  ;;  %v12193_v9 = vpop.f32.mrb[50].mxu0  ;;  %9407 = vmatpush3.bf16.msra.mxu0 %v9404_v32 }
 0x1b8   : > { %19306 = vst [vmem:[#allocation46_spill] sm:$0xff] %v12191_v48  ;;  %19307 = vst [vmem:[#allocation42_spill] sm:$0xff] %v12193_v9  ;;  %v12195_v11 = vpop.f32.mrb[49].mxu1  ;;  %v12197_v40 = vpop.f32.mrb[51].mxu0  ;;  %v12201_v46 = vsub.f32 %v11870_v4, %v12193_v9  ;;  %v12205_v28 = vsub.f32 %v11872_v27, %v12191_v48  ;;  %9441 = vmatprep.subr.bf16.mxu0 %v11727_v37 }
 0x1b9   : > { %19308 = vst [vmem:[#allocation47_spill] sm:$0xff] %v12195_v11  ;;  %19309 = vst [vmem:[#allocation20_spill] sm:$0xff] %v12197_v40  ;;  %v12210_v59 = vsub.f32 %v11874_v22, %v12197_v40  ;;  %v12214_v32 = vsub.f32 %v11876_v0, %v12195_v11 }
 0x1ba   : > { %19310 = vst [vmem:[#allocation48_spill] sm:$0xff] %v12201_v46  ;;  %19311 = vst [vmem:[#allocation18_spill] sm:$0xff] %v12205_v28  ;;  %8397 = vmatmul.mubr.f32.gmra.mrb[104].mxu0 %v12201_v46 }
 0x1bb   : > { %19312 = vst [vmem:[#allocation52_spill] sm:$0xff] %v12214_v32  ;;  %v12217_v2 = vpop.f32.mrb[50].mxu1  ;;  %v12219_v9 = vpop.f32.mrb[52].mxu0 }
 0x1bc   : > { %19313 = vst [vmem:[#allocation21_spill] sm:$0xff] %v12217_v2  ;;  %19314 = vst [vmem:[#allocation71_spill] sm:$0xff] %v12219_v9  ;;  %v12221_v4 = vpop.f32.mrb[51].mxu1  ;;  %v12223_v48 = vpop.f32.mrb[53].mxu0  ;;  %v12227_v37 = vsub.f32 %v11878_v62, %v12219_v9  ;;  %v12231_v28 = vsub.f32 %v11880_v61, %v12217_v2 }
 0x1bd   : > { %19315 = vst [vmem:[#allocation19_spill] sm:$0xff] %v12221_v4  ;;  %19316 = vst [vmem:[#allocation72_spill] sm:$0xff] %v12223_v48  ;;  %v12235_v32 = vsub.f32 %v11882_v42, %v12223_v48  ;;  %v12239_v46 = vsub.f32 %v11884_v15, %v12221_v4 }
 0x1be   : > { %19317 = vst [vmem:[#allocation16_spill] sm:$0xff] %v12227_v37  ;;  %19318 = vst [vmem:[#allocation73_spill] sm:$0xff] %v12231_v28  ;;  %8399 = vmatprep.mubr.f32.mxu0 %v12227_v37 }
 0x1bf   : > { %19319 = vst [vmem:[#allocation22_spill] sm:$0xff] %v12239_v46  ;;  %v12242_v11 = vpop.f32.mrb[52].mxu1  ;;  %v12244_v40 = vpop.f32.mrb[54].mxu0 }
 0x1c0   : > { %19320 = vst [vmem:[#allocation74_spill] sm:$0xff] %v12242_v11  ;;  %19321 = vst [vmem:[#allocation17_spill] sm:$0xff] %v12244_v40  ;;  %v12246_v9 = vpop.f32.mrb[53].mxu1  ;;  %v12248_v62 = vpop.f32.mrb[55].mxu0  ;;  %v12252_v28 = vsub.f32 %v11886_v39, %v12244_v40  ;;  %v12256_v48 = vsub.f32 %v11888_v6, %v12242_v11 }
 0x1c1   : > { %19322 = vst [vmem:[#allocation93_spill] sm:$0xff] %v12246_v9  ;;  %19323 = vst [vmem:[#allocation23_spill] sm:$0xff] %v12248_v62  ;;  %v12260_v46 = vsub.f32 %v11890_v3, %v12248_v62  ;;  %v12264_v37 = vsub.f32 %v11892_v1, %v12246_v9 }
 0x1c2   : > { %19324 = vst [vmem:[#allocation94_spill] sm:$0xff] %v12252_v28  ;;  %19325 = vst [vmem:[#allocation24_spill] sm:$0xff] %v12256_v48  ;;  %8400 = vmatmul.mubr.f32.gmra.mrb[106].mxu0 %v12252_v28 }
 0x1c3   : > { %19326 = vst [vmem:[#allocation96_spill] sm:$0xff] %v12264_v37  ;;  %v12267_v4 = vpop.f32.mrb[54].mxu1  ;;  %v12269_v2 = vpop.f32.mrb[56].mxu0 }
 0x1c4   : > { %19327 = vst [vmem:[#allocation25_spill] sm:$0xff] %v12267_v4  ;;  %19328 = vst [vmem:[#allocation98_spill] sm:$0xff] %v12269_v2  ;;  %v12271_v40 = vpop.f32.mrb[55].mxu1  ;;  %v12273_v39 = vpop.f32.mrb[57].mxu0  ;;  %v12277_v48 = vsub.f32 %v11894_v14, %v12269_v2  ;;  %v12281_v62 = vsub.f32 %v11896_v10, %v12267_v4  ;;  %v19364_v10 = vld [vmem:[#allocation113_spill] sm:$0xff] }
 0x1c5   : > { %19329 = vst [vmem:[#allocation26_spill] sm:$0xff] %v12271_v40  ;;  %19330 = vst [vmem:[#allocation116_spill] sm:$0xff] %v12273_v39  ;;  %v12285_v37 = vsub.f32 %v11898_v51, %v12273_v39  ;;  %v12289_v28 = vsub.f32 %v11900_v58, %v12271_v40 }
 0x1c6   : > { %19331 = vst [vmem:[#allocation117_spill] sm:$0xff] %v12277_v48  ;;  %19332 = vst [vmem:[#allocation119_spill] sm:$0xff] %v12281_v62  ;;  %8402 = vmatprep.mubr.f32.mxu0 %v12277_v48  ;;  %v19341_v48 = vld [vmem:[#allocation91_spill] sm:$0xff] }
 0x1c7   : > { %19333 = vst [vmem:[#allocation120_spill] sm:$0xff] %v12289_v28  ;;  %v12292_v9 = vpop.f32.mrb[56].mxu1  ;;  %v12294_v11 = vpop.f32.mrb[58].mxu0  ;;  %v19340_v28 = vld [vmem:[#allocation90_spill] sm:$0xff] }
 0x1c8   : > { %19334 = vst [vmem:[#allocation139_spill] sm:$0xff] %v12292_v9  ;;  %19335 = vst [vmem:[#allocation140_spill] sm:$0xff] %v12294_v11  ;;  %v12296_v2 = vpop.f32.mrb[57].mxu1  ;;  %v12298_v14 = vpop.f32.mrb[59].mxu0  ;;  %v12302_v62 = vsub.f32 %v11902_v52, %v12294_v11  ;;  %v12306_v39 = vsub.f32 %v11904_v20, %v12292_v9 }
 0x1c9   : > { %19336 = vst [vmem:[#allocation141_spill] sm:$0xff] %v12296_v2  ;;  %19337 = vst [vmem:[#allocation142_spill] sm:$0xff] %v12298_v14  ;;  %v12310_v40 = vsub.f32 %v19340_v28, %v12298_v14  ;;  %v12314_v4 = vsub.f32 %v19341_v48, %v12296_v2 }
 0x1ca   : > { %19338 = vst [vmem:[#allocation143_spill] sm:$0xff] %v12302_v62  ;;  %19339 = vst [vmem:[#allocation144_spill] sm:$0xff] %v12306_v39  ;;  %8403 = vmatmul.mubr.f32.gmra.mrb[108].mxu0 %v12302_v62  ;;  %v19347_v39 = vld [vmem:[#allocation112_spill] sm:$0xff] }
 0x1cb   : > { %19342 = vst [vmem:[#allocation145_spill] sm:$0xff] %v12314_v4  ;;  %v12317_v51 = vpop.f32.mrb[58].mxu1  ;;  %v12319_v58 = vpop.f32.mrb[60].mxu0  ;;  %v19350_v4 = vld [vmem:[#allocation115_spill] sm:$0xff] }
 0x1cc   : > { %19343 = vst [vmem:[#allocation146_spill] sm:$0xff] %v12317_v51  ;;  %19344 = vst [vmem:[#allocation147_spill] sm:$0xff] %v12319_v58  ;;  %v12321_v11 = vpop.f32.mrb[59].mxu1  ;;  %v12323_v52 = vpop.f32.mrb[61].mxu0  ;;  %v12327_v9 = vsub.f32 %v19347_v39, %v12319_v58  ;;  %v12331_v14 = vsub.f32 %v11912_v12, %v12317_v51  ;;  %v19356_v51 = vld [vmem:[#allocation103_spill] sm:$0xff] }
 0x1cd   : > { %19345 = vst [vmem:[#allocation148_spill] sm:$0xff] %v12321_v11  ;;  %19346 = vst [vmem:[#allocation149_spill] sm:$0xff] %v12323_v52  ;;  %v12335_v2 = vsub.f32 %v19350_v4, %v12323_v52  ;;  %v12339_v62 = vsub.f32 %v11916_v24, %v12321_v11  ;;  %v19358_v52 = vld [vmem:[#allocation102_spill] sm:$0xff] }
 0x1ce   : > { %19348 = vst [vmem:[#allocation150_spill] sm:$0xff] %v12327_v9  ;;  %19349 = vst [vmem:[#allocation151_spill] sm:$0xff] %v12331_v14  ;;  %8405 = vmatprep.mubr.f32.mxu0 %v12327_v9  ;;  %v19361_v9 = vld [vmem:[#allocation105_spill] sm:$0xff] }
 0x1cf   : > { %19351 = vst [vmem:[#allocation152_spill] sm:$0xff] %v12339_v62  ;;  %v12342_v28 = vpop.f32.mrb[60].mxu1  ;;  %v12344_v48 = vpop.f32.mrb[62].mxu0  ;;  %v19360_v62 = vld [vmem:[#allocation104_spill] sm:$0xff] }
 0x1d0   : > { %19352 = vst [vmem:[#allocation153_spill] sm:$0xff] %v12342_v28  ;;  %19353 = vst [vmem:[#allocation154_spill] sm:$0xff] %v12344_v48  ;;  %v12346_v58 = vpop.f32.mrb[61].mxu1  ;;  %v12348_v39 = vpop.f32.mrb[63].mxu0  ;;  %v12352_v14 = vsub.f32 %v19356_v51, %v12344_v48  ;;  %v12356_v4 = vsub.f32 %v19358_v52, %v12342_v28  ;;  %v19366_v51 = vld [vmem:[#allocation85_spill] sm:$0xff] }
 0x1d1   : > { %19354 = vst [vmem:[#allocation155_spill] sm:$0xff] %v12346_v58  ;;  %19355 = vst [vmem:[#allocation156_spill] sm:$0xff] %v12348_v39  ;;  %v12360_v11 = vsub.f32 %v19360_v62, %v12348_v39  ;;  %v12364_v24 = vsub.f32 %v19361_v9, %v12346_v58  ;;  %v19369_v62 = vld [vmem:[#allocation60_spill] sm:$0xff] }
 0x1d2   : > { %19357 = vst [vmem:[#allocation157_spill] sm:$0xff] %v12352_v14  ;;  %19359 = vst [vmem:[#allocation158_spill] sm:$0xff] %v12356_v4  ;;  %8406 = vmatmul.mubr.f32.gmra.mrb[110].mxu0 %v12352_v14  ;;  %v19367_v4 = vld [vmem:[#allocation101_spill] sm:$0xff]  ;;  %v19372_v14 = vld [vmem:[#allocation106_spill] sm:$0xff] }
 0x1d3   : > { %19362 = vst [vmem:[#allocation159_spill] sm:$0xff] %v12364_v24  ;;  %v12367_v12 = vpop.f32.mrb[62].mxu1  ;;  %v2137_v20 = vpop.f32.mrb[64].mxu0  ;;  %8408 = vmatprep.mubr.f32.mxu0 %v19364_v10  ;;  %v19370_v24 = vld [vmem:[#allocation108_spill] sm:$0xff] }
 0x1d4   : > { %19363 = vst [vmem:[#allocation160_spill] sm:$0xff] %v12367_v12  ;;  %v12370_v48 = vpop.f32.mrb[63].mxu1  ;;  %v2457_v28 = vsub.f32 %v2137_v20, %v19366_v51  ;;  %v2139_v52 = vpop.f32.mrb[65].mxu0  ;;  %v12375_v39 = vsub.f32 %v19367_v4, %v12367_v12  ;;  %v19373_v20 = vld [vmem:[#allocation109_spill] sm:$0xff] }
 0x1d5   : > { %19365 = vst [vmem:[#allocation113_spill] sm:$0xff] %v12370_v48  ;;  %v2458_v3 = vsub.f32 %v2139_v52, %v19369_v62  ;;  %v12380_v58 = vsub.f32 %v19370_v24, %v12370_v48  ;;  %v19374_v48 = vld [vmem:[#allocation62_spill] sm:$0xff]  ;;  %v19376_v24 = vld [vmem:[#allocation123_spill] sm:$0xff] }
 0x1d6   : > { %19368 = vst [vmem:[#allocation85_spill] sm:$0xff] %v12375_v39  ;;  %8409 = vmatmul.mubr.f32.gmra.mrb[112].mxu0 %v11967_v26  ;;  %v12384_v9 = vsub.f32 %v2457_v28, %v19372_v14 }
 0x1d7   : > { %19371 = vst [vmem:[#allocation60_spill] sm:$0xff] %v12380_v58  ;;  %v2298_v1 = vpop.f32.mrb[64].mxu1  ;;  %v2143_v6 = vpop.f32.mrb[66].mxu0  ;;  %8411 = vmatprep.mubr.f32.mxu0 %v11998_v7  ;;  %v12388_v51 = vsub.f32 %v2458_v3, %v19373_v20 }
 0x1d8   : > { %v2459_v12 = vsub.f32 %v2298_v1, %v11795_v23  ;;  %v2300_v4 = vpop.f32.mrb[65].mxu1  ;;  %v2461_v52 = vsub.f32 %v2143_v6, %v11793_v16  ;;  %v2145_v62 = vpop.f32.mrb[67].mxu0  ;;  %8512 = vmatprep.mubr.f32.mxu1 %v12384_v9  ;;  %v19378_v23 = vld [vmem:[#allocation121_spill] sm:$0xff]  ;;  %v19380_v1 = vld [vmem:[#allocation122_spill] sm:$0xff] }
 0x1d9   : > { %v2460_v58 = vsub.f32 %v2300_v4, %v11799_v57  ;;  %v2462_v28 = vsub.f32 %v2145_v62, %v19374_v48  ;;  %v12397_v14 = vadd.f32 %v12388_v51, %v19364_v10  ;;  %v19381_v4 = vld [vmem:[#allocation132_spill] sm:$0xff] }
 0x1da   : > { %v12400_v39 = vsub.f32 %v2461_v52, %v19376_v24  ;;  %8412 = vmatmul.mubr.f32.gmra.mrb[114].mxu0 %v12029_v5  ;;  %v12404_v3 = vsub.f32 %v2459_v12, %v19378_v23  ;;  %v19383_v12 = vld [vmem:[#allocation124_spill] sm:$0xff] }
 0x1db   : > { %19375 = vst [vmem:[#allocation106_spill] sm:$0xff] %v12397_v14  ;;  %v2304_v16 = vpop.f32.mrb[66].mxu1  ;;  %v2149_v6 = vpop.f32.mrb[68].mxu0  ;;  %8414 = vmatprep.mubr.f32.mxu0 %v12060_v13  ;;  %v12408_v57 = vsub.f32 %v2462_v28, %v19380_v1  ;;  %v12411_v48 = vsub.f32 %v2460_v58, %v19381_v4  ;;  %v19385_v14 = vld [vmem:[#allocation63_spill] sm:$0xff]  ;;  %v19387_v1 = vld [vmem:[#allocation125_spill] sm:$0xff]  ;;  %v19391_v4 = vld [vmem:[#allocation126_spill] sm:$0xff] }
 0x1dc   : > { %19377 = vst [vmem:[#allocation109_spill] sm:$0xff] %v12400_v39  ;;  %19379 = vst [vmem:[#allocation62_spill] sm:$0xff] %v12404_v3  ;;  %v2463_v10 = vsub.f32 %v2304_v16, %v11813_v31  ;;  %v2306_v20 = vpop.f32.mrb[67].mxu1  ;;  %v2465_v24 = vsub.f32 %v2149_v6, %v11811_v18  ;;  %v2151_v52 = vpop.f32.mrb[69].mxu0  ;;  %8513 = vmatmul.mubr.f32.vlgmr.msra.gmra.mrb[96].mxu1 %v12400_v39  ;;  %v12418_v62 = vadd.f32 %v12404_v3, %v19383_v12  ;;  %v19389_v18 = vld [vmem:[#allocation27_spill] sm:$0xff]  ;;  %v19390_v16 = vld [vmem:[#allocation128_spill] sm:$0xff] }
 0x1dd   : > { %19382 = vst [vmem:[#allocation123_spill] sm:$0xff] %v12411_v48  ;;  %v2464_v23 = vsub.f32 %v2306_v20, %v11817_v60  ;;  %v2466_v28 = vsub.f32 %v2151_v52, %v19385_v14  ;;  %v12424_v58 = vadd.f32 %v12408_v57, %v11967_v26  ;;  %v12428_v31 = vadd.f32 %v12411_v48, %v19387_v1  ;;  %v19393_v60 = vld [vmem:[#allocation53_spill] sm:$0xff]  ;;  %v19394_v26 = vld [vmem:[#allocation131_spill] sm:$0xff] }
 0x1de   : > { %19384 = vst [vmem:[#allocation121_spill] sm:$0xff] %v12418_v62  ;;  %9411 = vmatpush3.bf16.msra.mxu1 %v19389_v18  ;;  %8415 = vmatmul.mubr.f32.gmra.mrb[116].mxu0 %v12091_v21  ;;  %v12433_v6 = vsub.f32 %v2465_v24, %v19390_v16  ;;  %v12436_v62 = vsub.f32 %v2463_v10, %v19391_v4  ;;  %v19397_v10 = vld [vmem:[#allocation32_spill] sm:$0xff]  ;;  %v19399_v39 = vld [vmem:[#allocation57_spill] sm:$0xff] }
 0x1df   : > { %19386 = vst [vmem:[#allocation122_spill] sm:$0xff] %v12424_v58  ;;  %19388 = vst [vmem:[#allocation132_spill] sm:$0xff] %v12428_v31  ;;  %9413 = vmatprep.subr.bf16.mxu1 %v19393_v60  ;;  %v2310_v14 = vpop.f32.mrb[68].mxu1  ;;  %v2155_v20 = vpop.f32.mrb[70].mxu0  ;;  %8417 = vmatprep.mubr.f32.mxu0 %v12122_v17  ;;  %v12441_v52 = vsub.f32 %v2466_v28, %v19394_v26  ;;  %v19395_v31 = vld [vmem:[#allocation129_spill] sm:$0xff] }
 0x1e0   : > { %19392 = vst [vmem:[#allocation124_spill] sm:$0xff] %v12436_v62  ;;  %v12444_v58 = vsub.f32 %v2464_v23, %v19395_v31  ;;  %v2467_v18 = vsub.f32 %v2310_v14, %v11824_v56  ;;  %v2312_v48 = vpop.f32.mrb[69].mxu1  ;;  %v2469_v24 = vsub.f32 %v2155_v20, %v11822_v36  ;;  %v2157_v16 = vpop.f32.mrb[71].mxu0  ;;  %8515 = vmatprep.mubr.f32.mxu1 %v12433_v6  ;;  %v19401_v31 = vld [vmem:[#allocation3_spill] sm:$0xff]  ;;  %v19403_v36 = vld [vmem:[#allocation5_spill] sm:$0xff]  ;;  %v19404_v20 = vld [vmem:[#allocation4_spill] sm:$0xff] }
 0x1e1   : > { %v12451_v4 = vadd.f32 %v12436_v62, %v19397_v10  ;;  %v2468_v3 = vsub.f32 %v2312_v48, %v11828_v63  ;;  %v2470_v28 = vsub.f32 %v2157_v16, %v19399_v39  ;;  %v12457_v23 = vadd.f32 %v12441_v52, %v11998_v7  ;;  %v19406_v63 = vld [vmem:[#allocation58_spill] sm:$0xff]  ;;  %v19407_v7 = vld [vmem:[#allocation7_spill] sm:$0xff]  ;;  %v19412_v62 = vld [vmem:[#allocation64_spill] sm:$0xff] }
 0x1e2   : > { %19396 = vst [vmem:[#allocation63_spill] sm:$0xff] %v12444_v58  ;;  %v12461_v56 = vadd.f32 %v12444_v58, %v19401_v31  ;;  %9415 = vmatpush3.bf16.msra.mxu1 %v19393_v60  ;;  %8418 = vmatmul.mubr.f32.gmra.mrb[118].mxu0 %v12153_v29  ;;  %v12466_v14 = vsub.f32 %v2469_v24, %v19403_v36 }
 0x1e3   : > { %19398 = vst [vmem:[#allocation125_spill] sm:$0xff] %v12451_v4  ;;  %19400 = vst [vmem:[#allocation27_spill] sm:$0xff] %v12457_v23  ;;  %v12469_v26 = vsub.f32 %v2467_v18, %v19404_v20  ;;  %9417 = vmatprep.subr.bf16.mxu1 %v19406_v63  ;;  %v2316_v39 = vpop.f32.mrb[70].mxu1  ;;  %v2161_v48 = vpop.f32.mrb[72].mxu0  ;;  %8420 = vmatprep.mubr.f32.mxu0 %v12184_v53  ;;  %v12474_v16 = vsub.f32 %v2470_v28, %v19407_v7  ;;  %v19410_v18 = vld [vmem:[#allocation10_spill] sm:$0xff] }
 0x1e4   : > { %19402 = vst [vmem:[#allocation128_spill] sm:$0xff] %v12461_v56  ;;  %v19408_v56 = vld [vmem:[#allocation6_spill] sm:$0xff]  ;;  %v2471_v60 = vsub.f32 %v2316_v39, %v11832_v41  ;;  %v2318_v58 = vpop.f32.mrb[71].mxu1  ;;  %v2473_v24 = vsub.f32 %v2161_v48, %v11830_v35  ;;  %v2163_v36 = vpop.f32.mrb[73].mxu0  ;;  %8516 = vmatmul.mubr.f32.gmra.mrb[98].mxu1 %v12466_v14  ;;  %v19416_v35 = vld [vmem:[#allocation43_spill] sm:$0xff] }
 0x1e5   : > { %19405 = vst [vmem:[#allocation126_spill] sm:$0xff] %v12469_v26  ;;  %v12477_v4 = vsub.f32 %v2468_v3, %v19408_v56  ;;  %v12484_v20 = vadd.f32 %v12469_v26, %v19410_v18  ;;  %v2472_v23 = vsub.f32 %v2318_v58, %v11836_v34  ;;  %v2474_v28 = vsub.f32 %v2163_v36, %v19412_v62  ;;  %v19414_v56 = vld [vmem:[#allocation13_spill] sm:$0xff]  ;;  %v19417_v48 = vld [vmem:[#allocation39_spill] sm:$0xff]  ;;  %v19419_v34 = vld [vmem:[#allocation34_spill] sm:$0xff] }
 0x1e6   : > { %v12490_v3 = vadd.f32 %v12474_v16, %v12029_v5  ;;  %9419 = vmatpush3.bf16.msra.mxu1 %v19406_v63  ;;  %8421 = vmatmul.mubr.f32.gmra.mrb[120].mxu0 %v12210_v59  ;;  %v12499_v39 = vsub.f32 %v2473_v24, %v19416_v35  ;;  %v12502_v7 = vsub.f32 %v2471_v60, %v19417_v48  ;;  %v19420_v5 = vld [vmem:[#allocation38_spill] sm:$0xff] }
 0x1e7   : > { %19409 = vst [vmem:[#allocation53_spill] sm:$0xff] %v12477_v4  ;;  %19411 = vst [vmem:[#allocation131_spill] sm:$0xff] %v12484_v20  ;;  %v12494_v41 = vadd.f32 %v12477_v4, %v19414_v56  ;;  %9421 = vmatprep.subr.bf16.mxu1 %v19419_v34  ;;  %v2322_v62 = vpop.f32.mrb[72].mxu1  ;;  %v2167_v58 = vpop.f32.mrb[74].mxu0  ;;  %8423 = vmatprep.mubr.f32.mxu0 %v12235_v32  ;;  %v12507_v36 = vsub.f32 %v2474_v28, %v19420_v5  ;;  %v19423_v60 = vld [vmem:[#allocation50_spill] sm:$0xff] }
 0x1e8   : > { %19413 = vst [vmem:[#allocation129_spill] sm:$0xff] %v12490_v3  ;;  %19418 = vst [vmem:[#allocation57_spill] sm:$0xff] %v12502_v7  ;;  %v2475_v63 = vsub.f32 %v2322_v62, %v11840_v55  ;;  %v2324_v3 = vpop.f32.mrb[73].mxu1  ;;  %v2477_v24 = vsub.f32 %v2167_v58, %v11838_v50  ;;  %v2169_v35 = vpop.f32.mrb[75].mxu0  ;;  %8518 = vmatprep.mubr.f32.mxu1 %v12499_v39  ;;  %v12517_v48 = vadd.f32 %v12502_v7, %v19423_v60  ;;  %v19425_v26 = vld [vmem:[#allocation66_spill] sm:$0xff]  ;;  %v19429_v50 = vld [vmem:[#allocation65_spill] sm:$0xff] }
 0x1e9   : > { %19415 = vst [vmem:[#allocation32_spill] sm:$0xff] %v12494_v41  ;;  %v19421_v41 = vld [vmem:[#allocation54_spill] sm:$0xff]  ;;  %v2476_v4 = vsub.f32 %v2324_v3, %v11844_v8  ;;  %v2478_v28 = vsub.f32 %v2169_v35, %v19425_v26  ;;  %v19430_v58 = vld [vmem:[#allocation55_spill] sm:$0xff] }
 0x1ea   : > { %v12510_v20 = vsub.f32 %v2472_v23, %v19421_v41  ;;  %19424 = vst [vmem:[#allocation5_spill] sm:$0xff] %v12517_v48  ;;  %v12523_v23 = vadd.f32 %v12507_v36, %v12060_v13  ;;  %v19427_v41 = vld [vmem:[#allocation51_spill] sm:$0xff]  ;;  %9423 = vmatpush3.bf16.msra.mxu1 %v19419_v34  ;;  %8424 = vmatmul.mubr.f32.gmra.mrb[122].mxu0 %v12260_v46  ;;  %v19433_v13 = vld [vmem:[#allocation61_spill] sm:$0xff] }
 0x1eb   : > { %v12532_v62 = vsub.f32 %v2477_v24, %v19429_v50  ;;  %v12535_v5 = vsub.f32 %v2475_v63, %v19430_v58  ;;  %v19432_v8 = vld [vmem:[#allocation35_spill] sm:$0xff]  ;;  %v2328_v26 = vpop.f32.mrb[74].mxu1  ;;  %v2173_v3 = vpop.f32.mrb[76].mxu0  ;;  %8426 = vmatprep.mubr.f32.mxu0 %v12285_v37  ;;  %v12540_v35 = vsub.f32 %v2478_v28, %v19433_v13  ;;  %v19436_v63 = vld [vmem:[#allocation76_spill] sm:$0xff] }
 0x1ec   : > { %19422 = vst [vmem:[#allocation3_spill] sm:$0xff] %v12510_v20  ;;  %19426 = vst [vmem:[#allocation4_spill] sm:$0xff] %v12523_v23  ;;  %v12527_v55 = vadd.f32 %v12510_v20, %v19427_v41  ;;  %9425 = vmatprep.subr.bf16.mxu1 %v19432_v8  ;;  %v2479_v34 = vsub.f32 %v2328_v26, %v11848_v38  ;;  %v2330_v20 = vpop.f32.mrb[75].mxu1  ;;  %v2481_v24 = vsub.f32 %v2173_v3, %v11846_v30  ;;  %v2175_v50 = vpop.f32.mrb[77].mxu0  ;;  %v19438_v7 = vld [vmem:[#allocation67_spill] sm:$0xff]  ;;  %v19443_v3 = vld [vmem:[#allocation89_spill] sm:$0xff] }
 0x1ed   : > { %19431 = vst [vmem:[#allocation7_spill] sm:$0xff] %v12535_v5  ;;  %8519 = vmatmul.mubr.f32.gmra.mrb[100].mxu1 %v12532_v62  ;;  %v12550_v58 = vadd.f32 %v12535_v5, %v19436_v63  ;;  %v2480_v23 = vsub.f32 %v2330_v20, %v11852_v43  ;;  %v2482_v28 = vsub.f32 %v2175_v50, %v19438_v7  ;;  %v19442_v30 = vld [vmem:[#allocation99_spill] sm:$0xff]  ;;  %v19444_v43 = vld [vmem:[#allocation36_spill] sm:$0xff]  ;;  %v19450_v5 = vld [vmem:[#allocation69_spill] sm:$0xff] }
 0x1ee   : > { %19428 = vst [vmem:[#allocation58_spill] sm:$0xff] %v12527_v55  ;;  %v19434_v55 = vld [vmem:[#allocation68_spill] sm:$0xff]  ;;  %9427 = vmatpush3.bf16.msra.mxu1 %v19432_v8  ;;  %8427 = vmatmul.mubr.f32.gmra.mrb[124].mxu0 %v12310_v40  ;;  %v12565_v26 = vsub.f32 %v2481_v24, %v19442_v30  ;;  %v12568_v13 = vsub.f32 %v2479_v34, %v19443_v3  ;;  %v19448_v34 = vld [vmem:[#allocation127_spill] sm:$0xff] }
 0x1ef   : > { %v12543_v48 = vsub.f32 %v2476_v4, %v19434_v55  ;;  %19437 = vst [vmem:[#allocation10_spill] sm:$0xff] %v12550_v58  ;;  %v12556_v4 = vadd.f32 %v12540_v35, %v12091_v21  ;;  %v19440_v55 = vld [vmem:[#allocation86_spill] sm:$0xff]  ;;  %9429 = vmatprep.subr.bf16.mxu1 %v19444_v43  ;;  %v2334_v20 = vpop.f32.mrb[76].mxu1  ;;  %v2179_v7 = vpop.f32.mrb[78].mxu0  ;;  %8429 = vmatprep.mubr.f32.mxu0 %v12335_v2  ;;  %v19445_v21 = vld [vmem:[#allocation107_spill] sm:$0xff] }
 0x1f0   : > { %v12573_v50 = vsub.f32 %v2482_v28, %v19445_v21  ;;  %v2483_v8 = vsub.f32 %v2334_v20, %v11856_v47  ;;  %v2485_v24 = vsub.f32 %v2179_v7, %v11854_v49  ;;  %v2181_v30 = vpop.f32.mrb[79].mxu0  ;;  %8521 = vmatprep.mubr.f32.mxu1 %v12565_v26  ;;  %v12583_v3 = vadd.f32 %v12568_v13, %v19448_v34  ;;  %v19454_v49 = vld [vmem:[#allocation138_spill] sm:$0xff]  ;;  %v19455_v7 = vld [vmem:[#allocation135_spill] sm:$0xff] }
 0x1f1   : > { %19435 = vst [vmem:[#allocation6_spill] sm:$0xff] %v12543_v48  ;;  %19439 = vst [vmem:[#allocation64_spill] sm:$0xff] %v12556_v4  ;;  %v12560_v38 = vadd.f32 %v12543_v48, %v19440_v55  ;;  %v2336_v4 = vpop.f32.mrb[77].mxu1  ;;  %v2486_v28 = vsub.f32 %v2181_v30, %v19450_v5 }
 0x1f2   : > { %19449 = vst [vmem:[#allocation39_spill] sm:$0xff] %v12583_v3  ;;  %v2484_v48 = vsub.f32 %v2336_v4, %v11860_v45  ;;  %9431 = vmatpush3.bf16.msra.mxu1 %v19444_v43  ;;  %8430 = vmatmul.mubr.f32.gmra.mrb[126].mxu0 %v12360_v11  ;;  %v12598_v20 = vsub.f32 %v2485_v24, %v19454_v49  ;;  %v19456_v45 = vld [vmem:[#allocation33_spill] sm:$0xff] }
 0x1f3   : > { %19441 = vst [vmem:[#allocation13_spill] sm:$0xff] %v12560_v38  ;;  %v19446_v38 = vld [vmem:[#allocation100_spill] sm:$0xff]  ;;  %v12601_v21 = vsub.f32 %v2483_v8, %v19455_v7  ;;  %9433 = vmatprep.subr.bf16.mxu1 %v19456_v45  ;;  %v2340_v5 = vpop.f32.mrb[78].mxu1  ;;  %v2185_v4 = vpop.f32.mrb[80].mxu0  ;;  %8432 = vmatprep.mubr.f32.mxu0 %v19383_v12 }
 0x1f4   : > { %v12576_v58 = vsub.f32 %v2480_v23, %v19446_v38  ;;  %v12589_v23 = vadd.f32 %v12573_v50, %v12122_v17  ;;  %v19452_v38 = vld [vmem:[#allocation130_spill] sm:$0xff]  ;;  %v19457_v17 = vld [vmem:[#allocation137_spill] sm:$0xff]  ;;  %v2487_v43 = vsub.f32 %v2340_v5, %v11864_v44  ;;  %v2489_v24 = vsub.f32 %v2185_v4, %v11862_v33  ;;  %v2187_v49 = vpop.f32.mrb[81].mxu0  ;;  %8522 = vmatmul.mubr.f32.gmra.mrb[102].mxu1 %v12598_v20  ;;  %v19460_v8 = vld [vmem:[#allocation12_spill] sm:$0xff] }
 0x1f5   : > { %v12606_v30 = vsub.f32 %v2486_v28, %v19457_v17  ;;  %v12616_v7 = vadd.f32 %v12601_v21, %v19460_v8  ;;  %v2490_v28 = vsub.f32 %v2187_v49, %v11866_v54  ;;  %v19465_v33 = vld [vmem:[#allocation28_spill] sm:$0xff]  ;;  %v19466_v4 = vld [vmem:[#allocation15_spill] sm:$0xff]  ;;  %v19468_v49 = vld [vmem:[#allocation29_spill] sm:$0xff] }
 0x1f6   : > { %19447 = vst [vmem:[#allocation43_spill] sm:$0xff] %v12576_v58  ;;  %19451 = vst [vmem:[#allocation34_spill] sm:$0xff] %v12589_v23  ;;  %v12593_v47 = vadd.f32 %v12576_v58, %v19452_v38  ;;  %v2342_v58 = vpop.f32.mrb[79].mxu1  ;;  %9435 = vmatpush3.bf16.msra.mxu1 %v19456_v45  ;;  %8433 = vmatmul.mubr.f32.gmra.mrb[128].mxu0 %v19397_v10  ;;  %v12631_v5 = vsub.f32 %v2489_v24, %v19465_v33  ;;  %v19470_v24 = vld [vmem:[#allocation70_spill] sm:$0xff] }
 0x1f7   : > { %19461 = vst [vmem:[#allocation50_spill] sm:$0xff] %v12616_v7  ;;  %v2488_v12 = vsub.f32 %v2342_v58, %v11868_v19  ;;  %v12634_v17 = vsub.f32 %v2487_v43, %v19466_v4  ;;  %v19467_v19 = vld [vmem:[#allocation37_spill] sm:$0xff]  ;;  %v2346_v54 = vpop.f32.mrb[80].mxu1  ;;  %v2191_v58 = vpop.f32.mrb[82].mxu0  ;;  %8435 = vmatprep.mubr.f32.mxu0 %v19410_v18  ;;  %v19471_v43 = vld [vmem:[#allocation31_spill] sm:$0xff] }
 0x1f8   : > { %19453 = vst [vmem:[#allocation38_spill] sm:$0xff] %v12593_v47  ;;  %v19458_v47 = vld [vmem:[#allocation136_spill] sm:$0xff]  ;;  %9437 = vmatprep.subr.bf16.mxu1 %v19467_v19  ;;  %v2491_v10 = vsub.f32 %v2346_v54, %v11872_v27  ;;  %v2348_v45 = vpop.f32.mrb[81].mxu1  ;;  %v2493_v33 = vsub.f32 %v2191_v58, %v19470_v24  ;;  %v2193_v7 = vpop.f32.mrb[83].mxu0  ;;  %8524 = vmatprep.mubr.f32.mxu1 %v12631_v5  ;;  %v19476_v54 = vld [vmem:[#allocation42_spill] sm:$0xff] }
 0x1f9   : > { %v12609_v3 = vsub.f32 %v2484_v48, %v19458_v47  ;;  %v12622_v48 = vadd.f32 %v12606_v30, %v12153_v29  ;;  %v19463_v47 = vld [vmem:[#allocation14_spill] sm:$0xff]  ;;  %v12639_v29 = vsub.f32 %v2490_v28, %v12172_v25  ;;  %v12649_v4 = vadd.f32 %v12634_v17, %v19471_v43  ;;  %v19474_v28 = vld [vmem:[#allocation9_spill] sm:$0xff] }
 0x1fa   : > { %v2492_v18 = vsub.f32 %v2348_v45, %v11876_v0  ;;  %v2494_v25 = vsub.f32 %v2193_v7, %v11874_v22  ;;  %9439 = vmatpush3.bf16.msra.mxu1 %v19467_v19  ;;  %8436 = vmatmul.mubr.f32.gmra.mrb[130].mxu0 %v19423_v60  ;;  %v12664_v58 = vsub.f32 %v2493_v33, %v19476_v54  ;;  %v19480_v45 = vld [vmem:[#allocation47_spill] sm:$0xff]  ;;  %v19482_v60 = vld [vmem:[#allocation92_spill] sm:$0xff] }
 0x1fb   : > { %19459 = vst [vmem:[#allocation54_spill] sm:$0xff] %v12609_v3  ;;  %19462 = vst [vmem:[#allocation66_spill] sm:$0xff] %v12622_v48  ;;  %v12626_v44 = vadd.f32 %v12609_v3, %v19463_v47  ;;  %v2352_v0 = vpop.f32.mrb[82].mxu1  ;;  %v2197_v22 = vpop.f32.mrb[84].mxu0  ;;  %8438 = vmatprep.mubr.f32.mxu0 %v19436_v63  ;;  %v19516_v3 = vld [vmem:[#allocation78_spill] sm:$0xff] }
 0x1fc   : > { %19472 = vst [vmem:[#allocation55_spill] sm:$0xff] %v12649_v4  ;;  %v12674_v4 = vsub.f32 %v2492_v18, %v19480_v45  ;;  %v2495_v19 = vsub.f32 %v2352_v0, %v11880_v61  ;;  %v2199_v33 = vpop.f32.mrb[85].mxu0  ;;  %8525 = vmatmul.mubr.f32.gmra.mrb[104].mxu1 %v12664_v58  ;;  %v19488_v0 = vld [vmem:[#allocation71_spill] sm:$0xff] }
 0x1fd   : > { %19464 = vst [vmem:[#allocation51_spill] sm:$0xff] %v12626_v44  ;;  %v12642_v44 = vsub.f32 %v2488_v12, %v19468_v49  ;;  %v12655_v12 = vadd.f32 %v12639_v29, %v12184_v53  ;;  %v19477_v49 = vld [vmem:[#allocation46_spill] sm:$0xff]  ;;  %v19479_v53 = vld [vmem:[#allocation20_spill] sm:$0xff] }
 0x1fe   : > { %v12667_v24 = vsub.f32 %v2491_v10, %v19477_v49  ;;  %v12671_v7 = vsub.f32 %v2494_v25, %v19479_v53  ;;  %19481 = vst [vmem:[#allocation76_spill] sm:$0xff] %v12674_v4  ;;  %v19483_v10 = vld [vmem:[#allocation18_spill] sm:$0xff]  ;;  %v2498_v25 = vsub.f32 %v2199_v33, %v11882_v42  ;;  %v19486_v49 = vld [vmem:[#allocation52_spill] sm:$0xff]  ;;  %8439 = vmatmul.mubr.f32.gmra.mrb[132].mxu0 %v19448_v34  ;;  %v19490_v53 = vld [vmem:[#allocation21_spill] sm:$0xff] }
 0x1ff   : > { %19469 = vst [vmem:[#allocation65_spill] sm:$0xff] %v12642_v44  ;;  %19473 = vst [vmem:[#allocation35_spill] sm:$0xff] %v12655_v12  ;;  %v12659_v27 = vadd.f32 %v12642_v44, %v19474_v28  ;;  %v2497_v44 = vsub.f32 %v2197_v22, %v19482_v60  ;;  %v12691_v61 = vadd.f32 %v12674_v4, %v19486_v49  ;;  %8441 = vmatprep.mubr.f32.mxu0 %v19460_v8  ;;  %v19492_v42 = vld [vmem:[#allocation72_spill] sm:$0xff]  ;;  %v19496_v34 = vld [vmem:[#allocation95_spill] sm:$0xff] }
 0x200   : > { %19478 = vst [vmem:[#allocation68_spill] sm:$0xff] %v12667_v24  ;;  %v12681_v54 = vadd.f32 %v12667_v24, %v19483_v10  ;;  %v12687_v18 = vadd.f32 %v12671_v7, %v12210_v59  ;;  %v12698_v45 = vsub.f32 %v2495_v19, %v19490_v53  ;;  %v19493_v59 = vld [vmem:[#allocation19_spill] sm:$0xff]  ;;  %v19497_v19 = vld [vmem:[#allocation73_spill] sm:$0xff]  ;;  %v19499_v53 = vld [vmem:[#allocation82_spill] sm:$0xff] }
 0x201   : > { %19475 = vst [vmem:[#allocation61_spill] sm:$0xff] %v12659_v27  ;;  %v2354_v27 = vpop.f32.mrb[83].mxu1  ;;  %19487 = vst [vmem:[#allocation99_spill] sm:$0xff] %v12691_v61  ;;  %v12695_v22 = vsub.f32 %v2497_v44, %v19488_v0  ;;  %v19500_v12 = vld [vmem:[#allocation80_spill] sm:$0xff] }
 0x202   : > { %19484 = vst [vmem:[#allocation67_spill] sm:$0xff] %v12681_v54  ;;  %v2496_v63 = vsub.f32 %v2354_v27, %v11884_v15  ;;  %19485 = vst [vmem:[#allocation86_spill] sm:$0xff] %v12687_v18  ;;  %v2358_v60 = vpop.f32.mrb[84].mxu1  ;;  %v2203_v15 = vpop.f32.mrb[86].mxu0  ;;  %v12702_v27 = vsub.f32 %v2498_v25, %v19492_v42  ;;  %v19495_v54 = vld [vmem:[#allocation97_spill] sm:$0xff]  ;;  %v12712_v0 = vadd.f32 %v12698_v45, %v19497_v19  ;;  %v19502_v42 = vld [vmem:[#allocation22_spill] sm:$0xff]  ;;  %8442 = vmatmul.mubr.f32.gmra.mrb[134].mxu0 %v19471_v43 }
 0x203   : > { %19489 = vst [vmem:[#allocation89_spill] sm:$0xff] %v12695_v22  ;;  %19491 = vst [vmem:[#allocation36_spill] sm:$0xff] %v12698_v45  ;;  %v2499_v61 = vsub.f32 %v2358_v60, %v19495_v54  ;;  %v2360_v18 = vpop.f32.mrb[85].mxu1  ;;  %v2501_v4 = vsub.f32 %v2203_v15, %v19496_v34  ;;  %v2205_v44 = vpop.f32.mrb[87].mxu0  ;;  %8527 = vmatprep.mubr.f32.mxu1 %v12695_v22  ;;  %v19504_v60 = vld [vmem:[#allocation17_spill] sm:$0xff]  ;;  %8444 = vmatprep.mubr.f32.mxu0 %v19483_v10 }
 0x204   : > { %v12705_v33 = vsub.f32 %v2496_v63, %v19493_v59  ;;  %19498 = vst [vmem:[#allocation100_spill] sm:$0xff] %v12712_v0  ;;  %v2500_v8 = vsub.f32 %v2360_v18, %v19499_v53  ;;  %v2502_v25 = vsub.f32 %v2205_v44, %v19500_v12  ;;  %v12718_v63 = vadd.f32 %v12702_v27, %v12235_v32  ;;  %v19506_v59 = vld [vmem:[#allocation74_spill] sm:$0xff]  ;;  %v2364_v0 = vpop.f32.mrb[86].mxu1  ;;  %v2209_v18 = vpop.f32.mrb[88].mxu0  ;;  %v19508_v12 = vld [vmem:[#allocation23_spill] sm:$0xff]  ;;  %v19509_v32 = vld [vmem:[#allocation93_spill] sm:$0xff] }
 0x205   : > { %v12726_v15 = vsub.f32 %v2501_v4, %v19504_v60  ;;  %v12729_v34 = vsub.f32 %v2499_v61, %v19506_v59  ;;  %v19512_v43 = vld [vmem:[#allocation77_spill] sm:$0xff]  ;;  %v2211_v4 = vpop.f32.mrb[89].mxu0  ;;  %v19513_v61 = vld [vmem:[#allocation24_spill] sm:$0xff] }
 0x206   : > { %19494 = vst [vmem:[#allocation107_spill] sm:$0xff] %v12705_v33  ;;  %19501 = vst [vmem:[#allocation127_spill] sm:$0xff] %v12718_v63  ;;  %v12722_v54 = vadd.f32 %v12705_v33, %v19502_v42  ;;  %v12733_v44 = vsub.f32 %v2502_v25, %v19508_v12  ;;  %v12736_v53 = vsub.f32 %v2500_v8, %v19509_v32  ;;  %v19511_v33 = vld [vmem:[#allocation83_spill] sm:$0xff]  ;;  %v2366_v63 = vpop.f32.mrb[87].mxu1  ;;  %v19515_v59 = vld [vmem:[#allocation84_spill] sm:$0xff]  ;;  %8445 = vmatmul.mubr.f32.gmra.mrb[136].mxu0 %v19497_v19 }
 0x207   : > { %19505 = vst [vmem:[#allocation130_spill] sm:$0xff] %v12726_v15  ;;  %19507 = vst [vmem:[#allocation138_spill] sm:$0xff] %v12729_v34  ;;  %v2505_v48 = vsub.f32 %v2209_v18, %v19512_v43  ;;  %8528 = vmatmul.mubr.f32.gmra.mrb[106].mxu1 %v12726_v15  ;;  %v12743_v60 = vadd.f32 %v12729_v34, %v19513_v61  ;;  %v2504_v10 = vsub.f32 %v2366_v63, %v19515_v59  ;;  %v19518_v12 = vld [vmem:[#allocation96_spill] sm:$0xff]  ;;  %v19522_v32 = vld [vmem:[#allocation25_spill] sm:$0xff]  ;;  %v2215_v63 = vpop.f32.mrb[90].mxu0 }
 0x208   : > { %19503 = vst [vmem:[#allocation69_spill] sm:$0xff] %v12722_v54  ;;  %19510 = vst [vmem:[#allocation135_spill] sm:$0xff] %v12736_v53  ;;  %v2503_v54 = vsub.f32 %v2364_v0, %v19511_v33  ;;  %v2506_v25 = vsub.f32 %v2211_v4, %v19516_v3  ;;  %v12749_v8 = vadd.f32 %v12733_v44, %v12260_v46  ;;  %v19520_v0 = vld [vmem:[#allocation98_spill] sm:$0xff]  ;;  %8447 = vmatprep.mubr.f32.mxu0 %v19513_v61  ;;  %v19524_v3 = vld [vmem:[#allocation116_spill] sm:$0xff] }
 0x209   : > { %19514 = vst [vmem:[#allocation33_spill] sm:$0xff] %v12743_v60  ;;  %v12753_v33 = vadd.f32 %v12736_v53, %v19518_v12  ;;  %v12757_v18 = vsub.f32 %v2505_v48, %v19520_v0  ;;  %v2370_v60 = vpop.f32.mrb[88].mxu1  ;;  %v19525_v46 = vld [vmem:[#allocation26_spill] sm:$0xff]  ;;  %v19528_v19 = vld [vmem:[#allocation87_spill] sm:$0xff]  ;;  %v2217_v48 = vpop.f32.mrb[91].mxu0 }
 0x20a   : > { %19517 = vst [vmem:[#allocation137_spill] sm:$0xff] %v12749_v8  ;;  %v12760_v43 = vsub.f32 %v2503_v54, %v19522_v32  ;;  %v12764_v4 = vsub.f32 %v2506_v25, %v19524_v3  ;;  %v12767_v59 = vsub.f32 %v2504_v10, %v19525_v46  ;;  %v19527_v8 = vld [vmem:[#allocation88_spill] sm:$0xff]  ;;  %v2372_v53 = vpop.f32.mrb[89].mxu1  ;;  %v2509_v23 = vsub.f32 %v2215_v63, %v19528_v19  ;;  %v19529_v54 = vld [vmem:[#allocation119_spill] sm:$0xff]  ;;  %v19532_v34 = vld [vmem:[#allocation90_spill] sm:$0xff] }
 0x20b   : > { %19519 = vst [vmem:[#allocation136_spill] sm:$0xff] %v12753_v33  ;;  %19521 = vst [vmem:[#allocation12_spill] sm:$0xff] %v12757_v18  ;;  %v2507_v33 = vsub.f32 %v2370_v60, %v19527_v8  ;;  %8530 = vmatprep.mubr.f32.mxu1 %v12757_v18  ;;  %v19531_v32 = vld [vmem:[#allocation91_spill] sm:$0xff]  ;;  %v2510_v25 = vsub.f32 %v2217_v48, %v19532_v34  ;;  %v19534_v3 = vld [vmem:[#allocation120_spill] sm:$0xff]  ;;  %8448 = vmatmul.mubr.f32.gmra.mrb[138].mxu0 %v19529_v54 }
 0x20c   : > { %19523 = vst [vmem:[#allocation14_spill] sm:$0xff] %v12760_v43  ;;  %19526 = vst [vmem:[#allocation28_spill] sm:$0xff] %v12767_v59  ;;  %v12774_v0 = vadd.f32 %v12760_v43, %v19529_v54  ;;  %v2508_v61 = vsub.f32 %v2372_v53, %v19531_v32  ;;  %v12780_v10 = vadd.f32 %v12764_v4, %v12285_v37  ;;  %v19536_v8 = vld [vmem:[#allocation140_spill] sm:$0xff]  ;;  %v19538_v46 = vld [vmem:[#allocation139_spill] sm:$0xff]  ;;  %v2221_v53 = vpop.f32.mrb[92].mxu0 }
 0x20d   : > { %v12784_v60 = vadd.f32 %v12767_v59, %v19534_v3  ;;  %v12788_v63 = vsub.f32 %v2509_v23, %v19536_v8  ;;  %v12791_v19 = vsub.f32 %v2507_v33, %v19538_v46  ;;  %v19540_v32 = vld [vmem:[#allocation144_spill] sm:$0xff]  ;;  %v19541_v34 = vld [vmem:[#allocation142_spill] sm:$0xff]  ;;  %v19542_v37 = vld [vmem:[#allocation141_spill] sm:$0xff]  ;;  %v2223_v23 = vpop.f32.mrb[93].mxu0 }
 0x20e   : > { %19530 = vst [vmem:[#allocation15_spill] sm:$0xff] %v12774_v0  ;;  %19533 = vst [vmem:[#allocation37_spill] sm:$0xff] %v12780_v10  ;;  %v2376_v0 = vpop.f32.mrb[90].mxu1  ;;  %8450 = vmatprep.mubr.f32.mxu0 %v19540_v32  ;;  %v12795_v48 = vsub.f32 %v2510_v25, %v19541_v34  ;;  %v12798_v10 = vsub.f32 %v2508_v61, %v19542_v37  ;;  %v19544_v59 = vld [vmem:[#allocation114_spill] sm:$0xff]  ;;  %v19545_v54 = vld [vmem:[#allocation112_spill] sm:$0xff] }
 0x20f   : > { %19535 = vst [vmem:[#allocation29_spill] sm:$0xff] %v12784_v60  ;;  %19537 = vst [vmem:[#allocation70_spill] sm:$0xff] %v12788_v63  ;;  %v2511_v60 = vsub.f32 %v2376_v0, %v19544_v59  ;;  %v2378_v43 = vpop.f32.mrb[91].mxu1  ;;  %v2513_v18 = vsub.f32 %v2221_v53, %v19545_v54  ;;  %8531 = vmatmul.mubr.f32.gmra.mrb[108].mxu1 %v12788_v63  ;;  %v12805_v33 = vadd.f32 %v12791_v19, %v19540_v32  ;;  %v19547_v8 = vld [vmem:[#allocation118_spill] sm:$0xff]  ;;  %v19548_v15 = vld [vmem:[#allocation115_spill] sm:$0xff] }
 0x210   : > { %19539 = vst [vmem:[#allocation31_spill] sm:$0xff] %v12791_v19  ;;  %19543 = vst [vmem:[#allocation9_spill] sm:$0xff] %v12798_v10  ;;  %v2512_v46 = vsub.f32 %v2378_v43, %v19547_v8  ;;  %v2514_v25 = vsub.f32 %v2223_v23, %v19548_v15  ;;  %v12811_v61 = vadd.f32 %v12795_v48, %v12310_v40  ;;  %v19550_v34 = vld [vmem:[#allocation145_spill] sm:$0xff]  ;;  %v19552_v0 = vld [vmem:[#allocation151_spill] sm:$0xff]  ;;  %v2227_v43 = vpop.f32.mrb[94].mxu0 }
 0x211   : > { %19546 = vst [vmem:[#allocation42_spill] sm:$0xff] %v12805_v33  ;;  %v12815_v59 = vadd.f32 %v12798_v10, %v19550_v34  ;;  %8451 = vmatmul.mubr.f32.gmra.mrb[140].mxu0 %v19552_v0  ;;  %v19553_v53 = vld [vmem:[#allocation147_spill] sm:$0xff]  ;;  %v19554_v54 = vld [vmem:[#allocation146_spill] sm:$0xff]  ;;  %v2382_v33 = vpop.f32.mrb[92].mxu1  ;;  %v19556_v15 = vld [vmem:[#allocation149_spill] sm:$0xff]  ;;  %v2229_v22 = vpop.f32.mrb[95].mxu0 }
 0x212   : > { %19549 = vst [vmem:[#allocation46_spill] sm:$0xff] %v12811_v61  ;;  %v12819_v37 = vsub.f32 %v2513_v18, %v19553_v53  ;;  %v12822_v32 = vsub.f32 %v2511_v60, %v19554_v54  ;;  %v19555_v8 = vld [vmem:[#allocation158_spill] sm:$0xff]  ;;  %v2578_v23 = vsub.f32 %v2514_v25, %v19556_v15  ;;  %v19557_v40 = vld [vmem:[#allocation148_spill] sm:$0xff]  ;;  %v19560_v63 = vld [vmem:[#allocation103_spill] sm:$0xff] }
 0x213   : > { %19551 = vst [vmem:[#allocation20_spill] sm:$0xff] %v12815_v59  ;;  %8453 = vmatprep.mubr.f32.mxu0 %v19555_v8  ;;  %v12827_v61 = vsub.f32 %v2512_v46, %v19557_v40  ;;  %v19559_v19 = vld [vmem:[#allocation102_spill] sm:$0xff]  ;;  %v2384_v59 = vpop.f32.mrb[93].mxu1  ;;  %v2517_v45 = vsub.f32 %v2227_v43, %v19560_v63  ;;  %v19562_v60 = vld [vmem:[#allocation105_spill] sm:$0xff]  ;;  %v19563_v54 = vld [vmem:[#allocation104_spill] sm:$0xff] }
 0x214   : > { %v2515_v10 = vsub.f32 %v2382_v33, %v19559_v19  ;;  %8533 = vmatprep.mubr.f32.mxu1 %v12819_v37  ;;  %v12834_v18 = vadd.f32 %v12822_v32, %v19552_v0  ;;  %v2516_v53 = vsub.f32 %v2384_v59, %v19562_v60  ;;  %v2518_v24 = vsub.f32 %v2229_v22, %v19563_v54  ;;  %v19564_v46 = vld [vmem:[#allocation152_spill] sm:$0xff]  ;;  %v19565_v33 = vld [vmem:[#allocation85_spill] sm:$0xff]  ;;  %v19566_v63 = vld [vmem:[#allocation154_spill] sm:$0xff]  ;;  %v2388_v0 = vpop.f32.mrb[94].mxu1 }
 0x215   : > { %19558 = vst [vmem:[#allocation47_spill] sm:$0xff] %v12827_v61  ;;  %v12839_v25 = vadd.f32 %v2578_v23, %v12335_v2  ;;  %v12843_v19 = vadd.f32 %v12827_v61, %v19564_v46  ;;  %8454 = vmatmul.mubr.f32.gmra.mrb[142].mxu0 %v19565_v33  ;;  %v12847_v43 = vsub.f32 %v2517_v45, %v19566_v63  ;;  %v19567_v15 = vld [vmem:[#allocation153_spill] sm:$0xff]  ;;  %v19568_v59 = vld [vmem:[#allocation156_spill] sm:$0xff]  ;;  %v19569_v60 = vld [vmem:[#allocation155_spill] sm:$0xff]  ;;  %v2390_v61 = vpop.f32.mrb[95].mxu1 }
 0x216   : > { %19561 = vst [vmem:[#allocation92_spill] sm:$0xff] %v12834_v18  ;;  %v12850_v40 = vsub.f32 %v2515_v10, %v19567_v15  ;;  %8456 = vmatprep.mubr.f32.mxu0 %v19387_v1  ;;  %v2582_v22 = vsub.f32 %v2518_v24, %v19568_v59  ;;  %v12855_v2 = vsub.f32 %v2516_v53, %v19569_v60  ;;  %v19570_v54 = vld [vmem:[#allocation101_spill] sm:$0xff]  ;;  %v19571_v63 = vld [vmem:[#allocation108_spill] sm:$0xff]  ;;  %v19572_v24 = vld [vmem:[#allocation159_spill] sm:$0xff] }
 0x217   : > { %v2519_v18 = vsub.f32 %v2388_v0, %v19570_v54  ;;  %8534 = vmatmul.mubr.f32.gmra.mrb[110].mxu1 %v12847_v43  ;;  %v2520_v10 = vsub.f32 %v2390_v61, %v19571_v63  ;;  %v19573_v15 = vld [vmem:[#allocation160_spill] sm:$0xff]  ;;  %v19607_v63 = vld [vmem:[#allocation14_spill] sm:$0xff] }
 0x218   : > { %v12861_v45 = vadd.f32 %v12850_v40, %v19555_v8  ;;  %8536 = vmatprep.mubr.f32.mxu1 %v12388_v51  ;;  %v12866_v1 = vadd.f32 %v2582_v22, %v12360_v11  ;;  %v12870_v53 = vadd.f32 %v12855_v2, %v19572_v24  ;;  %v19574_v8 = vld [vmem:[#allocation113_spill] sm:$0xff]  ;;  %v19575_v51 = vld [vmem:[#allocation60_spill] sm:$0xff] }
 0x219   : > { %8457 = vmatmul.mubr.f32.gmra.mrb[144].mxu0 %v19401_v31  ;;  %v12874_v0 = vsub.f32 %v2519_v18, %v19573_v15  ;;  %v12878_v59 = vsub.f32 %v2520_v10, %v19574_v8  ;;  %v19577_v31 = vld [vmem:[#allocation134_spill] sm:$0xff]  ;;  %v19606_v60 = vld [vmem:[#allocation12_spill] sm:$0xff]  ;;  %v19608_v10 = vld [vmem:[#allocation143_spill] sm:$0xff] }
 0x21a   : > { %8459 = vmatprep.mubr.f32.mxu0 %v19414_v56  ;;  %v19610_v8 = vld [vmem:[#allocation59_spill] sm:$0xff] }
 0x21b   : > { %8537 = vmatmul.mubr.f32.gmra.mrb[112].mxu1 %v12408_v57  ;;  %v12883_v11 = vadd.f32 %v12874_v0, %v19565_v33  ;;  %v12888_v61 = vadd.f32 %v12878_v59, %v19575_v51  ;;  %v19576_v57 = vld [vmem:[#allocation111_spill] sm:$0xff] }
 0x21c   : > { %8539 = vmatprep.mubr.f32.mxu1 %v12441_v52  ;;  %v3355_v52 = vadd.f32 %v12384_v9, %v19576_v57  ;;  %v19612_v57 = vld [vmem:[#allocation150_spill] sm:$0xff] }
 0x21d   : > { %8460 = vmatmul.mubr.f32.gmra.mrb[146].mxu0 %v19427_v41  ;;  %v19580_v41 = vld [vmem:[#allocation133_spill] sm:$0xff] }
 0x21e   : > { %8462 = vmatprep.mubr.f32.mxu0 %v19440_v55  ;;  %v19581_v55 = vld [vmem:[#allocation40_spill] sm:$0xff] }
 0x21f   : > { %8540 = vmatmul.mubr.f32.gmra.mrb[114].mxu1 %v12474_v16  ;;  %v19578_v16 = vld [vmem:[#allocation109_spill] sm:$0xff] }
 0x220   : > { %8542 = vmatprep.mubr.f32.mxu1 %v12507_v36  ;;  %v3356_v56 = vadd.f32 %v19578_v16, %v19577_v31  ;;  %v19579_v36 = vld [vmem:[#allocation62_spill] sm:$0xff]  ;;  %v19613_v31 = vld [vmem:[#allocation157_spill] sm:$0xff] }
 0x221   : > { %8463 = vmatmul.mubr.f32.gmra.mrb[148].mxu0 %v19452_v38  ;;  %v19583_v38 = vld [vmem:[#allocation8_spill] sm:$0xff]  ;;  %v3370_v16 = vadd.f32 %v12847_v43, %v19613_v31  ;;  %v19620_v43 = vld [vmem:[#allocation53_spill] sm:$0xff] }
 0x222   : > { %8465 = vmatprep.mubr.f32.mxu0 %v19463_v47  ;;  %v3358_v9 = vadd.f32 %v12466_v14, %v19583_v38  ;;  %v19585_v47 = vld [vmem:[#allocation126_spill] sm:$0xff]  ;;  %v19665_v31 = vld [vmem:[#allocation32_spill] sm:$0xff] }
 0x223   : > { %8543 = vmatmul.mubr.f32.gmra.mrb[116].mxu1 %v12540_v35  ;;  %v3357_v35 = vadd.f32 %v12433_v6, %v19580_v41  ;;  %v19587_v6 = vld [vmem:[#allocation57_spill] sm:$0xff]  ;;  %v19591_v14 = vld [vmem:[#allocation110_spill] sm:$0xff] }
 0x224   : > { %8545 = vmatprep.mubr.f32.mxu1 %v12573_v50  ;;  %v19582_v50 = vld [vmem:[#allocation124_spill] sm:$0xff]  ;;  %v19617_v41 = vld [vmem:[#allocation122_spill] sm:$0xff] }
 0x225   : > { %8466 = vmatmul.mubr.f32.gmra.mrb[150].mxu0 %v19474_v28  ;;  %v19624_v38 = vld [vmem:[#allocation6_spill] sm:$0xff] }
 0x226   : > { %8468 = vmatprep.mubr.f32.mxu0 %v19486_v49 }
 0x227   : > { %8546 = vmatmul.mubr.f32.gmra.mrb[118].mxu1 %v12606_v30  ;;  %v19584_v30 = vld [vmem:[#allocation41_spill] sm:$0xff] }
 0x228   : > { %8548 = vmatprep.mubr.f32.mxu1 %v12639_v29  ;;  %v19586_v29 = vld [vmem:[#allocation49_spill] sm:$0xff] }
 0x229   : > { %8469 = vmatmul.mubr.f32.gmra.mrb[152].mxu0 %v19502_v42  ;;  %v3359_v28 = vadd.f32 %v12499_v39, %v19586_v29  ;;  %v19590_v42 = vld [vmem:[#allocation7_spill] sm:$0xff]  ;;  %v19629_v29 = vld [vmem:[#allocation66_spill] sm:$0xff] }
 0x22a   : > { %8471 = vmatprep.mubr.f32.mxu0 %v19518_v12  ;;  %v19592_v39 = vld [vmem:[#allocation11_spill] sm:$0xff] }
 0x22b   : > { %8549 = vmatmul.mubr.f32.gmra.mrb[120].mxu1 %v12671_v7  ;;  %v19588_v7 = vld [vmem:[#allocation75_spill] sm:$0xff]  ;;  %v3362_v12 = vadd.f32 %v12598_v20, %v19592_v39  ;;  %v19598_v20 = vld [vmem:[#allocation16_spill] sm:$0xff]  ;;  %v19638_v39 = vld [vmem:[#allocation37_spill] sm:$0xff] }
 0x22c   : > { %8551 = vmatprep.mubr.f32.mxu1 %v12702_v27  ;;  %v3360_v49 = vadd.f32 %v12532_v62, %v19588_v7  ;;  %v19589_v27 = vld [vmem:[#allocation44_spill] sm:$0xff]  ;;  %v19594_v62 = vld [vmem:[#allocation30_spill] sm:$0xff] }
 0x22d   : > { %8472 = vmatmul.mubr.f32.gmra.mrb[154].mxu0 %v19534_v3  ;;  %v3363_v3 = vadd.f32 %v12631_v5, %v19594_v62  ;;  %v19601_v5 = vld [vmem:[#allocation94_spill] sm:$0xff]  ;;  %v19632_v7 = vld [vmem:[#allocation76_spill] sm:$0xff]  ;;  %v19640_v62 = vld [vmem:[#allocation9_spill] sm:$0xff] }
 0x22e   : > { %8474 = vmatprep.mubr.f32.mxu0 %v19550_v34  ;;  %v19597_v34 = vld [vmem:[#allocation68_spill] sm:$0xff] }
 0x22f   : > { %8552 = vmatmul.mubr.f32.gmra.mrb[122].mxu1 %v12733_v44  ;;  %v3361_v44 = vadd.f32 %v12565_v26, %v19591_v14  ;;  %v19595_v26 = vld [vmem:[#allocation48_spill] sm:$0xff]  ;;  %v19636_v14 = vld [vmem:[#allocation135_spill] sm:$0xff] }
 0x230   : > { %8554 = vmatprep.mubr.f32.mxu1 %v12764_v4  ;;  %v19593_v4 = vld [vmem:[#allocation45_spill] sm:$0xff] }
 0x231   : > { %8475 = vmatmul.mubr.f32.gmra.mrb[156].mxu0 %v19564_v46  ;;  %v19602_v46 = vld [vmem:[#allocation130_spill] sm:$0xff] }
 0x232   : > { %8477 = vmatprep.mubr.f32.mxu0 %v19572_v24  ;;  %v3366_v33 = vadd.f32 %v19602_v46, %v19601_v5  ;;  %v19609_v24 = vld [vmem:[#allocation70_spill] sm:$0xff] }
 0x233   : > { %8555 = vmatmul.mubr.f32.gmra.mrb[124].mxu1 %v12795_v48  ;;  %v3364_v48 = vadd.f32 %v12664_v58, %v19595_v26  ;;  %v19605_v58 = vld [vmem:[#allocation117_spill] sm:$0xff]  ;;  %v3368_v15 = vadd.f32 %v19609_v24, %v19608_v10  ;;  %v19641_v26 = vld [vmem:[#allocation46_spill] sm:$0xff] }
 0x234   : > { %8557 = vmatprep.mubr.f32.mxu1 %v2578_v23  ;;  %v19599_v23 = vld [vmem:[#allocation89_spill] sm:$0xff]  ;;  %v3367_v54 = vadd.f32 %v19606_v60, %v19605_v58  ;;  %v19649_v46 = vld [vmem:[#allocation50_spill] sm:$0xff]  ;;  %v19654_v58 = vld [vmem:[#allocation100_spill] sm:$0xff] }
 0x235   : > { %8478 = vmatmul.mubr.f32.gmra.mrb[158].mxu0 %v19575_v51  ;;  %v3365_v18 = vadd.f32 %v19599_v23, %v19598_v20  ;;  %v19611_v51 = vld [vmem:[#allocation31_spill] sm:$0xff]  ;;  %v19644_v23 = vld [vmem:[#allocation125_spill] sm:$0xff] }
 0x236   : > { %8640 = vmatprep.mubr.f32.mxu0 %v3355_v52  ;;  %v3369_v52 = vadd.f32 %v12819_v37, %v19612_v57  ;;  %v19616_v37 = vld [vmem:[#allocation123_spill] sm:$0xff]  ;;  %v19655_v60 = vld [vmem:[#allocation33_spill] sm:$0xff] }
 0x237   : > { %8558 = vmatmul.mubr.f32.gmra.mrb[126].mxu1 %v2582_v22  ;;  %v19604_v22 = vld [vmem:[#allocation138_spill] sm:$0xff] }
 0x238   : > { %8560 = vmatprep.mubr.f32.mxu1 %v19579_v36  ;;  %v19615_v36 = vld [vmem:[#allocation106_spill] sm:$0xff] }
 0x239   : > { %8641 = vmatmul.mubr.f32.vlgmr.msra.gmra.mrb[160].mxu0 %v3356_v56  ;;  %v19614_v56 = vld [vmem:[#allocation56_spill] sm:$0xff] }
 0x23a   : > { %8643 = vmatprep.mubr.f32.mxu0 %v3357_v35  ;;  %9443 = vmatpush3.bf16.msra.mxu0 %v19581_v55  ;;  %v19618_v35 = vld [vmem:[#allocation27_spill] sm:$0xff]  ;;  %v19621_v55 = vld [vmem:[#allocation129_spill] sm:$0xff] }
 0x23b   : > { %8561 = vmatmul.mubr.f32.gmra.mrb[128].mxu1 %v19582_v50  ;;  %9445 = vmatprep.subr.bf16.mxu0 %v19584_v30  ;;  %v19623_v50 = vld [vmem:[#allocation3_spill] sm:$0xff] }
 0x23c   : > { %8563 = vmatprep.mubr.f32.mxu1 %v19585_v47  ;;  %v19628_v47 = vld [vmem:[#allocation54_spill] sm:$0xff] }
 0x23d   : > { %8644 = vmatmul.mubr.f32.gmra.mrb[162].mxu0 %v3358_v9  ;;  %v19625_v9 = vld [vmem:[#allocation64_spill] sm:$0xff] }
 0x23e   : > { %8646 = vmatprep.mubr.f32.mxu0 %v3359_v28  ;;  %9447 = vmatpush3.bf16.msra.mxu0 %v19584_v30  ;;  %v19627_v30 = vld [vmem:[#allocation43_spill] sm:$0xff] }
 0x23f   : > { %8564 = vmatmul.mubr.f32.gmra.mrb[130].mxu1 %v19587_v6  ;;  %9449 = vmatprep.subr.bf16.mxu0 %v19589_v27  ;;  %v19630_v28 = vld [vmem:[#allocation35_spill] sm:$0xff]  ;;  %v19631_v6 = vld [vmem:[#allocation65_spill] sm:$0xff] }
 0x240   : > { %8566 = vmatprep.mubr.f32.mxu1 %v19590_v42  ;;  %v19635_v42 = vld [vmem:[#allocation107_spill] sm:$0xff] }
 0x241   : > { %8647 = vmatmul.mubr.f32.gmra.mrb[164].mxu0 %v3360_v49  ;;  %v19633_v49 = vld [vmem:[#allocation86_spill] sm:$0xff] }
 0x242   : > { %8649 = vmatprep.mubr.f32.mxu0 %v3361_v44  ;;  %9451 = vmatpush3.bf16.msra.mxu0 %v19589_v27  ;;  %v19634_v27 = vld [vmem:[#allocation127_spill] sm:$0xff]  ;;  %v19637_v44 = vld [vmem:[#allocation137_spill] sm:$0xff] }
 0x243   : > { %8567 = vmatmul.mubr.f32.gmra.mrb[132].mxu1 %v12568_v13  ;;  %9453 = vmatprep.subr.bf16.mxu0 %v19593_v4  ;;  %v19596_v13 = vld [vmem:[#allocation79_spill] sm:$0xff] }
 0x244   : > { %8569 = vmatprep.mubr.f32.mxu1 %v12601_v21  ;;  %v19600_v21 = vld [vmem:[#allocation36_spill] sm:$0xff] }
 0x245   : > { %8650 = vmatmul.mubr.f32.gmra.mrb[166].mxu0 %v3362_v12  ;;  %v19639_v12 = vld [vmem:[#allocation28_spill] sm:$0xff] }
 0x246   : > { %8652 = vmatprep.mubr.f32.mxu0 %v3363_v3  ;;  %9455 = vmatpush3.bf16.msra.mxu0 %v19593_v4 }
 0x247   : > { %8570 = vmatmul.mubr.f32.gmra.mrb[134].mxu1 %v12634_v17  ;;  %9457 = vmatprep.subr.bf16.mxu0 %v19596_v13  ;;  %v19603_v17 = vld [vmem:[#allocation81_spill] sm:$0xff] }
 0x248   : > { %8572 = vmatprep.mubr.f32.mxu1 %v19597_v34 }
 0x249   : > { %8653 = vmatmul.mubr.f32.gmra.mrb[168].mxu0 %v3364_v48  ;;  %v19642_v48 = vld [vmem:[#allocation47_spill] sm:$0xff] }
 0x24a   : > { %8655 = vmatprep.mubr.f32.mxu0 %v3365_v18  ;;  %9459 = vmatpush3.bf16.msra.mxu0 %v19596_v13  ;;  %v19643_v13 = vld [vmem:[#allocation121_spill] sm:$0xff]  ;;  %v19645_v18 = vld [vmem:[#allocation131_spill] sm:$0xff] }
 0x24b   : > { %8573 = vmatmul.mubr.f32.gmra.mrb[136].mxu1 %v19600_v21  ;;  %9461 = vmatprep.subr.bf16.mxu0 %v19603_v17  ;;  %v19646_v21 = vld [vmem:[#allocation5_spill] sm:$0xff] }
 0x24c   : > { %8575 = vmatprep.mubr.f32.mxu1 %v19604_v22 }
 0x24d   : > { %8656 = vmatmul.mubr.f32.gmra.mrb[170].mxu0 %v3366_v33  ;;  %v19651_v33 = vld [vmem:[#allocation67_spill] sm:$0xff] }
 0x24e   : > { %8658 = vmatprep.mubr.f32.mxu0 %v3367_v54  ;;  %9463 = vmatpush3.bf16.msra.mxu0 %v19603_v17  ;;  %v19656_v54 = vld [vmem:[#allocation15_spill] sm:$0xff] }
 0x24f   : > { %8576 = vmatmul.mubr.f32.gmra.mrb[138].mxu1 %v19607_v63  ;;  %9465 = vmatprep.subr.bf16.mxu0 %v19610_v8  ;;  %v19657_v63 = vld [vmem:[#allocation42_spill] sm:$0xff] }
 0x250   : > { %8578 = vmatprep.mubr.f32.mxu1 %v19611_v51 }
 0x251   : > { %8659 = vmatmul.mubr.f32.gmra.mrb[172].mxu0 %v3368_v15  ;;  %v19660_v15 = vld [vmem:[#allocation92_spill] sm:$0xff] }
 0x252   : > { %8661 = vmatprep.mubr.f32.mxu0 %v3369_v52  ;;  %9467 = vmatpush3.bf16.msra.mxu0 %v19610_v8  ;;  %v19661_v8 = vld [vmem:[#allocation132_spill] sm:$0xff] }
 0x253   : > { %8579 = vmatmul.mubr.f32.gmra.mrb[140].mxu1 %v12822_v32  ;;  %9469 = vmatprep.subr.bf16.mxu0 %v19614_v56  ;;  %v19619_v32 = vld [vmem:[#allocation63_spill] sm:$0xff]  ;;  %v19664_v52 = vld [vmem:[#allocation128_spill] sm:$0xff] }
 0x254   : > { %8581 = vmatprep.mubr.f32.mxu1 %v12850_v40  ;;  %v19622_v40 = vld [vmem:[#allocation4_spill] sm:$0xff] }
 0x255   : > { %8662 = vmatmul.mubr.f32.gmra.mrb[174].mxu0 %v3370_v16  ;;  %v19666_v16 = vld [vmem:[#allocation58_spill] sm:$0xff] }
 0x256   : > { %8664 = vmatprep.mubr.f32.mxu0 %v19615_v36  ;;  %9471 = vmatpush3.bf16.msra.mxu0 %v19614_v56  ;;  %v19667_v56 = vld [vmem:[#allocation13_spill] sm:$0xff] }
 0x257   : > { %8582 = vmatmul.mubr.f32.gmra.mrb[142].mxu1 %v12874_v0  ;;  %v19626_v0 = vld [vmem:[#allocation34_spill] sm:$0xff] }
 0x258   : > { %8584 = vmatprep.mubr.f32.mxu1 %v19616_v37  ;;  %v19671_v37 = vld [vmem:[#allocation51_spill] sm:$0xff] }
 0x259   : > { %8665 = vmatmul.mubr.f32.gmra.mrb[176].mxu0 %v19617_v41  ;;  %v19672_v41 = vld [vmem:[#allocation61_spill] sm:$0xff] }
 0x25a   : > { %8667 = vmatprep.mubr.f32.mxu0 %v19618_v35  ;;  %v19673_v35 = vld [vmem:[#allocation99_spill] sm:$0xff] }
 0x25b   : > { %8585 = vmatmul.mubr.f32.gmra.mrb[144].mxu1 %v19619_v32 }
 0x25c   : > { %8587 = vmatprep.mubr.f32.mxu1 %v19620_v43 }
 0x25d   : > { %8668 = vmatmul.mubr.f32.gmra.mrb[178].mxu0 %v19621_v55  ;;  %v19676_v55 = vld [vmem:[#allocation69_spill] sm:$0xff] }
 0x25e   : > { %8670 = vmatprep.mubr.f32.mxu0 %v19622_v40  ;;  %v19677_v40 = vld [vmem:[#allocation136_spill] sm:$0xff] }
 0x25f   : > { %8588 = vmatmul.mubr.f32.gmra.mrb[146].mxu1 %v19623_v50 }
 0x260   : > { %8590 = vmatprep.mubr.f32.mxu1 %v19624_v38 }
 0x261   : > { %8671 = vmatmul.mubr.f32.gmra.mrb[180].mxu0 %v19625_v9  ;;  %v19678_v9 = vld [vmem:[#allocation29_spill] sm:$0xff] }
 0x262   : > { %8673 = vmatprep.mubr.f32.mxu0 %v19626_v0  ;;  %v19679_v0 = vld [vmem:[#allocation20_spill] sm:$0xff] }
 0x263   : > { %8591 = vmatmul.mubr.f32.gmra.mrb[148].mxu1 %v19627_v30 }
 0x264   : > { %8593 = vmatprep.mubr.f32.mxu1 %v19628_v47 }
 0x265   : > { %8674 = vmatmul.mubr.f32.gmra.mrb[182].mxu0 %v19629_v29  ;;  %v13093_v29 = vld [vmem:[%s13078_s29 + $0x8] sm:$0xff] }
 0x266   : > { %8676 = vmatprep.mubr.f32.mxu0 %v19630_v28 }
 0x267   : > { %8594 = vmatmul.mubr.f32.gmra.mrb[150].mxu1 %v19631_v6 }
 0x268   : > { %8596 = vmatprep.mubr.f32.mxu1 %v19632_v7 }
 0x269   : > { %8677 = vmatmul.mubr.f32.gmra.mrb[184].mxu0 %v19633_v49 }
 0x26a   : > { %8679 = vmatprep.mubr.f32.mxu0 %v19634_v27 }
 0x26b   : > { %8597 = vmatmul.mubr.f32.gmra.mrb[152].mxu1 %v19635_v42 }
 0x26c   : > { %8599 = vmatprep.mubr.f32.mxu1 %v19636_v14 }
 0x26d   : > { %8680 = vmatmul.mubr.f32.gmra.mrb[186].mxu0 %v19637_v44  ;;  %v13002_v4 = vpop.f32.mrb[96].mxu0  ;;  %v851_v44 = vld [vmem:[%s13090_s15 + $0x8] sm:$0xff] }
 0x26e   : > { %8682 = vmatprep.mubr.f32.mxu0 %v19638_v39  ;;  %v13005_v3 = vpop.f32.mrb[97].mxu0 }
 0x26f   : > { %8600 = vmatmul.mubr.f32.gmra.mrb[154].mxu1 %v19639_v12 }
 0x270   : > { %8602 = vmatprep.mubr.f32.mxu1 %v19640_v62 }
 0x271   : > { %8683 = vmatmul.mubr.f32.gmra.mrb[188].mxu0 %v19641_v26  ;;  %v656_v26 = vld [vmem:[%s17977_s11] sm:$0xff] }
 0x272   : > { %8685 = vmatprep.mubr.f32.mxu0 %v12839_v25  ;;  %v19647_v25 = vld [vmem:[#allocation10_spill] sm:$0xff] }
 0x273   : > { %8603 = vmatmul.mubr.f32.gmra.mrb[156].mxu1 %v19642_v48  ;;  %v657_v48 = vld [vmem:[%s17977_s11 + $0x8] sm:$0xff] }
 0x274   : > { %8605 = vmatprep.mubr.f32.mxu1 %v12855_v2 }
 0x275   : > { %8686 = vmatmul.mubr.f32.gmra.mrb[190].mxu0 %v12866_v1  ;;  %v13014_v34 = vpop.f32.mrb[98].mxu0  ;;  %v19648_v1 = vld [vmem:[#allocation39_spill] sm:$0xff] }
 0x276   : > { %8688 = vmatprep.mubr.f32.mxu0 %v19643_v13  ;;  %v13016_v20 = vpop.f32.mrb[99].mxu0 }
 0x277   : > { %8606 = vmatmul.mubr.f32.gmra.mrb[158].mxu1 %v12878_v59  ;;  %v19650_v59 = vld [vmem:[#allocation55_spill] sm:$0xff] }
 0x279   : > { %8689 = vmatmul.mubr.f32.gmra.mrb[192].mxu0 %v19644_v23  ;;  %v9472_v23 = vpack.c.bf16 %v657_v48, %v656_v26  ;;  %v854_v48 = vld [vmem:[%s13090_s15 + $0x20] sm:$0xff] }
 0x27a   : > { %8691 = vmatprep.mubr.f32.mxu0 %v19645_v18 }
 0x27b   : > { %9473 = vmatprep.subr.bf16.mxu1 %v9472_v23 }
 0x27d   : > { %8692 = vmatmul.mubr.f32.gmra.mrb[194].mxu0 %v19646_v21  ;;  %v13022_v5 = vpop.f32.mrb[100].mxu0  ;;  %v13134_v21 = vld [vmem:[%s13078_s29 + $0x18] sm:$0xff] }
 0x27e   : > { %8694 = vmatprep.mubr.f32.mxu0 %v19647_v25  ;;  %v13024_v2 = vpop.f32.mrb[101].mxu0 }
 0x281   : > { %8695 = vmatmul.mubr.f32.gmra.mrb[196].mxu0 %v19648_v1 }
 0x282   : > { %8697 = vmatprep.mubr.f32.mxu0 %v19649_v46  ;;  %v13142_v46 = vld [vmem:[%s13078_s29 + $0x10] sm:$0xff] }
 0x285   : > { %8698 = vmatmul.mubr.f32.gmra.mrb[198].mxu0 %v19650_v59  ;;  %v13030_v17 = vpop.f32.mrb[102].mxu0 }
 0x286   : > { %8700 = vmatprep.mubr.f32.mxu0 %v19651_v33  ;;  %19652 = vst [vmem:[#allocation18_spill] sm:$0xff] %v13030_v17  ;;  %v13032_v22 = vpop.f32.mrb[103].mxu0 }
 0x287   : > { %19653 = vst [vmem:[#allocation52_spill] sm:$0xff] %v13032_v22 }
 0x289   : > { %8701 = vmatmul.mubr.f32.gmra.mrb[200].mxu0 %v19654_v58  ;;  %v658_v58 = vld [vmem:[%s17977_s11 + $0x10] sm:$0xff] }
 0x28a   : > { %8703 = vmatprep.mubr.f32.mxu0 %v19655_v60  ;;  %v659_v60 = vld [vmem:[%s17977_s11 + $0x18] sm:$0xff] }
 0x28d   : > { %8704 = vmatmul.mubr.f32.gmra.mrb[202].mxu0 %v19656_v54  ;;  %v13038_v10 = vpop.f32.mrb[104].mxu0 }
 0x28e   : > { %8706 = vmatprep.mubr.f32.mxu0 %v19657_v63  ;;  %19658 = vst [vmem:[#allocation71_spill] sm:$0xff] %v13038_v10  ;;  %v13040_v24 = vpop.f32.mrb[105].mxu0  ;;  %v852_v63 = vld [vmem:[%s13090_s15 + $0x10] sm:$0xff] }
 0x28f   : > { %19659 = vst [vmem:[#allocation21_spill] sm:$0xff] %v13040_v24 }
 0x291   : > { %8707 = vmatmul.mubr.f32.gmra.mrb[204].mxu0 %v19660_v15 }
 0x292   : > { %8709 = vmatprep.mubr.f32.mxu0 %v12861_v45 }
 0x295   : > { %8710 = vmatmul.mubr.f32.gmra.mrb[206].mxu0 %v12883_v11  ;;  %v13046_v51 = vpop.f32.mrb[106].mxu0  ;;  %v19670_v11 = vld [vmem:[#allocation38_spill] sm:$0xff] }
 0x296   : > { %8712 = vmatprep.mubr.f32.mxu0 %v19661_v8  ;;  %19662 = vst [vmem:[#allocation72_spill] sm:$0xff] %v13046_v51  ;;  %v13048_v57 = vpop.f32.mrb[107].mxu0  ;;  %v9476_v8 = vpack.c.bf16 %v659_v60, %v658_v58  ;;  %v855_v58 = vld [vmem:[%s13090_s15 + $0x28] sm:$0xff] }
 0x297   : > { %19663 = vst [vmem:[#allocation19_spill] sm:$0xff] %v13048_v57 }
 0x299   : > { %8713 = vmatmul.mubr.f32.gmra.mrb[208].mxu0 %v19664_v52 }
 0x29a   : > { %8715 = vmatprep.mubr.f32.mxu0 %v19665_v31  ;;  %v853_v31 = vld [vmem:[%s13090_s15 + $0x18] sm:$0xff] }
 0x29d   : > { %8716 = vmatmul.mubr.f32.gmra.mrb[210].mxu0 %v19666_v16  ;;  %v13054_v36 = vpop.f32.mrb[108].mxu0 }
 0x29e   : > { %8718 = vmatprep.mubr.f32.mxu0 %v19667_v56  ;;  %19668 = vst [vmem:[#allocation97_spill] sm:$0xff] %v13054_v36  ;;  %v13056_v45 = vpop.f32.mrb[109].mxu0 }
 0x29f   : > { %19669 = vst [vmem:[#allocation95_spill] sm:$0xff] %v13056_v45 }
 0x2a1   : > { %8719 = vmatmul.mubr.f32.gmra.mrb[212].mxu0 %v19670_v11  ;;  %v660_v11 = vld [vmem:[%s17977_s11 + $0x20] sm:$0xff] }
 0x2a2   : > { %8721 = vmatprep.mubr.f32.mxu0 %v19671_v37  ;;  %v661_v37 = vld [vmem:[%s17977_s11 + $0x28] sm:$0xff] }
 0x2a5   : > { %8722 = vmatmul.mubr.f32.gmra.mrb[214].mxu0 %v19672_v41  ;;  %v13062_v32 = vpop.f32.mrb[110].mxu0 }
 0x2a6   : > { %8724 = vmatprep.mubr.f32.mxu0 %v19673_v35  ;;  %19674 = vst [vmem:[#allocation73_spill] sm:$0xff] %v13062_v32  ;;  %v13064_v43 = vpop.f32.mrb[111].mxu0 }
 0x2a7   : > { %19675 = vst [vmem:[#allocation82_spill] sm:$0xff] %v13064_v43 }
 0x2a9   : > { %8725 = vmatmul.mubr.f32.gmra.mrb[216].mxu0 %v19676_v55  ;;  %v13068_v50 = vpop.f32.mrb[112].mxu0  ;;  %v9480_v55 = vpack.c.bf16 %v661_v37, %v660_v11 }
 0x2aa   : > { %8727 = vmatprep.mubr.f32.mxu0 %v19677_v40  ;;  %v13071_v38 = vpop.f32.mrb[113].mxu0 }
 0x2ad   : > { %8728 = vmatmul.mubr.f32.gmra.mrb[218].mxu0 %v19678_v9  ;;  %v13080_v30 = vpop.f32.mrb[114].mxu0  ;;  %v13178_v9 = vld [vmem:[%s13078_s29 + $0x28] sm:$0xff] }
 0x2ae   : > { %8730 = vmatprep.mubr.f32.mxu0 %v19679_v0  ;;  %v13082_v47 = vpop.f32.mrb[115].mxu0 }
 0x2af   : > { %v13095_v28 = vpop.f32.mrb[96].mxu1 }
 0x2b0   : > { %v3805_v6 = vsub.f32 %v13002_v4, %v13095_v28  ;;  %v13100_v7 = vpop.f32.mrb[97].mxu1 }
 0x2b1   : > { %8731 = vmatmul.mubr.f32.gmra.mrb[220].mxu0 %v12843_v19  ;;  %v13103_v19 = vld [vmem:[%s13078_s29] sm:$0xff]  ;;  %v3804_v49 = vsub.f32 %v13005_v3, %v13100_v7  ;;  %v13107_v27 = vpop.f32.mrb[116].mxu0 }
 0x2b2   : > { %8733 = vmatprep.mubr.f32.mxu0 %v12870_v53  ;;  %v3997_v42 = vmul.f32 %v3805_v6, %v13093_v29  ;;  %v13110_v14 = vpop.f32.mrb[117].mxu0  ;;  %v850_v53 = vld [vmem:[%s13090_s15] sm:$0xff] }
 0x2b3   : > { %v3996_v39 = vmul.f32 %v3804_v49, %v13103_v19  ;;  %v13186_v49 = vld [vmem:[%s13078_s29 + $0x20] sm:$0xff] }
 0x2b4   : > { %v13126_v13 = vsub.f32 %v3997_v42, %v851_v44  ;;  %v662_v44 = vld [vmem:[%s17977_s11 + $0x30] sm:$0xff] }
 0x2b5   : > { %8734 = vmatmul.mubr.f32.gmra.mrb[222].mxu0 %v12888_v61  ;;  %v13116_v12 = vpop.f32.mrb[118].mxu0  ;;  %v13118_v62 = vsub.f32 %v3996_v39, %v850_v53  ;;  %v663_v39 = vld [vmem:[%s17977_s11 + $0x38] sm:$0xff] }
 0x2b6   : > { %19681 = vst [vmem:[#allocation22_spill] sm:$0xff] %v13126_v13  ;;  %v13128_v61 = vpop.f32.mrb[119].mxu0 }
 0x2b7   : > { %19680 = vst [vmem:[#allocation80_spill] sm:$0xff] %v13118_v62  ;;  %v13130_v18 = vpop.f32.mrb[98].mxu1  ;;  %8768 = vmatprep.mubr.f32.mxu1 %v13118_v62  ;;  %v13274_v62 = vld [vmem:[%s13078_s29 + $0x40] sm:$0xff] }
 0x2b8   : > { %v3807_v25 = vsub.f32 %v13014_v34, %v13130_v18  ;;  %v13138_v1 = vpop.f32.mrb[99].mxu1  ;;  %8769 = vmatmul.mubr.f32.vlgmr.msra.gmra.mrb[160].mxu1 %v13126_v13  ;;  %v669_v13 = vld [vmem:[%s17977_s11 + $0x68] sm:$0xff] }
 0x2b9   : > { %v3806_v59 = vsub.f32 %v13016_v20, %v13138_v1  ;;  %v13146_v33 = vpop.f32.mrb[120].mxu0  ;;  %9475 = vmatpush3.bf16.msra.mxu1 %v9472_v23 }
 0x2ba   : > { %v13154_v54 = vpop.f32.mrb[121].mxu0  ;;  %v3999_v15 = vmul.f32 %v3807_v25, %v13134_v21  ;;  %9477 = vmatprep.subr.bf16.mxu1 %v9476_v8  ;;  %v9484_v25 = vpack.c.bf16 %v663_v39, %v662_v44  ;;  %v13230_v44 = vld [vmem:[%s13078_s29 + $0x30] sm:$0xff] }
 0x2bb   : > { %v3998_v52 = vmul.f32 %v3806_v59, %v13142_v46 }
 0x2bc   : > { %v13172_v35 = vsub.f32 %v3999_v15, %v853_v31  ;;  %v664_v15 = vld [vmem:[%s17977_s11 + $0x40] sm:$0xff] }
 0x2bd   : > { %v13160_v16 = vpop.f32.mrb[122].mxu0  ;;  %v13162_v56 = vsub.f32 %v3998_v52, %v852_v63  ;;  %9479 = vmatpush3.bf16.msra.mxu1 %v9476_v8  ;;  %v665_v8 = vld [vmem:[%s17977_s11 + $0x48] sm:$0xff] }
 0x2be   : > { %v13170_v41 = vpop.f32.mrb[123].mxu0  ;;  %19683 = vst [vmem:[#allocation74_spill] sm:$0xff] %v13172_v35  ;;  %9481 = vmatprep.subr.bf16.mxu1 %v9480_v55  ;;  %v9488_v11 = vpack.c.bf16 %v665_v8, %v664_v15 }
 0x2bf   : > { %19682 = vst [vmem:[#allocation17_spill] sm:$0xff] %v13162_v56  ;;  %8771 = vmatprep.mubr.f32.mxu1 %v13162_v56  ;;  %v668_v56 = vld [vmem:[%s17977_s11 + $0x60] sm:$0xff] }
 0x2c0   : > { %v13174_v40 = vpop.f32.mrb[100].mxu1  ;;  %8772 = vmatmul.mubr.f32.gmra.mrb[162].mxu1 %v13172_v35 }
 0x2c1   : > { %v3809_v0 = vsub.f32 %v13022_v5, %v13174_v40  ;;  %v13182_v6 = vpop.f32.mrb[101].mxu1  ;;  %v13190_v53 = vpop.f32.mrb[124].mxu0  ;;  %9483 = vmatpush3.bf16.msra.mxu1 %v9480_v55  ;;  %v13222_v55 = vld [vmem:[%s13078_s29 + $0x38] sm:$0xff] }
 0x2c2   : > { %v3808_v42 = vsub.f32 %v13024_v2, %v13182_v6  ;;  %19684 = vst [vmem:[#allocation23_spill] sm:$0xff] %v13190_v53  ;;  %v13198_v26 = vpop.f32.mrb[125].mxu0  ;;  %9485 = vmatprep.subr.bf16.mxu1 %v9484_v25 }
 0x2c3   : > { %v4001_v23 = vmul.f32 %v3809_v0, %v13178_v9 }
 0x2c4   : > { %v4000_v59 = vmul.f32 %v3808_v42, %v13186_v49 }
 0x2c5   : > { %v13204_v60 = vpop.f32.mrb[126].mxu0  ;;  %9487 = vmatpush3.bf16.msra.mxu1 %v9484_v25  ;;  %v13216_v31 = vsub.f32 %v4001_v23, %v855_v58  ;;  %v666_v23 = vld [vmem:[%s17977_s11 + $0x50] sm:$0xff]  ;;  %v667_v25 = vld [vmem:[%s17977_s11 + $0x58] sm:$0xff] }
 0x2c6   : > { %19685 = vst [vmem:[#allocation93_spill] sm:$0xff] %v13204_v60  ;;  %v13206_v63 = vsub.f32 %v4000_v59, %v854_v48  ;;  %v13214_v52 = vpop.f32.mrb[127].mxu0  ;;  %9489 = vmatprep.subr.bf16.mxu1 %v9488_v11  ;;  %v856_v58 = vld [vmem:[%s13090_s15 + $0x30] sm:$0xff]  ;;  %v9492_v8 = vpack.c.bf16 %v667_v25, %v666_v23 }
 0x2c7   : > { %19687 = vst [vmem:[#allocation77_spill] sm:$0xff] %v13216_v31  ;;  %v13218_v37 = vpop.f32.mrb[102].mxu1 }
 0x2c8   : > { %19686 = vst [vmem:[#allocation83_spill] sm:$0xff] %v13206_v63  ;;  %19688 = vst [vmem:[#allocation24_spill] sm:$0xff] %v13218_v37  ;;  %8774 = vmatprep.mubr.f32.mxu1 %v13206_v63  ;;  %v3811_v0 = vsub.f32 %v13030_v17, %v13218_v37  ;;  %v13226_v42 = vpop.f32.mrb[103].mxu1  ;;  %v857_v63 = vld [vmem:[%s13090_s15 + $0x38] sm:$0xff] }
 0x2c9   : > { %19689 = vst [vmem:[#allocation84_spill] sm:$0xff] %v13226_v42  ;;  %8775 = vmatmul.mubr.f32.gmra.mrb[164].mxu1 %v13216_v31  ;;  %v3810_v39 = vsub.f32 %v13032_v22, %v13226_v42  ;;  %v13234_v48 = vpop.f32.mrb[128].mxu0 }
 0x2ca   : > { %9491 = vmatpush3.bf16.msra.mxu1 %v9488_v11  ;;  %v13242_v59 = vpop.f32.mrb[129].mxu0  ;;  %v4003_v15 = vmul.f32 %v3811_v0, %v13222_v55 }
 0x2cb   : > { %v4002_v31 = vmul.f32 %v3810_v39, %v13230_v44  ;;  %9493 = vmatprep.subr.bf16.mxu1 %v9492_v8  ;;  %v9496_v39 = vpack.c.bf16 %v669_v13, %v668_v56 }
 0x2cc   : > { %v13260_v23 = vsub.f32 %v4003_v15, %v857_v63  ;;  %v670_v63 = vld [vmem:[%s17977_s11 + $0x70] sm:$0xff]  ;;  %v671_v15 = vld [vmem:[%s17977_s11 + $0x78] sm:$0xff] }
 0x2cd   : > { %v13248_v11 = vpop.f32.mrb[130].mxu0  ;;  %v13250_v35 = vsub.f32 %v4002_v31, %v856_v58  ;;  %v13266_v31 = vld [vmem:[%s13078_s29 + $0x48] sm:$0xff] }
 0x2ce   : > { %9495 = vmatpush3.bf16.msra.mxu1 %v9492_v8  ;;  %v13258_v0 = vpop.f32.mrb[131].mxu0  ;;  %19691 = vst [vmem:[#allocation96_spill] sm:$0xff] %v13260_v23 }
 0x2cf   : > { %19690 = vst [vmem:[#allocation78_spill] sm:$0xff] %v13250_v35  ;;  %v13262_v25 = vpop.f32.mrb[104].mxu1  ;;  %8777 = vmatprep.mubr.f32.mxu1 %v13250_v35  ;;  %9497 = vmatprep.subr.bf16.mxu1 %v9496_v39 }
 0x2d0   : > { %19692 = vst [vmem:[#allocation98_spill] sm:$0xff] %v13262_v25  ;;  %v3813_v58 = vsub.f32 %v13038_v10, %v13262_v25  ;;  %v13270_v8 = vpop.f32.mrb[105].mxu1  ;;  %8778 = vmatmul.mubr.f32.gmra.mrb[166].mxu1 %v13260_v23  ;;  %v858_v23 = vld [vmem:[%s13090_s15 + $0x40] sm:$0xff]  ;;  %v9500_v10 = vpack.c.bf16 %v671_v15, %v670_v63 }
 0x2d1   : > { %19693 = vst [vmem:[#allocation25_spill] sm:$0xff] %v13270_v8  ;;  %v3812_v13 = vsub.f32 %v13040_v24, %v13270_v8  ;;  %v13278_v56 = vpop.f32.mrb[132].mxu0  ;;  %v859_v24 = vld [vmem:[%s13090_s15 + $0x48] sm:$0xff] }
 0x2d2   : > { %9499 = vmatpush3.bf16.msra.mxu1 %v9496_v39  ;;  %v13286_v35 = vpop.f32.mrb[133].mxu0  ;;  %v4005_v25 = vmul.f32 %v3813_v58, %v13266_v31  ;;  %v13304_v58 = vld [vmem:[%s13078_s29 + $0x58] sm:$0xff] }
 0x2d3   : > { %19694 = vst [vmem:[#allocation116_spill] sm:$0xff] %v13286_v35  ;;  %v4004_v8 = vmul.f32 %v3812_v13, %v13274_v62  ;;  %9501 = vmatprep.subr.bf16.mxu1 %v9500_v10 }
 0x2d4   : > { %v13298_v22 = vsub.f32 %v4005_v25, %v859_v24 }
 0x2d5   : > { %v13292_v39 = vpop.f32.mrb[134].mxu0  ;;  %v13294_v42 = vsub.f32 %v4004_v8, %v858_v23  ;;  %v860_v8 = vld [vmem:[%s13090_s15 + $0x50] sm:$0xff] }
 0x2d6   : > { %19695 = vst [vmem:[#allocation26_spill] sm:$0xff] %v13292_v39  ;;  %9503 = vmatpush3.bf16.msra.mxu1 %v9500_v10  ;;  %v13296_v37 = vpop.f32.mrb[135].mxu0  ;;  %19698 = vst [vmem:[#allocation119_spill] sm:$0xff] %v13298_v22  ;;  %v13312_v10 = vld [vmem:[%s13078_s29 + $0x50] sm:$0xff]  ;;  %v866_v39 = vld [vmem:[%s13090_s15 + $0x80] sm:$0xff] }
 0x2d7   : > { %19696 = vst [vmem:[#allocation88_spill] sm:$0xff] %v13294_v42  ;;  %19697 = vst [vmem:[#allocation87_spill] sm:$0xff] %v13296_v37  ;;  %8780 = vmatprep.mubr.f32.mxu1 %v13294_v42 }
 0x2d8   : > { %8781 = vmatmul.mubr.f32.gmra.mrb[168].mxu1 %v13298_v22 }
 0x2d9   : > { %v13316_v23 = vpop.f32.mrb[136].mxu0 }
 0x2da   : > { %v13300_v17 = vpop.f32.mrb[106].mxu1  ;;  %19701 = vst [vmem:[#allocation120_spill] sm:$0xff] %v13316_v23  ;;  %v13318_v25 = vpop.f32.mrb[137].mxu0 }
 0x2db   : > { %19699 = vst [vmem:[#allocation91_spill] sm:$0xff] %v13300_v17  ;;  %v3815_v13 = vsub.f32 %v13046_v51, %v13300_v17  ;;  %v13308_v63 = vpop.f32.mrb[107].mxu1  ;;  %19702 = vst [vmem:[#allocation140_spill] sm:$0xff] %v13318_v25  ;;  %v861_v17 = vld [vmem:[%s13090_s15 + $0x58] sm:$0xff]  ;;  %v13336_v25 = vld [vmem:[%s13078_s29 + $0x68] sm:$0xff] }
 0x2dc   : > { %19700 = vst [vmem:[#allocation90_spill] sm:$0xff] %v13308_v63  ;;  %v3814_v24 = vsub.f32 %v13048_v57, %v13308_v63 }
 0x2dd   : > { %v4007_v15 = vmul.f32 %v3815_v13, %v13304_v58 }
 0x2de   : > { %v4006_v42 = vmul.f32 %v3814_v24, %v13312_v10  ;;  %v13324_v51 = vpop.f32.mrb[138].mxu0 }
 0x2df   : > { %19703 = vst [vmem:[#allocation139_spill] sm:$0xff] %v13324_v51  ;;  %v13328_v37 = vpop.f32.mrb[139].mxu0  ;;  %v13330_v63 = vsub.f32 %v4007_v15, %v861_v17 }
 0x2e0   : > { %v13326_v22 = vsub.f32 %v4006_v42, %v860_v8  ;;  %19705 = vst [vmem:[#allocation142_spill] sm:$0xff] %v13328_v37  ;;  %v13344_v42 = vld [vmem:[%s13078_s29 + $0x60] sm:$0xff] }
 0x2e1   : > { %19706 = vst [vmem:[#allocation141_spill] sm:$0xff] %v13330_v63 }
 0x2e2   : > { %19704 = vst [vmem:[#allocation144_spill] sm:$0xff] %v13326_v22  ;;  %v13332_v57 = vpop.f32.mrb[108].mxu1  ;;  %8783 = vmatprep.mubr.f32.mxu1 %v13326_v22  ;;  %v862_v22 = vld [vmem:[%s13090_s15 + $0x60] sm:$0xff] }
 0x2e3   : > { %19707 = vst [vmem:[#allocation114_spill] sm:$0xff] %v13332_v57  ;;  %v3817_v13 = vsub.f32 %v13054_v36, %v13332_v57  ;;  %v13340_v24 = vpop.f32.mrb[109].mxu1  ;;  %8784 = vmatmul.mubr.f32.gmra.mrb[170].mxu1 %v13330_v63  ;;  %v863_v36 = vld [vmem:[%s13090_s15 + $0x68] sm:$0xff] }
 0x2e4   : > { %19708 = vst [vmem:[#allocation112_spill] sm:$0xff] %v13340_v24  ;;  %v3816_v17 = vsub.f32 %v13056_v45, %v13340_v24  ;;  %v13348_v8 = vpop.f32.mrb[140].mxu0 }
 0x2e5   : > { %19709 = vst [vmem:[#allocation118_spill] sm:$0xff] %v13348_v8  ;;  %v13350_v15 = vpop.f32.mrb[141].mxu0  ;;  %v4009_v37 = vmul.f32 %v3817_v13, %v13336_v25 }
 0x2e6   : > { %19710 = vst [vmem:[#allocation115_spill] sm:$0xff] %v13350_v15  ;;  %v4008_v57 = vmul.f32 %v3816_v17, %v13344_v42  ;;  %v13368_v15 = vld [vmem:[%s13078_s29 + $0x78] sm:$0xff] }
 0x2e7   : > { %v13362_v24 = vsub.f32 %v4009_v37, %v863_v36 }
 0x2e8   : > { %v13356_v51 = vpop.f32.mrb[142].mxu0  ;;  %v13358_v63 = vsub.f32 %v4008_v57, %v862_v22  ;;  %v13376_v22 = vld [vmem:[%s13078_s29 + $0x70] sm:$0xff] }
 0x2e9   : > { %19711 = vst [vmem:[#allocation145_spill] sm:$0xff] %v13356_v51  ;;  %v13360_v23 = vpop.f32.mrb[143].mxu0  ;;  %19714 = vst [vmem:[#allocation146_spill] sm:$0xff] %v13362_v24 }
 0x2ea   : > { %19712 = vst [vmem:[#allocation151_spill] sm:$0xff] %v13358_v63  ;;  %19713 = vst [vmem:[#allocation147_spill] sm:$0xff] %v13360_v23  ;;  %v13364_v8 = vpop.f32.mrb[110].mxu1  ;;  %8786 = vmatprep.mubr.f32.mxu1 %v13358_v63  ;;  %v864_v63 = vld [vmem:[%s13090_s15 + $0x70] sm:$0xff] }
 0x2eb   : > { %19715 = vst [vmem:[#allocation158_spill] sm:$0xff] %v13364_v8  ;;  %v3819_v13 = vsub.f32 %v13062_v32, %v13364_v8  ;;  %v13372_v17 = vpop.f32.mrb[111].mxu1  ;;  %8787 = vmatmul.mubr.f32.gmra.mrb[172].mxu1 %v13362_v24  ;;  %v865_v32 = vld [vmem:[%s13090_s15 + $0x78] sm:$0xff] }
 0x2ec   : > { %19716 = vst [vmem:[#allocation149_spill] sm:$0xff] %v13372_v17  ;;  %v3818_v57 = vsub.f32 %v13064_v43, %v13372_v17  ;;  %v13380_v36 = vpop.f32.mrb[144].mxu0 }
 0x2ed   : > { %19717 = vst [vmem:[#allocation148_spill] sm:$0xff] %v13380_v36  ;;  %v13382_v37 = vpop.f32.mrb[145].mxu0  ;;  %v4011_v23 = vmul.f32 %v3819_v13, %v13368_v15 }
 0x2ee   : > { %19718 = vst [vmem:[#allocation102_spill] sm:$0xff] %v13382_v37  ;;  %v13386_v51 = vpop.f32.mrb[112].mxu1  ;;  %v4010_v8 = vmul.f32 %v3818_v57, %v13376_v22 }
 0x2ef   : > { %19719 = vst [vmem:[#allocation103_spill] sm:$0xff] %v13386_v51  ;;  %v3821_v24 = vsub.f32 %v13068_v50, %v13386_v51  ;;  %v13392_v45 = vpop.f32.mrb[113].mxu1  ;;  %v13402_v13 = vsub.f32 %v4011_v23, %v865_v32 }
 0x2f0   : > { %19720 = vst [vmem:[#allocation105_spill] sm:$0xff] %v13392_v45  ;;  %v3820_v17 = vsub.f32 %v13071_v38, %v13392_v45  ;;  %v13396_v36 = vpop.f32.mrb[146].mxu0  ;;  %v13398_v37 = vsub.f32 %v4010_v8, %v864_v63  ;;  %v867_v45 = vld [vmem:[%s13090_s15 + $0x88] sm:$0xff] }
 0x2f1   : > { %19721 = vst [vmem:[#allocation104_spill] sm:$0xff] %v13396_v36  ;;  %v13400_v43 = vpop.f32.mrb[147].mxu0  ;;  %19724 = vst [vmem:[#allocation154_spill] sm:$0xff] %v13402_v13  ;;  %v4013_v57 = vmul.f32 %v3821_v24, %v13093_v29 }
 0x2f2   : > { %19722 = vst [vmem:[#allocation152_spill] sm:$0xff] %v13398_v37  ;;  %19723 = vst [vmem:[#allocation85_spill] sm:$0xff] %v13400_v43  ;;  %v13406_v35 = vpop.f32.mrb[114].mxu1  ;;  %8789 = vmatprep.mubr.f32.mxu1 %v13398_v37  ;;  %v4012_v51 = vmul.f32 %v3820_v17, %v13103_v19  ;;  %v868_v17 = vld [vmem:[%s13090_s15 + $0x90] sm:$0xff] }
 0x2f3   : > { %19725 = vst [vmem:[#allocation153_spill] sm:$0xff] %v13406_v35  ;;  %v3823_v63 = vsub.f32 %v13080_v30, %v13406_v35  ;;  %v13413_v8 = vpop.f32.mrb[115].mxu1  ;;  %8790 = vmatmul.mubr.f32.gmra.mrb[174].mxu1 %v13402_v13  ;;  %v13424_v37 = vsub.f32 %v4013_v57, %v867_v45 }
 0x2f4   : > { %19726 = vst [vmem:[#allocation156_spill] sm:$0xff] %v13413_v8  ;;  %v3822_v32 = vsub.f32 %v13082_v47, %v13413_v8  ;;  %v13418_v23 = vpop.f32.mrb[148].mxu0  ;;  %v13420_v24 = vsub.f32 %v4012_v51, %v866_v39  ;;  %v869_v8 = vld [vmem:[%s13090_s15 + $0x98] sm:$0xff] }
 0x2f5   : > { %19727 = vst [vmem:[#allocation155_spill] sm:$0xff] %v13418_v23  ;;  %v13422_v43 = vpop.f32.mrb[149].mxu0  ;;  %19730 = vst [vmem:[#allocation159_spill] sm:$0xff] %v13424_v37  ;;  %v4015_v36 = vmul.f32 %v3823_v63, %v13134_v21 }
 0x2f6   : > { %19728 = vst [vmem:[#allocation101_spill] sm:$0xff] %v13420_v24  ;;  %19729 = vst [vmem:[#allocation108_spill] sm:$0xff] %v13422_v43  ;;  %v13428_v35 = vpop.f32.mrb[116].mxu1  ;;  %8792 = vmatprep.mubr.f32.mxu1 %v13420_v24  ;;  %v4014_v13 = vmul.f32 %v3822_v32, %v13142_v46  ;;  %v870_v32 = vld [vmem:[%s13090_s15 + $0xa0] sm:$0xff] }
 0x2f7   : > { %19731 = vst [vmem:[#allocation160_spill] sm:$0xff] %v13428_v35  ;;  %v3825_v51 = vsub.f32 %v13107_v27, %v13428_v35  ;;  %v13435_v39 = vpop.f32.mrb[117].mxu1  ;;  %8793 = vmatmul.mubr.f32.gmra.mrb[176].mxu1 %v13424_v37  ;;  %v13446_v24 = vsub.f32 %v4015_v36, %v869_v8 }
 0x2f8   : > { %19732 = vst [vmem:[#allocation113_spill] sm:$0xff] %v13435_v39  ;;  %v3824_v45 = vsub.f32 %v13110_v14, %v13435_v39  ;;  %v13440_v57 = vpop.f32.mrb[150].mxu0  ;;  %v13442_v63 = vsub.f32 %v4014_v13, %v868_v17  ;;  %v871_v39 = vld [vmem:[%s13090_s15 + $0xa8] sm:$0xff] }
 0x2f9   : > { %19733 = vst [vmem:[#allocation60_spill] sm:$0xff] %v13440_v57  ;;  %v13444_v43 = vpop.f32.mrb[151].mxu0  ;;  %19736 = vst [vmem:[#allocation109_spill] sm:$0xff] %v13446_v24  ;;  %v4017_v23 = vmul.f32 %v3825_v51, %v13178_v9 }
 0x2fa   : > { %19734 = vst [vmem:[#allocation111_spill] sm:$0xff] %v13442_v63  ;;  %19735 = vst [vmem:[#allocation134_spill] sm:$0xff] %v13444_v43  ;;  %v13450_v35 = vpop.f32.mrb[118].mxu1  ;;  %8795 = vmatprep.mubr.f32.mxu1 %v13442_v63  ;;  %v4016_v37 = vmul.f32 %v3824_v45, %v13186_v49  ;;  %v872_v45 = vld [vmem:[%s13090_s15 + $0xb0] sm:$0xff] }
 0x2fb   : > { %19737 = vst [vmem:[#allocation62_spill] sm:$0xff] %v13450_v35  ;;  %v3827_v13 = vsub.f32 %v13116_v12, %v13450_v35  ;;  %v13457_v17 = vpop.f32.mrb[119].mxu1  ;;  %8796 = vmatmul.mubr.f32.gmra.mrb[178].mxu1 %v13446_v24  ;;  %v13468_v63 = vsub.f32 %v4017_v23, %v871_v39 }
 0x2fc   : > { %19738 = vst [vmem:[#allocation133_spill] sm:$0xff] %v13457_v17  ;;  %v3826_v36 = vsub.f32 %v13128_v61, %v13457_v17  ;;  %v13462_v8 = vpop.f32.mrb[152].mxu0  ;;  %v13464_v51 = vsub.f32 %v4016_v37, %v870_v32  ;;  %v873_v17 = vld [vmem:[%s13090_s15 + $0xb8] sm:$0xff] }
 0x2fd   : > { %19739 = vst [vmem:[#allocation40_spill] sm:$0xff] %v13462_v8  ;;  %v13466_v43 = vpop.f32.mrb[153].mxu0  ;;  %19742 = vst [vmem:[#allocation41_spill] sm:$0xff] %v13468_v63  ;;  %v4019_v57 = vmul.f32 %v3827_v13, %v13222_v55 }
 0x2fe   : > { %19740 = vst [vmem:[#allocation124_spill] sm:$0xff] %v13464_v51  ;;  %19741 = vst [vmem:[#allocation8_spill] sm:$0xff] %v13466_v43  ;;  %v13472_v35 = vpop.f32.mrb[120].mxu1  ;;  %8798 = vmatprep.mubr.f32.mxu1 %v13464_v51  ;;  %v4018_v24 = vmul.f32 %v3826_v36, %v13230_v44  ;;  %v874_v36 = vld [vmem:[%s13090_s15 + $0xc0] sm:$0xff] }
 0x2ff   : > { %19743 = vst [vmem:[#allocation126_spill] sm:$0xff] %v13472_v35  ;;  %v3829_v37 = vsub.f32 %v13146_v33, %v13472_v35  ;;  %v13479_v32 = vpop.f32.mrb[121].mxu1  ;;  %8799 = vmatmul.mubr.f32.gmra.mrb[180].mxu1 %v13468_v63  ;;  %v13490_v51 = vsub.f32 %v4019_v57, %v873_v17 }
 0x300   : > { %19744 = vst [vmem:[#allocation49_spill] sm:$0xff] %v13479_v32  ;;  %v3828_v23 = vsub.f32 %v13154_v54, %v13479_v32  ;;  %v13484_v39 = vpop.f32.mrb[154].mxu0  ;;  %v13486_v13 = vsub.f32 %v4018_v24, %v872_v45  ;;  %v875_v32 = vld [vmem:[%s13090_s15 + $0xc8] sm:$0xff] }
 0x301   : > { %19745 = vst [vmem:[#allocation57_spill] sm:$0xff] %v13484_v39  ;;  %v13488_v43 = vpop.f32.mrb[155].mxu0  ;;  %19748 = vst [vmem:[#allocation7_spill] sm:$0xff] %v13490_v51  ;;  %v4021_v8 = vmul.f32 %v3829_v37, %v13266_v31 }
 0x302   : > { %19746 = vst [vmem:[#allocation75_spill] sm:$0xff] %v13486_v13  ;;  %19747 = vst [vmem:[#allocation44_spill] sm:$0xff] %v13488_v43  ;;  %v13494_v35 = vpop.f32.mrb[122].mxu1  ;;  %8801 = vmatprep.mubr.f32.mxu1 %v13486_v13  ;;  %v4020_v63 = vmul.f32 %v3828_v23, %v13274_v62  ;;  %v876_v23 = vld [vmem:[%s13090_s15 + $0xd0] sm:$0xff] }
 0x303   : > { %19749 = vst [vmem:[#allocation110_spill] sm:$0xff] %v13494_v35  ;;  %v3831_v24 = vsub.f32 %v13160_v16, %v13494_v35  ;;  %v13501_v45 = vpop.f32.mrb[123].mxu1  ;;  %8802 = vmatmul.mubr.f32.gmra.mrb[182].mxu1 %v13490_v51  ;;  %v13512_v13 = vsub.f32 %v4021_v8, %v875_v32 }
 0x304   : > { %19750 = vst [vmem:[#allocation11_spill] sm:$0xff] %v13501_v45  ;;  %v3830_v57 = vsub.f32 %v13170_v41, %v13501_v45  ;;  %v13506_v17 = vpop.f32.mrb[156].mxu0  ;;  %v13508_v37 = vsub.f32 %v4020_v63, %v874_v36  ;;  %v877_v45 = vld [vmem:[%s13090_s15 + $0xd8] sm:$0xff] }
 0x305   : > { %19751 = vst [vmem:[#allocation45_spill] sm:$0xff] %v13506_v17  ;;  %v13510_v43 = vpop.f32.mrb[157].mxu0  ;;  %19754 = vst [vmem:[#allocation79_spill] sm:$0xff] %v13512_v13  ;;  %v4023_v39 = vmul.f32 %v3831_v24, %v13304_v58 }
 0x306   : > { %19752 = vst [vmem:[#allocation30_spill] sm:$0xff] %v13508_v37  ;;  %19753 = vst [vmem:[#allocation48_spill] sm:$0xff] %v13510_v43  ;;  %v13516_v35 = vpop.f32.mrb[124].mxu1  ;;  %8804 = vmatprep.mubr.f32.mxu1 %v13508_v37  ;;  %v4022_v51 = vmul.f32 %v3830_v57, %v13312_v10  ;;  %v878_v57 = vld [vmem:[%s13090_s15 + $0xe0] sm:$0xff] }
 0x307   : > { %19755 = vst [vmem:[#allocation68_spill] sm:$0xff] %v13516_v35  ;;  %v3833_v63 = vsub.f32 %v13190_v53, %v13516_v35  ;;  %v13523_v36 = vpop.f32.mrb[125].mxu1  ;;  %8805 = vmatmul.mubr.f32.gmra.mrb[184].mxu1 %v13512_v13  ;;  %v13534_v37 = vsub.f32 %v4023_v39, %v877_v45  ;;  %v879_v53 = vld [vmem:[%s13090_s15 + $0xe8] sm:$0xff] }
 0x308   : > { %19756 = vst [vmem:[#allocation16_spill] sm:$0xff] %v13523_v36  ;;  %v3832_v8 = vsub.f32 %v13198_v26, %v13523_v36  ;;  %v13528_v32 = vpop.f32.mrb[158].mxu0  ;;  %v13530_v24 = vsub.f32 %v4022_v51, %v876_v23 }
 0x309   : > { %19757 = vst [vmem:[#allocation89_spill] sm:$0xff] %v13528_v32  ;;  %v13532_v43 = vpop.f32.mrb[159].mxu0  ;;  %19760 = vst [vmem:[#allocation130_spill] sm:$0xff] %v13534_v37  ;;  %v4025_v17 = vmul.f32 %v3833_v63, %v13336_v25  ;;  %v880_v32 = vld [vmem:[%s13090_s15 + $0xf0] sm:$0xff] }
 0x30a   : > { %19758 = vst [vmem:[#allocation36_spill] sm:$0xff] %v13530_v24  ;;  %19759 = vst [vmem:[#allocation94_spill] sm:$0xff] %v13532_v43  ;;  %v13538_v35 = vpop.f32.mrb[126].mxu1  ;;  %8807 = vmatprep.mubr.f32.mxu1 %v13530_v24  ;;  %v4024_v13 = vmul.f32 %v3832_v8, %v13344_v42 }
 0x30b   : > { %19761 = vst [vmem:[#allocation81_spill] sm:$0xff] %v13538_v35  ;;  %v3835_v51 = vsub.f32 %v13204_v60, %v13538_v35  ;;  %v13545_v23 = vpop.f32.mrb[127].mxu1  ;;  %8808 = vmatmul.mubr.f32.gmra.mrb[186].mxu1 %v13534_v37  ;;  %v13553_v8 = vsub.f32 %v4025_v17, %v879_v53  ;;  %v7786_v17 = vld [vmem:[%s13090_s15 + $0x208] sm:$0xff] }
 0x30c   : > { %19762 = vst [vmem:[#allocation138_spill] sm:$0xff] %v13545_v23  ;;  %v3834_v39 = vsub.f32 %v13214_v52, %v13545_v23  ;;  %v8642_v45 = vpop.f32.mrb[160].mxu0  ;;  %v13550_v63 = vsub.f32 %v4024_v13, %v878_v57  ;;  %v881_v23 = vld [vmem:[%s13090_s15 + $0xf8] sm:$0xff] }
 0x30d   : > { %v3869_v24 = vsub.f32 %v8642_v45, %v13002_v4  ;;  %v3485_v43 = vpop.f32.mrb[161].mxu0  ;;  %19764 = vst [vmem:[#allocation12_spill] sm:$0xff] %v13553_v8  ;;  %v4027_v36 = vmul.f32 %v3835_v51, %v13368_v15 }
 0x30e   : > { %19763 = vst [vmem:[#allocation117_spill] sm:$0xff] %v13550_v63  ;;  %v3868_v35 = vsub.f32 %v3485_v43, %v13005_v3  ;;  %v13558_v60 = vpop.f32.mrb[128].mxu1  ;;  %8810 = vmatprep.mubr.f32.mxu1 %v13550_v63  ;;  %v4026_v37 = vmul.f32 %v3834_v39, %v13376_v22 }
 0x30f   : > { %19765 = vst [vmem:[#allocation14_spill] sm:$0xff] %v13558_v60  ;;  %v3933_v13 = vsub.f32 %v3869_v24, %v13095_v28  ;;  %v3837_v4 = vsub.f32 %v13234_v48, %v13558_v60  ;;  %v13566_v53 = vpop.f32.mrb[129].mxu1  ;;  %8811 = vmatmul.mubr.f32.gmra.mrb[188].mxu1 %v13553_v8  ;;  %v13578_v63 = vsub.f32 %v4027_v36, %v881_v23  ;;  %v882_v8 = vld [vmem:[%s13090_s15 + $0x100] sm:$0xff] }
 0x310   : > { %19766 = vst [vmem:[#allocation143_spill] sm:$0xff] %v13566_v53  ;;  %v3932_v3 = vsub.f32 %v3868_v35, %v13100_v7  ;;  %v3836_v43 = vsub.f32 %v13242_v59, %v13566_v53  ;;  %v8645_v57 = vpop.f32.mrb[162].mxu0  ;;  %v13573_v51 = vsub.f32 %v4026_v37, %v880_v32  ;;  %v7785_v60 = vld [vmem:[%s13090_s15 + $0x200] sm:$0xff]  ;;  %v883_v32 = vld [vmem:[%s13090_s15 + $0x108] sm:$0xff] }
 0x311   : > { %v4125_v39 = vmul.f32 %v3933_v13, %v13093_v29  ;;  %v4029_v28 = vmul.f32 %v3837_v4, %v13093_v29  ;;  %v3871_v24 = vsub.f32 %v8645_v57, %v13014_v34  ;;  %v3495_v45 = vpop.f32.mrb[163].mxu0  ;;  %19768 = vst [vmem:[#allocation59_spill] sm:$0xff] %v13578_v63 }
 0x312   : > { %19767 = vst [vmem:[#allocation70_spill] sm:$0xff] %v13573_v51  ;;  %v4124_v7 = vmul.f32 %v3932_v3, %v13103_v19  ;;  %v4028_v35 = vmul.f32 %v3836_v43, %v13103_v19  ;;  %v3870_v53 = vsub.f32 %v3495_v45, %v13016_v20  ;;  %v13585_v37 = vpop.f32.mrb[130].mxu1  ;;  %8813 = vmatprep.mubr.f32.mxu1 %v13573_v51 }
 0x313   : > { %v13589_v13 = vsub.f32 %v4125_v39, %v7786_v17  ;;  %v3935_v34 = vsub.f32 %v3871_v24, %v13130_v18  ;;  %v3839_v36 = vsub.f32 %v13248_v11, %v13585_v37  ;;  %v13594_v23 = vpop.f32.mrb[131].mxu1  ;;  %8814 = vmatmul.mubr.f32.gmra.mrb[190].mxu1 %v13578_v63  ;;  %v885_v18 = vld [vmem:[%s13090_s15 + $0x118] sm:$0xff]  ;;  %v13608_v63 = vsub.f32 %v4029_v28, %v883_v32  ;;  %v19773_v32 = vld [vmem:[#allocation116_spill] sm:$0xff] }
 0x314   : > { %v3934_v20 = vsub.f32 %v3870_v53, %v13138_v1  ;;  %v3838_v4 = vsub.f32 %v13258_v0, %v13594_v23  ;;  %v8648_v3 = vpop.f32.mrb[164].mxu0  ;;  %v13600_v43 = vsub.f32 %v4028_v35, %v882_v8  ;;  %v13602_v17 = vsub.f32 %v4124_v7, %v7785_v60  ;;  %v884_v1 = vld [vmem:[%s13090_s15 + $0x110] sm:$0xff] }
 0x315   : > { %v4127_v57 = vmul.f32 %v3935_v34, %v13134_v21  ;;  %v4031_v39 = vmul.f32 %v3839_v36, %v13134_v21  ;;  %v3873_v24 = vsub.f32 %v8648_v3, %v13022_v5  ;;  %v3505_v45 = vpop.f32.mrb[165].mxu0  ;;  %v7787_v53 = vld [vmem:[%s13090_s15 + $0x210] sm:$0xff]  ;;  %v7788_v21 = vld [vmem:[%s13090_s15 + $0x218] sm:$0xff] }
 0x316   : > { %19769 = vst [vmem:[#allocation31_spill] sm:$0xff] %v13600_v43  ;;  %v4126_v51 = vmul.f32 %v3934_v20, %v13142_v46  ;;  %v4030_v8 = vmul.f32 %v3838_v4, %v13142_v46  ;;  %v3872_v35 = vsub.f32 %v3505_v45, %v13024_v2  ;;  %v13615_v60 = vpop.f32.mrb[132].mxu1  ;;  %8816 = vmatprep.mubr.f32.mxu1 %v13600_v43  ;;  %v887_v4 = vld [vmem:[%s13090_s15 + $0x128] sm:$0xff]  ;;  %v19775_v45 = vld [vmem:[#allocation18_spill] sm:$0xff] }
 0x317   : > { %19770 = vst [vmem:[#allocation150_spill] sm:$0xff] %v13615_v60  ;;  %8896 = vmatprep.mubr.f32.mxu0 %v13602_v17  ;;  %v3937_v5 = vsub.f32 %v3873_v24, %v13174_v40  ;;  %v3841_v28 = vsub.f32 %v13278_v56, %v13615_v60  ;;  %v13623_v7 = vpop.f32.mrb[133].mxu1  ;;  %8817 = vmatmul.mubr.f32.gmra.mrb[192].mxu1 %v13608_v63 }
 0x318   : > { %19771 = vst [vmem:[#allocation157_spill] sm:$0xff] %v13623_v7  ;;  %8897 = vmatmul.mubr.f32.vlgmr.msra.gmra.mrb[224].mxu0 %v13589_v13  ;;  %v13627_v2 = vsub.f32 %v4031_v39, %v885_v18  ;;  %v3936_v46 = vsub.f32 %v3872_v35, %v13182_v6  ;;  %v3840_v34 = vsub.f32 %v19773_v32, %v13623_v7  ;;  %v8651_v36 = vpop.f32.mrb[166].mxu0  ;;  %v886_v6 = vld [vmem:[%s13090_s15 + $0x120] sm:$0xff] }
 0x319   : > { %v13632_v40 = vsub.f32 %v4030_v8, %v884_v1  ;;  %v13634_v20 = vsub.f32 %v4126_v51, %v7787_v53  ;;  %v4129_v3 = vmul.f32 %v3937_v5, %v13178_v9  ;;  %v4033_v24 = vmul.f32 %v3841_v28, %v13178_v9  ;;  %v3515_v18 = vpop.f32.mrb[167].mxu0  ;;  %v7789_v35 = vld [vmem:[%s13090_s15 + $0x220] sm:$0xff]  ;;  %v19777_v8 = vld [vmem:[#allocation52_spill] sm:$0xff] }
 0x31a   : > { %19772 = vst [vmem:[#allocation56_spill] sm:$0xff] %v13627_v2  ;;  %v3875_v43 = vsub.f32 %v8651_v36, %v19775_v45  ;;  %v13640_v39 = vsub.f32 %v4127_v57, %v7788_v21  ;;  %v4128_v7 = vmul.f32 %v3936_v46, %v13186_v49  ;;  %v4032_v1 = vmul.f32 %v3840_v34, %v13186_v49  ;;  %v13647_v51 = vpop.f32.mrb[134].mxu1  ;;  %v7790_v53 = vld [vmem:[%s13090_s15 + $0x228] sm:$0xff]  ;;  %v19780_v57 = vld [vmem:[#allocation26_spill] sm:$0xff]  ;;  %v19784_v45 = vld [vmem:[#allocation87_spill] sm:$0xff] }
 0x31b   : > { %19774 = vst [vmem:[#allocation106_spill] sm:$0xff] %v13632_v40  ;;  %v3874_v60 = vsub.f32 %v3515_v18, %v19777_v8  ;;  %19778 = vst [vmem:[#allocation122_spill] sm:$0xff] %v13647_v51  ;;  %8819 = vmatprep.mubr.f32.mxu1 %v13632_v40  ;;  %8899 = vmatprep.mubr.f32.mxu0 %v13634_v20  ;;  %v19779_v5 = vld [vmem:[#allocation24_spill] sm:$0xff]  ;;  %v3843_v21 = vsub.f32 %v19780_v57, %v13647_v51  ;;  %v13655_v36 = vpop.f32.mrb[135].mxu1  ;;  %v889_v40 = vld [vmem:[%s13090_s15 + $0x138] sm:$0xff] }
 0x31c   : > { %19776 = vst [vmem:[#allocation123_spill] sm:$0xff] %v13640_v39  ;;  %v3939_v28 = vsub.f32 %v3875_v43, %v19779_v5  ;;  %19781 = vst [vmem:[#allocation27_spill] sm:$0xff] %v13655_v36  ;;  %8820 = vmatmul.mubr.f32.gmra.mrb[194].mxu1 %v13627_v2  ;;  %8900 = vmatmul.mubr.f32.gmra.mrb[226].mxu0 %v13640_v39  ;;  %v13659_v49 = vsub.f32 %v4033_v24, %v887_v4  ;;  %v19783_v46 = vld [vmem:[#allocation84_spill] sm:$0xff]  ;;  %v8654_v8 = vpop.f32.mrb[168].mxu0  ;;  %v19787_v2 = vld [vmem:[#allocation71_spill] sm:$0xff] }
 0x31d   : > { %v3938_v34 = vsub.f32 %v3874_v60, %v19783_v46  ;;  %v3842_v18 = vsub.f32 %v19784_v45, %v13655_v36  ;;  %v13664_v43 = vsub.f32 %v4032_v1, %v886_v6  ;;  %v13666_v5 = vsub.f32 %v4128_v7, %v7789_v35  ;;  %v3525_v4 = vpop.f32.mrb[169].mxu0  ;;  %v888_v60 = vld [vmem:[%s13090_s15 + $0x130] sm:$0xff]  ;;  %v7792_v35 = vld [vmem:[%s13090_s15 + $0x238] sm:$0xff] }
 0x31e   : > { %19782 = vst [vmem:[#allocation63_spill] sm:$0xff] %v13659_v49  ;;  %v4131_v51 = vmul.f32 %v3939_v28, %v13222_v55  ;;  %v4035_v57 = vmul.f32 %v3843_v21, %v13222_v55  ;;  %v3877_v39 = vsub.f32 %v8654_v8, %v19787_v2  ;;  %v13672_v24 = vsub.f32 %v4129_v3, %v7790_v53  ;;  %v7791_v46 = vld [vmem:[%s13090_s15 + $0x230] sm:$0xff]  ;;  %v13679_v7 = vpop.f32.mrb[136].mxu1  ;;  %v19791_v2 = vld [vmem:[#allocation98_spill] sm:$0xff]  ;;  %v19792_v3 = vld [vmem:[#allocation120_spill] sm:$0xff] }
 0x31f   : > { %19785 = vst [vmem:[#allocation53_spill] sm:$0xff] %v13664_v43  ;;  %19786 = vst [vmem:[#allocation129_spill] sm:$0xff] %v13666_v5  ;;  %v4130_v36 = vmul.f32 %v3938_v34, %v13230_v44  ;;  %v4034_v6 = vmul.f32 %v3842_v18, %v13230_v44  ;;  %v19789_v1 = vld [vmem:[#allocation21_spill] sm:$0xff]  ;;  %8822 = vmatprep.mubr.f32.mxu1 %v13664_v43  ;;  %8902 = vmatprep.mubr.f32.mxu0 %v13666_v5  ;;  %v13687_v21 = vpop.f32.mrb[137].mxu1  ;;  %v19799_v5 = vld [vmem:[#allocation72_spill] sm:$0xff] }
 0x320   : > { %19788 = vst [vmem:[#allocation4_spill] sm:$0xff] %v13672_v24  ;;  %v3876_v45 = vsub.f32 %v3525_v4, %v19789_v1  ;;  %19790 = vst [vmem:[#allocation3_spill] sm:$0xff] %v13679_v7  ;;  %v3941_v28 = vsub.f32 %v3877_v39, %v19791_v2  ;;  %v3845_v53 = vsub.f32 %v19792_v3, %v13679_v7  ;;  %8823 = vmatmul.mubr.f32.gmra.mrb[196].mxu1 %v13659_v49  ;;  %v19795_v18 = vld [vmem:[#allocation25_spill] sm:$0xff]  ;;  %v19796_v4 = vld [vmem:[#allocation140_spill] sm:$0xff]  ;;  %v8657_v43 = vpop.f32.mrb[170].mxu0 }
 0x321   : > { %19793 = vst [vmem:[#allocation6_spill] sm:$0xff] %v13687_v21  ;;  %8903 = vmatmul.mubr.f32.gmra.mrb[228].mxu0 %v13672_v24  ;;  %v13691_v34 = vsub.f32 %v4035_v57, %v889_v40  ;;  %v3844_v1 = vsub.f32 %v19796_v4, %v13687_v21  ;;  %v13696_v39 = vsub.f32 %v4034_v6, %v888_v60  ;;  %v891_v7 = vld [vmem:[%s13090_s15 + $0x148] sm:$0xff]  ;;  %v3535_v40 = vpop.f32.mrb[171].mxu0  ;;  %v19801_v6 = vld [vmem:[#allocation19_spill] sm:$0xff] }
 0x322   : > { %v3940_v8 = vsub.f32 %v3876_v45, %v19795_v18  ;;  %v13698_v2 = vsub.f32 %v4130_v36, %v7791_v46  ;;  %v4133_v3 = vmul.f32 %v3941_v28, %v13266_v31  ;;  %v4037_v49 = vmul.f32 %v3845_v53, %v13266_v31  ;;  %v890_v45 = vld [vmem:[%s13090_s15 + $0x140] sm:$0xff]  ;;  %v13711_v36 = vpop.f32.mrb[138].mxu1  ;;  %v7794_v46 = vld [vmem:[%s13090_s15 + $0x248] sm:$0xff] }
 0x323   : > { %19794 = vst [vmem:[#allocation64_spill] sm:$0xff] %v13691_v34  ;;  %19797 = vst [vmem:[#allocation34_spill] sm:$0xff] %v13696_v39  ;;  %v3879_v24 = vsub.f32 %v8657_v43, %v19799_v5  ;;  %v13704_v57 = vsub.f32 %v4131_v51, %v7792_v35  ;;  %v7793_v18 = vld [vmem:[%s13090_s15 + $0x240] sm:$0xff]  ;;  %v4036_v60 = vmul.f32 %v3844_v1, %v13274_v62  ;;  %8825 = vmatprep.mubr.f32.mxu1 %v13696_v39  ;;  %v13719_v28 = vpop.f32.mrb[139].mxu1 }
 0x324   : > { %19798 = vst [vmem:[#allocation43_spill] sm:$0xff] %v13698_v2  ;;  %v4132_v21 = vmul.f32 %v3940_v8, %v13274_v62  ;;  %v3878_v4 = vsub.f32 %v3535_v40, %v19801_v6  ;;  %19802 = vst [vmem:[#allocation66_spill] sm:$0xff] %v13711_v36  ;;  %8905 = vmatprep.mubr.f32.mxu0 %v13698_v2  ;;  %v19803_v43 = vld [vmem:[#allocation91_spill] sm:$0xff]  ;;  %8826 = vmatmul.mubr.f32.gmra.mrb[198].mxu1 %v13691_v34  ;;  %v19807_v8 = vld [vmem:[#allocation90_spill] sm:$0xff]  ;;  %v8660_v39 = vpop.f32.mrb[172].mxu0 }
 0x325   : > { %19800 = vst [vmem:[#allocation54_spill] sm:$0xff] %v13704_v57  ;;  %v3943_v5 = vsub.f32 %v3879_v24, %v19803_v43  ;;  %v19804_v51 = vld [vmem:[#allocation139_spill] sm:$0xff]  ;;  %19805 = vst [vmem:[#allocation35_spill] sm:$0xff] %v13719_v28  ;;  %8906 = vmatmul.mubr.f32.gmra.mrb[230].mxu0 %v13704_v57  ;;  %v13723_v53 = vsub.f32 %v4037_v49, %v891_v7  ;;  %v19808_v40 = vld [vmem:[#allocation142_spill] sm:$0xff]  ;;  %v13728_v24 = vsub.f32 %v4036_v60, %v890_v45  ;;  %v3545_v49 = vpop.f32.mrb[173].mxu0 }
 0x326   : > { %v3847_v35 = vsub.f32 %v19804_v51, %v13711_v36  ;;  %v3942_v1 = vsub.f32 %v3878_v4, %v19807_v8  ;;  %v3846_v6 = vsub.f32 %v19808_v40, %v13719_v28  ;;  %v13730_v43 = vsub.f32 %v4132_v21, %v7793_v18  ;;  %v893_v36 = vld [vmem:[%s13090_s15 + $0x158] sm:$0xff]  ;;  %v19811_v2 = vld [vmem:[#allocation97_spill] sm:$0xff]  ;;  %v19813_v60 = vld [vmem:[#allocation95_spill] sm:$0xff]  ;;  %v13743_v21 = vpop.f32.mrb[140].mxu1 }
 0x327   : > { %19806 = vst [vmem:[#allocation65_spill] sm:$0xff] %v13723_v53  ;;  %19809 = vst [vmem:[#allocation76_spill] sm:$0xff] %v13728_v24  ;;  %v4135_v51 = vmul.f32 %v3943_v5, %v13304_v58  ;;  %v3881_v57 = vsub.f32 %v8660_v39, %v19811_v2  ;;  %v13736_v7 = vsub.f32 %v4133_v3, %v7794_v46  ;;  %v892_v4 = vld [vmem:[%s13090_s15 + $0x150] sm:$0xff]  ;;  %8828 = vmatprep.mubr.f32.mxu1 %v13728_v24  ;;  %v7796_v18 = vld [vmem:[%s13090_s15 + $0x258] sm:$0xff]  ;;  %v13751_v5 = vpop.f32.mrb[141].mxu1 }
 0x328   : > { %19810 = vst [vmem:[#allocation86_spill] sm:$0xff] %v13730_v43  ;;  %v4039_v34 = vmul.f32 %v3847_v35, %v13304_v58  ;;  %v7795_v8 = vld [vmem:[%s13090_s15 + $0x250] sm:$0xff]  ;;  %v4134_v28 = vmul.f32 %v3942_v1, %v13312_v10  ;;  %v4038_v45 = vmul.f32 %v3846_v6, %v13312_v10  ;;  %v3880_v40 = vsub.f32 %v3545_v49, %v19813_v60  ;;  %v19815_v39 = vld [vmem:[#allocation114_spill] sm:$0xff]  ;;  %v19818_v1 = vld [vmem:[#allocation112_spill] sm:$0xff]  ;;  %v8663_v24 = vpop.f32.mrb[174].mxu0 }
 0x329   : > { %19812 = vst [vmem:[#allocation127_spill] sm:$0xff] %v13736_v7  ;;  %19814 = vst [vmem:[#allocation107_spill] sm:$0xff] %v13743_v21  ;;  %8908 = vmatprep.mubr.f32.mxu0 %v13730_v43  ;;  %v3945_v2 = vsub.f32 %v3881_v57, %v19815_v39  ;;  %v19816_v3 = vld [vmem:[#allocation118_spill] sm:$0xff]  ;;  %8829 = vmatmul.mubr.f32.gmra.mrb[200].mxu1 %v13723_v53  ;;  %v19819_v49 = vld [vmem:[#allocation115_spill] sm:$0xff] }
 0x32a   : > { %v3849_v46 = vsub.f32 %v19816_v3, %v13743_v21  ;;  %19817 = vst [vmem:[#allocation135_spill] sm:$0xff] %v13751_v5  ;;  %8909 = vmatmul.mubr.f32.gmra.mrb[232].mxu0 %v13736_v7  ;;  %v13755_v35 = vsub.f32 %v4039_v34, %v893_v36  ;;  %v3944_v6 = vsub.f32 %v3880_v40, %v19818_v1  ;;  %v895_v21 = vld [vmem:[%s13090_s15 + $0x168] sm:$0xff]  ;;  %v19821_v43 = vld [vmem:[#allocation73_spill] sm:$0xff]  ;;  %v3555_v34 = vpop.f32.mrb[175].mxu0  ;;  %v894_v40 = vld [vmem:[%s13090_s15 + $0x160] sm:$0xff] }
 0x32b   : > { %v3848_v60 = vsub.f32 %v19819_v49, %v13751_v5  ;;  %v13760_v57 = vsub.f32 %v4038_v45, %v892_v4  ;;  %v13762_v39 = vsub.f32 %v4134_v28, %v7795_v8  ;;  %v4137_v3 = vmul.f32 %v3945_v2, %v13336_v25  ;;  %v7797_v1 = vld [vmem:[%s13090_s15 + $0x260] sm:$0xff]  ;;  %v19823_v45 = vld [vmem:[#allocation82_spill] sm:$0xff]  ;;  %v13775_v28 = vpop.f32.mrb[142].mxu1  ;;  %v19828_v2 = vld [vmem:[#allocation149_spill] sm:$0xff] }
 0x32c   : > { %v4041_v53 = vmul.f32 %v3849_v46, %v13336_v25  ;;  %v3883_v7 = vsub.f32 %v8663_v24, %v19821_v43  ;;  %v13768_v36 = vsub.f32 %v4135_v51, %v7796_v18  ;;  %v4136_v5 = vmul.f32 %v3944_v6, %v13344_v42  ;;  %19824 = vst [vmem:[#allocation28_spill] sm:$0xff] %v13775_v28  ;;  %v7798_v25 = vld [vmem:[%s13090_s15 + $0x268] sm:$0xff]  ;;  %v19825_v24 = vld [vmem:[#allocation158_spill] sm:$0xff]  ;;  %v19826_v51 = vld [vmem:[#allocation145_spill] sm:$0xff]  ;;  %v13783_v18 = vpop.f32.mrb[143].mxu1 }
 0x32d   : > { %19820 = vst [vmem:[#allocation137_spill] sm:$0xff] %v13760_v57  ;;  %v4040_v4 = vmul.f32 %v3848_v60, %v13344_v42  ;;  %v3882_v49 = vsub.f32 %v3555_v34, %v19823_v45  ;;  %8831 = vmatprep.mubr.f32.mxu1 %v13760_v57  ;;  %8911 = vmatprep.mubr.f32.mxu0 %v13762_v39  ;;  %19827 = vst [vmem:[#allocation9_spill] sm:$0xff] %v13783_v18  ;;  %v19829_v6 = vld [vmem:[#allocation147_spill] sm:$0xff]  ;;  %v8666_v34 = vpop.f32.mrb[176].mxu0 }
 0x32e   : > { %19822 = vst [vmem:[#allocation37_spill] sm:$0xff] %v13768_v36  ;;  %v3947_v43 = vsub.f32 %v3883_v7, %v19825_v24  ;;  %v3851_v8 = vsub.f32 %v19826_v51, %v13775_v28  ;;  %8832 = vmatmul.mubr.f32.gmra.mrb[202].mxu1 %v13755_v35  ;;  %8912 = vmatmul.mubr.f32.gmra.mrb[234].mxu0 %v13768_v36  ;;  %v897_v24 = vld [vmem:[%s13090_s15 + $0x178] sm:$0xff] }
 0x32f   : > { %v13787_v42 = vsub.f32 %v4041_v53, %v895_v21  ;;  %v3946_v46 = vsub.f32 %v3882_v49, %v19828_v2  ;;  %v3850_v60 = vsub.f32 %v19829_v6, %v13783_v18  ;;  %v13792_v7 = vsub.f32 %v4040_v4, %v894_v40  ;;  %v3565_v53 = vpop.f32.mrb[177].mxu0  ;;  %v896_v49 = vld [vmem:[%s13090_s15 + $0x170] sm:$0xff] }
 0x330   : > { %v13794_v45 = vsub.f32 %v4136_v5, %v7797_v1  ;;  %v4139_v28 = vmul.f32 %v3947_v43, %v13368_v15  ;;  %v4043_v57 = vmul.f32 %v3851_v8, %v13368_v15  ;;  %v3885_v36 = vsub.f32 %v8666_v34, %v13068_v50  ;;  %v7799_v2 = vld [vmem:[%s13090_s15 + $0x270] sm:$0xff]  ;;  %v13807_v5 = vpop.f32.mrb[144].mxu1  ;;  %v7800_v15 = vld [vmem:[%s13090_s15 + $0x278] sm:$0xff]  ;;  %v19833_v50 = vld [vmem:[#allocation103_spill] sm:$0xff] }
 0x331   : > { %19830 = vst [vmem:[#allocation46_spill] sm:$0xff] %v13792_v7  ;;  %v13800_v21 = vsub.f32 %v4137_v3, %v7798_v25  ;;  %v4138_v18 = vmul.f32 %v3946_v46, %v13376_v22  ;;  %v4042_v40 = vmul.f32 %v3850_v60, %v13376_v22  ;;  %v3884_v4 = vsub.f32 %v3565_v53, %v13071_v38  ;;  %v19834_v3 = vld [vmem:[#allocation148_spill] sm:$0xff]  ;;  %v13815_v43 = vpop.f32.mrb[145].mxu1  ;;  %v19836_v22 = vld [vmem:[#allocation105_spill] sm:$0xff]  ;;  %v19837_v46 = vld [vmem:[#allocation102_spill] sm:$0xff] }
 0x332   : > { %19832 = vst [vmem:[#allocation121_spill] sm:$0xff] %v13807_v5  ;;  %8834 = vmatprep.mubr.f32.mxu1 %v13792_v7  ;;  %8914 = vmatprep.mubr.f32.mxu0 %v13794_v45  ;;  %v3949_v1 = vsub.f32 %v3885_v36, %v19833_v50  ;;  %v3853_v25 = vsub.f32 %v19834_v3, %v13807_v5  ;;  %19835 = vst [vmem:[#allocation125_spill] sm:$0xff] %v13815_v43  ;;  %v8669_v36 = vpop.f32.mrb[178].mxu0  ;;  %v899_v50 = vld [vmem:[%s13090_s15 + $0x188] sm:$0xff] }
 0x333   : > { %19831 = vst [vmem:[#allocation47_spill] sm:$0xff] %v13800_v21  ;;  %8835 = vmatmul.mubr.f32.gmra.mrb[204].mxu1 %v13787_v42  ;;  %8915 = vmatmul.mubr.f32.gmra.mrb[236].mxu0 %v13800_v21  ;;  %v13819_v38 = vsub.f32 %v4043_v57, %v897_v24  ;;  %v3948_v8 = vsub.f32 %v3884_v4, %v19836_v22  ;;  %v3575_v57 = vpop.f32.mrb[179].mxu0  ;;  %v898_v4 = vld [vmem:[%s13090_s15 + $0x180] sm:$0xff] }
 0x334   : > { %v3852_v60 = vsub.f32 %v19837_v46, %v13815_v43  ;;  %v13824_v34 = vsub.f32 %v4042_v40, %v896_v49  ;;  %v13826_v53 = vsub.f32 %v4138_v18, %v7799_v2  ;;  %v4141_v5 = vmul.f32 %v3949_v1, %v13093_v29  ;;  %v7801_v22 = vld [vmem:[%s13090_s15 + $0x280] sm:$0xff]  ;;  %v13842_v2 = vpop.f32.mrb[146].mxu1  ;;  %v19842_v40 = vld [vmem:[#allocation104_spill] sm:$0xff] }
 0x335   : > { %v4045_v7 = vmul.f32 %v3853_v25, %v13093_v29  ;;  %v3887_v21 = vsub.f32 %v8669_v36, %v13080_v30  ;;  %v13832_v24 = vsub.f32 %v4139_v28, %v7800_v15  ;;  %v4140_v43 = vmul.f32 %v3948_v8, %v13103_v19  ;;  %v13838_v46 = vld [vmem:[%s13078_s29] sm:$0xff]  ;;  %19840 = vst [vmem:[#allocation10_spill] sm:$0xff] %v13842_v2  ;;  %v7802_v30 = vld [vmem:[%s13090_s15 + $0x288] sm:$0xff]  ;;  %v19841_v29 = vld [vmem:[#allocation153_spill] sm:$0xff]  ;;  %v13850_v15 = vpop.f32.mrb[147].mxu1 }
 0x336   : > { %19838 = vst [vmem:[#allocation131_spill] sm:$0xff] %v13824_v34  ;;  %v4044_v18 = vmul.f32 %v13838_v46, %v3852_v60  ;;  %v3886_v49 = vsub.f32 %v3575_v57, %v13082_v47  ;;  %8837 = vmatprep.mubr.f32.mxu1 %v13824_v34  ;;  %8917 = vmatprep.mubr.f32.mxu0 %v13826_v53  ;;  %19843 = vst [vmem:[#allocation39_spill] sm:$0xff] %v13850_v15  ;;  %v19845_v1 = vld [vmem:[#allocation156_spill] sm:$0xff]  ;;  %v19846_v8 = vld [vmem:[#allocation85_spill] sm:$0xff] }
 0x337   : > { %19839 = vst [vmem:[#allocation5_spill] sm:$0xff] %v13832_v24  ;;  %v3951_v28 = vsub.f32 %v3887_v21, %v19841_v29  ;;  %v3855_v19 = vsub.f32 %v19842_v40, %v13842_v2  ;;  %8838 = vmatmul.mubr.f32.gmra.mrb[206].mxu1 %v13819_v38  ;;  %8918 = vmatmul.mubr.f32.gmra.mrb[238].mxu0 %v13832_v24  ;;  %v8672_v21 = vpop.f32.mrb[180].mxu0  ;;  %v901_v29 = vld [vmem:[%s13090_s15 + $0x198] sm:$0xff]  ;;  %v13910_v40 = vld [vmem:[%s13078_s29 + $0x20] sm:$0xff] }
 0x338   : > { %v13854_v47 = vsub.f32 %v4045_v7, %v899_v50  ;;  %v3950_v25 = vsub.f32 %v3886_v49, %v19845_v1  ;;  %v3854_v60 = vsub.f32 %v19846_v8, %v13850_v15  ;;  %v13859_v36 = vsub.f32 %v4044_v18, %v898_v4  ;;  %v13865_v2 = vld [vmem:[%s13078_s29 + $0x18] sm:$0xff]  ;;  %v3585_v50 = vpop.f32.mrb[181].mxu0  ;;  %v900_v1 = vld [vmem:[%s13090_s15 + $0x190] sm:$0xff]  ;;  %v13880_v18 = vpop.f32.mrb[148].mxu1 }
 0x339   : > { %v13861_v57 = vsub.f32 %v4140_v43, %v7801_v22  ;;  %v4143_v34 = vmul.f32 %v13865_v2, %v3951_v28  ;;  %v4047_v24 = vmul.f32 %v13865_v2, %v3855_v19  ;;  %v3889_v7 = vsub.f32 %v8672_v21, %v13107_v27  ;;  %v7803_v15 = vld [vmem:[%s13090_s15 + $0x290] sm:$0xff]  ;;  %19850 = vst [vmem:[#allocation33_spill] sm:$0xff] %v13880_v18  ;;  %v7804_v27 = vld [vmem:[%s13090_s15 + $0x298] sm:$0xff]  ;;  %v19852_v28 = vld [vmem:[#allocation155_spill] sm:$0xff]  ;;  %v13888_v21 = vpop.f32.mrb[149].mxu1 }
 0x33a   : > { %19844 = vst [vmem:[#allocation50_spill] sm:$0xff] %v13854_v47  ;;  %19847 = vst [vmem:[#allocation55_spill] sm:$0xff] %v13859_v36  ;;  %v13870_v49 = vsub.f32 %v4141_v5, %v7802_v30  ;;  %v13875_v8 = vld [vmem:[%s13078_s29 + $0x10] sm:$0xff]  ;;  %v3888_v22 = vsub.f32 %v3585_v50, %v13110_v14  ;;  %8840 = vmatprep.mubr.f32.mxu1 %v13859_v36  ;;  %v19851_v5 = vld [vmem:[#allocation160_spill] sm:$0xff]  ;;  %v3857_v19 = vsub.f32 %v19852_v28, %v13880_v18 }
 0x33b   : > { %19848 = vst [vmem:[#allocation67_spill] sm:$0xff] %v13861_v57  ;;  %v4142_v43 = vmul.f32 %v13875_v8, %v3950_v25  ;;  %v4046_v4 = vmul.f32 %v13875_v8, %v3854_v60  ;;  %8920 = vmatprep.mubr.f32.mxu0 %v13861_v57  ;;  %v3953_v30 = vsub.f32 %v3889_v7, %v19851_v5  ;;  %v19854_v25 = vld [vmem:[#allocation113_spill] sm:$0xff]  ;;  %v19855_v50 = vld [vmem:[#allocation108_spill] sm:$0xff]  ;;  %v8675_v7 = vpop.f32.mrb[182].mxu0 }
 0x33c   : > { %19849 = vst [vmem:[#allocation100_spill] sm:$0xff] %v13870_v49  ;;  %8841 = vmatmul.mubr.f32.gmra.mrb[208].mxu1 %v13854_v47  ;;  %8921 = vmatmul.mubr.f32.gmra.mrb[240].mxu0 %v13870_v49  ;;  %v13892_v14 = vsub.f32 %v4047_v24, %v901_v29  ;;  %v3952_v60 = vsub.f32 %v3888_v22, %v19854_v25  ;;  %v903_v28 = vld [vmem:[%s13090_s15 + $0x1a8] sm:$0xff]  ;;  %v3595_v24 = vpop.f32.mrb[183].mxu0  ;;  %v902_v22 = vld [vmem:[%s13090_s15 + $0x1a0] sm:$0xff] }
 0x33d   : > { %v3856_v36 = vsub.f32 %v19855_v50, %v13888_v21  ;;  %v13897_v5 = vsub.f32 %v4046_v4, %v900_v1  ;;  %v13899_v18 = vsub.f32 %v4142_v43, %v7803_v15  ;;  %v4145_v57 = vmul.f32 %v3953_v30, %v13178_v9  ;;  %v7805_v25 = vld [vmem:[%s13090_s15 + $0x2a0] sm:$0xff]  ;;  %v13915_v4 = vpop.f32.mrb[150].mxu1 }
 0x33e   : > { %19853 = vst [vmem:[#allocation15_spill] sm:$0xff] %v13892_v14  ;;  %v4049_v47 = vmul.f32 %v3857_v19, %v13178_v9  ;;  %v3891_v49 = vsub.f32 %v8675_v7, %v13116_v12  ;;  %v13905_v29 = vsub.f32 %v4143_v34, %v7804_v27  ;;  %v4144_v1 = vmul.f32 %v13910_v40, %v3952_v60  ;;  %v7806_v12 = vld [vmem:[%s13090_s15 + $0x2a8] sm:$0xff]  ;;  %v19859_v9 = vld [vmem:[#allocation62_spill] sm:$0xff]  ;;  %v13923_v19 = vpop.f32.mrb[151].mxu1 }
 0x33f   : > { %19856 = vst [vmem:[#allocation42_spill] sm:$0xff] %v13897_v5  ;;  %v4048_v15 = vmul.f32 %v13910_v40, %v3856_v36  ;;  %v3890_v43 = vsub.f32 %v3595_v24, %v13128_v61  ;;  %19858 = vst [vmem:[#allocation132_spill] sm:$0xff] %v13915_v4  ;;  %8843 = vmatprep.mubr.f32.mxu1 %v13897_v5  ;;  %8923 = vmatprep.mubr.f32.mxu0 %v13899_v18  ;;  %v19860_v27 = vld [vmem:[#allocation60_spill] sm:$0xff]  ;;  %v19862_v36 = vld [vmem:[#allocation133_spill] sm:$0xff] }
 0x340   : > { %19857 = vst [vmem:[#allocation92_spill] sm:$0xff] %v13905_v29  ;;  %v3955_v34 = vsub.f32 %v3891_v49, %v19859_v9  ;;  %v3859_v30 = vsub.f32 %v19860_v27, %v13915_v4  ;;  %19861 = vst [vmem:[#allocation128_spill] sm:$0xff] %v13923_v19  ;;  %8844 = vmatmul.mubr.f32.gmra.mrb[210].mxu1 %v13892_v14  ;;  %8924 = vmatmul.mubr.f32.gmra.mrb[242].mxu0 %v13905_v29  ;;  %v19863_v7 = vld [vmem:[#allocation134_spill] sm:$0xff]  ;;  %v8678_v49 = vpop.f32.mrb[184].mxu0 }
 0x341   : > { %v13927_v61 = vsub.f32 %v4049_v47, %v903_v28  ;;  %v3954_v60 = vsub.f32 %v3890_v43, %v19862_v36  ;;  %v3858_v24 = vsub.f32 %v19863_v7, %v13923_v19  ;;  %v13932_v9 = vsub.f32 %v4048_v15, %v902_v22  ;;  %v905_v5 = vld [vmem:[%s13090_s15 + $0x1b8] sm:$0xff]  ;;  %v3605_v47 = vpop.f32.mrb[185].mxu0  ;;  %v904_v43 = vld [vmem:[%s13090_s15 + $0x1b0] sm:$0xff]  ;;  %v19868_v15 = vld [vmem:[#allocation40_spill] sm:$0xff] }
 0x342   : > { %v13934_v4 = vsub.f32 %v4144_v1, %v7805_v25  ;;  %v4147_v27 = vmul.f32 %v3955_v34, %v13222_v55  ;;  %v4051_v14 = vmul.f32 %v3859_v30, %v13222_v55  ;;  %v3893_v29 = vsub.f32 %v8678_v49, %v13146_v33  ;;  %v7807_v36 = vld [vmem:[%s13090_s15 + $0x2b0] sm:$0xff]  ;;  %v13950_v1 = vpop.f32.mrb[152].mxu1  ;;  %v7808_v33 = vld [vmem:[%s13090_s15 + $0x2b8] sm:$0xff]  ;;  %v8681_v49 = vpop.f32.mrb[186].mxu0 }
 0x343   : > { %19864 = vst [vmem:[#allocation32_spill] sm:$0xff] %v13932_v9  ;;  %v13940_v28 = vsub.f32 %v4145_v57, %v7806_v12  ;;  %v4146_v19 = vmul.f32 %v3954_v60, %v13230_v44  ;;  %v13946_v7 = vld [vmem:[%s13078_s29 + $0x30] sm:$0xff]  ;;  %v3892_v25 = vsub.f32 %v3605_v47, %v13154_v54  ;;  %19866 = vst [vmem:[#allocation13_spill] sm:$0xff] %v13950_v1  ;;  %8846 = vmatprep.mubr.f32.mxu1 %v13932_v9  ;;  %v19867_v55 = vld [vmem:[#allocation126_spill] sm:$0xff]  ;;  %v13958_v44 = vpop.f32.mrb[153].mxu1 }
 0x344   : > { %v4050_v22 = vmul.f32 %v13946_v7, %v3858_v24  ;;  %8926 = vmatprep.mubr.f32.mxu0 %v13934_v4  ;;  %v3957_v57 = vsub.f32 %v3893_v29, %v19867_v55  ;;  %v3861_v12 = vsub.f32 %v19868_v15, %v13950_v1  ;;  %19869 = vst [vmem:[#allocation38_spill] sm:$0xff] %v13958_v44  ;;  %v19870_v34 = vld [vmem:[#allocation49_spill] sm:$0xff]  ;;  %v19871_v60 = vld [vmem:[#allocation8_spill] sm:$0xff] }
 0x345   : > { %19865 = vst [vmem:[#allocation58_spill] sm:$0xff] %v13940_v28  ;;  %8847 = vmatmul.mubr.f32.gmra.mrb[212].mxu1 %v13927_v61  ;;  %8927 = vmatmul.mubr.f32.gmra.mrb[244].mxu0 %v13940_v28  ;;  %v13962_v54 = vsub.f32 %v4051_v14, %v905_v5  ;;  %v3956_v30 = vsub.f32 %v3892_v25, %v19870_v34  ;;  %v907_v55 = vld [vmem:[%s13090_s15 + $0x1c8] sm:$0xff]  ;;  %v3615_v14 = vpop.f32.mrb[187].mxu0  ;;  %v906_v25 = vld [vmem:[%s13090_s15 + $0x1c0] sm:$0xff] }
 0x346   : > { %v3860_v24 = vsub.f32 %v19871_v60, %v13958_v44  ;;  %v13967_v29 = vsub.f32 %v4050_v22, %v904_v43  ;;  %v13969_v47 = vsub.f32 %v4146_v19, %v7807_v36  ;;  %v4149_v1 = vmul.f32 %v3957_v57, %v13266_v31  ;;  %v7809_v34 = vld [vmem:[%s13090_s15 + $0x2c0] sm:$0xff]  ;;  %v13982_v19 = vpop.f32.mrb[154].mxu1 }
 0x347   : > { %v4053_v9 = vmul.f32 %v3861_v12, %v13266_v31  ;;  %v3895_v28 = vsub.f32 %v8681_v49, %v13160_v16  ;;  %v13975_v5 = vsub.f32 %v4147_v27, %v7808_v33  ;;  %v4148_v44 = vmul.f32 %v3956_v30, %v13274_v62  ;;  %19874 = vst [vmem:[#allocation99_spill] sm:$0xff] %v13982_v19  ;;  %v7810_v31 = vld [vmem:[%s13090_s15 + $0x2c8] sm:$0xff]  ;;  %v19875_v16 = vld [vmem:[#allocation110_spill] sm:$0xff]  ;;  %v19876_v27 = vld [vmem:[#allocation57_spill] sm:$0xff]  ;;  %v13990_v57 = vpop.f32.mrb[155].mxu1  ;;  %v8684_v49 = vpop.f32.mrb[188].mxu0 }
 0x348   : > { %19872 = vst [vmem:[#allocation51_spill] sm:$0xff] %v13967_v29  ;;  %v4052_v43 = vmul.f32 %v3860_v24, %v13274_v62  ;;  %v3894_v22 = vsub.f32 %v3615_v14, %v13170_v41  ;;  %8849 = vmatprep.mubr.f32.mxu1 %v13967_v29  ;;  %8929 = vmatprep.mubr.f32.mxu0 %v13969_v47  ;;  %19877 = vst [vmem:[#allocation69_spill] sm:$0xff] %v13990_v57  ;;  %v19878_v41 = vld [vmem:[#allocation11_spill] sm:$0xff]  ;;  %v19879_v30 = vld [vmem:[#allocation44_spill] sm:$0xff] }
 0x349   : > { %19873 = vst [vmem:[#allocation61_spill] sm:$0xff] %v13975_v5  ;;  %v3959_v36 = vsub.f32 %v3895_v28, %v19875_v16  ;;  %v3863_v33 = vsub.f32 %v19876_v27, %v13982_v19  ;;  %8850 = vmatmul.mubr.f32.gmra.mrb[214].mxu1 %v13962_v54  ;;  %8930 = vmatmul.mubr.f32.gmra.mrb[246].mxu0 %v13975_v5  ;;  %v909_v16 = vld [vmem:[%s13090_s15 + $0x1d8] sm:$0xff]  ;;  %v19881_v27 = vld [vmem:[#allocation23_spill] sm:$0xff] }
 0x34a   : > { %v13994_v62 = vsub.f32 %v4053_v9, %v907_v55  ;;  %v3958_v12 = vsub.f32 %v3894_v22, %v19878_v41  ;;  %v3862_v24 = vsub.f32 %v19879_v30, %v13990_v57  ;;  %v13999_v28 = vsub.f32 %v4052_v43, %v906_v25  ;;  %v3625_v9 = vpop.f32.mrb[189].mxu0  ;;  %v908_v22 = vld [vmem:[%s13090_s15 + $0x1d0] sm:$0xff] }
 0x34b   : > { %v14001_v14 = vsub.f32 %v4148_v44, %v7809_v34  ;;  %v4151_v19 = vmul.f32 %v3959_v36, %v13304_v58  ;;  %v4055_v29 = vmul.f32 %v3863_v33, %v13304_v58  ;;  %v3897_v5 = vsub.f32 %v8684_v49, %v19881_v27  ;;  %v7811_v41 = vld [vmem:[%s13090_s15 + $0x2d0] sm:$0xff]  ;;  %v14014_v44 = vpop.f32.mrb[156].mxu1  ;;  %v7812_v58 = vld [vmem:[%s13090_s15 + $0x2d8] sm:$0xff]  ;;  %v19884_v34 = vld [vmem:[#allocation68_spill] sm:$0xff] }
 0x34c   : > { %19880 = vst [vmem:[#allocation136_spill] sm:$0xff] %v13999_v28  ;;  %v14007_v55 = vsub.f32 %v4149_v1, %v7810_v31  ;;  %v4150_v57 = vmul.f32 %v3958_v12, %v13312_v10  ;;  %v4054_v25 = vmul.f32 %v3862_v24, %v13312_v10  ;;  %v3896_v43 = vsub.f32 %v3625_v9, %v13198_v26  ;;  %v19885_v31 = vld [vmem:[#allocation45_spill] sm:$0xff]  ;;  %v14022_v27 = vpop.f32.mrb[157].mxu1  ;;  %v19888_v10 = vld [vmem:[#allocation16_spill] sm:$0xff] }
 0x34d   : > { %19883 = vst [vmem:[#allocation20_spill] sm:$0xff] %v14014_v44  ;;  %8852 = vmatprep.mubr.f32.mxu1 %v13999_v28  ;;  %8932 = vmatprep.mubr.f32.mxu0 %v14001_v14  ;;  %v3961_v1 = vsub.f32 %v3897_v5, %v19884_v34  ;;  %v3865_v36 = vsub.f32 %v19885_v31, %v14014_v44  ;;  %19886 = vst [vmem:[#allocation116_spill] sm:$0xff] %v14022_v27  ;;  %v19889_v12 = vld [vmem:[#allocation48_spill] sm:$0xff]  ;;  %v8687_v5 = vpop.f32.mrb[190].mxu0 }
 0x34e   : > { %19882 = vst [vmem:[#allocation29_spill] sm:$0xff] %v14007_v55  ;;  %8853 = vmatmul.mubr.f32.gmra.mrb[216].mxu1 %v13994_v62  ;;  %8933 = vmatmul.mubr.f32.gmra.mrb[248].mxu0 %v14007_v55  ;;  %v14026_v26 = vsub.f32 %v4055_v29, %v909_v16  ;;  %v3960_v33 = vsub.f32 %v3896_v43, %v19888_v10  ;;  %v911_v34 = vld [vmem:[%s13090_s15 + $0x1e8] sm:$0xff]  ;;  %v19891_v29 = vld [vmem:[#allocation93_spill] sm:$0xff]  ;;  %v3635_v31 = vpop.f32.mrb[191].mxu0  ;;  %v910_v10 = vld [vmem:[%s13090_s15 + $0x1e0] sm:$0xff] }
 0x34f   : > { %v3864_v24 = vsub.f32 %v19889_v12, %v14022_v27  ;;  %v14031_v49 = vsub.f32 %v4054_v25, %v908_v22  ;;  %v14033_v9 = vsub.f32 %v4150_v57, %v7811_v41  ;;  %v14037_v44 = vld [vmem:[%s13078_s29 + $0x68] sm:$0xff]  ;;  %v3899_v16 = vsub.f32 %v8687_v5, %v19891_v29  ;;  %v7813_v27 = vld [vmem:[%s13090_s15 + $0x2e0] sm:$0xff]  ;;  %v14052_v25 = vpop.f32.mrb[158].mxu1 }
 0x350   : > { %19887 = vst [vmem:[#allocation18_spill] sm:$0xff] %v14026_v26  ;;  %v4153_v28 = vmul.f32 %v14037_v44, %v3961_v1  ;;  %v4057_v55 = vmul.f32 %v14037_v44, %v3865_v36  ;;  %v14042_v43 = vsub.f32 %v4151_v19, %v7812_v58  ;;  %v14047_v12 = vld [vmem:[%s13078_s29 + $0x60] sm:$0xff]  ;;  %v3898_v41 = vsub.f32 %v3635_v31, %v13214_v52  ;;  %v7814_v1 = vld [vmem:[%s13090_s15 + $0x2e8] sm:$0xff]  ;;  %v19894_v19 = vld [vmem:[#allocation81_spill] sm:$0xff]  ;;  %v14060_v29 = vpop.f32.mrb[159].mxu1 }
 0x351   : > { %19890 = vst [vmem:[#allocation52_spill] sm:$0xff] %v14031_v49  ;;  %v4152_v57 = vmul.f32 %v14047_v12, %v3960_v33  ;;  %v4056_v22 = vmul.f32 %v14047_v12, %v3864_v24  ;;  %19893 = vst [vmem:[#allocation84_spill] sm:$0xff] %v14052_v25  ;;  %8855 = vmatprep.mubr.f32.mxu1 %v14031_v49  ;;  %8935 = vmatprep.mubr.f32.mxu0 %v14033_v9  ;;  %v19895_v36 = vld [vmem:[#allocation89_spill] sm:$0xff]  ;;  %v19898_v31 = vld [vmem:[#allocation138_spill] sm:$0xff] }
 0x352   : > { %19892 = vst [vmem:[#allocation24_spill] sm:$0xff] %v14042_v43  ;;  %v3963_v58 = vsub.f32 %v3899_v16, %v19894_v19  ;;  %v3867_v5 = vsub.f32 %v19895_v36, %v14052_v25  ;;  %19896 = vst [vmem:[#allocation71_spill] sm:$0xff] %v14060_v29  ;;  %8856 = vmatmul.mubr.f32.gmra.mrb[218].mxu1 %v14026_v26  ;;  %8936 = vmatmul.mubr.f32.gmra.mrb[250].mxu0 %v14042_v43  ;;  %v19899_v24 = vld [vmem:[#allocation94_spill] sm:$0xff]  ;;  %v8690_v16 = vpop.f32.mrb[192].mxu0 }
 0x353   : > { %v14064_v52 = vsub.f32 %v4057_v55, %v911_v34  ;;  %v3962_v33 = vsub.f32 %v3898_v41, %v19898_v31  ;;  %v3866_v49 = vsub.f32 %v19899_v24, %v14060_v29  ;;  %v14069_v19 = vsub.f32 %v4056_v22, %v910_v10  ;;  %v14074_v36 = vld [vmem:[%s13078_s29 + $0x78] sm:$0xff]  ;;  %v3645_v34 = vpop.f32.mrb[193].mxu0  ;;  %v912_v31 = vld [vmem:[%s13090_s15 + $0x1f0] sm:$0xff] }
 0x354   : > { %v14071_v25 = vsub.f32 %v4152_v57, %v7813_v27  ;;  %v4155_v26 = vmul.f32 %v14074_v36, %v3963_v58  ;;  %v4059_v43 = vmul.f32 %v14074_v36, %v3867_v5  ;;  %v3901_v55 = vsub.f32 %v8690_v16, %v13234_v48  ;;  %v7815_v29 = vld [vmem:[%s13090_s15 + $0x2f0] sm:$0xff]  ;;  %v913_v48 = vld [vmem:[%s13090_s15 + $0x1f8] sm:$0xff]  ;;  %v7818_v5 = vld [vmem:[%s13090_s15 + $0x308] sm:$0xff]  ;;  %v8693_v24 = vpop.f32.mrb[194].mxu0 }
 0x355   : > { %19897 = vst [vmem:[#allocation21_spill] sm:$0xff] %v14064_v52  ;;  %19900 = vst [vmem:[#allocation98_spill] sm:$0xff] %v14069_v19  ;;  %v14079_v41 = vsub.f32 %v4153_v28, %v7814_v1  ;;  %v14084_v10 = vld [vmem:[%s13078_s29 + $0x70] sm:$0xff]  ;;  %v3900_v22 = vsub.f32 %v3645_v34, %v13242_v59  ;;  %8858 = vmatprep.mubr.f32.mxu1 %v14069_v19  ;;  %v7816_v58 = vld [vmem:[%s13090_s15 + $0x2f8] sm:$0xff] }
 0x356   : > { %19901 = vst [vmem:[#allocation25_spill] sm:$0xff] %v14071_v25  ;;  %v4154_v27 = vmul.f32 %v14084_v10, %v3962_v33  ;;  %v4058_v57 = vmul.f32 %v14084_v10, %v3866_v49  ;;  %8938 = vmatprep.mubr.f32.mxu0 %v14071_v25  ;;  %v19903_v28 = vld [vmem:[#allocation14_spill] sm:$0xff]  ;;  %8859 = vmatmul.mubr.f32.gmra.mrb[220].mxu1 %v14064_v52  ;;  %v19904_v16 = vld [vmem:[#allocation143_spill] sm:$0xff]  ;;  %v14103_v34 = vld [vmem:[%s13078_s29 + $0x8] sm:$0xff] }
 0x357   : > { %19902 = vst [vmem:[#allocation72_spill] sm:$0xff] %v14079_v41  ;;  %v3965_v1 = vsub.f32 %v3901_v55, %v19903_v28  ;;  %8939 = vmatmul.mubr.f32.gmra.mrb[252].mxu0 %v14079_v41  ;;  %v3964_v33 = vsub.f32 %v3900_v22, %v19904_v16  ;;  %v3903_v25 = vsub.f32 %v8693_v24, %v13248_v11  ;;  %v3655_v55 = vpop.f32.mrb[195].mxu0  ;;  %v7817_v41 = vld [vmem:[%s13090_s15 + $0x300] sm:$0xff] }
 0x358   : > { %v14098_v49 = vsub.f32 %v4058_v57, %v912_v31  ;;  %v14100_v59 = vsub.f32 %v4154_v27, %v7815_v29  ;;  %v14107_v28 = vsub.f32 %v4059_v43, %v913_v48  ;;  %v14109_v52 = vsub.f32 %v4155_v26, %v7816_v58  ;;  %v19906_v29 = vld [vmem:[#allocation80_spill] sm:$0xff]  ;;  %v7820_v26 = vld [vmem:[%s13090_s15 + $0x318] sm:$0xff]  ;;  %v8696_v24 = vpop.f32.mrb[196].mxu0 }
 0x359   : > { %v4157_v19 = vmul.f32 %v14103_v34, %v3965_v1  ;;  %v4156_v22 = vmul.f32 %v13838_v46, %v3964_v33  ;;  %v3902_v31 = vsub.f32 %v3655_v55, %v13258_v0  ;;  %v5022_v27 = vadd.f32 %v13602_v17, %v19906_v29  ;;  %v19907_v48 = vld [vmem:[#allocation22_spill] sm:$0xff]  ;;  %v7819_v1 = vld [vmem:[%s13090_s15 + $0x310] sm:$0xff]  ;;  %v7822_v55 = vld [vmem:[%s13090_s15 + $0x328] sm:$0xff] }
 0x35a   : > { %19905 = vst [vmem:[#allocation19_spill] sm:$0xff] %v14098_v49  ;;  %8861 = vmatprep.mubr.f32.mxu1 %v14098_v49  ;;  %8941 = vmatprep.mubr.f32.mxu0 %v14100_v59  ;;  %v3967_v11 = vsub.f32 %v3903_v25, %v13585_v37  ;;  %v5023_v58 = vadd.f32 %v13589_v13, %v19907_v48  ;;  %v19917_v48 = vld [vmem:[#allocation123_spill] sm:$0xff] }
 0x35b   : > { %v4221_v57 = vsub.f32 %v4157_v19, %v7818_v5  ;;  %8862 = vmatmul.mubr.f32.gmra.mrb[222].mxu1 %v14107_v28  ;;  %8942 = vmatmul.mubr.f32.gmra.mrb[254].mxu0 %v14109_v52  ;;  %v3966_v43 = vsub.f32 %v3902_v31, %v13594_v23  ;;  %v14123_v0 = vsub.f32 %v4156_v22, %v7817_v41  ;;  %v3665_v19 = vpop.f32.mrb[197].mxu0  ;;  %v19909_v41 = vld [vmem:[#allocation17_spill] sm:$0xff] }
 0x35c   : > { %9024 = vmatprep.mubr.f32.mxu1 %v5022_v27  ;;  %v4159_v37 = vmul.f32 %v13865_v2, %v3967_v11  ;;  %v3905_v25 = vsub.f32 %v8696_v24, %v13278_v56  ;;  %v3904_v5 = vsub.f32 %v3665_v19, %v19773_v32  ;;  %v5024_v16 = vadd.f32 %v13634_v20, %v19909_v41  ;;  %v19911_v56 = vld [vmem:[#allocation157_spill] sm:$0xff]  ;;  %v8699_v31 = vpop.f32.mrb[198].mxu0  ;;  %v19913_v27 = vld [vmem:[#allocation56_spill] sm:$0xff]  ;;  %v19918_v19 = vld [vmem:[#allocation87_spill] sm:$0xff] }
 0x35d   : > { %v14128_v17 = vadd.f32 %v4221_v57, %v13608_v63  ;;  %v4158_v23 = vmul.f32 %v13875_v8, %v3966_v43  ;;  %8944 = vmatprep.mubr.f32.mxu0 %v14123_v0  ;;  %v19910_v63 = vld [vmem:[#allocation150_spill] sm:$0xff]  ;;  %v14147_v11 = vld [vmem:[%s13078_s29 + $0x28] sm:$0xff]  ;;  %v3675_v24 = vpop.f32.mrb[199].mxu0 }
 0x35e   : > { %v4223_v13 = vsub.f32 %v4159_v37, %v7820_v26  ;;  %v3969_v33 = vsub.f32 %v3905_v25, %v19910_v63  ;;  %v3968_v22 = vsub.f32 %v3904_v5, %v19911_v56  ;;  %v19915_v26 = vld [vmem:[#allocation26_spill] sm:$0xff]  ;;  %v7821_v37 = vld [vmem:[%s13090_s15 + $0x320] sm:$0xff]  ;;  %v19920_v5 = vld [vmem:[#allocation129_spill] sm:$0xff] }
 0x35f   : > { %19908 = vst [vmem:[#allocation91_spill] sm:$0xff] %v14128_v17  ;;  %8945 = vmatmul.mubr.f32.gmra.mrb[0].mxu0 %v4221_v57  ;;  %9025 = vmatmul.mubr.f32.vlgmr.msra.gmra.mrb[224].mxu1 %v5023_v58  ;;  %v14141_v29 = vsub.f32 %v4158_v23, %v7819_v1  ;;  %v3907_v43 = vsub.f32 %v8699_v31, %v19915_v26  ;;  %v19916_v57 = vld [vmem:[#allocation74_spill] sm:$0xff]  ;;  %v19919_v23 = vld [vmem:[#allocation83_spill] sm:$0xff]  ;;  %v8702_v26 = vpop.f32.mrb[200].mxu0 }
 0x360   : > { %9027 = vmatprep.mubr.f32.mxu1 %v5024_v16  ;;  %v14144_v32 = vadd.f32 %v4223_v13, %v19913_v27  ;;  %v4161_v20 = vmul.f32 %v14147_v11, %v3969_v33  ;;  %v5025_v58 = vadd.f32 %v19917_v48, %v19916_v57  ;;  %v4160_v25 = vmul.f32 %v13910_v40, %v3968_v22  ;;  %v19921_v63 = vld [vmem:[#allocation122_spill] sm:$0xff]  ;;  %v19922_v31 = vld [vmem:[#allocation27_spill] sm:$0xff] }
 0x361   : > { %19912 = vst [vmem:[#allocation90_spill] sm:$0xff] %v14141_v29  ;;  %v3906_v1 = vsub.f32 %v3675_v24, %v19918_v19  ;;  %8947 = vmatprep.mubr.f32.mxu0 %v14141_v29  ;;  %v5026_v41 = vadd.f32 %v19920_v5, %v19919_v23  ;;  %v3971_v33 = vsub.f32 %v3907_v43, %v19921_v63  ;;  %v7824_v56 = vld [vmem:[%s13090_s15 + $0x338] sm:$0xff]  ;;  %v19924_v22 = vld [vmem:[#allocation63_spill] sm:$0xff]  ;;  %v3685_v43 = vpop.f32.mrb[201].mxu0 }
 0x362   : > { %19914 = vst [vmem:[#allocation97_spill] sm:$0xff] %v14144_v32  ;;  %v4225_v16 = vsub.f32 %v4161_v20, %v7822_v55  ;;  %v14162_v57 = vsub.f32 %v4160_v25, %v7821_v37  ;;  %v14168_v48 = vld [vmem:[%s13078_s29 + $0x38] sm:$0xff]  ;;  %v19926_v55 = vld [vmem:[#allocation120_spill] sm:$0xff]  ;;  %v19931_v63 = vld [vmem:[#allocation43_spill] sm:$0xff] }
 0x363   : > { %8948 = vmatmul.mubr.f32.gmra.mrb[2].mxu0 %v4223_v13  ;;  %9028 = vmatmul.mubr.f32.gmra.mrb[226].mxu1 %v5025_v58  ;;  %v3970_v27 = vsub.f32 %v3906_v1, %v19922_v31  ;;  %v4163_v19 = vmul.f32 %v14168_v48, %v3971_v33  ;;  %v3909_v20 = vsub.f32 %v8702_v26, %v19926_v55  ;;  %v19927_v13 = vld [vmem:[#allocation77_spill] sm:$0xff]  ;;  %v19928_v58 = vld [vmem:[#allocation4_spill] sm:$0xff]  ;;  %v19932_v33 = vld [vmem:[#allocation3_spill] sm:$0xff] }
 0x364   : > { %9030 = vmatprep.mubr.f32.mxu1 %v5026_v41  ;;  %19923 = vst [vmem:[#allocation95_spill] sm:$0xff] %v14162_v57  ;;  %v14165_v24 = vadd.f32 %v4225_v16, %v19924_v22  ;;  %v5027_v23 = vadd.f32 %v19928_v58, %v19927_v13  ;;  %v7823_v1 = vld [vmem:[%s13090_s15 + $0x330] sm:$0xff]  ;;  %v19929_v37 = vld [vmem:[#allocation140_spill] sm:$0xff]  ;;  %8950 = vmatprep.mubr.f32.mxu0 %v14162_v57  ;;  %v19930_v41 = vld [vmem:[#allocation78_spill] sm:$0xff] }
 0x365   : > { %v4162_v5 = vmul.f32 %v13946_v7, %v3970_v27  ;;  %v3908_v25 = vsub.f32 %v3685_v43, %v19929_v37  ;;  %v5028_v31 = vadd.f32 %v19931_v63, %v19930_v41  ;;  %v4227_v22 = vsub.f32 %v4163_v19, %v7824_v56  ;;  %v7826_v55 = vld [vmem:[%s13090_s15 + $0x348] sm:$0xff]  ;;  %v19933_v13 = vld [vmem:[#allocation6_spill] sm:$0xff]  ;;  %v19937_v19 = vld [vmem:[#allocation139_spill] sm:$0xff] }
 0x366   : > { %19925 = vst [vmem:[#allocation114_spill] sm:$0xff] %v14165_v24  ;;  %v3973_v26 = vsub.f32 %v3909_v20, %v19932_v33  ;;  %v8705_v24 = vpop.f32.mrb[202].mxu0  ;;  %v19935_v43 = vld [vmem:[#allocation64_spill] sm:$0xff]  ;;  %v7825_v33 = vld [vmem:[%s13090_s15 + $0x340] sm:$0xff] }
 0x367   : > { %8951 = vmatmul.mubr.f32.gmra.mrb[4].mxu0 %v4225_v16  ;;  %9031 = vmatmul.mubr.f32.gmra.mrb[228].mxu1 %v5027_v23  ;;  %v3972_v58 = vsub.f32 %v3908_v25, %v19933_v13  ;;  %v14183_v27 = vsub.f32 %v4162_v5, %v7823_v1  ;;  %v14186_v37 = vadd.f32 %v4227_v22, %v19935_v43  ;;  %v14189_v32 = vld [vmem:[%s13078_s29 + $0x48] sm:$0xff]  ;;  %v3695_v20 = vpop.f32.mrb[203].mxu0  ;;  %v19939_v23 = vld [vmem:[#allocation54_spill] sm:$0xff]  ;;  %v14197_v25 = vld [vmem:[%s13078_s29 + $0x40] sm:$0xff] }
 0x368   : > { %9033 = vmatprep.mubr.f32.mxu1 %v5028_v31  ;;  %v4165_v56 = vmul.f32 %v14189_v32, %v3973_v26  ;;  %v3911_v41 = vsub.f32 %v8705_v24, %v19937_v19  ;;  %v19938_v16 = vld [vmem:[#allocation96_spill] sm:$0xff]  ;;  %v19940_v5 = vld [vmem:[#allocation142_spill] sm:$0xff]  ;;  %v8708_v17 = vpop.f32.mrb[204].mxu0 }
 0x369   : > { %19934 = vst [vmem:[#allocation112_spill] sm:$0xff] %v14183_v27  ;;  %19936 = vst [vmem:[#allocation73_spill] sm:$0xff] %v14186_v37  ;;  %v5029_v63 = vadd.f32 %v19939_v23, %v19938_v16  ;;  %v4164_v1 = vmul.f32 %v14197_v25, %v3972_v58  ;;  %v3910_v31 = vsub.f32 %v3695_v20, %v19940_v5  ;;  %8953 = vmatprep.mubr.f32.mxu0 %v14183_v27  ;;  %v19941_v13 = vld [vmem:[#allocation88_spill] sm:$0xff]  ;;  %v19942_v43 = vld [vmem:[#allocation86_spill] sm:$0xff] }
 0x36a   : > { %v5030_v37 = vadd.f32 %v19942_v43, %v19941_v13  ;;  %v4229_v26 = vsub.f32 %v4165_v56, %v7826_v55  ;;  %v19943_v24 = vld [vmem:[#allocation66_spill] sm:$0xff]  ;;  %v19944_v23 = vld [vmem:[#allocation35_spill] sm:$0xff]  ;;  %v19945_v20 = vld [vmem:[#allocation65_spill] sm:$0xff] }
 0x36b   : > { %v3975_v19 = vsub.f32 %v3911_v41, %v19943_v24  ;;  %8954 = vmatmul.mubr.f32.gmra.mrb[6].mxu0 %v4227_v22  ;;  %9034 = vmatmul.mubr.f32.gmra.mrb[230].mxu1 %v5029_v63  ;;  %v7828_v16 = vld [vmem:[%s13090_s15 + $0x358] sm:$0xff]  ;;  %v3974_v57 = vsub.f32 %v3910_v31, %v19944_v23  ;;  %v14207_v58 = vsub.f32 %v4164_v1, %v7825_v33  ;;  %v3705_v41 = vpop.f32.mrb[205].mxu0  ;;  %v19948_v22 = vld [vmem:[#allocation119_spill] sm:$0xff]  ;;  %v7827_v24 = vld [vmem:[%s13090_s15 + $0x350] sm:$0xff] }
 0x36c   : > { %9036 = vmatprep.mubr.f32.mxu1 %v5030_v37  ;;  %v14210_v5 = vadd.f32 %v4229_v26, %v19945_v20  ;;  %v14213_v27 = vld [vmem:[%s13078_s29 + $0x58] sm:$0xff]  ;;  %v19949_v63 = vld [vmem:[#allocation127_spill] sm:$0xff]  ;;  %v14221_v31 = vld [vmem:[%s13078_s29 + $0x50] sm:$0xff]  ;;  %v8711_v29 = vpop.f32.mrb[206].mxu0 }
 0x36d   : > { %v4167_v55 = vmul.f32 %v14213_v27, %v3975_v19  ;;  %v19947_v56 = vld [vmem:[#allocation118_spill] sm:$0xff]  ;;  %v5031_v43 = vadd.f32 %v19949_v63, %v19948_v22  ;;  %v4166_v37 = vmul.f32 %v14221_v31, %v3974_v57  ;;  %v19950_v33 = vld [vmem:[#allocation115_spill] sm:$0xff]  ;;  %8956 = vmatprep.mubr.f32.mxu0 %v14207_v58  ;;  %v19951_v23 = vld [vmem:[#allocation144_spill] sm:$0xff] }
 0x36e   : > { %19946 = vst [vmem:[#allocation82_spill] sm:$0xff] %v14210_v5  ;;  %v3913_v13 = vsub.f32 %v8708_v17, %v19947_v56  ;;  %v3912_v1 = vsub.f32 %v3705_v41, %v19950_v33  ;;  %v5032_v20 = vadd.f32 %v13762_v39, %v19951_v23  ;;  %v19952_v5 = vld [vmem:[#allocation107_spill] sm:$0xff]  ;;  %v7830_v56 = vld [vmem:[%s13090_s15 + $0x368] sm:$0xff]  ;;  %v3915_v33 = vsub.f32 %v8711_v29, %v19826_v51  ;;  %v3715_v39 = vpop.f32.mrb[207].mxu0  ;;  %v7832_v29 = vld [vmem:[%s13090_s15 + $0x378] sm:$0xff] }
 0x36f   : > { %v4231_v19 = vsub.f32 %v4167_v55, %v7828_v16  ;;  %8957 = vmatmul.mubr.f32.gmra.mrb[8].mxu0 %v4229_v26  ;;  %9037 = vmatmul.mubr.f32.gmra.mrb[232].mxu1 %v5031_v43  ;;  %v19953_v22 = vld [vmem:[#allocation135_spill] sm:$0xff]  ;;  %v4230_v49 = vsub.f32 %v4166_v37, %v7827_v24  ;;  %v19954_v16 = vld [vmem:[#allocation141_spill] sm:$0xff]  ;;  %v3914_v43 = vsub.f32 %v3715_v39, %v19829_v6 }
 0x370   : > { %v3977_v17 = vsub.f32 %v3913_v13, %v19952_v5  ;;  %v3976_v63 = vsub.f32 %v3912_v1, %v19953_v22  ;;  %9039 = vmatprep.mubr.f32.mxu1 %v5032_v20  ;;  %v19955_v55 = vld [vmem:[#allocation37_spill] sm:$0xff]  ;;  %v7829_v26 = vld [vmem:[%s13090_s15 + $0x360] sm:$0xff]  ;;  %v19958_v20 = vld [vmem:[#allocation28_spill] sm:$0xff] }
 0x371   : > { %v14232_v57 = vadd.f32 %v4231_v19, %v13755_v35  ;;  %v5033_v5 = vadd.f32 %v19955_v55, %v19954_v16  ;;  %8959 = vmatprep.mubr.f32.mxu0 %v4230_v49  ;;  %v19956_v1 = vld [vmem:[#allocation151_spill] sm:$0xff]  ;;  %v19957_v37 = vld [vmem:[#allocation137_spill] sm:$0xff]  ;;  %v3979_v51 = vsub.f32 %v3915_v33, %v19958_v20  ;;  %v8714_v16 = vpop.f32.mrb[208].mxu0  ;;  %v7834_v20 = vld [vmem:[%s13090_s15 + $0x388] sm:$0xff] }
 0x372   : > { %v4169_v41 = vmul.f32 %v14037_v44, %v3977_v17  ;;  %v4168_v13 = vmul.f32 %v14047_v12, %v3976_v63  ;;  %v5034_v24 = vadd.f32 %v13794_v45, %v19956_v1  ;;  %v14244_v35 = vadd.f32 %v4230_v49, %v19957_v37  ;;  %v19959_v17 = vld [vmem:[#allocation9_spill] sm:$0xff]  ;;  %v3725_v39 = vpop.f32.mrb[209].mxu0  ;;  %v19963_v1 = vld [vmem:[#allocation152_spill] sm:$0xff] }
 0x373   : > { %8960 = vmatmul.mubr.f32.gmra.mrb[10].mxu0 %v4231_v19  ;;  %9040 = vmatmul.mubr.f32.gmra.mrb[234].mxu1 %v5033_v5  ;;  %v3978_v22 = vsub.f32 %v3914_v43, %v19959_v17  ;;  %v4171_v45 = vmul.f32 %v14074_v36, %v3979_v51  ;;  %v3917_v49 = vsub.f32 %v8714_v16, %v19834_v3  ;;  %v7831_v19 = vld [vmem:[%s13090_s15 + $0x370] sm:$0xff]  ;;  %v19962_v5 = vld [vmem:[#allocation102_spill] sm:$0xff]  ;;  %v8717_v16 = vpop.f32.mrb[210].mxu0 }
 0x374   : > { %v4233_v23 = vsub.f32 %v4169_v41, %v7830_v56  ;;  %9042 = vmatprep.mubr.f32.mxu1 %v5034_v24  ;;  %v4232_v63 = vsub.f32 %v4168_v13, %v7829_v26  ;;  %v19960_v56 = vld [vmem:[#allocation146_spill] sm:$0xff]  ;;  %v19961_v41 = vld [vmem:[#allocation47_spill] sm:$0xff]  ;;  %v3916_v43 = vsub.f32 %v3725_v39, %v19962_v5  ;;  %v5036_v26 = vadd.f32 %v13826_v53, %v19963_v1  ;;  %v19965_v37 = vld [vmem:[#allocation121_spill] sm:$0xff] }
 0x375   : > { %v5035_v33 = vadd.f32 %v19961_v41, %v19960_v56  ;;  %v4170_v55 = vmul.f32 %v14084_v10, %v3978_v22  ;;  %v19964_v13 = vld [vmem:[#allocation46_spill] sm:$0xff]  ;;  %v4235_v24 = vsub.f32 %v4171_v45, %v7832_v29  ;;  %v3981_v3 = vsub.f32 %v3917_v49, %v19965_v37  ;;  %v19966_v51 = vld [vmem:[#allocation125_spill] sm:$0xff]  ;;  %v19967_v56 = vld [vmem:[#allocation104_spill] sm:$0xff]  ;;  %v3735_v41 = vpop.f32.mrb[211].mxu0 }
 0x376   : > { %v14250_v6 = vadd.f32 %v4233_v23, %v13787_v42  ;;  %8962 = vmatprep.mubr.f32.mxu0 %v4232_v63  ;;  %v14262_v42 = vadd.f32 %v4232_v63, %v19964_v13  ;;  %v3980_v17 = vsub.f32 %v3916_v43, %v19966_v51  ;;  %v3919_v63 = vsub.f32 %v8717_v16, %v19967_v56  ;;  %v19968_v29 = vld [vmem:[#allocation154_spill] sm:$0xff]  ;;  %v19969_v45 = vld [vmem:[#allocation5_spill] sm:$0xff]  ;;  %v19975_v51 = vld [vmem:[#allocation39_spill] sm:$0xff]  ;;  %v8720_v56 = vpop.f32.mrb[212].mxu0 }
 0x377   : > { %8963 = vmatmul.mubr.f32.gmra.mrb[12].mxu0 %v4233_v23  ;;  %9043 = vmatmul.mubr.f32.gmra.mrb[236].mxu1 %v5035_v33  ;;  %v4234_v22 = vsub.f32 %v4170_v55, %v7831_v19  ;;  %v14268_v39 = vadd.f32 %v4235_v24, %v13819_v38  ;;  %v4173_v53 = vmul.f32 %v14103_v34, %v3981_v3  ;;  %v7833_v23 = vld [vmem:[%s13090_s15 + $0x380] sm:$0xff]  ;;  %v19970_v5 = vld [vmem:[#allocation85_spill] sm:$0xff]  ;;  %v19974_v13 = vld [vmem:[#allocation10_spill] sm:$0xff] }
 0x378   : > { %9045 = vmatprep.mubr.f32.mxu1 %v5036_v26  ;;  %v5037_v49 = vadd.f32 %v19969_v45, %v19968_v29  ;;  %v4172_v33 = vmul.f32 %v13838_v46, %v3980_v17  ;;  %v3918_v43 = vsub.f32 %v3735_v41, %v19970_v5  ;;  %v19971_v1 = vld [vmem:[#allocation101_spill] sm:$0xff]  ;;  %v19972_v19 = vld [vmem:[#allocation67_spill] sm:$0xff]  ;;  %v3983_v37 = vsub.f32 %v3919_v63, %v19974_v13  ;;  %v7836_v3 = vld [vmem:[%s13090_s15 + $0x398] sm:$0xff]  ;;  %v3745_v5 = vpop.f32.mrb[213].mxu0 }
 0x379   : > { %8965 = vmatprep.mubr.f32.mxu0 %v4234_v22  ;;  %v5038_v55 = vadd.f32 %v19972_v19, %v19971_v1  ;;  %v19973_v26 = vld [vmem:[#allocation131_spill] sm:$0xff]  ;;  %v4237_v34 = vsub.f32 %v4173_v53, %v7834_v20  ;;  %v19976_v17 = vld [vmem:[#allocation50_spill] sm:$0xff]  ;;  %v19979_v53 = vld [vmem:[#allocation100_spill] sm:$0xff] }
 0x37a   : > { %v14280_v38 = vadd.f32 %v4234_v22, %v19973_v26  ;;  %v3982_v16 = vsub.f32 %v3918_v43, %v19975_v51  ;;  %v4236_v46 = vsub.f32 %v4172_v33, %v7833_v23  ;;  %v4175_v29 = vmul.f32 %v13865_v2, %v3983_v37  ;;  %v19977_v45 = vld [vmem:[#allocation155_spill] sm:$0xff]  ;;  %v7838_v13 = vld [vmem:[%s13090_s15 + $0x3a8] sm:$0xff]  ;;  %v8723_v51 = vpop.f32.mrb[214].mxu0 }
 0x37b   : > { %8966 = vmatmul.mubr.f32.gmra.mrb[14].mxu0 %v4235_v24  ;;  %9046 = vmatmul.mubr.f32.gmra.mrb[238].mxu1 %v5037_v49  ;;  %v14286_v41 = vadd.f32 %v4237_v34, %v19976_v17  ;;  %v3921_v22 = vsub.f32 %v8720_v56, %v19977_v45  ;;  %v19978_v20 = vld [vmem:[#allocation159_spill] sm:$0xff]  ;;  %v7835_v24 = vld [vmem:[%s13090_s15 + $0x390] sm:$0xff]  ;;  %v3920_v43 = vsub.f32 %v3745_v5, %v19855_v50  ;;  %v19984_v56 = vld [vmem:[#allocation60_spill] sm:$0xff]  ;;  %v3755_v17 = vpop.f32.mrb[215].mxu0 }
 0x37c   : > { %9048 = vmatprep.mubr.f32.mxu1 %v5038_v55  ;;  %v5039_v63 = vadd.f32 %v19979_v53, %v19978_v20  ;;  %v4174_v49 = vmul.f32 %v13875_v8, %v3982_v16  ;;  %8968 = vmatprep.mubr.f32.mxu0 %v4236_v46  ;;  %v19980_v1 = vld [vmem:[#allocation111_spill] sm:$0xff]  ;;  %v4239_v2 = vsub.f32 %v4175_v29, %v7836_v3  ;;  %v19982_v55 = vld [vmem:[#allocation33_spill] sm:$0xff]  ;;  %v19986_v29 = vld [vmem:[#allocation92_spill] sm:$0xff] }
 0x37d   : > { %v5040_v23 = vadd.f32 %v13899_v18, %v19980_v1  ;;  %v19981_v33 = vld [vmem:[#allocation55_spill] sm:$0xff]  ;;  %v3985_v26 = vsub.f32 %v3921_v22, %v19982_v55  ;;  %v3984_v37 = vsub.f32 %v3920_v43, %v13888_v21  ;;  %v19985_v3 = vld [vmem:[#allocation109_spill] sm:$0xff]  ;;  %v19987_v5 = vld [vmem:[#allocation134_spill] sm:$0xff]  ;;  %v8726_v55 = vpop.f32.mrb[216].mxu0 }
 0x37e   : > { %v14298_v19 = vadd.f32 %v4236_v46, %v19981_v33  ;;  %v4238_v8 = vsub.f32 %v4174_v49, %v7835_v24  ;;  %v19983_v50 = vld [vmem:[#allocation15_spill] sm:$0xff]  ;;  %v3923_v46 = vsub.f32 %v8723_v51, %v19984_v56  ;;  %v5041_v45 = vadd.f32 %v19986_v29, %v19985_v3  ;;  %v19988_v20 = vld [vmem:[#allocation124_spill] sm:$0xff]  ;;  %v7840_v1 = vld [vmem:[%s13090_s15 + $0x3b8] sm:$0xff]  ;;  %v3765_v51 = vpop.f32.mrb[217].mxu0 }
 0x37f   : > { %8969 = vmatmul.mubr.f32.gmra.mrb[16].mxu0 %v4237_v34  ;;  %9049 = vmatmul.mubr.f32.gmra.mrb[240].mxu1 %v5039_v63  ;;  %v14304_v16 = vadd.f32 %v4239_v2, %v19983_v50  ;;  %v4177_v18 = vmul.f32 %v14147_v11, %v3985_v26  ;;  %v7837_v34 = vld [vmem:[%s13090_s15 + $0x3a0] sm:$0xff]  ;;  %v4176_v22 = vmul.f32 %v13910_v40, %v3984_v37  ;;  %v19989_v63 = vld [vmem:[#allocation42_spill] sm:$0xff]  ;;  %v19990_v49 = vld [vmem:[#allocation132_spill] sm:$0xff] }
 0x380   : > { %9051 = vmatprep.mubr.f32.mxu1 %v5040_v23  ;;  %v3922_v21 = vsub.f32 %v3755_v17, %v19987_v5  ;;  %8971 = vmatprep.mubr.f32.mxu0 %v4238_v8  ;;  %v5042_v53 = vadd.f32 %v13934_v4, %v19988_v20  ;;  %v14316_v24 = vadd.f32 %v4238_v8, %v19989_v63  ;;  %v19991_v23 = vld [vmem:[#allocation128_spill] sm:$0xff]  ;;  %v19993_v8 = vld [vmem:[#allocation58_spill] sm:$0xff]  ;;  %v19996_v29 = vld [vmem:[#allocation13_spill] sm:$0xff]  ;;  %v8729_v5 = vpop.f32.mrb[218].mxu0 }
 0x381   : > { %v4241_v11 = vsub.f32 %v4177_v18, %v7838_v13  ;;  %v3987_v43 = vsub.f32 %v3923_v46, %v19990_v49  ;;  %v4240_v40 = vsub.f32 %v4176_v22, %v7837_v34  ;;  %v3925_v37 = vsub.f32 %v8726_v55, %v19868_v15  ;;  %v19992_v13 = vld [vmem:[#allocation41_spill] sm:$0xff]  ;;  %v19994_v46 = vld [vmem:[#allocation75_spill] sm:$0xff]  ;;  %v19995_v3 = vld [vmem:[#allocation32_spill] sm:$0xff] }
 0x382   : > { %v3986_v33 = vsub.f32 %v3922_v21, %v19991_v23  ;;  %v5043_v50 = vadd.f32 %v19993_v8, %v19992_v13  ;;  %v3924_v56 = vsub.f32 %v3765_v51, %v19871_v60  ;;  %v5044_v17 = vadd.f32 %v13969_v47, %v19994_v46  ;;  %v19997_v34 = vld [vmem:[#allocation38_spill] sm:$0xff]  ;;  %v19998_v21 = vld [vmem:[#allocation57_spill] sm:$0xff]  ;;  %v19999_v63 = vld [vmem:[#allocation7_spill] sm:$0xff] }
 0x383   : > { %8972 = vmatmul.mubr.f32.gmra.mrb[18].mxu0 %v4239_v2  ;;  %9052 = vmatmul.mubr.f32.gmra.mrb[242].mxu1 %v5041_v45  ;;  %v14322_v26 = vadd.f32 %v4241_v11, %v13927_v61  ;;  %v4179_v4 = vmul.f32 %v14168_v48, %v3987_v43  ;;  %v7839_v2 = vld [vmem:[%s13090_s15 + $0x3b0] sm:$0xff]  ;;  %v14334_v61 = vadd.f32 %v4240_v40, %v19995_v3  ;;  %v7842_v45 = vld [vmem:[%s13090_s15 + $0x3c8] sm:$0xff]  ;;  %v7844_v51 = vld [vmem:[%s13090_s15 + $0x3d8] sm:$0xff] }
 0x384   : > { %9054 = vmatprep.mubr.f32.mxu1 %v5042_v53  ;;  %v4178_v18 = vmul.f32 %v13946_v7, %v3986_v33  ;;  %8974 = vmatprep.mubr.f32.mxu0 %v4240_v40  ;;  %v3989_v15 = vsub.f32 %v3925_v37, %v19996_v29  ;;  %v3988_v22 = vsub.f32 %v3924_v56, %v19997_v34  ;;  %v3775_v53 = vpop.f32.mrb[219].mxu0  ;;  %v20000_v49 = vld [vmem:[#allocation61_spill] sm:$0xff]  ;;  %v20001_v33 = vld [vmem:[#allocation30_spill] sm:$0xff]  ;;  %v20002_v40 = vld [vmem:[#allocation51_spill] sm:$0xff] }
 0x385   : > { %v4243_v48 = vsub.f32 %v4179_v4, %v7840_v1  ;;  %v3927_v20 = vsub.f32 %v8729_v5, %v19998_v21  ;;  %v5045_v43 = vadd.f32 %v20000_v49, %v19999_v63  ;;  %v3926_v23 = vsub.f32 %v3775_v53, %v19879_v30  ;;  %v20003_v4 = vld [vmem:[#allocation99_spill] sm:$0xff]  ;;  %v20004_v13 = vld [vmem:[#allocation69_spill] sm:$0xff]  ;;  %v20009_v34 = vld [vmem:[#allocation36_spill] sm:$0xff] }
 0x386   : > { %v4242_v7 = vsub.f32 %v4178_v18, %v7839_v2  ;;  %v4181_v47 = vmul.f32 %v14189_v32, %v3989_v15  ;;  %v4180_v1 = vmul.f32 %v14197_v25, %v3988_v22  ;;  %v5046_v55 = vadd.f32 %v14001_v14, %v20001_v33  ;;  %v20005_v2 = vld [vmem:[#allocation45_spill] sm:$0xff]  ;;  %v20006_v46 = vld [vmem:[#allocation79_spill] sm:$0xff]  ;;  %v20008_v15 = vld [vmem:[#allocation48_spill] sm:$0xff] }
 0x387   : > { %8975 = vmatmul.mubr.f32.gmra.mrb[20].mxu0 %v4241_v11  ;;  %9055 = vmatmul.mubr.f32.gmra.mrb[244].mxu1 %v5043_v50  ;;  %v14340_v60 = vadd.f32 %v4243_v48, %v13962_v54  ;;  %v7841_v11 = vld [vmem:[%s13090_s15 + $0x3c0] sm:$0xff]  ;;  %v3991_v37 = vsub.f32 %v3927_v20, %v20003_v4  ;;  %v3990_v8 = vsub.f32 %v3926_v23, %v20004_v13  ;;  %v8732_v50 = vpop.f32.mrb[220].mxu0  ;;  %v20010_v5 = vld [vmem:[#allocation136_spill] sm:$0xff]  ;;  %v20013_v49 = vld [vmem:[#allocation18_spill] sm:$0xff] }
 0x388   : > { %9057 = vmatprep.mubr.f32.mxu1 %v5044_v17  ;;  %8977 = vmatprep.mubr.f32.mxu0 %v4242_v7  ;;  %v14352_v54 = vadd.f32 %v4242_v7, %v20002_v40  ;;  %v4245_v32 = vsub.f32 %v4181_v47, %v7842_v45  ;;  %v4244_v25 = vsub.f32 %v4180_v1, %v7841_v11  ;;  %v3785_v56 = vpop.f32.mrb[221].mxu0  ;;  %v20007_v17 = vld [vmem:[#allocation29_spill] sm:$0xff]  ;;  %v20011_v7 = vld [vmem:[#allocation20_spill] sm:$0xff]  ;;  %v20015_v33 = vld [vmem:[#allocation130_spill] sm:$0xff] }
 0x389   : > { %v4183_v14 = vmul.f32 %v14213_v27, %v3991_v37  ;;  %v3929_v18 = vsub.f32 %v8732_v50, %v20005_v2  ;;  %v5047_v3 = vadd.f32 %v20007_v17, %v20006_v46  ;;  %v4182_v29 = vmul.f32 %v14221_v31, %v3990_v8  ;;  %v7846_v21 = vld [vmem:[%s13090_s15 + $0x3e8] sm:$0xff]  ;;  %v8735_v63 = vpop.f32.mrb[222].mxu0  ;;  %v20014_v11 = vld [vmem:[#allocation89_spill] sm:$0xff]  ;;  %v20017_v37 = vld [vmem:[#allocation94_spill] sm:$0xff] }
 0x38a   : > { %v14358_v30 = vadd.f32 %v4245_v32, %v13994_v62  ;;  %v3928_v45 = vsub.f32 %v3785_v56, %v20008_v15  ;;  %v5048_v22 = vadd.f32 %v14033_v9, %v20009_v34  ;;  %v14370_v62 = vadd.f32 %v4244_v25, %v20010_v5  ;;  %v20012_v20 = vld [vmem:[#allocation116_spill] sm:$0xff]  ;;  %v3795_v23 = vpop.f32.mrb[223].mxu0  ;;  %v20018_v13 = vld [vmem:[#allocation117_spill] sm:$0xff]  ;;  %v7848_v56 = vld [vmem:[%s13090_s15 + $0x3f8] sm:$0xff] }
 0x38b   : > { %8978 = vmatmul.mubr.f32.gmra.mrb[22].mxu0 %v4243_v48  ;;  %9058 = vmatmul.mubr.f32.gmra.mrb[246].mxu1 %v5045_v43  ;;  %v7843_v48 = vld [vmem:[%s13090_s15 + $0x3d0] sm:$0xff]  ;;  %v4247_v27 = vsub.f32 %v4183_v14, %v7844_v51  ;;  %v3993_v47 = vsub.f32 %v3929_v18, %v20011_v7  ;;  %v3931_v1 = vsub.f32 %v8735_v63, %v20014_v11  ;;  %v20021_v2 = vld [vmem:[#allocation84_spill] sm:$0xff]  ;;  %v20022_v46 = vld [vmem:[#allocation71_spill] sm:$0xff]  ;;  %v14401_v7 = vpop.f32.mrb[160].mxu1 }
 0x38c   : > { %9060 = vmatprep.mubr.f32.mxu1 %v5046_v55  ;;  %8980 = vmatprep.mubr.f32.mxu0 %v4244_v25  ;;  %v3992_v53 = vsub.f32 %v3928_v45, %v20012_v20  ;;  %v4246_v31 = vsub.f32 %v4182_v29, %v7843_v48  ;;  %v20016_v55 = vld [vmem:[#allocation24_spill] sm:$0xff]  ;;  %v3930_v51 = vsub.f32 %v3795_v23, %v20017_v37  ;;  %v20019_v8 = vld [vmem:[#allocation25_spill] sm:$0xff]  ;;  %v14406_v63 = vpop.f32.mrb[161].mxu1  ;;  %v20031_v23 = vmov 0.0   ;;  %v20036_v37 = vld [vmem:[#allocation95_spill] sm:$0xff] }
 0x38d   : > { %v14376_v43 = vadd.f32 %v4247_v27, %v20013_v49  ;;  %v4185_v9 = vmul.f32 %v14037_v44, %v3993_v47  ;;  %v5049_v40 = vadd.f32 %v20016_v55, %v20015_v33  ;;  %v5050_v50 = vadd.f32 %v20019_v8, %v20018_v13  ;;  %v20020_v25 = vld [vmem:[#allocation52_spill] sm:$0xff]  ;;  %v20028_v49 = vld [vmem:[#allocation59_spill] sm:$0xff]  ;;  %v20032_v55 = vld [vmem:[#allocation106_spill] sm:$0xff] }
 0x38e   : > { %v4184_v4 = vmul.f32 %v14047_v12, %v3992_v53  ;;  %v14388_v14 = vadd.f32 %v4246_v31, %v20020_v25  ;;  %v3995_v18 = vsub.f32 %v3931_v1, %v20021_v2  ;;  %v3994_v17 = vsub.f32 %v3930_v51, %v20022_v46  ;;  %v20024_v15 = vld [vmem:[#allocation12_spill] sm:$0xff]  ;;  %v20030_v1 = vld [vmem:[#allocation19_spill] sm:$0xff]  ;;  %v20037_v51 = vld [vmem:[#allocation97_spill] sm:$0xff] }
 0x38f   : > { %8981 = vmatmul.mubr.f32.gmra.mrb[24].mxu0 %v4245_v32  ;;  %9061 = vmatmul.mubr.f32.gmra.mrb[248].mxu1 %v5047_v3  ;;  %v7845_v32 = vld [vmem:[%s13090_s15 + $0x3e0] sm:$0xff]  ;;  %v4249_v44 = vsub.f32 %v4185_v9, %v7846_v21  ;;  %v20023_v3 = vld [vmem:[#allocation21_spill] sm:$0xff]  ;;  %v20025_v45 = vld [vmem:[#allocation72_spill] sm:$0xff] }
 0x390   : > { %9063 = vmatprep.mubr.f32.mxu1 %v5048_v22  ;;  %8983 = vmatprep.mubr.f32.mxu0 %v4246_v31  ;;  %v4248_v12 = vsub.f32 %v4184_v4, %v7845_v32  ;;  %v4187_v29 = vmul.f32 %v14074_v36, %v3995_v18  ;;  %v5051_v34 = vadd.f32 %v20025_v45, %v20024_v15  ;;  %v7847_v22 = vld [vmem:[%s13090_s15 + $0x3f0] sm:$0xff]  ;;  %v20027_v21 = vld [vmem:[#allocation98_spill] sm:$0xff]  ;;  %v20029_v9 = vld [vmem:[#allocation31_spill] sm:$0xff] }
 0x391   : > { %v14394_v48 = vadd.f32 %v4249_v44, %v20023_v3  ;;  %v4186_v5 = vmul.f32 %v14084_v10, %v3994_v17  ;;  %v5053_v10 = vadd.f32 %v14109_v52, %v20028_v49  ;;  %v5054_v11 = vadd.f32 %v14123_v0, %v20029_v9  ;;  %v20034_v4 = vld [vmem:[#allocation91_spill] sm:$0xff]  ;;  %v20035_v52 = vld [vmem:[#allocation53_spill] sm:$0xff]  ;;  %v20038_v8 = vld [vmem:[#allocation34_spill] sm:$0xff] }
 0x392   : > { %v5082_v20 = vadd.f32 %v4248_v12, %v20027_v21  ;;  %v4251_v53 = vsub.f32 %v4187_v29, %v7848_v56  ;;  %v5058_v0 = vadd.f32 %v20036_v37, %v20035_v52  ;;  %v20040_v2 = vld [vmem:[#allocation114_spill] sm:$0xff]  ;;  %v20041_v18 = vld [vmem:[#allocation76_spill] sm:$0xff]  ;;  %v20042_v46 = vld [vmem:[#allocation73_spill] sm:$0xff] }
 0x393   : > { %8984 = vmatmul.mubr.f32.gmra.mrb[26].mxu0 %v4247_v27  ;;  %9064 = vmatmul.mubr.f32.gmra.mrb[250].mxu1 %v5049_v40  ;;  %v20026_v27 = vld [vmem:[#allocation70_spill] sm:$0xff]  ;;  %v4250_v36 = vsub.f32 %v4186_v5, %v7847_v22  ;;  %v14415_v33 = vpop.f32.mrb[162].mxu1  ;;  %v5062_v56 = vadd.f32 %v14207_v58, %v20041_v18 }
 0x394   : > { %9066 = vmatprep.mubr.f32.mxu1 %v5050_v50  ;;  %8986 = vmatprep.mubr.f32.mxu0 %v4248_v12  ;;  %v5052_v47 = vadd.f32 %v14100_v59, %v20026_v27  ;;  %v5085_v31 = vadd.f32 %v4251_v53, %v14107_v28  ;;  %v20033_v40 = vld [vmem:[#allocation90_spill] sm:$0xff]  ;;  %v14419_v28 = vpop.f32.mrb[163].mxu1  ;;  %v20039_v50 = vld [vmem:[#allocation112_spill] sm:$0xff] }
 0x395   : > { %v5084_v59 = vadd.f32 %v4250_v36, %v20030_v1  ;;  %v5056_v32 = vadd.f32 %v20033_v40, %v20032_v55  ;;  %v5060_v25 = vadd.f32 %v20039_v50, %v20038_v8  ;;  %v20043_v3 = vld [vmem:[#allocation82_spill] sm:$0xff] }
 0x397   : > { %8987 = vmatmul.mubr.f32.gmra.mrb[28].mxu0 %v4249_v44  ;;  %9067 = vmatmul.mubr.f32.gmra.mrb[252].mxu1 %v5051_v34 }
 0x398   : > { %9069 = vmatprep.mubr.f32.mxu1 %v5052_v47  ;;  %8989 = vmatprep.mubr.f32.mxu0 %v4250_v36 }
 0x39b   : > { %8990 = vmatmul.mubr.f32.gmra.mrb[30].mxu0 %v4251_v53  ;;  %9070 = vmatmul.mubr.f32.gmra.mrb[254].mxu1 %v5053_v10 }
 0x39c   : > { %9072 = vmatprep.mubr.f32.mxu1 %v5054_v11  ;;  %5727 = vmatprep.mubr.f32.mxu0 %v20031_v23  ;;  %v14425_v13 = vpop.f32.mrb[164].mxu1 }
 0x39d   : > { %v14429_v44 = vpop.f32.mrb[165].mxu1 }
 0x39f   : > { %9073 = vmatmul.mubr.f32.gmra.mrb[0].mxu1 %v20034_v4 }
 0x3a0   : > { %9075 = vmatprep.mubr.f32.mxu1 %v5056_v32 }
 0x3a3   : > { %9076 = vmatmul.mubr.f32.gmra.mrb[2].mxu1 %v20037_v51  ;;  %v14435_v17 = vpop.f32.mrb[166].mxu1 }
 0x3a4   : > { %9078 = vmatprep.mubr.f32.mxu1 %v5058_v0  ;;  %v14437_v12 = vpop.f32.mrb[167].mxu1 }
 0x3a7   : > { %9079 = vmatmul.mubr.f32.gmra.mrb[4].mxu1 %v20040_v2 }
 0x3a8   : > { %9081 = vmatprep.mubr.f32.mxu1 %v5060_v25 }
 0x3ab   : > { %9082 = vmatmul.mubr.f32.gmra.mrb[6].mxu1 %v20042_v46  ;;  %v14443_v29 = vpop.f32.mrb[168].mxu1 }
 0x3ac   : > { %9084 = vmatprep.mubr.f32.mxu1 %v5062_v56  ;;  %20044 = vst [vmem:[#allocation158_spill] sm:$0xff] %v14443_v29  ;;  %v14445_v15 = vpop.f32.mrb[169].mxu1 }
 0x3ad   : > { %20045 = vst [vmem:[#allocation145_spill] sm:$0xff] %v14445_v15 }
 0x3af   : > { %9085 = vmatmul.mubr.f32.gmra.mrb[8].mxu1 %v20043_v3 }
 0x3b0   : > { %9087 = vmatprep.mubr.f32.mxu1 %v14244_v35 }
 0x3b3   : > { %9088 = vmatmul.mubr.f32.gmra.mrb[10].mxu1 %v14232_v57 }
 0x3b4   : > { %9090 = vmatprep.mubr.f32.mxu1 %v14262_v42 }
 0x3b6   : > { %v14451_v58 = vpop.f32.mrb[170].mxu1 }
 0x3b7   : > { %9091 = vmatmul.mubr.f32.gmra.mrb[12].mxu1 %v14250_v6  ;;  %20046 = vst [vmem:[#allocation149_spill] sm:$0xff] %v14451_v58  ;;  %v14453_v45 = vpop.f32.mrb[171].mxu1 }
 0x3b8   : > { %9093 = vmatprep.mubr.f32.mxu1 %v14280_v38  ;;  %20047 = vst [vmem:[#allocation147_spill] sm:$0xff] %v14453_v45 }
 0x3bb   : > { %9094 = vmatmul.mubr.f32.gmra.mrb[14].mxu1 %v14268_v39 }
 0x3bc   : > { %9096 = vmatprep.mubr.f32.mxu1 %v14298_v19 }
 0x3be   : > { %v14459_v57 = vpop.f32.mrb[172].mxu1 }
 0x3bf   : > { %9097 = vmatmul.mubr.f32.gmra.mrb[16].mxu1 %v14286_v41  ;;  %20048 = vst [vmem:[#allocation103_spill] sm:$0xff] %v14459_v57  ;;  %v14461_v35 = vpop.f32.mrb[173].mxu1 }
 0x3c0   : > { %9099 = vmatprep.mubr.f32.mxu1 %v14316_v24  ;;  %20049 = vst [vmem:[#allocation148_spill] sm:$0xff] %v14461_v35 }
 0x3c3   : > { %9100 = vmatmul.mubr.f32.gmra.mrb[18].mxu1 %v14304_v16 }
 0x3c4   : > { %9102 = vmatprep.mubr.f32.mxu1 %v14334_v61 }
 0x3c6   : > { %v14467_v6 = vpop.f32.mrb[174].mxu1 }
 0x3c7   : > { %9103 = vmatmul.mubr.f32.gmra.mrb[20].mxu1 %v14322_v26  ;;  %20050 = vst [vmem:[#allocation105_spill] sm:$0xff] %v14467_v6  ;;  %v14469_v42 = vpop.f32.mrb[175].mxu1 }
 0x3c8   : > { %9105 = vmatprep.mubr.f32.mxu1 %v14352_v54  ;;  %20051 = vst [vmem:[#allocation153_spill] sm:$0xff] %v14469_v42 }
 0x3ca   : > { %v14473_v39 = vpop.f32.mrb[176].mxu1 }
 0x3cb   : > { %9106 = vmatmul.mubr.f32.gmra.mrb[22].mxu1 %v14340_v60  ;;  %20052 = vst [vmem:[#allocation156_spill] sm:$0xff] %v14473_v39  ;;  %v14475_v38 = vpop.f32.mrb[177].mxu1 }
 0x3cc   : > { %9108 = vmatprep.mubr.f32.mxu1 %v14370_v62 }
 0x3ce   : > { %v14478_v41 = vpop.f32.mrb[178].mxu1 }
 0x3cf   : > { %9109 = vmatmul.mubr.f32.gmra.mrb[24].mxu1 %v14358_v30  ;;  %20053 = vst [vmem:[#allocation160_spill] sm:$0xff] %v14478_v41  ;;  %v14480_v19 = vpop.f32.mrb[179].mxu1 }
 0x3d0   : > { %9111 = vmatprep.mubr.f32.mxu1 %v14388_v14 }
 0x3d2   : > { %v14483_v16 = vpop.f32.mrb[180].mxu1 }
 0x3d3   : > { %9112 = vmatmul.mubr.f32.gmra.mrb[26].mxu1 %v14376_v43  ;;  %20054 = vst [vmem:[#allocation113_spill] sm:$0xff] %v14483_v16  ;;  %v14485_v24 = vpop.f32.mrb[181].mxu1 }
 0x3d4   : > { %9114 = vmatprep.mubr.f32.mxu1 %v5082_v20 }
 0x3d6   : > { %v14488_v26 = vpop.f32.mrb[182].mxu1 }
 0x3d7   : > { %9115 = vmatmul.mubr.f32.gmra.mrb[28].mxu1 %v14394_v48  ;;  %20055 = vst [vmem:[#allocation108_spill] sm:$0xff] %v14488_v26  ;;  %v14490_v61 = vpop.f32.mrb[183].mxu1 }
 0x3d8   : > { %9117 = vmatprep.mubr.f32.mxu1 %v5084_v59 }
 0x3da   : > { %v14492_v60 = vpop.f32.mrb[184].mxu1 }
 0x3db   : > { %9118 = vmatmul.mubr.f32.gmra.mrb[30].mxu1 %v5085_v31  ;;  %20056 = vst [vmem:[#allocation62_spill] sm:$0xff] %v14492_v60  ;;  %v14494_v54 = vpop.f32.mrb[185].mxu1 }
 0x3dc   : > { %5888 = vmatprep.mubr.f32.mxu1 %v20031_v23 }
 0x3de   : > { %v14496_v30 = vpop.f32.mrb[186].mxu1 }
 0x3df   : > { %20057 = vst [vmem:[#allocation133_spill] sm:$0xff] %v14496_v30  ;;  %v14498_v62 = vpop.f32.mrb[187].mxu1 }
 0x3e2   : > { %v14500_v43 = vpop.f32.mrb[188].mxu1 }
 0x3e3   : > { %20058 = vst [vmem:[#allocation126_spill] sm:$0xff] %v14500_v43  ;;  %v14502_v14 = vpop.f32.mrb[189].mxu1 }
 0x3e6   : > { %v14504_v48 = vpop.f32.mrb[190].mxu1 }
 0x3e7   : > { %20059 = vst [vmem:[#allocation40_spill] sm:$0xff] %v14504_v48  ;;  %v14506_v34 = vpop.f32.mrb[191].mxu1 }
 0x3ea   : > { %v14508_v22 = vpop.f32.mrb[192].mxu1 }
 0x3eb   : > { %v14510_v5 = vpop.f32.mrb[224].mxu0  ;;  %v14516_v47 = vpop.f32.mrb[193].mxu1 }
 0x3ec   : > { %v14514_v27 = vadd.f32 %v14510_v5, %v14401_v7  ;;  %v14518_v21 = vpop.f32.mrb[225].mxu0 }
 0x3ed   : > { %v14522_v20 = vadd.f32 %v14518_v21, %v14406_v63 }
 0x3ef   : > { %v14524_v53 = vpop.f32.mrb[194].mxu1  ;;  %v14526_v36 = vpop.f32.mrb[226].mxu0 }
 0x3f0   : > { %20060 = vst [vmem:[#allocation49_spill] sm:$0xff] %v14524_v53  ;;  %v14530_v31 = vadd.f32 %v14526_v36, %v14415_v33  ;;  %v14532_v49 = vpop.f32.mrb[195].mxu1  ;;  %v14534_v10 = vpop.f32.mrb[227].mxu0 }
 0x3f1   : > { %20061 = vst [vmem:[#allocation8_spill] sm:$0xff] %v14532_v49  ;;  %v14538_v9 = vadd.f32 %v14534_v10, %v14419_v28 }
 0x3f3   : > { %v14540_v11 = vpop.f32.mrb[196].mxu1 }
 0x3f4   : > { %20062 = vst [vmem:[#allocation110_spill] sm:$0xff] %v14540_v11  ;;  %v14542_v1 = vpop.f32.mrb[228].mxu0  ;;  %v14548_v55 = vpop.f32.mrb[197].mxu1 }
 0x3f5   : > { %v14546_v59 = vadd.f32 %v14542_v1, %v14425_v13  ;;  %20063 = vst [vmem:[#allocation11_spill] sm:$0xff] %v14548_v55  ;;  %v14550_v40 = vpop.f32.mrb[229].mxu0 }
 0x3f6   : > { %v14554_v32 = vadd.f32 %v14550_v40, %v14429_v44 }
 0x3f7   : > { %v14556_v4 = vpop.f32.mrb[198].mxu1 }
 0x3f8   : > { %20064 = vst [vmem:[#allocation44_spill] sm:$0xff] %v14556_v4  ;;  %v14558_v52 = vpop.f32.mrb[230].mxu0  ;;  %v14564_v0 = vpop.f32.mrb[199].mxu1 }
 0x3f9   : > { %20065 = vst [vmem:[#allocation23_spill] sm:$0xff] %v14558_v52  ;;  %v14562_v37 = vadd.f32 %v14558_v52, %v14435_v17  ;;  %20066 = vst [vmem:[#allocation68_spill] sm:$0xff] %v14564_v0  ;;  %v14566_v51 = vpop.f32.mrb[231].mxu0 }
 0x3fa   : > { %20067 = vst [vmem:[#allocation16_spill] sm:$0xff] %v14566_v51  ;;  %v14570_v8 = vadd.f32 %v14566_v51, %v14437_v12 }
 0x3fc   : > { %v14572_v50 = vpop.f32.mrb[200].mxu1 }
 0x3fd   : > { %20068 = vst [vmem:[#allocation93_spill] sm:$0xff] %v14572_v50  ;;  %v14574_v25 = vpop.f32.mrb[232].mxu0  ;;  %v14580_v18 = vpop.f32.mrb[201].mxu1 }
 0x3fe   : > { %20069 = vst [vmem:[#allocation81_spill] sm:$0xff] %v14574_v25  ;;  %v14578_v2 = vadd.f32 %v14574_v25, %v14443_v29  ;;  %20070 = vst [vmem:[#allocation138_spill] sm:$0xff] %v14580_v18  ;;  %v14582_v56 = vpop.f32.mrb[233].mxu0 }
 0x3ff   : > { %20071 = vst [vmem:[#allocation14_spill] sm:$0xff] %v14582_v56  ;;  %v14586_v46 = vadd.f32 %v14582_v56, %v14445_v15 }
 0x401   : > { %v14588_v3 = vpop.f32.mrb[202].mxu1  ;;  %v14590_v51 = vpop.f32.mrb[234].mxu0 }
 0x402   : > { %20072 = vst [vmem:[#allocation143_spill] sm:$0xff] %v14588_v3  ;;  %20073 = vst [vmem:[#allocation80_spill] sm:$0xff] %v14590_v51  ;;  %v14594_v50 = vadd.f32 %v14590_v51, %v14451_v58  ;;  %v14596_v52 = vpop.f32.mrb[203].mxu1  ;;  %v14598_v25 = vpop.f32.mrb[235].mxu0 }
 0x403   : > { %20074 = vst [vmem:[#allocation22_spill] sm:$0xff] %v14596_v52  ;;  %20075 = vst [vmem:[#allocation17_spill] sm:$0xff] %v14598_v25  ;;  %v14602_v18 = vadd.f32 %v14598_v25, %v14453_v45 }
 0x406   : > { %v14604_v29 = vpop.f32.mrb[204].mxu1  ;;  %v14606_v56 = vpop.f32.mrb[236].mxu0 }
 0x407   : > { %20076 = vst [vmem:[#allocation150_spill] sm:$0xff] %v14604_v29  ;;  %20077 = vst [vmem:[#allocation157_spill] sm:$0xff] %v14606_v56  ;;  %v14610_v3 = vadd.f32 %v14606_v56, %v14459_v57  ;;  %v14612_v15 = vpop.f32.mrb[205].mxu1  ;;  %v14614_v51 = vpop.f32.mrb[237].mxu0 }
 0x408   : > { %20078 = vst [vmem:[#allocation56_spill] sm:$0xff] %v14612_v15  ;;  %20079 = vst [vmem:[#allocation26_spill] sm:$0xff] %v14614_v51  ;;  %v14618_v52 = vadd.f32 %v14614_v51, %v14461_v35 }
 0x40a   : > { %v14620_v58 = vpop.f32.mrb[206].mxu1  ;;  %v14622_v25 = vpop.f32.mrb[238].mxu0 }
 0x40b   : > { %20080 = vst [vmem:[#allocation74_spill] sm:$0xff] %v14620_v58  ;;  %20081 = vst [vmem:[#allocation123_spill] sm:$0xff] %v14622_v25  ;;  %v14626_v29 = vadd.f32 %v14622_v25, %v14467_v6  ;;  %v14628_v45 = vpop.f32.mrb[207].mxu1  ;;  %v14630_v56 = vpop.f32.mrb[239].mxu0  ;;  %v9506_v6 = vpack.c.bf16 %v14514_v27, %v14522_v20 }
 0x40c   : > { %20082 = vst [vmem:[#allocation87_spill] sm:$0xff] %v14628_v45  ;;  %20083 = vst [vmem:[#allocation83_spill] sm:$0xff] %v14630_v56  ;;  %v14634_v15 = vadd.f32 %v14630_v56, %v14469_v42 }
 0x40f   : > { %v14636_v57 = vpop.f32.mrb[208].mxu1  ;;  %v14638_v51 = vpop.f32.mrb[240].mxu0 }
 0x410   : > { %20084 = vst [vmem:[#allocation129_spill] sm:$0xff] %v14636_v57  ;;  %20085 = vst [vmem:[#allocation122_spill] sm:$0xff] %v14638_v51  ;;  %v14642_v58 = vadd.f32 %v14638_v51, %v14473_v39  ;;  %v14644_v35 = vpop.f32.mrb[209].mxu1  ;;  %v14646_v25 = vpop.f32.mrb[241].mxu0 }
 0x411   : > { %20087 = vst [vmem:[#allocation63_spill] sm:$0xff] %v14644_v35  ;;  %20088 = vst [vmem:[#allocation120_spill] sm:$0xff] %v14646_v25  ;;  %v14650_v45 = vadd.f32 %v14646_v25, %v14475_v38 }
 0x412   : > { %20086 = vst [vmem:[#allocation27_spill] sm:$0xff] %v14642_v58 }
 0x413   : > { %20089 = vst [vmem:[#allocation77_spill] sm:$0xff] %v14650_v45  ;;  %v9504_v56 = vpack.c.bf16 %v14642_v58, %v14650_v45  ;;  %v14654_v42 = vpop.f32.mrb[210].mxu1  ;;  %v14656_v57 = vpop.f32.mrb[242].mxu0 }
 0x414   : > { %20090 = vst [vmem:[#allocation4_spill] sm:$0xff] %v14654_v42  ;;  %20091 = vst [vmem:[#allocation140_spill] sm:$0xff] %v14656_v57  ;;  %v14662_v51 = vadd.f32 %v14656_v57, %v14478_v41  ;;  %v14664_v35 = vpop.f32.mrb[211].mxu1  ;;  %v14666_v39 = vpop.f32.mrb[243].mxu0  ;;  %v9510_v57 = vpack.c.bf16 %v14530_v31, %v14538_v9 }
 0x415   : > { %20092 = vst [vmem:[#allocation78_spill] sm:$0xff] %v14664_v35  ;;  %20093 = vst [vmem:[#allocation43_spill] sm:$0xff] %v14666_v39  ;;  %v14670_v25 = vadd.f32 %v14666_v39, %v14480_v19  ;;  %9505 = vmatprep.subr.bf16.mxu0 %v9504_v56 }
 0x416   : > { %9507 = vmatpush1.bf16.msra.mxu0 %v9506_v6 }
 0x417   : > { %20094 = vst [vmem:[#allocation3_spill] sm:$0xff] %v14670_v25  ;;  %v9508_v45 = vpack.c.bf16 %v14662_v51, %v14670_v25 }
 0x418   : > { %v14674_v42 = vpop.f32.mrb[212].mxu1  ;;  %v14676_v58 = vpop.f32.mrb[244].mxu0 }
 0x419   : > { %20095 = vst [vmem:[#allocation6_spill] sm:$0xff] %v14674_v42  ;;  %20096 = vst [vmem:[#allocation64_spill] sm:$0xff] %v14676_v58  ;;  %v14682_v35 = vadd.f32 %v14676_v58, %v14483_v16  ;;  %v14684_v41 = vpop.f32.mrb[213].mxu1  ;;  %v14686_v39 = vpop.f32.mrb[245].mxu0  ;;  %9509 = vmatprep.subr.bf16.mxu0 %v9508_v45  ;;  %v9514_v58 = vpack.c.bf16 %v14546_v59, %v14554_v32 }
 0x41a   : > { %20097 = vst [vmem:[#allocation139_spill] sm:$0xff] %v14684_v41  ;;  %20098 = vst [vmem:[#allocation96_spill] sm:$0xff] %v14686_v39  ;;  %v14690_v6 = vadd.f32 %v14686_v39, %v14485_v24  ;;  %9511 = vmatpush1.bf16.msra.mxu0 %v9510_v57 }
 0x41c   : > { %20099 = vst [vmem:[#allocation54_spill] sm:$0xff] %v14690_v6  ;;  %v9512_v56 = vpack.c.bf16 %v14682_v35, %v14690_v6  ;;  %v14694_v25 = vpop.f32.mrb[214].mxu1  ;;  %v14696_v42 = vpop.f32.mrb[246].mxu0 }
 0x41d   : > { %20100 = vst [vmem:[#allocation142_spill] sm:$0xff] %v14694_v25  ;;  %20101 = vst [vmem:[#allocation88_spill] sm:$0xff] %v14696_v42  ;;  %v14702_v41 = vadd.f32 %v14696_v42, %v14488_v26  ;;  %v14704_v16 = vpop.f32.mrb[215].mxu1  ;;  %v14706_v39 = vpop.f32.mrb[247].mxu0  ;;  %v9518_v42 = vpack.c.bf16 %v14562_v37, %v14570_v8 }
 0x41e   : > { %20102 = vst [vmem:[#allocation86_spill] sm:$0xff] %v14704_v16  ;;  %20103 = vst [vmem:[#allocation66_spill] sm:$0xff] %v14706_v39  ;;  %v14710_v45 = vadd.f32 %v14706_v39, %v14490_v61  ;;  %9513 = vmatprep.subr.bf16.mxu0 %v9512_v56 }
 0x41f   : > { %9515 = vmatpush1.bf16.msra.mxu0 %v9514_v58 }
 0x420   : > { %20104 = vst [vmem:[#allocation35_spill] sm:$0xff] %v14710_v45  ;;  %v9516_v57 = vpack.c.bf16 %v14702_v41, %v14710_v45 }
 0x421   : > { %v14714_v6 = vpop.f32.mrb[216].mxu1  ;;  %v14716_v25 = vpop.f32.mrb[248].mxu0 }
 0x422   : > { %20105 = vst [vmem:[#allocation65_spill] sm:$0xff] %v14714_v6  ;;  %20106 = vst [vmem:[#allocation118_spill] sm:$0xff] %v14716_v25  ;;  %v14722_v16 = vadd.f32 %v14716_v25, %v14492_v60  ;;  %v14724_v26 = vpop.f32.mrb[217].mxu1  ;;  %v14726_v39 = vpop.f32.mrb[249].mxu0  ;;  %9517 = vmatprep.subr.bf16.mxu0 %v9516_v57  ;;  %v9522_v25 = vpack.c.bf16 %v14578_v2, %v14586_v46 }
 0x423   : > { %20107 = vst [vmem:[#allocation119_spill] sm:$0xff] %v14724_v26  ;;  %20108 = vst [vmem:[#allocation127_spill] sm:$0xff] %v14726_v39  ;;  %v14730_v58 = vadd.f32 %v14726_v39, %v14494_v54  ;;  %9519 = vmatpush1.bf16.msra.mxu0 %v9518_v42 }
 0x425   : > { %20109 = vst [vmem:[#allocation115_spill] sm:$0xff] %v14730_v58  ;;  %v9520_v56 = vpack.c.bf16 %v14722_v16, %v14730_v58  ;;  %v14734_v45 = vpop.f32.mrb[218].mxu1  ;;  %v14736_v6 = vpop.f32.mrb[250].mxu0 }
 0x426   : > { %20110 = vst [vmem:[#allocation144_spill] sm:$0xff] %v14734_v45  ;;  %20111 = vst [vmem:[#allocation107_spill] sm:$0xff] %v14736_v6  ;;  %v14742_v26 = vadd.f32 %v14736_v6, %v14496_v30  ;;  %v14744_v60 = vpop.f32.mrb[219].mxu1  ;;  %v14746_v39 = vpop.f32.mrb[251].mxu0  ;;  %v9526_v6 = vpack.c.bf16 %v14594_v50, %v14602_v18 }
 0x427   : > { %20112 = vst [vmem:[#allocation135_spill] sm:$0xff] %v14744_v60  ;;  %20113 = vst [vmem:[#allocation141_spill] sm:$0xff] %v14746_v39  ;;  %v14750_v42 = vadd.f32 %v14746_v39, %v14498_v62  ;;  %9521 = vmatprep.subr.bf16.mxu0 %v9520_v56 }
 0x428   : > { %9523 = vmatpush1.bf16.msra.mxu0 %v9522_v25 }
 0x429   : > { %20114 = vst [vmem:[#allocation37_spill] sm:$0xff] %v14750_v42  ;;  %v9524_v57 = vpack.c.bf16 %v14742_v26, %v14750_v42  ;;  %v14754_v58 = vpop.f32.mrb[220].mxu1 }
 0x42a   : > { %20115 = vst [vmem:[#allocation151_spill] sm:$0xff] %v14754_v58  ;;  %v14756_v45 = vpop.f32.mrb[252].mxu0  ;;  %v14764_v30 = vpop.f32.mrb[221].mxu1 }
 0x42b   : > { %20116 = vst [vmem:[#allocation137_spill] sm:$0xff] %v14756_v45  ;;  %v14762_v60 = vadd.f32 %v14756_v45, %v14500_v43  ;;  %20118 = vst [vmem:[#allocation9_spill] sm:$0xff] %v14764_v30  ;;  %v14766_v39 = vpop.f32.mrb[253].mxu0  ;;  %9525 = vmatprep.subr.bf16.mxu0 %v9524_v57  ;;  %v9530_v45 = vpack.c.bf16 %v14610_v3, %v14618_v52 }
 0x42c   : > { %20119 = vst [vmem:[#allocation146_spill] sm:$0xff] %v14766_v39  ;;  %v14770_v25 = vadd.f32 %v14766_v39, %v14502_v14  ;;  %9527 = vmatpush1.bf16.msra.mxu0 %v9526_v6 }
 0x42d   : > { %20117 = vst [vmem:[#allocation28_spill] sm:$0xff] %v14762_v60 }
 0x42e   : > { %20120 = vst [vmem:[#allocation47_spill] sm:$0xff] %v14770_v25  ;;  %v9528_v56 = vpack.c.bf16 %v14762_v60, %v14770_v25  ;;  %v14774_v42 = vpop.f32.mrb[222].mxu1  ;;  %v14776_v58 = vpop.f32.mrb[254].mxu0 }
 0x42f   : > { %20121 = vst [vmem:[#allocation102_spill] sm:$0xff] %v14774_v42  ;;  %20122 = vst [vmem:[#allocation152_spill] sm:$0xff] %v14776_v58  ;;  %v14782_v30 = vadd.f32 %v14776_v58, %v14504_v48  ;;  %v14784_v43 = vpop.f32.mrb[223].mxu1  ;;  %v14786_v39 = vpop.f32.mrb[255].mxu0  ;;  %v9534_v58 = vpack.c.bf16 %v14626_v29, %v14634_v15 }
 0x430   : > { %20124 = vst [vmem:[#allocation121_spill] sm:$0xff] %v14784_v43  ;;  %20125 = vst [vmem:[#allocation125_spill] sm:$0xff] %v14786_v39  ;;  %v14790_v6 = vadd.f32 %v14786_v39, %v14506_v34  ;;  %9529 = vmatprep.subr.bf16.mxu0 %v9528_v56 }
 0x431   : > { %20123 = vst [vmem:[#allocation46_spill] sm:$0xff] %v14782_v30  ;;  %9531 = vmatpush1.bf16.msra.mxu0 %v9530_v45 }
 0x432   : > { %20126 = vst [vmem:[#allocation104_spill] sm:$0xff] %v14790_v6  ;;  %v9532_v57 = vpack.c.bf16 %v14782_v30, %v14790_v6  ;;  %v14794_v25 = vpop.f32.mrb[0].mxu0  ;;  %v9026_v42 = vpop.f32.mrb[224].mxu1 }
 0x433   : > { %20127 = vst [vmem:[#allocation154_spill] sm:$0xff] %v14794_v25  ;;  %v14800_v43 = vadd.f32 %v14794_v25, %v14508_v22  ;;  %v5536_v48 = vsub.f32 %v9026_v42, %v14401_v7  ;;  %v14803_v60 = vpop.f32.mrb[1].mxu0  ;;  %v5152_v39 = vpop.f32.mrb[225].mxu1 }
 0x434   : > { %20129 = vst [vmem:[#allocation85_spill] sm:$0xff] %v14803_v60  ;;  %v14807_v45 = vadd.f32 %v14803_v60, %v14516_v47  ;;  %v5535_v56 = vsub.f32 %v5152_v39, %v14406_v63  ;;  %9533 = vmatprep.subr.bf16.mxu0 %v9532_v57 }
 0x435   : > { %20128 = vst [vmem:[#allocation5_spill] sm:$0xff] %v14800_v43  ;;  %v14811_v6 = vadd.f32 %v14510_v5, %v5536_v48  ;;  %9535 = vmatpush1.bf16.msra.mxu0 %v9534_v58 }
 0x436   : > { %20130 = vst [vmem:[#allocation101_spill] sm:$0xff] %v14807_v45  ;;  %v14814_v30 = vadd.f32 %v5535_v56, %v14518_v21  ;;  %v14816_v25 = vpop.f32.mrb[2].mxu0  ;;  %v9029_v7 = vpop.f32.mrb[226].mxu1 }
 0x437   : > { %20131 = vst [vmem:[#allocation67_spill] sm:$0xff] %v14816_v25  ;;  %v14820_v42 = vadd.f32 %v14811_v6, %v14514_v27  ;;  %v14824_v60 = vadd.f32 %v14816_v25, %v14524_v53  ;;  %v5538_v63 = vsub.f32 %v9029_v7, %v14415_v33  ;;  %v14827_v39 = vpop.f32.mrb[3].mxu0  ;;  %v5162_v48 = vpop.f32.mrb[227].mxu1  ;;  %v14843_v33 = vld [vmem:[%s17970_s4] sm:$0xff] }
 0x438   : > { %20133 = vst [vmem:[#allocation10_spill] sm:$0xff] %v14827_v39  ;;  %v14833_v21 = vadd.f32 %v14814_v30, %v14522_v20  ;;  %v14837_v27 = vadd.f32 %v14827_v39, %v14532_v49  ;;  %v5537_v58 = vsub.f32 %v5162_v48, %v14419_v28  ;;  %20135 = vst [vmem:[#allocation50_spill] sm:$0xff] %v14843_v33  ;;  %5728 = vmatmul.mubr.f32.vlgmr.msra.gmra.mrb[32].mxu0 %v14843_v33 }
 0x439   : > { %20132 = vst [vmem:[#allocation131_spill] sm:$0xff] %v14820_v42  ;;  %v14847_v57 = vadd.f32 %v14526_v36, %v5538_v63  ;;  %5733 = vmatprep.mubr.f32.mxu0 %v20031_v23 }
 0x43a   : > { %20134 = vst [vmem:[#allocation39_spill] sm:$0xff] %v14833_v21  ;;  %v14853_v56 = vadd.f32 %v5537_v58, %v14534_v10  ;;  %v14855_v7 = vpop.f32.mrb[4].mxu0  ;;  %v9032_v28 = vpop.f32.mrb[228].mxu1 }
 0x43b   : > { %20136 = vst [vmem:[#allocation155_spill] sm:$0xff] %v14855_v7  ;;  %v14859_v48 = vadd.f32 %v14847_v57, %v14530_v31  ;;  %v14863_v5 = vadd.f32 %v14855_v7, %v14540_v11  ;;  %v5540_v36 = vsub.f32 %v9032_v28, %v14425_v13  ;;  %v14866_v63 = vpop.f32.mrb[5].mxu0  ;;  %v5172_v39 = vpop.f32.mrb[229].mxu1  ;;  %v14882_v13 = vld [vmem:[%s17970_s4 + $0x8] sm:$0xff] }
 0x43c   : > { %20138 = vst [vmem:[#allocation100_spill] sm:$0xff] %v14866_v63  ;;  %v14872_v58 = vadd.f32 %v14853_v56, %v14538_v9  ;;  %v14876_v31 = vadd.f32 %v14866_v63, %v14548_v55  ;;  %v5539_v20 = vsub.f32 %v5172_v39, %v14429_v44  ;;  %20140 = vst [vmem:[#allocation55_spill] sm:$0xff] %v14882_v13  ;;  %5734 = vmatmul.mubr.f32.gmra.mrb[34].mxu0 %v14882_v13 }
 0x43d   : > { %20137 = vst [vmem:[#allocation159_spill] sm:$0xff] %v14859_v48  ;;  %v14886_v28 = vadd.f32 %v14542_v1, %v5540_v36  ;;  %5739 = vmatprep.mubr.f32.mxu0 %v20031_v23 }
 0x43e   : > { %20139 = vst [vmem:[#allocation111_spill] sm:$0xff] %v14872_v58  ;;  %v14892_v10 = vadd.f32 %v5539_v20, %v14550_v40  ;;  %v14894_v63 = vpop.f32.mrb[6].mxu0  ;;  %v9035_v44 = vpop.f32.mrb[230].mxu1  ;;  %v20147_v40 = vld [vmem:[#allocation16_spill] sm:$0xff]  ;;  %v20150_v58 = vld [vmem:[#allocation93_spill] sm:$0xff] }
 0x43f   : > { %20141 = vst [vmem:[#allocation33_spill] sm:$0xff] %v14894_v63  ;;  %v14898_v39 = vadd.f32 %v14886_v28, %v14546_v59  ;;  %v14902_v7 = vadd.f32 %v14894_v63, %v14556_v4  ;;  %v5542_v1 = vsub.f32 %v9035_v44, %v14435_v17  ;;  %v14905_v36 = vpop.f32.mrb[7].mxu0  ;;  %v5182_v13 = vpop.f32.mrb[231].mxu1  ;;  %v14921_v17 = vld [vmem:[%s17970_s4 + $0x10] sm:$0xff]  ;;  %v20146_v44 = vld [vmem:[#allocation23_spill] sm:$0xff] }
 0x440   : > { %20143 = vst [vmem:[#allocation60_spill] sm:$0xff] %v14905_v36  ;;  %v14911_v20 = vadd.f32 %v14892_v10, %v14554_v32  ;;  %v14915_v59 = vadd.f32 %v14905_v36, %v14564_v0  ;;  %v5541_v9 = vsub.f32 %v5182_v13, %v14437_v12  ;;  %20145 = vst [vmem:[#allocation92_spill] sm:$0xff] %v14921_v17  ;;  %5740 = vmatmul.mubr.f32.gmra.mrb[36].mxu0 %v14921_v17  ;;  %v20154_v32 = vld [vmem:[#allocation138_spill] sm:$0xff] }
 0x441   : > { %20142 = vst [vmem:[#allocation15_spill] sm:$0xff] %v14898_v39  ;;  %v14925_v63 = vadd.f32 %v20146_v44, %v5542_v1  ;;  %5745 = vmatprep.mubr.f32.mxu0 %v20031_v23  ;;  %v20151_v1 = vld [vmem:[#allocation158_spill] sm:$0xff] }
 0x442   : > { %20144 = vst [vmem:[#allocation109_spill] sm:$0xff] %v14911_v20  ;;  %v14931_v36 = vadd.f32 %v5541_v9, %v20147_v40  ;;  %v14933_v0 = vpop.f32.mrb[8].mxu0  ;;  %v9038_v12 = vpop.f32.mrb[232].mxu1  ;;  %v20155_v20 = vld [vmem:[#allocation145_spill] sm:$0xff]  ;;  %v20158_v9 = vld [vmem:[#allocation14_spill] sm:$0xff] }
 0x443   : > { %20148 = vst [vmem:[#allocation134_spill] sm:$0xff] %v14933_v0  ;;  %v14937_v13 = vadd.f32 %v14925_v63, %v14562_v37  ;;  %v14941_v17 = vadd.f32 %v14933_v0, %v20150_v58  ;;  %v5544_v44 = vsub.f32 %v9038_v12, %v20151_v1  ;;  %v14944_v48 = vpop.f32.mrb[9].mxu0  ;;  %v5192_v4 = vpop.f32.mrb[233].mxu1  ;;  %v14960_v12 = vld [vmem:[%s17970_s4 + $0x18] sm:$0xff]  ;;  %v20157_v1 = vld [vmem:[#allocation81_spill] sm:$0xff]  ;;  %v20161_v58 = vld [vmem:[#allocation143_spill] sm:$0xff] }
 0x444   : > { %20152 = vst [vmem:[#allocation42_spill] sm:$0xff] %v14944_v48  ;;  %v14950_v40 = vadd.f32 %v14931_v36, %v14570_v8  ;;  %v14954_v37 = vadd.f32 %v14944_v48, %v20154_v32  ;;  %v5543_v39 = vsub.f32 %v5192_v4, %v20155_v20  ;;  %20156 = vst [vmem:[#allocation128_spill] sm:$0xff] %v14960_v12  ;;  %5746 = vmatmul.mubr.f32.gmra.mrb[38].mxu0 %v14960_v12  ;;  %v20165_v8 = vld [vmem:[#allocation22_spill] sm:$0xff] }
 0x445   : > { %20149 = vst [vmem:[#allocation124_spill] sm:$0xff] %v14937_v13  ;;  %v14964_v0 = vadd.f32 %v20157_v1, %v5544_v44  ;;  %5751 = vmatprep.mubr.f32.mxu0 %v20031_v23  ;;  %v20162_v44 = vld [vmem:[#allocation149_spill] sm:$0xff] }
 0x446   : > { %20153 = vst [vmem:[#allocation132_spill] sm:$0xff] %v14950_v40  ;;  %v14970_v48 = vadd.f32 %v5543_v39, %v20158_v9  ;;  %v14972_v32 = vpop.f32.mrb[10].mxu0  ;;  %v9041_v4 = vpop.f32.mrb[234].mxu1  ;;  %v20166_v40 = vld [vmem:[#allocation147_spill] sm:$0xff]  ;;  %v20169_v39 = vld [vmem:[#allocation17_spill] sm:$0xff] }
 0x447   : > { %20159 = vst [vmem:[#allocation41_spill] sm:$0xff] %v14972_v32  ;;  %v14976_v20 = vadd.f32 %v14964_v0, %v14578_v2  ;;  %v14980_v12 = vadd.f32 %v14972_v32, %v20161_v58  ;;  %v5546_v1 = vsub.f32 %v9041_v4, %v20162_v44  ;;  %v14983_v55 = vpop.f32.mrb[11].mxu0  ;;  %v5202_v21 = vpop.f32.mrb[235].mxu1  ;;  %v14999_v4 = vld [vmem:[%s17970_s4 + $0x20] sm:$0xff]  ;;  %v20168_v44 = vld [vmem:[#allocation80_spill] sm:$0xff]  ;;  %v20172_v58 = vld [vmem:[#allocation150_spill] sm:$0xff] }
 0x448   : > { %20163 = vst [vmem:[#allocation75_spill] sm:$0xff] %v14983_v55  ;;  %v14989_v9 = vadd.f32 %v14970_v48, %v14586_v46  ;;  %v14993_v2 = vadd.f32 %v14983_v55, %v20165_v8  ;;  %v5545_v13 = vsub.f32 %v5202_v21, %v20166_v40  ;;  %20167 = vst [vmem:[#allocation13_spill] sm:$0xff] %v14999_v4  ;;  %5752 = vmatmul.mubr.f32.gmra.mrb[40].mxu0 %v14999_v4  ;;  %v20176_v46 = vld [vmem:[#allocation56_spill] sm:$0xff] }
 0x449   : > { %20160 = vst [vmem:[#allocation58_spill] sm:$0xff] %v14976_v20  ;;  %v15003_v32 = vadd.f32 %v20168_v44, %v5546_v1  ;;  %5757 = vmatprep.mubr.f32.mxu0 %v20031_v23  ;;  %v20173_v1 = vld [vmem:[#allocation103_spill] sm:$0xff] }
 0x44a   : > { %20164 = vst [vmem:[#allocation32_spill] sm:$0xff] %v14989_v9  ;;  %v15009_v55 = vadd.f32 %v5545_v13, %v20169_v39  ;;  %v15011_v8 = vpop.f32.mrb[12].mxu0  ;;  %v9044_v21 = vpop.f32.mrb[236].mxu1  ;;  %v20177_v9 = vld [vmem:[#allocation148_spill] sm:$0xff]  ;;  %v20180_v13 = vld [vmem:[#allocation26_spill] sm:$0xff] }
 0x44b   : > { %20170 = vst [vmem:[#allocation38_spill] sm:$0xff] %v15011_v8  ;;  %v15015_v40 = vadd.f32 %v15003_v32, %v14594_v50  ;;  %v15019_v4 = vadd.f32 %v15011_v8, %v20172_v58  ;;  %v5548_v44 = vsub.f32 %v9044_v21, %v20173_v1  ;;  %v15022_v42 = vpop.f32.mrb[13].mxu0  ;;  %v5212_v11 = vpop.f32.mrb[237].mxu1  ;;  %v15038_v21 = vld [vmem:[%s17970_s4 + $0x28] sm:$0xff]  ;;  %v20179_v1 = vld [vmem:[#allocation157_spill] sm:$0xff]  ;;  %v20183_v58 = vld [vmem:[#allocation74_spill] sm:$0xff] }
 0x44c   : > { %20174 = vst [vmem:[#allocation7_spill] sm:$0xff] %v15022_v42  ;;  %v15028_v39 = vadd.f32 %v15009_v55, %v14602_v18  ;;  %v15032_v50 = vadd.f32 %v15022_v42, %v20176_v46  ;;  %v5547_v20 = vsub.f32 %v5212_v11, %v20177_v9  ;;  %20178 = vst [vmem:[#allocation30_spill] sm:$0xff] %v15038_v21  ;;  %5758 = vmatmul.mubr.f32.gmra.mrb[42].mxu0 %v15038_v21  ;;  %v20187_v18 = vld [vmem:[#allocation87_spill] sm:$0xff] }
 0x44d   : > { %20171 = vst [vmem:[#allocation57_spill] sm:$0xff] %v15015_v40  ;;  %v15042_v8 = vadd.f32 %v20179_v1, %v5548_v44  ;;  %5763 = vmatprep.mubr.f32.mxu0 %v20031_v23  ;;  %v20184_v44 = vld [vmem:[#allocation105_spill] sm:$0xff] }
 0x44e   : > { %20175 = vst [vmem:[#allocation61_spill] sm:$0xff] %v15028_v39  ;;  %v15048_v42 = vadd.f32 %v5547_v20, %v20180_v13  ;;  %v15050_v46 = vpop.f32.mrb[14].mxu0  ;;  %v9047_v11 = vpop.f32.mrb[238].mxu1  ;;  %v20188_v39 = vld [vmem:[#allocation153_spill] sm:$0xff]  ;;  %v20192_v20 = vld [vmem:[#allocation83_spill] sm:$0xff] }
 0x44f   : > { %20181 = vst [vmem:[#allocation51_spill] sm:$0xff] %v15050_v46  ;;  %v15054_v9 = vadd.f32 %v15042_v8, %v14610_v3  ;;  %v15058_v21 = vadd.f32 %v15050_v46, %v20183_v58  ;;  %v5550_v1 = vsub.f32 %v9047_v11, %v20184_v44  ;;  %v15061_v25 = vpop.f32.mrb[15].mxu0  ;;  %v5222_v33 = vpop.f32.mrb[239].mxu1  ;;  %v15077_v11 = vld [vmem:[%s17970_s4 + $0x30] sm:$0xff]  ;;  %v20190_v44 = vld [vmem:[#allocation123_spill] sm:$0xff] }
 0x450   : > { %20185 = vst [vmem:[#allocation69_spill] sm:$0xff] %v15061_v25  ;;  %v15067_v13 = vadd.f32 %v15048_v42, %v14618_v52  ;;  %v15071_v3 = vadd.f32 %v15061_v25, %v20187_v18  ;;  %v5549_v40 = vsub.f32 %v5222_v33, %v20188_v39  ;;  %20189 = vst [vmem:[#allocation79_spill] sm:$0xff] %v15077_v11  ;;  %5764 = vmatmul.mubr.f32.gmra.mrb[44].mxu0 %v15077_v11  ;;  %v20196_v58 = vld [vmem:[#allocation129_spill] sm:$0xff]  ;;  %v20201_v52 = vld [vmem:[#allocation63_spill] sm:$0xff] }
 0x451   : > { %20182 = vst [vmem:[#allocation99_spill] sm:$0xff] %v15054_v9  ;;  %v15081_v46 = vadd.f32 %v20190_v44, %v5550_v1  ;;  %5769 = vmatprep.mubr.f32.mxu0 %v20031_v23  ;;  %v20198_v1 = vld [vmem:[#allocation156_spill] sm:$0xff]  ;;  %v9538_v9 = vpack.c.bf16 %v14800_v43, %v14807_v45 }
 0x452   : > { %20186 = vst [vmem:[#allocation45_spill] sm:$0xff] %v15067_v13  ;;  %v15087_v25 = vadd.f32 %v5549_v40, %v20192_v20  ;;  %v15089_v18 = vpop.f32.mrb[16].mxu0  ;;  %v9050_v33 = vpop.f32.mrb[240].mxu1 }
 0x453   : > { %20191 = vst [vmem:[#allocation29_spill] sm:$0xff] %v15081_v46  ;;  %20194 = vst [vmem:[#allocation36_spill] sm:$0xff] %v15089_v18  ;;  %v15093_v39 = vadd.f32 %v15081_v46, %v14626_v29  ;;  %v15097_v11 = vadd.f32 %v15089_v18, %v20196_v58  ;;  %v5552_v44 = vsub.f32 %v9050_v33, %v20198_v1  ;;  %v15100_v49 = vpop.f32.mrb[17].mxu0  ;;  %v5232_v53 = vpop.f32.mrb[241].mxu1  ;;  %v15116_v33 = vld [vmem:[%s17970_s4 + $0x38] sm:$0xff]  ;;  %v20207_v58 = vld [vmem:[#allocation27_spill] sm:$0xff] }
 0x454   : > { %20193 = vst [vmem:[#allocation48_spill] sm:$0xff] %v15087_v25  ;;  %20199 = vst [vmem:[#allocation116_spill] sm:$0xff] %v15100_v49  ;;  %v15106_v20 = vadd.f32 %v15087_v25, %v14634_v15  ;;  %v15110_v29 = vadd.f32 %v15100_v49, %v20201_v52  ;;  %v5551_v13 = vsub.f32 %v5232_v53, %v14475_v38  ;;  %5770 = vmatmul.mubr.f32.gmra.mrb[46].mxu0 %v15116_v33  ;;  %v20204_v1 = vld [vmem:[#allocation122_spill] sm:$0xff]  ;;  %v20205_v49 = vld [vmem:[#allocation120_spill] sm:$0xff] }
 0x455   : > { %20195 = vst [vmem:[#allocation136_spill] sm:$0xff] %v15093_v39  ;;  %20197 = vst [vmem:[#allocation20_spill] sm:$0xff] %v15097_v11  ;;  %v5616_v18 = vadd.f32 %v20204_v1, %v5552_v44  ;;  %5775 = vmatprep.mubr.f32.mxu0 %v20031_v23  ;;  %v20208_v44 = vld [vmem:[#allocation4_spill] sm:$0xff]  ;;  %v20212_v39 = vld [vmem:[#allocation77_spill] sm:$0xff] }
 0x456   : > { %20200 = vst [vmem:[#allocation18_spill] sm:$0xff] %v15106_v20  ;;  %20202 = vst [vmem:[#allocation89_spill] sm:$0xff] %v15110_v29  ;;  %v9536_v40 = vpack.c.bf16 %v15097_v11, %v15110_v29  ;;  %v5615_v52 = vadd.f32 %v5551_v13, %v20205_v49  ;;  %v15126_v38 = vpop.f32.mrb[18].mxu0  ;;  %v9053_v53 = vpop.f32.mrb[242].mxu1  ;;  %v20210_v25 = vld [vmem:[#allocation160_spill] sm:$0xff]  ;;  %v20213_v13 = vld [vmem:[#allocation78_spill] sm:$0xff] }
 0x457   : > { %20203 = vst [vmem:[#allocation130_spill] sm:$0xff] %v15116_v33  ;;  %20206 = vst [vmem:[#allocation24_spill] sm:$0xff] %v15126_v38  ;;  %v15131_v33 = vadd.f32 %v5616_v18, %v20207_v58  ;;  %v15135_v1 = vadd.f32 %v15126_v38, %v20208_v44  ;;  %v5554_v15 = vsub.f32 %v9053_v53, %v20210_v25  ;;  %v15138_v20 = vpop.f32.mrb[19].mxu0  ;;  %v5242_v29 = vpop.f32.mrb[243].mxu1  ;;  %v20215_v46 = vld [vmem:[#allocation140_spill] sm:$0xff]  ;;  %v15152_v25 = vld [vmem:[%s17970_s4 + $0x40] sm:$0xff] }
 0x458   : > { %20211 = vst [vmem:[#allocation117_spill] sm:$0xff] %v15138_v20  ;;  %v15141_v49 = vadd.f32 %v5615_v52, %v20212_v39  ;;  %v15145_v11 = vadd.f32 %v15138_v20, %v20213_v13  ;;  %v5553_v45 = vsub.f32 %v5242_v29, %v14480_v19  ;;  %9537 = vmatprep.subr.bf16.mxu1 %v9536_v40  ;;  %20216 = vst [vmem:[#allocation52_spill] sm:$0xff] %v15152_v25  ;;  %v20217_v53 = vld [vmem:[#allocation43_spill] sm:$0xff] }
 0x459   : > { %20209 = vst [vmem:[#allocation94_spill] sm:$0xff] %v15135_v1  ;;  %v9568_v58 = vpack.c.bf16 %v5616_v18, %v5615_v52  ;;  %v5618_v43 = vadd.f32 %v20215_v46, %v5554_v15  ;;  %9539 = vmatpush1.bf16.msra.mxu1 %v9538_v9  ;;  %5776 = vmatmul.mubr.f32.gmra.mrb[48].mxu0 %v15152_v25  ;;  %v20219_v52 = vld [vmem:[#allocation6_spill] sm:$0xff]  ;;  %v20224_v46 = vld [vmem:[#allocation3_spill] sm:$0xff] }
 0x45a   : > { %20214 = vst [vmem:[#allocation25_spill] sm:$0xff] %v15145_v11  ;;  %v9540_v39 = vpack.c.bf16 %v15135_v1, %v15145_v11  ;;  %v5617_v20 = vadd.f32 %v5553_v45, %v20217_v53  ;;  %v15158_v38 = vpop.f32.mrb[20].mxu0  ;;  %v9056_v19 = vpop.f32.mrb[244].mxu1  ;;  %5781 = vmatprep.mubr.f32.mxu0 %v20031_v23  ;;  %v9542_v18 = vpack.c.bf16 %v14824_v60, %v14837_v27  ;;  %v20221_v45 = vld [vmem:[#allocation113_spill] sm:$0xff]  ;;  %v20225_v1 = vld [vmem:[#allocation139_spill] sm:$0xff] }
 0x45b   : > { %20218 = vst [vmem:[#allocation84_spill] sm:$0xff] %v15158_v38  ;;  %9569 = vmatprep.subr.bf16.mxu0 %v9568_v58  ;;  %v15166_v9 = vadd.f32 %v5618_v43, %v14662_v51  ;;  %v15170_v40 = vadd.f32 %v15158_v38, %v20219_v52  ;;  %v5556_v29 = vsub.f32 %v9056_v19, %v20221_v45  ;;  %v15173_v15 = vpop.f32.mrb[21].mxu0  ;;  %v5252_v58 = vpop.f32.mrb[245].mxu1  ;;  %v20227_v52 = vld [vmem:[#allocation64_spill] sm:$0xff] }
 0x45c   : > { %20222 = vst [vmem:[#allocation21_spill] sm:$0xff] %v15173_v15  ;;  %v20223_v53 = vpack.c.bf16 %v14811_v6, %v14814_v30  ;;  %v15179_v11 = vadd.f32 %v5617_v20, %v20224_v46  ;;  %v15183_v51 = vadd.f32 %v15173_v15, %v20225_v1  ;;  %v5555_v25 = vsub.f32 %v5252_v58, %v14485_v24  ;;  %v15190_v45 = vld [vmem:[%s17970_s4 + $0x48] sm:$0xff] }
 0x45d   : > { %20220 = vst [vmem:[#allocation71_spill] sm:$0xff] %v15170_v40  ;;  %9541 = vmatprep.subr.bf16.mxu1 %v9540_v39  ;;  %v9572_v38 = vpack.c.bf16 %v5618_v43, %v5617_v20  ;;  %v5620_v19 = vadd.f32 %v20227_v52, %v5556_v29  ;;  %5782 = vmatmul.mubr.f32.gmra.mrb[50].mxu0 %v15190_v45  ;;  %v20228_v6 = vld [vmem:[#allocation96_spill] sm:$0xff]  ;;  %v20235_v43 = vld [vmem:[#allocation54_spill] sm:$0xff] }
 0x45e   : > { %9571 = vmatpush1.bf16.msra.mxu0 %v20223_v53  ;;  %20226 = vst [vmem:[#allocation12_spill] sm:$0xff] %v15183_v51  ;;  %9543 = vmatpush1.bf16.msra.mxu1 %v9542_v18  ;;  %v9544_v30 = vpack.c.bf16 %v15170_v40, %v15183_v51  ;;  %v5619_v46 = vadd.f32 %v5555_v25, %v20228_v6  ;;  %v15196_v53 = vpop.f32.mrb[22].mxu0  ;;  %v9059_v24 = vpop.f32.mrb[246].mxu1  ;;  %v20230_v18 = vld [vmem:[#allocation142_spill] sm:$0xff]  ;;  %v20232_v25 = vld [vmem:[#allocation108_spill] sm:$0xff] }
 0x45f   : > { %20229 = vst [vmem:[#allocation72_spill] sm:$0xff] %v15196_v53  ;;  %9573 = vmatprep.subr.bf16.mxu0 %v9572_v38  ;;  %5787 = vmatprep.mubr.f32.mxu0 %v20031_v23  ;;  %v9546_v20 = vpack.c.bf16 %v14863_v5, %v14876_v31  ;;  %v15204_v39 = vadd.f32 %v5620_v19, %v14682_v35  ;;  %v15211_v58 = vpop.f32.mrb[23].mxu0  ;;  %v5262_v38 = vpop.f32.mrb[247].mxu1  ;;  %v20236_v40 = vld [vmem:[#allocation86_spill] sm:$0xff] }
 0x460   : > { %v15208_v52 = vadd.f32 %v15196_v53, %v20230_v18  ;;  %v5558_v29 = vsub.f32 %v9059_v24, %v20232_v25  ;;  %20233 = vst [vmem:[#allocation98_spill] sm:$0xff] %v15211_v58  ;;  %v20234_v6 = vpack.c.bf16 %v14847_v57, %v14853_v56  ;;  %v15217_v51 = vadd.f32 %v5619_v46, %v20235_v43  ;;  %v20238_v18 = vld [vmem:[#allocation88_spill] sm:$0xff]  ;;  %v15228_v25 = vld [vmem:[%s17970_s4 + $0x50] sm:$0xff]  ;;  %v20239_v56 = vld [vmem:[#allocation66_spill] sm:$0xff] }
 0x461   : > { %v15221_v35 = vadd.f32 %v15211_v58, %v20236_v40  ;;  %v5557_v15 = vsub.f32 %v5262_v38, %v14490_v61  ;;  %9545 = vmatprep.subr.bf16.mxu1 %v9544_v30  ;;  %v9576_v53 = vpack.c.bf16 %v5620_v19, %v5619_v46  ;;  %5788 = vmatmul.mubr.f32.gmra.mrb[52].mxu0 %v15228_v25  ;;  %v20246_v19 = vld [vmem:[#allocation35_spill] sm:$0xff] }
 0x462   : > { %20231 = vst [vmem:[#allocation70_spill] sm:$0xff] %v15208_v52  ;;  %9575 = vmatpush1.bf16.msra.mxu0 %v20234_v6  ;;  %v5622_v24 = vadd.f32 %v20238_v18, %v5558_v29  ;;  %9547 = vmatpush1.bf16.msra.mxu1 %v9546_v20  ;;  %v15234_v6 = vpop.f32.mrb[24].mxu0  ;;  %v9062_v61 = vpop.f32.mrb[248].mxu1  ;;  %v9550_v30 = vpack.c.bf16 %v14902_v7, %v14915_v59  ;;  %v20241_v20 = vld [vmem:[#allocation65_spill] sm:$0xff] }
 0x463   : > { %20237 = vst [vmem:[#allocation59_spill] sm:$0xff] %v15221_v35  ;;  %v9548_v57 = vpack.c.bf16 %v15208_v52, %v15221_v35  ;;  %v5621_v43 = vadd.f32 %v5557_v15, %v20239_v56  ;;  %20240 = vst [vmem:[#allocation31_spill] sm:$0xff] %v15234_v6  ;;  %9577 = vmatprep.subr.bf16.mxu0 %v9576_v53  ;;  %5793 = vmatprep.mubr.f32.mxu0 %v20031_v23  ;;  %v20243_v15 = vld [vmem:[#allocation62_spill] sm:$0xff]  ;;  %v15249_v38 = vpop.f32.mrb[25].mxu0  ;;  %v5272_v53 = vpop.f32.mrb[249].mxu1  ;;  %v20247_v52 = vld [vmem:[#allocation119_spill] sm:$0xff] }
 0x464   : > { %v15242_v46 = vadd.f32 %v5622_v24, %v14702_v41  ;;  %v15246_v18 = vadd.f32 %v15234_v6, %v20241_v20  ;;  %v5560_v29 = vsub.f32 %v9062_v61, %v20243_v15  ;;  %20244 = vst [vmem:[#allocation106_spill] sm:$0xff] %v15249_v38  ;;  %v20245_v56 = vpack.c.bf16 %v14886_v28, %v14892_v10  ;;  %v20249_v20 = vld [vmem:[#allocation118_spill] sm:$0xff]  ;;  %v20250_v28 = vld [vmem:[#allocation127_spill] sm:$0xff] }
 0x465   : > { %v15255_v35 = vadd.f32 %v5621_v43, %v20246_v19  ;;  %v15259_v41 = vadd.f32 %v15249_v38, %v20247_v52  ;;  %v5559_v58 = vsub.f32 %v5272_v53, %v14494_v54  ;;  %9549 = vmatprep.subr.bf16.mxu1 %v9548_v57  ;;  %v9580_v6 = vpack.c.bf16 %v5622_v24, %v5621_v43  ;;  %v15266_v15 = vld [vmem:[%s17970_s4 + $0x58] sm:$0xff]  ;;  %v20257_v24 = vld [vmem:[#allocation115_spill] sm:$0xff] }
 0x466   : > { %20242 = vst [vmem:[#allocation19_spill] sm:$0xff] %v15246_v18  ;;  %9579 = vmatpush1.bf16.msra.mxu0 %v20245_v56  ;;  %v5624_v61 = vadd.f32 %v20249_v20, %v5560_v29  ;;  %9551 = vmatpush1.bf16.msra.mxu1 %v9550_v30  ;;  %v15272_v56 = vpop.f32.mrb[26].mxu0  ;;  %v9065_v54 = vpop.f32.mrb[250].mxu1  ;;  %v9554_v57 = vpack.c.bf16 %v14941_v17, %v14954_v37  ;;  %v20252_v30 = vld [vmem:[#allocation144_spill] sm:$0xff] }
 0x467   : > { %20248 = vst [vmem:[#allocation90_spill] sm:$0xff] %v15259_v41  ;;  %5794 = vmatmul.mubr.f32.gmra.mrb[54].mxu0 %v15266_v15  ;;  %v9552_v10 = vpack.c.bf16 %v15246_v18, %v15259_v41  ;;  %v5623_v19 = vadd.f32 %v5559_v58, %v20250_v28  ;;  %20251 = vst [vmem:[#allocation91_spill] sm:$0xff] %v15272_v56  ;;  %9581 = vmatprep.subr.bf16.mxu0 %v9580_v6  ;;  %v20254_v58 = vld [vmem:[#allocation133_spill] sm:$0xff]  ;;  %v15287_v53 = vpop.f32.mrb[27].mxu0  ;;  %v5282_v6 = vpop.f32.mrb[251].mxu1  ;;  %v20258_v18 = vld [vmem:[#allocation135_spill] sm:$0xff] }
 0x468   : > { %5799 = vmatprep.mubr.f32.mxu0 %v20031_v23  ;;  %v15280_v43 = vadd.f32 %v5624_v61, %v14722_v16  ;;  %v15284_v20 = vadd.f32 %v15272_v56, %v20252_v30  ;;  %v5562_v29 = vsub.f32 %v9065_v54, %v20254_v58  ;;  %20255 = vst [vmem:[#allocation95_spill] sm:$0xff] %v15287_v53  ;;  %v20260_v30 = vld [vmem:[#allocation107_spill] sm:$0xff] }
 0x469   : > { %v20256_v28 = vpack.c.bf16 %v14925_v63, %v14931_v36  ;;  %v15293_v41 = vadd.f32 %v5623_v19, %v20257_v24  ;;  %v15297_v16 = vadd.f32 %v15287_v53, %v20258_v18  ;;  %v5561_v38 = vsub.f32 %v5282_v6, %v14498_v62  ;;  %9553 = vmatprep.subr.bf16.mxu1 %v9552_v10  ;;  %v15304_v58 = vld [vmem:[%s17970_s4 + $0x60] sm:$0xff]  ;;  %v20261_v36 = vld [vmem:[#allocation141_spill] sm:$0xff] }
 0x46a   : > { %20253 = vst [vmem:[#allocation53_spill] sm:$0xff] %v15284_v20  ;;  %v9584_v56 = vpack.c.bf16 %v5624_v61, %v5623_v19  ;;  %v5626_v54 = vadd.f32 %v20260_v30, %v5562_v29  ;;  %9555 = vmatpush1.bf16.msra.mxu1 %v9554_v57  ;;  %v9068_v62 = vpop.f32.mrb[252].mxu1  ;;  %v9558_v10 = vpack.c.bf16 %v14980_v12, %v14993_v2  ;;  %v20263_v57 = vld [vmem:[#allocation151_spill] sm:$0xff]  ;;  %v20268_v61 = vld [vmem:[#allocation37_spill] sm:$0xff] }
 0x46b   : > { %9583 = vmatpush1.bf16.msra.mxu0 %v20256_v28  ;;  %20259 = vst [vmem:[#allocation97_spill] sm:$0xff] %v15297_v16  ;;  %v9556_v63 = vpack.c.bf16 %v15284_v20, %v15297_v16  ;;  %v5625_v24 = vadd.f32 %v5561_v38, %v20261_v36  ;;  %v15310_v28 = vpop.f32.mrb[28].mxu0  ;;  %v20265_v38 = vld [vmem:[#allocation126_spill] sm:$0xff]  ;;  %v20267_v36 = vpack.c.bf16 %v14964_v0, %v14970_v48  ;;  %v20269_v20 = vld [vmem:[#allocation9_spill] sm:$0xff] }
 0x46c   : > { %5800 = vmatmul.mubr.f32.gmra.mrb[56].mxu0 %v15304_v58  ;;  %20262 = vst [vmem:[#allocation34_spill] sm:$0xff] %v15310_v28  ;;  %9585 = vmatprep.subr.bf16.mxu0 %v9584_v56  ;;  %v15318_v19 = vadd.f32 %v5626_v54, %v14742_v26  ;;  %v15322_v30 = vadd.f32 %v15310_v28, %v20263_v57  ;;  %v15325_v6 = vpop.f32.mrb[29].mxu0  ;;  %v5292_v56 = vpop.f32.mrb[253].mxu1  ;;  %v20271_v57 = vld [vmem:[#allocation137_spill] sm:$0xff]  ;;  %v20273_v48 = vld [vmem:[#allocation146_spill] sm:$0xff] }
 0x46d   : > { %5805 = vmatprep.mubr.f32.mxu0 %v20031_v23  ;;  %v5564_v29 = vsub.f32 %v9068_v62, %v20265_v38  ;;  %20266 = vst [vmem:[#allocation114_spill] sm:$0xff] %v15325_v6  ;;  %v15331_v16 = vadd.f32 %v5625_v24, %v20268_v61  ;;  %v15335_v26 = vadd.f32 %v15325_v6, %v20269_v20  ;;  %v15342_v38 = vld [vmem:[%s17970_s4 + $0x68] sm:$0xff]  ;;  %v20280_v6 = vld [vmem:[#allocation121_spill] sm:$0xff] }
 0x46e   : > { %20264 = vst [vmem:[#allocation112_spill] sm:$0xff] %v15322_v30  ;;  %v5563_v53 = vsub.f32 %v5292_v56, %v14502_v14  ;;  %9557 = vmatprep.subr.bf16.mxu1 %v9556_v63  ;;  %v9588_v28 = vpack.c.bf16 %v5626_v54, %v5625_v24  ;;  %20272 = vst [vmem:[#allocation73_spill] sm:$0xff] %v15342_v38  ;;  %v9071_v14 = vpop.f32.mrb[254].mxu1  ;;  %v9562_v63 = vpack.c.bf16 %v15019_v4, %v15032_v50  ;;  %v20275_v24 = vld [vmem:[#allocation28_spill] sm:$0xff]  ;;  %v20279_v54 = vld [vmem:[#allocation47_spill] sm:$0xff] }
 0x46f   : > { %9587 = vmatpush1.bf16.msra.mxu0 %v20267_v36  ;;  %20270 = vst [vmem:[#allocation76_spill] sm:$0xff] %v15335_v26  ;;  %v5628_v62 = vadd.f32 %v20271_v57, %v5564_v29  ;;  %9559 = vmatpush1.bf16.msra.mxu1 %v9558_v10  ;;  %v9560_v0 = vpack.c.bf16 %v15322_v30, %v15335_v26  ;;  %v15348_v36 = vpop.f32.mrb[30].mxu0  ;;  %v20276_v57 = vld [vmem:[#allocation102_spill] sm:$0xff] }
 0x470   : > { %5806 = vmatmul.mubr.f32.gmra.mrb[58].mxu0 %v15342_v38  ;;  %v5627_v61 = vadd.f32 %v5563_v53, %v20273_v48  ;;  %20274 = vst [vmem:[#allocation82_spill] sm:$0xff] %v15348_v36  ;;  %9589 = vmatprep.subr.bf16.mxu0 %v9588_v28  ;;  %v15360_v29 = vadd.f32 %v15348_v36, %v20276_v57  ;;  %v20277_v53 = vld [vmem:[#allocation40_spill] sm:$0xff]  ;;  %v15363_v48 = vpop.f32.mrb[31].mxu0  ;;  %v5302_v28 = vpop.f32.mrb[255].mxu1 }
 0x471   : > { %5811 = vmatprep.mubr.f32.mxu0 %v20031_v23  ;;  %v15356_v10 = vadd.f32 %v5628_v62, %v20275_v24  ;;  %v5566_v56 = vsub.f32 %v9071_v14, %v20277_v53  ;;  %v20278_v26 = vpack.c.bf16 %v15003_v32, %v15009_v55  ;;  %v15373_v24 = vadd.f32 %v15363_v48, %v20280_v6  ;;  %v20282_v57 = vld [vmem:[#allocation152_spill] sm:$0xff]  ;;  %v15380_v53 = vld [vmem:[%s17970_s4 + $0x70] sm:$0xff] }
 0x472   : > { %v15369_v30 = vadd.f32 %v5627_v61, %v20279_v54  ;;  %v5565_v38 = vsub.f32 %v5302_v28, %v14506_v34  ;;  %9561 = vmatprep.subr.bf16.mxu1 %v9560_v0  ;;  %v9592_v36 = vpack.c.bf16 %v5628_v62, %v5627_v61  ;;  %v20283_v32 = vld [vmem:[#allocation125_spill] sm:$0xff]  ;;  %v9074_v54 = vpop.f32.mrb[0].mxu1  ;;  %v9566_v62 = vpack.c.bf16 %v15058_v21, %v15071_v3  ;;  %v20284_v0 = vld [vmem:[#allocation46_spill] sm:$0xff] }
 0x473   : > { %9591 = vmatpush1.bf16.msra.mxu0 %v20278_v26  ;;  %20281 = vst [vmem:[#allocation23_spill] sm:$0xff] %v15373_v24  ;;  %v5630_v14 = vadd.f32 %v20282_v57, %v5566_v56  ;;  %9563 = vmatpush1.bf16.msra.mxu1 %v9562_v63  ;;  %v9564_v55 = vpack.c.bf16 %v15360_v29, %v15373_v24  ;;  %v5312_v57 = vpop.f32.mrb[1].mxu1  ;;  %v20287_v34 = vld [vmem:[#allocation154_spill] sm:$0xff] }
 0x474   : > { %5812 = vmatmul.mubr.f32.gmra.mrb[60].mxu0 %v15380_v53  ;;  %v5629_v26 = vadd.f32 %v5565_v38, %v20283_v32  ;;  %9593 = vmatprep.subr.bf16.mxu0 %v9592_v36  ;;  %v5568_v63 = vsub.f32 %v9074_v54, %v14508_v22  ;;  %v20285_v56 = vpack.c.bf16 %v15042_v8, %v15048_v42  ;;  %v20286_v38 = vld [vmem:[#allocation104_spill] sm:$0xff]  ;;  %v15408_v22 = vld [vmem:[%s17970_s4 + $0x78] sm:$0xff]  ;;  %v20288_v42 = vld [vmem:[#allocation85_spill] sm:$0xff] }
 0x475   : > { %5817 = vmatprep.mubr.f32.mxu0 %v20031_v23  ;;  %v15392_v61 = vadd.f32 %v5630_v14, %v20284_v0  ;;  %v5567_v28 = vsub.f32 %v5312_v57, %v14516_v47  ;;  %9565 = vmatprep.subr.bf16.mxu1 %v9564_v55  ;;  %v20291_v0 = vld [vmem:[#allocation29_spill] sm:$0xff]  ;;  %v20297_v47 = vld [vmem:[#allocation50_spill] sm:$0xff] }
 0x476   : > { %v15399_v36 = vadd.f32 %v5629_v26, %v20286_v38  ;;  %v9596_v32 = vpack.c.bf16 %v5630_v14, %v5629_v26  ;;  %v15403_v24 = vadd.f32 %v20287_v34, %v5568_v63  ;;  %v9077_v54 = vpop.f32.mrb[2].mxu1  ;;  %v20289_v14 = vld [vmem:[#allocation5_spill] sm:$0xff]  ;;  %v20292_v63 = vld [vmem:[#allocation48_spill] sm:$0xff] }
 0x477   : > { %9595 = vmatpush1.bf16.msra.mxu0 %v20285_v56  ;;  %9567 = vmatpush1.bf16.msra.mxu1 %v9566_v62  ;;  %v15412_v8 = vadd.f32 %v5567_v28, %v20288_v42  ;;  %v20290_v26 = vld [vmem:[#allocation49_spill] sm:$0xff]  ;;  %v5322_v62 = vpop.f32.mrb[3].mxu1  ;;  %v20293_v57 = vpack.c.bf16 %v20291_v0, %v20292_v63  ;;  %v20299_v63 = vld [vmem:[#allocation10_spill] sm:$0xff]  ;;  %v20305_v0 = vld [vmem:[#allocation11_spill] sm:$0xff] }
 0x478   : > { %5818 = vmatmul.mubr.f32.gmra.mrb[62].mxu0 %v15408_v22  ;;  %9597 = vmatprep.subr.bf16.mxu0 %v9596_v32  ;;  %v15419_v55 = vadd.f32 %v15403_v24, %v20289_v14  ;;  %v5570_v34 = vsub.f32 %v9077_v54, %v20290_v26  ;;  %v20294_v38 = vld [vmem:[#allocation101_spill] sm:$0xff]  ;;  %v20295_v32 = vld [vmem:[#allocation8_spill] sm:$0xff]  ;;  %v20296_v14 = vpack.c.bf16 %v15131_v33, %v15141_v49  ;;  %v20298_v54 = vld [vmem:[#allocation67_spill] sm:$0xff] }
 0x479   : > { %6049 = vmatprep.mubr.f32.mxu0 %v20031_v23  ;;  %v15429_v28 = vadd.f32 %v15412_v8, %v20294_v38  ;;  %v5569_v42 = vsub.f32 %v5322_v62, %v20295_v32  ;;  %v15448_v62 = vld [vmem:[%s17971_s5] sm:$0xff]  ;;  %v20300_v49 = vld [vmem:[#allocation110_spill] sm:$0xff] }
 0x47a   : > { %5889 = vmatmul.mubr.f32.vlgmr.msra.gmra.mrb[32].mxu1 %v20297_v47  ;;  %v15437_v26 = vadd.f32 %v20298_v54, %v5570_v34  ;;  %v9080_v38 = vpop.f32.mrb[4].mxu1  ;;  %v20301_v32 = vld [vmem:[#allocation131_spill] sm:$0xff] }
 0x47b   : > { %9599 = vmatpush1.bf16.msra.mxu0 %v20293_v57  ;;  %5894 = vmatprep.mubr.f32.mxu1 %v20031_v23  ;;  %v15443_v57 = vadd.f32 %v5569_v42, %v20299_v63  ;;  %v5572_v47 = vsub.f32 %v9080_v38, %v20300_v49  ;;  %v5332_v34 = vpop.f32.mrb[5].mxu1  ;;  %v20307_v38 = vld [vmem:[#allocation55_spill] sm:$0xff] }
 0x47c   : > { %9633 = vmatprep.subr.bf16.mxu0 %v20296_v14  ;;  %v15453_v33 = vadd.f32 %v15437_v26, %v14824_v60  ;;  %v20302_v14 = vld [vmem:[#allocation39_spill] sm:$0xff]  ;;  %v5571_v56 = vsub.f32 %v5332_v34, %v20305_v0  ;;  %v20306_v60 = vpack.c.bf16 %v15166_v9, %v15179_v11  ;;  %v15483_v0 = vld [vmem:[%s17971_s5 + $0x8] sm:$0xff] }
 0x47d   : > { %v20303_v54 = vpack.c.bf16 %v20301_v32, %v20302_v14  ;;  %v15464_v63 = vadd.f32 %v15443_v57, %v14837_v27  ;;  %v20308_v49 = vld [vmem:[#allocation155_spill] sm:$0xff]  ;;  %v20310_v9 = vld [vmem:[#allocation44_spill] sm:$0xff] }
 0x47e   : > { %6050 = vmatmul.mubr.f32.vlgmr.msra.gmra.mrb[64].mxu0 %v15448_v62  ;;  %5895 = vmatmul.mubr.f32.gmra.mrb[34].mxu1 %v20307_v38  ;;  %v15472_v32 = vadd.f32 %v20308_v49, %v5572_v47  ;;  %v9083_v27 = vpop.f32.mrb[6].mxu1  ;;  %v20312_v38 = vld [vmem:[#allocation111_spill] sm:$0xff]  ;;  %v20315_v14 = vld [vmem:[#allocation68_spill] sm:$0xff] }
 0x47f   : > { %9635 = vmatpush1.bf16.msra.mxu0 %v20303_v54  ;;  %6055 = vmatprep.mubr.f32.mxu0 %v20031_v23  ;;  %20304 = vst [vmem:[#allocation16_spill] sm:$0xff] %v15464_v63  ;;  %v20309_v54 = vld [vmem:[#allocation100_spill] sm:$0xff]  ;;  %v5574_v47 = vsub.f32 %v9083_v27, %v20310_v9  ;;  %v5342_v34 = vpop.f32.mrb[7].mxu1  ;;  %v20318_v9 = vld [vmem:[#allocation33_spill] sm:$0xff] }
 0x480   : > { %9637 = vmatprep.subr.bf16.mxu0 %v20306_v60  ;;  %5900 = vmatprep.mubr.f32.mxu1 %v20031_v23  ;;  %v15478_v42 = vadd.f32 %v5571_v56, %v20309_v54  ;;  %v15488_v11 = vadd.f32 %v15472_v32, %v14863_v5  ;;  %v20311_v60 = vld [vmem:[#allocation159_spill] sm:$0xff]  ;;  %v5573_v63 = vsub.f32 %v5342_v34, %v20315_v14  ;;  %v20317_v27 = vld [vmem:[#allocation92_spill] sm:$0xff]  ;;  %v15518_v14 = vld [vmem:[%s17971_s5 + $0x10] sm:$0xff] }
 0x481   : > { %v20313_v49 = vpack.c.bf16 %v20311_v60, %v20312_v38  ;;  %v20316_v5 = vpack.c.bf16 %v15204_v39, %v15217_v51  ;;  %v15507_v60 = vadd.f32 %v20318_v9, %v5574_v47  ;;  %v20320_v39 = vld [vmem:[#allocation93_spill] sm:$0xff]  ;;  %v20325_v38 = vld [vmem:[#allocation138_spill] sm:$0xff] }
 0x482   : > { %6056 = vmatmul.mubr.f32.gmra.mrb[66].mxu0 %v15483_v0  ;;  %v15499_v54 = vadd.f32 %v15478_v42, %v14876_v31  ;;  %5901 = vmatmul.mubr.f32.gmra.mrb[36].mxu1 %v20317_v27  ;;  %v9086_v31 = vpop.f32.mrb[8].mxu1  ;;  %v20322_v27 = vld [vmem:[#allocation109_spill] sm:$0xff] }
 0x483   : > { %9639 = vmatpush1.bf16.msra.mxu0 %v20313_v49  ;;  %6061 = vmatprep.mubr.f32.mxu0 %v20031_v23  ;;  %v20319_v49 = vld [vmem:[#allocation60_spill] sm:$0xff]  ;;  %v15523_v51 = vadd.f32 %v15507_v60, %v14902_v7  ;;  %v5576_v47 = vsub.f32 %v9086_v31, %v20320_v39  ;;  %v5352_v34 = vpop.f32.mrb[9].mxu1  ;;  %v20326_v7 = vpack.c.bf16 %v15242_v46, %v15255_v35  ;;  %v20328_v39 = vld [vmem:[#allocation134_spill] sm:$0xff]  ;;  %v20330_v46 = vld [vmem:[#allocation143_spill] sm:$0xff] }
 0x484   : > { %20314 = vst [vmem:[#allocation158_spill] sm:$0xff] %v15499_v54  ;;  %9641 = vmatprep.subr.bf16.mxu0 %v20316_v5  ;;  %5906 = vmatprep.mubr.f32.mxu1 %v20031_v23  ;;  %v15513_v56 = vadd.f32 %v5573_v63, %v20319_v49  ;;  %v20321_v5 = vld [vmem:[#allocation15_spill] sm:$0xff]  ;;  %v5575_v54 = vsub.f32 %v5352_v34, %v20325_v38  ;;  %v20327_v31 = vld [vmem:[#allocation128_spill] sm:$0xff]  ;;  %v15553_v38 = vld [vmem:[%s17971_s5 + $0x18] sm:$0xff] }
 0x485   : > { %v20323_v9 = vpack.c.bf16 %v20321_v5, %v20322_v27  ;;  %v15542_v5 = vadd.f32 %v20328_v39, %v5576_v47  ;;  %v20335_v27 = vld [vmem:[#allocation22_spill] sm:$0xff] }
 0x486   : > { %6062 = vmatmul.mubr.f32.gmra.mrb[68].mxu0 %v15518_v14  ;;  %v15534_v49 = vadd.f32 %v15513_v56, %v14915_v59  ;;  %5907 = vmatmul.mubr.f32.gmra.mrb[38].mxu1 %v20327_v31  ;;  %v9089_v59 = vpop.f32.mrb[10].mxu1  ;;  %v20332_v31 = vld [vmem:[#allocation132_spill] sm:$0xff] }
 0x487   : > { %9643 = vmatpush1.bf16.msra.mxu0 %v20323_v9  ;;  %6067 = vmatprep.mubr.f32.mxu0 %v20031_v23  ;;  %v20329_v9 = vld [vmem:[#allocation42_spill] sm:$0xff]  ;;  %v15558_v35 = vadd.f32 %v15542_v5, %v14941_v17  ;;  %v5578_v47 = vsub.f32 %v9089_v59, %v20330_v46  ;;  %v5362_v34 = vpop.f32.mrb[11].mxu1  ;;  %v20336_v17 = vpack.c.bf16 %v15280_v43, %v15293_v41  ;;  %v20337_v59 = vld [vmem:[#allocation13_spill] sm:$0xff] }
 0x488   : > { %20324 = vst [vmem:[#allocation145_spill] sm:$0xff] %v15534_v49  ;;  %9645 = vmatprep.subr.bf16.mxu0 %v20326_v7  ;;  %5912 = vmatprep.mubr.f32.mxu1 %v20031_v23  ;;  %v15548_v63 = vadd.f32 %v5575_v54, %v20329_v9  ;;  %v20331_v7 = vld [vmem:[#allocation124_spill] sm:$0xff]  ;;  %v5577_v49 = vsub.f32 %v5362_v34, %v20335_v27  ;;  %v20338_v46 = vld [vmem:[#allocation41_spill] sm:$0xff]  ;;  %v15588_v27 = vld [vmem:[%s17971_s5 + $0x20] sm:$0xff] }
 0x489   : > { %v20333_v39 = vpack.c.bf16 %v20331_v7, %v20332_v31  ;;  %v15577_v7 = vadd.f32 %v20338_v46, %v5578_v47  ;;  %v20340_v43 = vld [vmem:[#allocation150_spill] sm:$0xff]  ;;  %v20345_v31 = vld [vmem:[#allocation56_spill] sm:$0xff] }
 0x48a   : > { %6068 = vmatmul.mubr.f32.gmra.mrb[70].mxu0 %v15553_v38  ;;  %v15569_v9 = vadd.f32 %v15548_v63, %v14954_v37  ;;  %5913 = vmatmul.mubr.f32.gmra.mrb[40].mxu1 %v20337_v59  ;;  %v9092_v37 = vpop.f32.mrb[12].mxu1  ;;  %v20342_v59 = vld [vmem:[#allocation32_spill] sm:$0xff] }
 0x48b   : > { %9647 = vmatpush1.bf16.msra.mxu0 %v20333_v39  ;;  %6073 = vmatprep.mubr.f32.mxu0 %v20031_v23  ;;  %v20339_v39 = vld [vmem:[#allocation75_spill] sm:$0xff]  ;;  %v15593_v41 = vadd.f32 %v15577_v7, %v14980_v12  ;;  %v5580_v47 = vsub.f32 %v9092_v37, %v20340_v43  ;;  %v5372_v34 = vpop.f32.mrb[13].mxu1  ;;  %v20346_v12 = vpack.c.bf16 %v15318_v19, %v15331_v16  ;;  %v20347_v37 = vld [vmem:[#allocation30_spill] sm:$0xff] }
 0x48c   : > { %20334 = vst [vmem:[#allocation81_spill] sm:$0xff] %v15569_v9  ;;  %9649 = vmatprep.subr.bf16.mxu0 %v20336_v17  ;;  %5918 = vmatprep.mubr.f32.mxu1 %v20031_v23  ;;  %v15583_v54 = vadd.f32 %v5577_v49, %v20339_v39  ;;  %v20341_v17 = vld [vmem:[#allocation58_spill] sm:$0xff]  ;;  %v5579_v9 = vsub.f32 %v5372_v34, %v20345_v31  ;;  %v15623_v31 = vld [vmem:[%s17971_s5 + $0x28] sm:$0xff] }
 0x48d   : > { %v20343_v46 = vpack.c.bf16 %v20341_v17, %v20342_v59  ;;  %v20348_v43 = vld [vmem:[#allocation38_spill] sm:$0xff]  ;;  %v20356_v59 = vld [vmem:[#allocation87_spill] sm:$0xff] }
 0x48e   : > { %6074 = vmatmul.mubr.f32.gmra.mrb[72].mxu0 %v15588_v27  ;;  %v15604_v39 = vadd.f32 %v15583_v54, %v14993_v2  ;;  %5919 = vmatmul.mubr.f32.gmra.mrb[42].mxu1 %v20347_v37  ;;  %v15612_v17 = vadd.f32 %v20348_v43, %v5580_v47  ;;  %v9095_v2 = vpop.f32.mrb[14].mxu1  ;;  %v20351_v19 = vld [vmem:[#allocation74_spill] sm:$0xff]  ;;  %v20353_v37 = vld [vmem:[#allocation61_spill] sm:$0xff] }
 0x48f   : > { %9651 = vmatpush1.bf16.msra.mxu0 %v20343_v46  ;;  %6079 = vmatprep.mubr.f32.mxu0 %v20031_v23  ;;  %v20349_v46 = vld [vmem:[#allocation7_spill] sm:$0xff]  ;;  %v5582_v47 = vsub.f32 %v9095_v2, %v20351_v19  ;;  %v5382_v34 = vpop.f32.mrb[15].mxu1 }
 0x490   : > { %20344 = vst [vmem:[#allocation14_spill] sm:$0xff] %v15604_v39  ;;  %9653 = vmatprep.subr.bf16.mxu0 %v20346_v12  ;;  %5924 = vmatprep.mubr.f32.mxu1 %v20031_v23  ;;  %v15618_v49 = vadd.f32 %v5579_v9, %v20349_v46  ;;  %v15628_v16 = vadd.f32 %v15612_v17, %v15019_v4  ;;  %v20352_v12 = vld [vmem:[#allocation57_spill] sm:$0xff]  ;;  %v20358_v2 = vld [vmem:[#allocation79_spill] sm:$0xff] }
 0x491   : > { %v20354_v43 = vpack.c.bf16 %v20352_v12, %v20353_v37  ;;  %v5581_v39 = vsub.f32 %v5382_v34, %v20356_v59  ;;  %v20357_v4 = vpack.c.bf16 %v15356_v10, %v15369_v30  ;;  %v20359_v19 = vld [vmem:[#allocation51_spill] sm:$0xff]  ;;  %v15658_v59 = vld [vmem:[%s17971_s5 + $0x30] sm:$0xff] }
 0x492   : > { %6080 = vmatmul.mubr.f32.gmra.mrb[74].mxu0 %v15623_v31  ;;  %20350 = vst [vmem:[#allocation149_spill] sm:$0xff] %v15628_v16  ;;  %v15639_v46 = vadd.f32 %v15618_v49, %v15032_v50  ;;  %5925 = vmatmul.mubr.f32.gmra.mrb[44].mxu1 %v20358_v2  ;;  %v15647_v12 = vadd.f32 %v20359_v19, %v5582_v47  ;;  %v9098_v50 = vpop.f32.mrb[16].mxu1  ;;  %v20362_v10 = vld [vmem:[#allocation129_spill] sm:$0xff]  ;;  %v20367_v37 = vld [vmem:[#allocation63_spill] sm:$0xff] }
 0x493   : > { %9655 = vmatpush1.bf16.msra.mxu0 %v20354_v43  ;;  %6085 = vmatprep.mubr.f32.mxu0 %v20031_v23  ;;  %v20360_v43 = vld [vmem:[#allocation69_spill] sm:$0xff]  ;;  %v5584_v47 = vsub.f32 %v9098_v50, %v20362_v10  ;;  %v5392_v34 = vpop.f32.mrb[17].mxu1  ;;  %v20369_v50 = vld [vmem:[#allocation130_spill] sm:$0xff]  ;;  %v20370_v10 = vld [vmem:[#allocation36_spill] sm:$0xff] }
 0x494   : > { %20355 = vst [vmem:[#allocation147_spill] sm:$0xff] %v15639_v46  ;;  %9657 = vmatprep.subr.bf16.mxu0 %v20357_v4  ;;  %5930 = vmatprep.mubr.f32.mxu1 %v20031_v23  ;;  %v15653_v9 = vadd.f32 %v5581_v39, %v20360_v43  ;;  %v15663_v30 = vadd.f32 %v15647_v12, %v15058_v21  ;;  %v20363_v4 = vld [vmem:[#allocation99_spill] sm:$0xff]  ;;  %v20364_v2 = vld [vmem:[#allocation45_spill] sm:$0xff] }
 0x495   : > { %v20365_v19 = vpack.c.bf16 %v20363_v4, %v20364_v2  ;;  %v5583_v46 = vsub.f32 %v5392_v34, %v20367_v37  ;;  %v20368_v21 = vpack.c.bf16 %v15392_v61, %v15399_v36  ;;  %v5648_v4 = vadd.f32 %v20370_v10, %v5584_v47  ;;  %v20373_v61 = vld [vmem:[#allocation20_spill] sm:$0xff] }
 0x496   : > { %6086 = vmatmul.mubr.f32.gmra.mrb[76].mxu0 %v15658_v59  ;;  %20361 = vst [vmem:[#allocation80_spill] sm:$0xff] %v15663_v30  ;;  %v15674_v43 = vadd.f32 %v15653_v9, %v15071_v3  ;;  %5931 = vmatmul.mubr.f32.gmra.mrb[46].mxu1 %v20369_v50  ;;  %v9101_v16 = vpop.f32.mrb[18].mxu1  ;;  %v15689_v3 = vld [vmem:[%s17971_s5 + $0x38] sm:$0xff]  ;;  %v20374_v34 = vld [vmem:[#allocation136_spill] sm:$0xff] }
 0x497   : > { %9659 = vmatpush1.bf16.msra.mxu0 %v20365_v19  ;;  %6091 = vmatprep.mubr.f32.mxu0 %v20031_v23  ;;  %v20371_v19 = vld [vmem:[#allocation116_spill] sm:$0xff]  ;;  %20372 = vst [vmem:[#allocation103_spill] sm:$0xff] %v15689_v3  ;;  %v15693_v36 = vadd.f32 %v5648_v4, %v20373_v61  ;;  %v5586_v37 = vsub.f32 %v9101_v16, %v20208_v44  ;;  %v5402_v47 = vpop.f32.mrb[19].mxu1  ;;  %v20380_v44 = vld [vmem:[#allocation117_spill] sm:$0xff] }
 0x498   : > { %20366 = vst [vmem:[#allocation17_spill] sm:$0xff] %v15674_v43  ;;  %9661 = vmatprep.subr.bf16.mxu0 %v20368_v21  ;;  %5936 = vmatprep.mubr.f32.mxu1 %v20031_v23  ;;  %v5647_v39 = vadd.f32 %v5583_v46, %v20371_v19  ;;  %v20375_v21 = vld [vmem:[#allocation18_spill] sm:$0xff]  ;;  %v20377_v46 = vld [vmem:[#allocation89_spill] sm:$0xff]  ;;  %v5585_v19 = vsub.f32 %v5402_v47, %v20213_v13  ;;  %v20378_v2 = vld [vmem:[#allocation52_spill] sm:$0xff] }
 0x499   : > { %v20376_v50 = vpack.c.bf16 %v20374_v34, %v20375_v21  ;;  %v20379_v30 = vld [vmem:[#allocation24_spill] sm:$0xff]  ;;  %v15711_v34 = vld [vmem:[%s17971_s5 + $0x40] sm:$0xff]  ;;  %v20383_v47 = vpack.c.bf16 %v15403_v24, %v15412_v8 }
 0x49a   : > { %6092 = vmatmul.mubr.f32.gmra.mrb[78].mxu0 %v15689_v3  ;;  %v15701_v10 = vadd.f32 %v5647_v39, %v20377_v46  ;;  %5937 = vmatmul.mubr.f32.gmra.mrb[48].mxu1 %v20378_v2  ;;  %v9600_v43 = vpack.c.bf16 %v5648_v4, %v5647_v39  ;;  %v5650_v61 = vadd.f32 %v20379_v30, %v5586_v37  ;;  %v9104_v3 = vpop.f32.mrb[20].mxu1  ;;  %v20381_v2 = vld [vmem:[#allocation94_spill] sm:$0xff]  ;;  %v15735_v24 = vld [vmem:[%s17971_s5 + $0x48] sm:$0xff] }
 0x49b   : > { %9663 = vmatpush1.bf16.msra.mxu0 %v20376_v50  ;;  %6097 = vmatprep.mubr.f32.mxu0 %v20031_v23  ;;  %v5649_v16 = vadd.f32 %v5585_v19, %v20380_v44  ;;  %v20382_v30 = vld [vmem:[#allocation6_spill] sm:$0xff]  ;;  %v5412_v37 = vpop.f32.mrb[21].mxu1  ;;  %v20385_v19 = vld [vmem:[#allocation84_spill] sm:$0xff] }
 0x49c   : > { %5942 = vmatprep.mubr.f32.mxu1 %v20031_v23  ;;  %9601 = vmatprep.subr.bf16.mxu1 %v9600_v43  ;;  %v9664_v13 = vpack.c.bf16 %v15693_v36, %v15701_v10  ;;  %v15717_v39 = vadd.f32 %v5650_v61, %v20381_v2  ;;  %v5588_v4 = vsub.f32 %v9104_v3, %v20382_v30  ;;  %v20384_v43 = vld [vmem:[#allocation25_spill] sm:$0xff]  ;;  %v15940_v36 = vld [vmem:[%s17973_s7 + $0x20] sm:$0xff] }
 0x49d   : > { %9603 = vmatpush1.bf16.msra.mxu1 %v20383_v47  ;;  %v15725_v21 = vadd.f32 %v5649_v16, %v20384_v43  ;;  %v5587_v50 = vsub.f32 %v5412_v37, %v20225_v1  ;;  %v9604_v46 = vpack.c.bf16 %v5650_v61, %v5649_v16  ;;  %v20386_v3 = vld [vmem:[#allocation21_spill] sm:$0xff]  ;;  %v20388_v61 = vld [vmem:[#allocation142_spill] sm:$0xff]  ;;  %v20389_v37 = vpack.c.bf16 %v15437_v26, %v15443_v57  ;;  %v20390_v47 = vld [vmem:[#allocation12_spill] sm:$0xff] }
 0x49e   : > { %6098 = vmatmul.mubr.f32.gmra.mrb[80].mxu0 %v15711_v34  ;;  %5943 = vmatmul.mubr.f32.gmra.mrb[50].mxu1 %v15190_v45  ;;  %v5652_v44 = vadd.f32 %v20385_v19, %v5588_v4  ;;  %v9107_v30 = vpop.f32.mrb[22].mxu1  ;;  %v20387_v45 = vld [vmem:[#allocation71_spill] sm:$0xff]  ;;  %v20391_v19 = vld [vmem:[#allocation72_spill] sm:$0xff]  ;;  %v15759_v26 = vld [vmem:[%s17971_s5 + $0x50] sm:$0xff] }
 0x49f   : > { %6103 = vmatprep.mubr.f32.mxu0 %v20031_v23  ;;  %5948 = vmatprep.mubr.f32.mxu1 %v20031_v23  ;;  %v5651_v2 = vadd.f32 %v5587_v50, %v20386_v3  ;;  %v9668_v1 = vpack.c.bf16 %v15717_v39, %v15725_v21  ;;  %v5590_v16 = vsub.f32 %v9107_v30, %v20388_v61  ;;  %v5422_v4 = vpop.f32.mrb[23].mxu1  ;;  %v20392_v30 = vld [vmem:[#allocation98_spill] sm:$0xff]  ;;  %v15970_v39 = vld [vmem:[%s17973_s7 + $0x30] sm:$0xff]  ;;  %v20433_v21 = vld [vmem:[#allocation147_spill] sm:$0xff] }
 0x4a0   : > { %9605 = vmatprep.subr.bf16.mxu1 %v9604_v46  ;;  %v15741_v8 = vadd.f32 %v5652_v44, %v20387_v45  ;;  %v5589_v50 = vsub.f32 %v5422_v4, %v20236_v40  ;;  %v20395_v4 = vpack.c.bf16 %v15472_v32, %v15478_v42  ;;  %v15783_v42 = vld [vmem:[%s17971_s5 + $0x58] sm:$0xff] }
 0x4a1   : > { %9607 = vmatpush1.bf16.msra.mxu1 %v20389_v37  ;;  %v15749_v43 = vadd.f32 %v5651_v2, %v20390_v47  ;;  %v9608_v46 = vpack.c.bf16 %v5652_v44, %v5651_v2  ;;  %v5654_v3 = vadd.f32 %v20391_v19, %v5590_v16  ;;  %v20394_v44 = vld [vmem:[#allocation65_spill] sm:$0xff]  ;;  %v20396_v37 = vld [vmem:[#allocation59_spill] sm:$0xff] }
 0x4a2   : > { %6104 = vmatmul.mubr.f32.gmra.mrb[82].mxu0 %v15735_v24  ;;  %5949 = vmatmul.mubr.f32.gmra.mrb[52].mxu1 %v15228_v25  ;;  %v5653_v45 = vadd.f32 %v5589_v50, %v20392_v30  ;;  %v9110_v61 = vpop.f32.mrb[24].mxu1  ;;  %v20393_v25 = vld [vmem:[#allocation70_spill] sm:$0xff]  ;;  %v20397_v19 = vld [vmem:[#allocation31_spill] sm:$0xff] }
 0x4a3   : > { %6109 = vmatprep.mubr.f32.mxu0 %v20031_v23  ;;  %5954 = vmatprep.mubr.f32.mxu1 %v20031_v23  ;;  %v9672_v40 = vpack.c.bf16 %v15741_v8, %v15749_v43  ;;  %v15765_v57 = vadd.f32 %v5654_v3, %v20393_v25  ;;  %v5592_v2 = vsub.f32 %v9110_v61, %v20394_v44  ;;  %v5432_v16 = vpop.f32.mrb[25].mxu1  ;;  %v20398_v61 = vld [vmem:[#allocation106_spill] sm:$0xff]  ;;  %v20435_v8 = vld [vmem:[#allocation103_spill] sm:$0xff]  ;;  %v20437_v43 = vld [vmem:[#allocation17_spill] sm:$0xff] }
 0x4a4   : > { %9609 = vmatprep.subr.bf16.mxu1 %v9608_v46  ;;  %v15773_v47 = vadd.f32 %v5653_v45, %v20396_v37  ;;  %v5591_v50 = vsub.f32 %v5432_v16, %v20247_v52  ;;  %v9612_v46 = vpack.c.bf16 %v5654_v3, %v5653_v45  ;;  %v20400_v3 = vld [vmem:[#allocation144_spill] sm:$0xff]  ;;  %v20401_v16 = vpack.c.bf16 %v15507_v60, %v15513_v56  ;;  %v15807_v56 = vld [vmem:[%s17971_s5 + $0x60] sm:$0xff] }
 0x4a5   : > { %9611 = vmatpush1.bf16.msra.mxu1 %v20395_v4  ;;  %v5656_v30 = vadd.f32 %v20397_v19, %v5592_v2  ;;  %v20402_v4 = vld [vmem:[#allocation90_spill] sm:$0xff]  ;;  %v20403_v19 = vld [vmem:[#allocation91_spill] sm:$0xff] }
 0x4a6   : > { %6110 = vmatmul.mubr.f32.gmra.mrb[84].mxu0 %v15759_v26  ;;  %5955 = vmatmul.mubr.f32.gmra.mrb[54].mxu1 %v15266_v15  ;;  %v5655_v25 = vadd.f32 %v5591_v50, %v20398_v61  ;;  %v9113_v44 = vpop.f32.mrb[26].mxu1  ;;  %v9676_v52 = vpack.c.bf16 %v15765_v57, %v15773_v47  ;;  %v20399_v15 = vld [vmem:[#allocation19_spill] sm:$0xff]  ;;  %v601_v47 = vld [vmem:[%s17973_s7 + $0x48] sm:$0xff] }
 0x4a7   : > { %6115 = vmatprep.mubr.f32.mxu0 %v20031_v23  ;;  %5960 = vmatprep.mubr.f32.mxu1 %v20031_v23  ;;  %v15789_v32 = vadd.f32 %v5656_v30, %v20399_v15  ;;  %v5594_v45 = vsub.f32 %v9113_v44, %v20400_v3  ;;  %v5442_v2 = vpop.f32.mrb[27].mxu1  ;;  %v20404_v44 = vld [vmem:[#allocation95_spill] sm:$0xff] }
 0x4a8   : > { %9613 = vmatprep.subr.bf16.mxu1 %v9612_v46  ;;  %v15797_v37 = vadd.f32 %v5655_v25, %v20402_v4  ;;  %v5593_v50 = vsub.f32 %v5442_v2, %v20258_v18  ;;  %v9616_v46 = vpack.c.bf16 %v5656_v30, %v5655_v25  ;;  %v20406_v30 = vld [vmem:[#allocation151_spill] sm:$0xff]  ;;  %v20407_v2 = vpack.c.bf16 %v15542_v5, %v15548_v63  ;;  %v15831_v63 = vld [vmem:[%s17971_s5 + $0x68] sm:$0xff] }
 0x4a9   : > { %9615 = vmatpush1.bf16.msra.mxu1 %v20401_v16  ;;  %v5658_v61 = vadd.f32 %v20403_v19, %v5594_v45  ;;  %v20408_v16 = vld [vmem:[#allocation97_spill] sm:$0xff]  ;;  %v20412_v5 = vld [vmem:[#allocation112_spill] sm:$0xff]  ;;  %v15994_v57 = vld [vmem:[%s17973_s7 + $0x40] sm:$0xff] }
 0x4aa   : > { %6116 = vmatmul.mubr.f32.gmra.mrb[86].mxu0 %v15783_v42  ;;  %5961 = vmatmul.mubr.f32.gmra.mrb[56].mxu1 %v15304_v58  ;;  %v5657_v15 = vadd.f32 %v5593_v50, %v20404_v44  ;;  %v9116_v3 = vpop.f32.mrb[28].mxu1  ;;  %v20405_v58 = vld [vmem:[#allocation53_spill] sm:$0xff]  ;;  %v20410_v44 = vld [vmem:[#allocation34_spill] sm:$0xff]  ;;  %v20427_v10 = vpack.c.bf16 %v15789_v32, %v15797_v37 }
 0x4ab   : > { %6121 = vmatprep.mubr.f32.mxu0 %v20031_v23  ;;  %5966 = vmatprep.mubr.f32.mxu1 %v20031_v23  ;;  %v15813_v60 = vadd.f32 %v5658_v61, %v20405_v58  ;;  %v5596_v25 = vsub.f32 %v9116_v3, %v20406_v30  ;;  %v5452_v45 = vpop.f32.mrb[29].mxu1  ;;  %v20411_v3 = vld [vmem:[#allocation114_spill] sm:$0xff] }
 0x4ac   : > { %9617 = vmatprep.subr.bf16.mxu1 %v9616_v46  ;;  %v15821_v4 = vadd.f32 %v5657_v15, %v20408_v16  ;;  %v5595_v50 = vsub.f32 %v5452_v45, %v20269_v20  ;;  %v20409_v46 = vld [vmem:[#allocation73_spill] sm:$0xff]  ;;  %v9620_v19 = vpack.c.bf16 %v5658_v61, %v5657_v15  ;;  %v20413_v15 = vld [vmem:[#allocation102_spill] sm:$0xff]  ;;  %v20415_v16 = vld [vmem:[#allocation76_spill] sm:$0xff] }
 0x4ad   : > { %9619 = vmatpush1.bf16.msra.mxu1 %v20407_v2  ;;  %v5660_v58 = vadd.f32 %v20410_v44, %v5596_v25  ;;  %v20414_v2 = vpack.c.bf16 %v15577_v7, %v15583_v54  ;;  %v20416_v44 = vld [vmem:[#allocation82_spill] sm:$0xff]  ;;  %v15855_v54 = vld [vmem:[%s17971_s5 + $0x70] sm:$0xff]  ;;  %v20417_v7 = vpack.c.bf16 %v15612_v17, %v15618_v49  ;;  %v20419_v49 = vpack.c.bf16 %v15647_v12, %v15653_v9  ;;  %v15895_v9 = vld [vmem:[%s17973_s7 + $0x8] sm:$0xff] }
 0x4ae   : > { %6122 = vmatmul.mubr.f32.gmra.mrb[88].mxu0 %v15807_v56  ;;  %5967 = vmatmul.mubr.f32.gmra.mrb[58].mxu1 %v20409_v46  ;;  %v5659_v30 = vadd.f32 %v5595_v50, %v20411_v3  ;;  %v9119_v18 = vpop.f32.mrb[30].mxu1  ;;  %v9684_v20 = vpack.c.bf16 %v15813_v60, %v15821_v4  ;;  %v20420_v17 = vpack.c.bf16 %v15419_v55, %v15429_v28  ;;  %v20421_v55 = vld [vmem:[#allocation16_spill] sm:$0xff]  ;;  %v15925_v12 = vld [vmem:[%s17973_s7 + $0x18] sm:$0xff] }
 0x4af   : > { %6127 = vmatprep.mubr.f32.mxu0 %v20031_v23  ;;  %5972 = vmatprep.mubr.f32.mxu1 %v20031_v23  ;;  %v15837_v61 = vadd.f32 %v5660_v58, %v20412_v5  ;;  %v5598_v25 = vsub.f32 %v9119_v18, %v20413_v15  ;;  %v5462_v45 = vpop.f32.mrb[31].mxu1  ;;  %v15871_v5 = vld [vmem:[%s17971_s5 + $0x78] sm:$0xff]  ;;  %v20422_v28 = vpack.c.bf16 %v15453_v33, %v20421_v55 }
 0x4b0   : > { %9621 = vmatprep.subr.bf16.mxu1 %v9620_v19  ;;  %v15845_v50 = vadd.f32 %v5659_v30, %v20415_v16  ;;  %v5597_v46 = vsub.f32 %v5462_v45, %v20280_v6  ;;  %v9624_v19 = vpack.c.bf16 %v5660_v58, %v5659_v30  ;;  %v20423_v33 = vld [vmem:[#allocation158_spill] sm:$0xff] }
 0x4b1   : > { %9623 = vmatpush1.bf16.msra.mxu1 %v20414_v2  ;;  %v5662_v3 = vadd.f32 %v20416_v44, %v5598_v25  ;;  %v607_v32 = vld [vmem:[%s17973_s7 + $0x78] sm:$0xff] }
 0x4b2   : > { %6128 = vmatmul.mubr.f32.gmra.mrb[90].mxu0 %v15831_v63  ;;  %5973 = vmatmul.mubr.f32.gmra.mrb[60].mxu1 %v15380_v53  ;;  %v5661_v18 = vadd.f32 %v5597_v46, %v15363_v48  ;;  %v9688_v6 = vpack.c.bf16 %v15837_v61, %v15845_v50  ;;  %v20418_v48 = vld [vmem:[#allocation23_spill] sm:$0xff] }
 0x4b3   : > { %6133 = vmatprep.mubr.f32.mxu0 %v20031_v23  ;;  %5978 = vmatprep.mubr.f32.mxu1 %v20031_v23  ;;  %v6370_v53 = vadd.f32 %v5662_v3, %v15360_v29 }
 0x4b4   : > { %9625 = vmatprep.subr.bf16.mxu1 %v9624_v19  ;;  %v6366_v58 = vadd.f32 %v5661_v18, %v20418_v48  ;;  %v9628_v30 = vpack.c.bf16 %v5662_v3, %v5661_v18 }
 0x4b5   : > { %9627 = vmatpush1.bf16.msra.mxu1 %v20417_v7 }
 0x4b6   : > { %6134 = vmatmul.mubr.f32.gmra.mrb[92].mxu0 %v15855_v54  ;;  %5979 = vmatmul.mubr.f32.gmra.mrb[62].mxu1 %v15408_v22  ;;  %v9692_v29 = vpack.c.bf16 %v6370_v53, %v6366_v58  ;;  %v15881_v22 = vld [vmem:[%s17973_s7] sm:$0xff] }
 0x4b7   : > { %6139 = vmatprep.mubr.f32.mxu0 %v20031_v23  ;;  %6210 = vmatprep.mubr.f32.mxu1 %v20031_v23 }
 0x4b8   : > { %9629 = vmatprep.subr.bf16.mxu1 %v9628_v30 }
 0x4b9   : > { %9631 = vmatpush1.bf16.msra.mxu1 %v20419_v49 }
 0x4ba   : > { %6140 = vmatmul.mubr.f32.gmra.mrb[94].mxu0 %v15871_v5  ;;  %9665 = vmatprep.subr.bf16.mxu1 %v9664_v13  ;;  %v15955_v13 = vld [vmem:[%s17973_s7 + $0x28] sm:$0xff] }
 0x4bb   : > { %6435 = vmatprep.mubr.f32.mxu0 %v20031_v23 }
 0x4bc   : > { %6211 = vmatmul.mubr.f32.vlgmr.msra.gmra.mrb[64].mxu1 %v15448_v62  ;;  %v15910_v62 = vld [vmem:[%s17973_s7 + $0x10] sm:$0xff] }
 0x4bd   : > { %9667 = vmatpush1.bf16.msra.mxu1 %v20420_v17  ;;  %6216 = vmatprep.mubr.f32.mxu1 %v20031_v23 }
 0x4be   : > { %6436 = vmatmul.mubr.f32.vlgmr.msra.gmra.mrb[96].mxu0 %v15881_v22  ;;  %9669 = vmatprep.subr.bf16.mxu1 %v9668_v1 }
 0x4bf   : > { %6441 = vmatprep.mubr.f32.mxu0 %v20031_v23 }
 0x4c0   : > { %6217 = vmatmul.mubr.f32.gmra.mrb[66].mxu1 %v15483_v0  ;;  %v20424_v0 = vpack.c.bf16 %v15488_v11, %v20423_v33  ;;  %v20425_v11 = vld [vmem:[#allocation145_spill] sm:$0xff] }
 0x4c1   : > { %9671 = vmatpush1.bf16.msra.mxu1 %v20422_v28  ;;  %6222 = vmatprep.mubr.f32.mxu1 %v20031_v23 }
 0x4c2   : > { %6442 = vmatmul.mubr.f32.gmra.mrb[98].mxu0 %v15895_v9  ;;  %9673 = vmatprep.subr.bf16.mxu1 %v9672_v40 }
 0x4c3   : > { %6447 = vmatprep.mubr.f32.mxu0 %v20031_v23 }
 0x4c4   : > { %6223 = vmatmul.mubr.f32.gmra.mrb[68].mxu1 %v15518_v14  ;;  %v20426_v14 = vpack.c.bf16 %v15523_v51, %v20425_v11  ;;  %v20428_v51 = vld [vmem:[#allocation81_spill] sm:$0xff] }
 0x4c5   : > { %9675 = vmatpush1.bf16.msra.mxu1 %v20424_v0  ;;  %6228 = vmatprep.mubr.f32.mxu1 %v20031_v23 }
 0x4c6   : > { %6448 = vmatmul.mubr.f32.gmra.mrb[100].mxu0 %v15910_v62  ;;  %9677 = vmatprep.subr.bf16.mxu1 %v9676_v52  ;;  %v606_v52 = vld [vmem:[%s17973_s7 + $0x70] sm:$0xff] }
 0x4c7   : > { %6453 = vmatprep.mubr.f32.mxu0 %v20031_v23 }
 0x4c8   : > { %6229 = vmatmul.mubr.f32.gmra.mrb[70].mxu1 %v15553_v38  ;;  %v20429_v38 = vpack.c.bf16 %v15558_v35, %v20428_v51  ;;  %v20430_v35 = vld [vmem:[#allocation14_spill] sm:$0xff] }
 0x4c9   : > { %9679 = vmatpush1.bf16.msra.mxu1 %v20426_v14  ;;  %6234 = vmatprep.mubr.f32.mxu1 %v20031_v23 }
 0x4ca   : > { %6454 = vmatmul.mubr.f32.gmra.mrb[102].mxu0 %v15925_v12  ;;  %9681 = vmatprep.subr.bf16.mxu1 %v20427_v10 }
 0x4cb   : > { %6459 = vmatprep.mubr.f32.mxu0 %v20031_v23 }
 0x4cc   : > { %6235 = vmatmul.mubr.f32.gmra.mrb[72].mxu1 %v15588_v27  ;;  %v20431_v27 = vpack.c.bf16 %v15593_v41, %v20430_v35  ;;  %v15982_v41 = vld [vmem:[%s17973_s7 + $0x38] sm:$0xff] }
 0x4cd   : > { %9683 = vmatpush1.bf16.msra.mxu1 %v20429_v38  ;;  %6240 = vmatprep.mubr.f32.mxu1 %v20031_v23 }
 0x4ce   : > { %6460 = vmatmul.mubr.f32.gmra.mrb[104].mxu0 %v15940_v36  ;;  %9685 = vmatprep.subr.bf16.mxu1 %v9684_v20 }
 0x4cf   : > { %6465 = vmatprep.mubr.f32.mxu0 %v20031_v23 }
 0x4d0   : > { %6241 = vmatmul.mubr.f32.gmra.mrb[74].mxu1 %v15623_v31  ;;  %v20432_v31 = vld [vmem:[#allocation149_spill] sm:$0xff] }
 0x4d1   : > { %9687 = vmatpush1.bf16.msra.mxu1 %v20431_v27  ;;  %6246 = vmatprep.mubr.f32.mxu1 %v20031_v23  ;;  %v20434_v1 = vpack.c.bf16 %v20432_v31, %v20433_v21 }
 0x4d2   : > { %6466 = vmatmul.mubr.f32.gmra.mrb[106].mxu0 %v15955_v13  ;;  %9689 = vmatprep.subr.bf16.mxu1 %v9688_v6 }
 0x4d3   : > { %6471 = vmatprep.mubr.f32.mxu0 %v20031_v23 }
 0x4d4   : > { %6247 = vmatmul.mubr.f32.gmra.mrb[76].mxu1 %v15658_v59  ;;  %v20436_v59 = vld [vmem:[#allocation80_spill] sm:$0xff] }
 0x4d5   : > { %9691 = vmatpush1.bf16.msra.mxu1 %v20434_v1  ;;  %6252 = vmatprep.mubr.f32.mxu1 %v20031_v23  ;;  %v20438_v40 = vpack.c.bf16 %v20436_v59, %v20437_v43 }
 0x4d6   : > { %6472 = vmatmul.mubr.f32.gmra.mrb[108].mxu0 %v15970_v39  ;;  %9693 = vmatprep.subr.bf16.mxu1 %v9692_v29 }
 0x4d7   : > { %6477 = vmatprep.mubr.f32.mxu0 %v20031_v23 }
 0x4d8   : > { %6253 = vmatmul.mubr.f32.gmra.mrb[78].mxu1 %v20435_v8 }
 0x4d9   : > { %9695 = vmatpush1.bf16.msra.mxu1 %v20438_v40  ;;  %6258 = vmatprep.mubr.f32.mxu1 %v20031_v23 }
 0x4da   : > { %6478 = vmatmul.mubr.f32.gmra.mrb[110].mxu0 %v15982_v41 }
 0x4db   : > { %6483 = vmatprep.mubr.f32.mxu0 %v20031_v23 }
 0x4dc   : > { %6259 = vmatmul.mubr.f32.gmra.mrb[80].mxu1 %v15711_v34  ;;  %v602_v34 = vld [vmem:[%s17973_s7 + $0x50] sm:$0xff] }
 0x4dd   : > { %6264 = vmatprep.mubr.f32.mxu1 %v20031_v23 }
 0x4de   : > { %6484 = vmatmul.mubr.f32.gmra.mrb[112].mxu0 %v15994_v57 }
 0x4df   : > { %6489 = vmatprep.mubr.f32.mxu0 %v20031_v23 }
 0x4e0   : > { %6265 = vmatmul.mubr.f32.gmra.mrb[82].mxu1 %v15735_v24  ;;  %v603_v24 = vld [vmem:[%s17973_s7 + $0x58] sm:$0xff] }
 0x4e1   : > { %6270 = vmatprep.mubr.f32.mxu1 %v20031_v23 }
 0x4e2   : > { %6490 = vmatmul.mubr.f32.gmra.mrb[114].mxu0 %v601_v47 }
 0x4e3   : > { %6495 = vmatprep.mubr.f32.mxu0 %v20031_v23 }
 0x4e4   : > { %6271 = vmatmul.mubr.f32.gmra.mrb[84].mxu1 %v15759_v26  ;;  %v604_v26 = vld [vmem:[%s17973_s7 + $0x60] sm:$0xff] }
 0x4e5   : > { %6276 = vmatprep.mubr.f32.mxu1 %v20031_v23 }
 0x4e6   : > { %6496 = vmatmul.mubr.f32.gmra.mrb[116].mxu0 %v602_v34 }
 0x4e7   : > { %6501 = vmatprep.mubr.f32.mxu0 %v20031_v23 }
 0x4e8   : > { %6277 = vmatmul.mubr.f32.gmra.mrb[86].mxu1 %v15783_v42  ;;  %v605_v42 = vld [vmem:[%s17973_s7 + $0x68] sm:$0xff] }
 0x4e9   : > { %6282 = vmatprep.mubr.f32.mxu1 %v20031_v23 }
 0x4ea   : > { %6502 = vmatmul.mubr.f32.gmra.mrb[118].mxu0 %v603_v24 }
 0x4eb   : > { %6507 = vmatprep.mubr.f32.mxu0 %v20031_v23 }
 0x4ec   : > { %6283 = vmatmul.mubr.f32.gmra.mrb[88].mxu1 %v15807_v56 }
 0x4ed   : > { %6288 = vmatprep.mubr.f32.mxu1 %v20031_v23 }
 0x4ee   : > { %6508 = vmatmul.mubr.f32.gmra.mrb[120].mxu0 %v604_v26 }
 0x4ef   : > { %6513 = vmatprep.mubr.f32.mxu0 %v20031_v23 }
 0x4f0   : > { %6289 = vmatmul.mubr.f32.gmra.mrb[90].mxu1 %v15831_v63 }
 0x4f1   : > { %6294 = vmatprep.mubr.f32.mxu1 %v20031_v23 }
 0x4f2   : > { %6514 = vmatmul.mubr.f32.gmra.mrb[122].mxu0 %v605_v42 }
 0x4f3   : > { %6519 = vmatprep.mubr.f32.mxu0 %v20031_v23 }
 0x4f4   : > { %6295 = vmatmul.mubr.f32.gmra.mrb[92].mxu1 %v15855_v54 }
 0x4f5   : > { %6300 = vmatprep.mubr.f32.mxu1 %v20031_v23 }
 0x4f6   : > { %6520 = vmatmul.mubr.f32.gmra.mrb[124].mxu0 %v606_v52 }
 0x4f7   : > { %6525 = vmatprep.mubr.f32.mxu0 %v20031_v23 }
 0x4f8   : > { %6301 = vmatmul.mubr.f32.gmra.mrb[94].mxu1 %v15871_v5 }
 0x4f9   : > { %6596 = vmatprep.mubr.f32.mxu1 %v20031_v23 }
 0x4fa   : > { %6526 = vmatmul.mubr.f32.gmra.mrb[126].mxu0 %v607_v32 }
 0x4fc   : > { %6597 = vmatmul.mubr.f32.vlgmr.msra.gmra.mrb[96].mxu1 %v15881_v22 }
 0x4fd   : > { %6602 = vmatprep.mubr.f32.mxu1 %v20031_v23 }
 0x500   : > { %6603 = vmatmul.mubr.f32.gmra.mrb[98].mxu1 %v15895_v9 }
 0x501   : > { %6608 = vmatprep.mubr.f32.mxu1 %v20031_v23 }
 0x504   : > { %6609 = vmatmul.mubr.f32.gmra.mrb[100].mxu1 %v15910_v62 }
 0x505   : > { %6614 = vmatprep.mubr.f32.mxu1 %v20031_v23 }
 0x508   : > { %6615 = vmatmul.mubr.f32.gmra.mrb[102].mxu1 %v15925_v12 }
 0x509   : > { %6620 = vmatprep.mubr.f32.mxu1 %v20031_v23 }
 0x50b   : > { %v16052_v37 = vpop.f32.mrb[32].mxu0 }
 0x50c   : > { %6621 = vmatmul.mubr.f32.gmra.mrb[104].mxu1 %v15940_v36  ;;  %v16054_v56 = vpop.f32.mrb[33].mxu0 }
 0x50d   : > { %6626 = vmatprep.mubr.f32.mxu1 %v20031_v23 }
 0x50f   : > { %v16058_v60 = vpop.f32.mrb[34].mxu0 }
 0x510   : > { %6627 = vmatmul.mubr.f32.gmra.mrb[106].mxu1 %v15955_v13  ;;  %v16060_v4 = vpop.f32.mrb[35].mxu0 }
 0x511   : > { %6632 = vmatprep.mubr.f32.mxu1 %v20031_v23 }
 0x513   : > { %v16064_v63 = vpop.f32.mrb[36].mxu0 }
 0x514   : > { %6633 = vmatmul.mubr.f32.gmra.mrb[108].mxu1 %v15970_v39  ;;  %v16066_v20 = vpop.f32.mrb[37].mxu0 }
 0x515   : > { %6638 = vmatprep.mubr.f32.mxu1 %v20031_v23  ;;  %20439 = vst [vmem:[#allocation148_spill] sm:$0xff] %v16066_v20 }
 0x517   : > { %v16070_v61 = vpop.f32.mrb[38].mxu0 }
 0x518   : > { %6639 = vmatmul.mubr.f32.gmra.mrb[110].mxu1 %v15982_v41  ;;  %20440 = vst [vmem:[#allocation157_spill] sm:$0xff] %v16070_v61  ;;  %v16072_v15 = vpop.f32.mrb[39].mxu0 }
 0x519   : > { %6644 = vmatprep.mubr.f32.mxu1 %v20031_v23  ;;  %20441 = vst [vmem:[#allocation26_spill] sm:$0xff] %v16072_v15 }
 0x51b   : > { %v16076_v25 = vpop.f32.mrb[40].mxu0 }
 0x51c   : > { %6645 = vmatmul.mubr.f32.gmra.mrb[112].mxu1 %v15994_v57  ;;  %20442 = vst [vmem:[#allocation105_spill] sm:$0xff] %v16076_v25  ;;  %v16078_v45 = vpop.f32.mrb[41].mxu0 }
 0x51d   : > { %6650 = vmatprep.mubr.f32.mxu1 %v20031_v23  ;;  %20443 = vst [vmem:[#allocation153_spill] sm:$0xff] %v16078_v45 }
 0x51f   : > { %v16081_v2 = vpop.f32.mrb[42].mxu0 }
 0x520   : > { %6651 = vmatmul.mubr.f32.gmra.mrb[114].mxu1 %v601_v47  ;;  %20444 = vst [vmem:[#allocation123_spill] sm:$0xff] %v16081_v2  ;;  %v16083_v16 = vpop.f32.mrb[43].mxu0 }
 0x521   : > { %6656 = vmatprep.mubr.f32.mxu1 %v20031_v23  ;;  %20445 = vst [vmem:[#allocation83_spill] sm:$0xff] %v16083_v16 }
 0x523   : > { %v16086_v50 = vpop.f32.mrb[44].mxu0 }
 0x524   : > { %6657 = vmatmul.mubr.f32.gmra.mrb[116].mxu1 %v602_v34  ;;  %20446 = vst [vmem:[#allocation156_spill] sm:$0xff] %v16086_v50  ;;  %v16088_v46 = vpop.f32.mrb[45].mxu0 }
 0x525   : > { %6662 = vmatprep.mubr.f32.mxu1 %v20031_v23  ;;  %20447 = vst [vmem:[#allocation122_spill] sm:$0xff] %v16088_v46 }
 0x527   : > { %v16091_v19 = vpop.f32.mrb[46].mxu0 }
 0x528   : > { %6663 = vmatmul.mubr.f32.gmra.mrb[118].mxu1 %v603_v24  ;;  %20448 = vst [vmem:[#allocation120_spill] sm:$0xff] %v16091_v19  ;;  %v16093_v44 = vpop.f32.mrb[47].mxu0 }
 0x529   : > { %6668 = vmatprep.mubr.f32.mxu1 %v20031_v23  ;;  %20449 = vst [vmem:[#allocation27_spill] sm:$0xff] %v16093_v44 }
 0x52c   : > { %6669 = vmatmul.mubr.f32.gmra.mrb[120].mxu1 %v604_v26  ;;  %v16096_v3 = vpop.f32.mrb[48].mxu0 }
 0x52d   : > { %6674 = vmatprep.mubr.f32.mxu1 %v20031_v23  ;;  %20450 = vst [vmem:[#allocation4_spill] sm:$0xff] %v16096_v3  ;;  %v16098_v18 = vpop.f32.mrb[49].mxu0 }
 0x52e   : > { %20451 = vst [vmem:[#allocation160_spill] sm:$0xff] %v16098_v18 }
 0x530   : > { %6675 = vmatmul.mubr.f32.gmra.mrb[122].mxu1 %v605_v42  ;;  %v16101_v54 = vpop.f32.mrb[50].mxu0 }
 0x531   : > { %6680 = vmatprep.mubr.f32.mxu1 %v20031_v23  ;;  %20452 = vst [vmem:[#allocation77_spill] sm:$0xff] %v16101_v54  ;;  %v16103_v6 = vpop.f32.mrb[51].mxu0 }
 0x532   : > { %20453 = vst [vmem:[#allocation78_spill] sm:$0xff] %v16103_v6 }
 0x534   : > { %6681 = vmatmul.mubr.f32.gmra.mrb[124].mxu1 %v606_v52  ;;  %v16106_v53 = vpop.f32.mrb[52].mxu0 }
 0x535   : > { %6686 = vmatprep.mubr.f32.mxu1 %v20031_v23  ;;  %20454 = vst [vmem:[#allocation140_spill] sm:$0xff] %v16106_v53  ;;  %v16108_v7 = vpop.f32.mrb[53].mxu0 }
 0x536   : > { %20455 = vst [vmem:[#allocation43_spill] sm:$0xff] %v16108_v7 }
 0x538   : > { %6687 = vmatmul.mubr.f32.gmra.mrb[126].mxu1 %v607_v32 }
 0x53a   : > { %v16110_v48 = vpop.f32.mrb[54].mxu0 }
 0x53b   : > { %20456 = vst [vmem:[#allocation113_spill] sm:$0xff] %v16110_v48  ;;  %v16112_v58 = vpop.f32.mrb[55].mxu0 }
 0x53c   : > { %20457 = vst [vmem:[#allocation3_spill] sm:$0xff] %v16112_v58 }
 0x53f   : > { %v16114_v30 = vpop.f32.mrb[56].mxu0 }
 0x540   : > { %20458 = vst [vmem:[#allocation139_spill] sm:$0xff] %v16114_v30  ;;  %v16116_v5 = vpop.f32.mrb[57].mxu0 }
 0x541   : > { %20459 = vst [vmem:[#allocation64_spill] sm:$0xff] %v16116_v5 }
 0x543   : > { %v16118_v29 = vpop.f32.mrb[58].mxu0 }
 0x544   : > { %20460 = vst [vmem:[#allocation96_spill] sm:$0xff] %v16118_v29  ;;  %v16120_v49 = vpop.f32.mrb[59].mxu0 }
 0x545   : > { %20461 = vst [vmem:[#allocation108_spill] sm:$0xff] %v16120_v49 }
 0x547   : > { %v16122_v22 = vpop.f32.mrb[60].mxu0 }
 0x548   : > { %20462 = vst [vmem:[#allocation54_spill] sm:$0xff] %v16122_v22  ;;  %v16124_v23 = vpop.f32.mrb[61].mxu0 }
 0x549   : > { %20463 = vst [vmem:[#allocation86_spill] sm:$0xff] %v16124_v23 }
 0x54b   : > { %v16126_v17 = vpop.f32.mrb[62].mxu0 }
 0x54c   : > { %20464 = vst [vmem:[#allocation88_spill] sm:$0xff] %v16126_v17  ;;  %v16128_v9 = vpop.f32.mrb[63].mxu0 }
 0x54d   : > { %20465 = vst [vmem:[#allocation66_spill] sm:$0xff] %v16128_v9  ;;  %v16130_v55 = vpop.f32.mrb[32].mxu1 }
 0x54e   : > { %v16132_v28 = vpop.f32.mrb[33].mxu1 }
 0x551   : > { %v16134_v62 = vpop.f32.mrb[64].mxu0  ;;  %v16146_v11 = vpop.f32.mrb[34].mxu1 }
 0x552   : > { %v16138_v33 = vadd.f32 %v16134_v62, %v16052_v37  ;;  %v16140_v0 = vpop.f32.mrb[65].mxu0  ;;  %v16148_v14 = vpop.f32.mrb[35].mxu1 }
 0x553   : > { %v16144_v12 = vadd.f32 %v16140_v0, %v16054_v56 }
 0x555   : > { %v16150_v36 = vpop.f32.mrb[66].mxu0  ;;  %v16162_v13 = vpop.f32.mrb[36].mxu1 }
 0x556   : > { %v16154_v10 = vadd.f32 %v16150_v36, %v16058_v60  ;;  %v16156_v51 = vpop.f32.mrb[67].mxu0  ;;  %20466 = vst [vmem:[#allocation62_spill] sm:$0xff] %v16162_v13  ;;  %v16164_v35 = vpop.f32.mrb[37].mxu1  ;;  %v16406_v13 = vld [vmem:[%s10023_s14 + $0x240] sm:$0xff] }
 0x557   : > { %v16160_v38 = vadd.f32 %v16156_v51, %v16060_v4  ;;  %20467 = vst [vmem:[#allocation35_spill] sm:$0xff] %v16164_v35 }
 0x559   : > { %v16166_v27 = vpop.f32.mrb[68].mxu0  ;;  %v16178_v1 = vpop.f32.mrb[38].mxu1 }
 0x55a   : > { %v16170_v39 = vadd.f32 %v16166_v27, %v16064_v63  ;;  %v16172_v31 = vpop.f32.mrb[69].mxu0  ;;  %20469 = vst [vmem:[#allocation118_spill] sm:$0xff] %v16178_v1  ;;  %v16180_v41 = vpop.f32.mrb[39].mxu1  ;;  %v16376_v1 = vld [vmem:[%s10023_s14 + $0x220] sm:$0xff] }
 0x55b   : > { %20468 = vst [vmem:[#allocation119_spill] sm:$0xff] %v16172_v31  ;;  %v16176_v21 = vadd.f32 %v16172_v31, %v16066_v20  ;;  %20470 = vst [vmem:[#allocation127_spill] sm:$0xff] %v16180_v41  ;;  %v16369_v41 = vld [vmem:[%s10023_s14 + $0x20] sm:$0xff]  ;;  %v16413_v20 = vld [vmem:[%s10023_s14 + $0x48] sm:$0xff] }
 0x55c   : > { %v16399_v31 = vld [vmem:[%s10023_s14 + $0x40] sm:$0xff]  ;;  %20516 = vst [vmem:[#allocation109_spill] sm:$0xff] %v16413_v20 }
 0x55d   : > { %v16182_v8 = vpop.f32.mrb[70].mxu0  ;;  %v16194_v57 = vpop.f32.mrb[40].mxu1  ;;  %20513 = vst [vmem:[#allocation60_spill] sm:$0xff] %v16399_v31 }
 0x55e   : > { %20471 = vst [vmem:[#allocation133_spill] sm:$0xff] %v16182_v8  ;;  %v16186_v59 = vadd.f32 %v16182_v8, %v16070_v61  ;;  %v16188_v43 = vpop.f32.mrb[71].mxu0  ;;  %20473 = vst [vmem:[#allocation135_spill] sm:$0xff] %v16194_v57  ;;  %v16196_v47 = vpop.f32.mrb[41].mxu1  ;;  %v16356_v8 = vld [vmem:[%s10023_s14 + $0x208] sm:$0xff] }
 0x55f   : > { %20472 = vst [vmem:[#allocation115_spill] sm:$0xff] %v16188_v43  ;;  %v16192_v40 = vadd.f32 %v16188_v43, %v16072_v15  ;;  %20474 = vst [vmem:[#allocation107_spill] sm:$0xff] %v16196_v47  ;;  %v16373_v15 = vmul.f32 %v16369_v41, %v16154_v10  ;;  %v16383_v61 = vld [vmem:[%s10023_s14 + $0x28] sm:$0xff] }
 0x561   : > { %v16198_v34 = vpop.f32.mrb[72].mxu0  ;;  %v16210_v52 = vpop.f32.mrb[42].mxu1 }
 0x562   : > { %20475 = vst [vmem:[#allocation141_spill] sm:$0xff] %v16198_v34  ;;  %v16202_v24 = vadd.f32 %v16198_v34, %v16076_v25  ;;  %v16204_v26 = vpop.f32.mrb[73].mxu0  ;;  %20477 = vst [vmem:[#allocation37_spill] sm:$0xff] %v16210_v52  ;;  %v16212_v32 = vpop.f32.mrb[43].mxu1 }
 0x563   : > { %20476 = vst [vmem:[#allocation126_spill] sm:$0xff] %v16204_v26  ;;  %v16208_v42 = vadd.f32 %v16204_v26, %v16078_v45  ;;  %20478 = vst [vmem:[#allocation9_spill] sm:$0xff] %v16212_v32 }
 0x565   : > { %v16214_v43 = vpop.f32.mrb[74].mxu0  ;;  %v16226_v25 = vpop.f32.mrb[44].mxu1 }
 0x566   : > { %20479 = vst [vmem:[#allocation137_spill] sm:$0xff] %v16214_v43  ;;  %v16218_v47 = vadd.f32 %v16214_v43, %v16081_v2  ;;  %v16220_v57 = vpop.f32.mrb[75].mxu0  ;;  %20481 = vst [vmem:[#allocation28_spill] sm:$0xff] %v16226_v25  ;;  %v16228_v26 = vpop.f32.mrb[45].mxu1 }
 0x567   : > { %20480 = vst [vmem:[#allocation146_spill] sm:$0xff] %v16220_v57  ;;  %v16224_v34 = vadd.f32 %v16220_v57, %v16083_v16  ;;  %20482 = vst [vmem:[#allocation40_spill] sm:$0xff] %v16228_v26 }
 0x569   : > { %v16230_v45 = vpop.f32.mrb[76].mxu0  ;;  %v16242_v2 = vpop.f32.mrb[46].mxu1 }
 0x56a   : > { %20483 = vst [vmem:[#allocation47_spill] sm:$0xff] %v16230_v45  ;;  %v16234_v32 = vadd.f32 %v16230_v45, %v16086_v50  ;;  %v16236_v52 = vpop.f32.mrb[77].mxu0  ;;  %20485 = vst [vmem:[#allocation152_spill] sm:$0xff] %v16242_v2  ;;  %v16244_v57 = vpop.f32.mrb[47].mxu1 }
 0x56b   : > { %20484 = vst [vmem:[#allocation121_spill] sm:$0xff] %v16236_v52  ;;  %v16240_v43 = vadd.f32 %v16236_v52, %v16088_v46  ;;  %20486 = vst [vmem:[#allocation125_spill] sm:$0xff] %v16244_v57 }
 0x56d   : > { %v16246_v16 = vpop.f32.mrb[78].mxu0  ;;  %v16258_v50 = vpop.f32.mrb[48].mxu1 }
 0x56e   : > { %20487 = vst [vmem:[#allocation46_spill] sm:$0xff] %v16246_v16  ;;  %v16250_v26 = vadd.f32 %v16246_v16, %v16091_v19  ;;  %v16252_v25 = vpop.f32.mrb[79].mxu0  ;;  %20489 = vst [vmem:[#allocation154_spill] sm:$0xff] %v16258_v50  ;;  %v16260_v52 = vpop.f32.mrb[49].mxu1 }
 0x56f   : > { %20488 = vst [vmem:[#allocation104_spill] sm:$0xff] %v16252_v25  ;;  %v16256_v45 = vadd.f32 %v16252_v25, %v16093_v44  ;;  %20490 = vst [vmem:[#allocation85_spill] sm:$0xff] %v16260_v52 }
 0x571   : > { %v16262_v46 = vpop.f32.mrb[80].mxu0  ;;  %v16274_v19 = vpop.f32.mrb[50].mxu1 }
 0x572   : > { %20491 = vst [vmem:[#allocation5_spill] sm:$0xff] %v16262_v46  ;;  %v16266_v57 = vadd.f32 %v16262_v46, %v16096_v3  ;;  %v16268_v2 = vpop.f32.mrb[81].mxu0  ;;  %20493 = vst [vmem:[#allocation29_spill] sm:$0xff] %v16274_v19  ;;  %v16276_v25 = vpop.f32.mrb[51].mxu1 }
 0x573   : > { %20492 = vst [vmem:[#allocation49_spill] sm:$0xff] %v16268_v2  ;;  %v16272_v16 = vadd.f32 %v16268_v2, %v16098_v18  ;;  %20494 = vst [vmem:[#allocation48_spill] sm:$0xff] %v16276_v25 }
 0x575   : > { %v16278_v44 = vpop.f32.mrb[82].mxu0  ;;  %v16290_v3 = vpop.f32.mrb[52].mxu1 }
 0x576   : > { %20495 = vst [vmem:[#allocation101_spill] sm:$0xff] %v16278_v44  ;;  %v16282_v52 = vadd.f32 %v16278_v44, %v16101_v54  ;;  %v16284_v50 = vpop.f32.mrb[83].mxu0  ;;  %20497 = vst [vmem:[#allocation50_spill] sm:$0xff] %v16290_v3  ;;  %v16292_v2 = vpop.f32.mrb[53].mxu1 }
 0x577   : > { %20496 = vst [vmem:[#allocation8_spill] sm:$0xff] %v16284_v50  ;;  %v16288_v46 = vadd.f32 %v16284_v50, %v16103_v6  ;;  %20498 = vst [vmem:[#allocation67_spill] sm:$0xff] %v16292_v2 }
 0x579   : > { %v16294_v18 = vpop.f32.mrb[84].mxu0  ;;  %v16306_v50 = vpop.f32.mrb[54].mxu1 }
 0x57a   : > { %20499 = vst [vmem:[#allocation10_spill] sm:$0xff] %v16294_v18  ;;  %v16298_v25 = vadd.f32 %v16294_v18, %v16106_v53  ;;  %v16300_v44 = vpop.f32.mrb[85].mxu0  ;;  %20501 = vst [vmem:[#allocation131_spill] sm:$0xff] %v16306_v50  ;;  %v16308_v6 = vpop.f32.mrb[55].mxu1  ;;  %v16329_v50 = vld [vmem:[%s10023_s14] sm:$0xff] }
 0x57b   : > { %20500 = vst [vmem:[#allocation110_spill] sm:$0xff] %v16300_v44  ;;  %v16304_v54 = vadd.f32 %v16300_v44, %v16108_v7  ;;  %20502 = vst [vmem:[#allocation39_spill] sm:$0xff] %v16308_v6 }
 0x57d   : > { %v16310_v2 = vpop.f32.mrb[86].mxu0  ;;  %v16322_v44 = vpop.f32.mrb[56].mxu1 }
 0x57e   : > { %20503 = vst [vmem:[#allocation11_spill] sm:$0xff] %v16310_v2  ;;  %v16314_v3 = vadd.f32 %v16310_v2, %v16110_v48  ;;  %v16316_v18 = vpop.f32.mrb[87].mxu0  ;;  %20505 = vst [vmem:[#allocation155_spill] sm:$0xff] %v16322_v44  ;;  %v16324_v7 = vpop.f32.mrb[57].mxu1  ;;  %v16333_v2 = vmul.f32 %v16329_v50, %v16138_v33  ;;  %v16349_v44 = vld [vmem:[%s10023_s14 + $0x8] sm:$0xff] }
 0x57f   : > { %20504 = vst [vmem:[#allocation55_spill] sm:$0xff] %v16316_v18  ;;  %v16320_v53 = vadd.f32 %v16316_v18, %v16112_v58  ;;  %20506 = vst [vmem:[#allocation100_spill] sm:$0xff] %v16324_v7  ;;  %v16342_v58 = vld [vmem:[%s10023_s14 + $0x200] sm:$0xff]  ;;  %v16353_v19 = vmul.f32 %v16349_v44, %v16144_v12 }
 0x580   : > { %v16346_v7 = vmul.f32 %v16342_v58, %v16138_v33 }
 0x581   : > { %v16326_v6 = vpop.f32.mrb[88].mxu0  ;;  %v16366_v33 = vpop.f32.mrb[58].mxu1 }
 0x582   : > { %20507 = vst [vmem:[#allocation44_spill] sm:$0xff] %v16326_v6  ;;  %v16337_v48 = vadd.f32 %v16326_v6, %v16114_v30  ;;  %v16339_v18 = vpop.f32.mrb[89].mxu0  ;;  %v16360_v6 = vmul.f32 %v16356_v8, %v16144_v12  ;;  %20509 = vst [vmem:[#allocation111_spill] sm:$0xff] %v16366_v33  ;;  %v16380_v12 = vmul.f32 %v16376_v1, %v16154_v10  ;;  %v16396_v35 = vpop.f32.mrb[59].mxu1 }
 0x583   : > { %20508 = vst [vmem:[#allocation159_spill] sm:$0xff] %v16339_v18  ;;  %v16364_v30 = vadd.f32 %v16339_v18, %v16116_v5  ;;  %v16387_v18 = vmul.f32 %v16383_v61, %v16160_v38  ;;  %v16390_v5 = vld [vmem:[%s10023_s14 + $0x228] sm:$0xff]  ;;  %20512 = vst [vmem:[#allocation33_spill] sm:$0xff] %v16396_v35  ;;  %v16403_v10 = vmul.f32 %v16399_v31, %v16170_v39 }
 0x584   : > { %v16394_v33 = vmul.f32 %v16390_v5, %v16160_v38  ;;  %v16417_v38 = vmul.f32 %v16413_v20, %v16176_v21  ;;  %v16420_v35 = vld [vmem:[%s10023_s14 + $0x248] sm:$0xff] }
 0x585   : > { %20510 = vst [vmem:[#allocation68_spill] sm:$0xff] %v16387_v18  ;;  %20514 = vst [vmem:[#allocation93_spill] sm:$0xff] %v16403_v10  ;;  %v16410_v18 = vmul.f32 %v16406_v13, %v16170_v39  ;;  %v16424_v10 = vmul.f32 %v16420_v35, %v16176_v21  ;;  %v16426_v31 = vpop.f32.mrb[90].mxu0  ;;  %v16443_v20 = vld [vmem:[%s10023_s14 + $0x68] sm:$0xff] }
 0x586   : > { %20511 = vst [vmem:[#allocation92_spill] sm:$0xff] %v16394_v33  ;;  %20517 = vst [vmem:[#allocation138_spill] sm:$0xff] %v16417_v38  ;;  %v16429_v33 = vld [vmem:[%s10023_s14 + $0x60] sm:$0xff]  ;;  %v16447_v21 = vmul.f32 %v16443_v20, %v16192_v40 }
 0x587   : > { %20515 = vst [vmem:[#allocation15_spill] sm:$0xff] %v16410_v18  ;;  %20518 = vst [vmem:[#allocation128_spill] sm:$0xff] %v16424_v10  ;;  %v16433_v39 = vmul.f32 %v16429_v33, %v16186_v59  ;;  %v16436_v18 = vld [vmem:[%s10023_s14 + $0x260] sm:$0xff]  ;;  %v16451_v10 = vadd.f32 %v16426_v31, %v16118_v29 }
 0x588   : > { %20519 = vst [vmem:[#allocation134_spill] sm:$0xff] %v16426_v31  ;;  %20520 = vst [vmem:[#allocation42_spill] sm:$0xff] %v16429_v33  ;;  %v16440_v38 = vmul.f32 %v16436_v18, %v16186_v59  ;;  %v16456_v33 = vld [vmem:[%s10023_s14 + $0x268] sm:$0xff] }
 0x589   : > { %20521 = vst [vmem:[#allocation143_spill] sm:$0xff] %v16433_v39  ;;  %20523 = vst [vmem:[#allocation132_spill] sm:$0xff] %v16443_v20  ;;  %v16453_v39 = vpop.f32.mrb[91].mxu0  ;;  %v16460_v59 = vmul.f32 %v16456_v33, %v16192_v40  ;;  %v16480_v40 = vpop.f32.mrb[60].mxu1 }
 0x58a   : > { %20522 = vst [vmem:[#allocation124_spill] sm:$0xff] %v16440_v38  ;;  %20524 = vst [vmem:[#allocation22_spill] sm:$0xff] %v16447_v21  ;;  %v16463_v38 = vld [vmem:[%s10023_s14 + $0x80] sm:$0xff]  ;;  %v16478_v29 = vadd.f32 %v16453_v39, %v16120_v49 }
 0x58b   : > { %20525 = vst [vmem:[#allocation13_spill] sm:$0xff] %v16453_v39  ;;  %20526 = vst [vmem:[#allocation41_spill] sm:$0xff] %v16460_v59  ;;  %v16467_v20 = vmul.f32 %v16463_v38, %v16202_v24  ;;  %v16470_v21 = vld [vmem:[%s10023_s14 + $0x280] sm:$0xff]  ;;  %v16483_v59 = vld [vmem:[%s10023_s14 + $0x88] sm:$0xff] }
 0x58c   : > { %20527 = vst [vmem:[#allocation75_spill] sm:$0xff] %v16463_v38  ;;  %v16474_v31 = vmul.f32 %v16470_v21, %v16202_v24  ;;  %20530 = vst [vmem:[#allocation32_spill] sm:$0xff] %v16480_v40  ;;  %v16490_v38 = vld [vmem:[%s10023_s14 + $0x288] sm:$0xff]  ;;  %v16504_v49 = vld [vmem:[%s10023_s14 + $0x2a0] sm:$0xff] }
 0x58d   : > { %20528 = vst [vmem:[#allocation150_spill] sm:$0xff] %v16467_v20  ;;  %20531 = vst [vmem:[#allocation56_spill] sm:$0xff] %v16483_v59  ;;  %v16487_v20 = vmul.f32 %v16483_v59, %v16208_v42  ;;  %v16494_v24 = vmul.f32 %v16490_v38, %v16208_v42  ;;  %v16508_v40 = vmul.f32 %v16504_v49, %v16218_v47  ;;  %v16513_v59 = vld [vmem:[%s10023_s14 + $0xa8] sm:$0xff] }
 0x58e   : > { %20529 = vst [vmem:[#allocation58_spill] sm:$0xff] %v16474_v31  ;;  %v16497_v31 = vld [vmem:[%s10023_s14 + $0xa0] sm:$0xff]  ;;  %20538 = vst [vmem:[#allocation87_spill] sm:$0xff] %v16513_v59  ;;  %v16517_v42 = vmul.f32 %v16513_v59, %v16224_v34  ;;  %v16543_v59 = vld [vmem:[%s10023_s14 + $0xc8] sm:$0xff] }
 0x58f   : > { %20532 = vst [vmem:[#allocation30_spill] sm:$0xff] %v16487_v20  ;;  %20533 = vst [vmem:[#allocation38_spill] sm:$0xff] %v16494_v24  ;;  %v16501_v39 = vmul.f32 %v16497_v31, %v16218_v47  ;;  %v16510_v20 = vpop.f32.mrb[61].mxu1  ;;  %v16520_v24 = vld [vmem:[%s10023_s14 + $0x2a8] sm:$0xff] }
 0x590   : > { %20534 = vst [vmem:[#allocation7_spill] sm:$0xff] %v16497_v31  ;;  %20536 = vst [vmem:[#allocation57_spill] sm:$0xff] %v16508_v40  ;;  %v16527_v31 = vld [vmem:[%s10023_s14 + $0xc0] sm:$0xff]  ;;  %v16540_v40 = vpop.f32.mrb[92].mxu0 }
 0x591   : > { %20535 = vst [vmem:[#allocation74_spill] sm:$0xff] %v16501_v39  ;;  %20537 = vst [vmem:[#allocation61_spill] sm:$0xff] %v16510_v20  ;;  %v16524_v39 = vmul.f32 %v16520_v24, %v16224_v34  ;;  %v16531_v47 = vmul.f32 %v16527_v31, %v16234_v32  ;;  %v16534_v20 = vld [vmem:[%s10023_s14 + $0x2c0] sm:$0xff]  ;;  %v16547_v34 = vmul.f32 %v16543_v59, %v16240_v43 }
 0x592   : > { %20539 = vst [vmem:[#allocation79_spill] sm:$0xff] %v16517_v42  ;;  %20541 = vst [vmem:[#allocation69_spill] sm:$0xff] %v16527_v31  ;;  %v16538_v42 = vmul.f32 %v16534_v20, %v16234_v32  ;;  %v16557_v31 = vld [vmem:[%s10023_s14 + $0xe0] sm:$0xff] }
 0x593   : > { %20540 = vst [vmem:[#allocation51_spill] sm:$0xff] %v16524_v39  ;;  %20542 = vst [vmem:[#allocation129_spill] sm:$0xff] %v16531_v47  ;;  %v16550_v39 = vld [vmem:[%s10023_s14 + $0x2c8] sm:$0xff]  ;;  %v16561_v32 = vmul.f32 %v16557_v31, %v16250_v26 }
 0x594   : > { %20543 = vst [vmem:[#allocation99_spill] sm:$0xff] %v16538_v42  ;;  %20544 = vst [vmem:[#allocation45_spill] sm:$0xff] %v16540_v40  ;;  %v16554_v47 = vmul.f32 %v16550_v39, %v16240_v43  ;;  %v16565_v42 = vadd.f32 %v16540_v40, %v16122_v22 }
 0x595   : > { %20545 = vst [vmem:[#allocation63_spill] sm:$0xff] %v16543_v59  ;;  %20546 = vst [vmem:[#allocation130_spill] sm:$0xff] %v16547_v34  ;;  %v16567_v34 = vpop.f32.mrb[93].mxu0  ;;  %v16570_v59 = vld [vmem:[%s10023_s14 + $0x2e0] sm:$0xff] }
 0x596   : > { %20547 = vst [vmem:[#allocation36_spill] sm:$0xff] %v16554_v47  ;;  %20548 = vst [vmem:[#allocation116_spill] sm:$0xff] %v16557_v31  ;;  %v16574_v43 = vmul.f32 %v16570_v59, %v16250_v26  ;;  %v16577_v47 = vld [vmem:[%s10023_s14 + $0xe8] sm:$0xff]  ;;  %v16592_v22 = vadd.f32 %v16567_v34, %v16124_v23  ;;  %v16594_v26 = vpop.f32.mrb[62].mxu1 }
 0x597   : > { %20549 = vst [vmem:[#allocation20_spill] sm:$0xff] %v16561_v32  ;;  %20550 = vst [vmem:[#allocation136_spill] sm:$0xff] %v16567_v34  ;;  %v16581_v31 = vmul.f32 %v16577_v47, %v16256_v45  ;;  %v16584_v32 = vld [vmem:[%s10023_s14 + $0x2e8] sm:$0xff] }
 0x598   : > { %20551 = vst [vmem:[#allocation18_spill] sm:$0xff] %v16574_v43  ;;  %20552 = vst [vmem:[#allocation89_spill] sm:$0xff] %v16577_v47  ;;  %v16588_v40 = vmul.f32 %v16584_v32, %v16256_v45  ;;  %v16597_v43 = vld [vmem:[%s10023_s14 + $0x100] sm:$0xff]  ;;  %v16618_v23 = vld [vmem:[%s10023_s14 + $0x308] sm:$0xff] }
 0x599   : > { %20553 = vst [vmem:[#allocation52_spill] sm:$0xff] %v16581_v31  ;;  %20555 = vst [vmem:[#allocation117_spill] sm:$0xff] %v16594_v26  ;;  %v16601_v31 = vmul.f32 %v16597_v43, %v16266_v57  ;;  %v16604_v47 = vld [vmem:[%s10023_s14 + $0x300] sm:$0xff]  ;;  %v16622_v26 = vmul.f32 %v16618_v23, %v16272_v16 }
 0x59a   : > { %20554 = vst [vmem:[#allocation24_spill] sm:$0xff] %v16588_v40  ;;  %20556 = vst [vmem:[#allocation94_spill] sm:$0xff] %v16597_v43  ;;  %v16608_v45 = vmul.f32 %v16604_v47, %v16266_v57  ;;  %v16611_v40 = vld [vmem:[%s10023_s14 + $0x108] sm:$0xff]  ;;  %v16627_v43 = vld [vmem:[%s10023_s14 + $0x120] sm:$0xff] }
 0x59b   : > { %20557 = vst [vmem:[#allocation6_spill] sm:$0xff] %v16601_v31  ;;  %20559 = vst [vmem:[#allocation84_spill] sm:$0xff] %v16611_v40  ;;  %v16615_v34 = vmul.f32 %v16611_v40, %v16272_v16  ;;  %v16624_v31 = vpop.f32.mrb[63].mxu1  ;;  %v16631_v57 = vmul.f32 %v16627_v43, %v16282_v52  ;;  %v16641_v40 = vld [vmem:[%s10023_s14 + $0x128] sm:$0xff] }
 0x59c   : > { %20558 = vst [vmem:[#allocation25_spill] sm:$0xff] %v16608_v45  ;;  %20561 = vst [vmem:[#allocation71_spill] sm:$0xff] %v16622_v26  ;;  %v16634_v45 = vld [vmem:[%s10023_s14 + $0x320] sm:$0xff]  ;;  %v16645_v16 = vmul.f32 %v16641_v40, %v16288_v46 }
 0x59d   : > { %20560 = vst [vmem:[#allocation21_spill] sm:$0xff] %v16615_v34  ;;  %20562 = vst [vmem:[#allocation142_spill] sm:$0xff] %v16624_v31  ;;  %v16638_v34 = vmul.f32 %v16634_v45, %v16282_v52  ;;  %v16648_v31 = vld [vmem:[%s10023_s14 + $0x328] sm:$0xff]  ;;  %v16657_v26 = vld [vmem:[%s10023_s14 + $0x140] sm:$0xff] }
 0x59e   : > { %20563 = vst [vmem:[#allocation12_spill] sm:$0xff] %v16627_v43  ;;  %20564 = vst [vmem:[#allocation72_spill] sm:$0xff] %v16631_v57  ;;  %v16652_v57 = vmul.f32 %v16648_v31, %v16288_v46  ;;  %v16654_v43 = vpop.f32.mrb[94].mxu0  ;;  %v16661_v52 = vmul.f32 %v16657_v26, %v16298_v25 }
 0x59f   : > { %20565 = vst [vmem:[#allocation98_spill] sm:$0xff] %v16638_v34  ;;  %20566 = vst [vmem:[#allocation70_spill] sm:$0xff] %v16641_v40  ;;  %v16664_v34 = vld [vmem:[%s10023_s14 + $0x340] sm:$0xff]  ;;  %v16671_v40 = vld [vmem:[%s10023_s14 + $0x148] sm:$0xff] }
 0x5a0   : > { %20567 = vst [vmem:[#allocation65_spill] sm:$0xff] %v16645_v16  ;;  %20568 = vst [vmem:[#allocation59_spill] sm:$0xff] %v16652_v57  ;;  %v16668_v16 = vmul.f32 %v16664_v34, %v16298_v25  ;;  %v16675_v46 = vmul.f32 %v16671_v40, %v16304_v54  ;;  %v6753_v57 = vadd.f32 %v16654_v43, %v16126_v17 }
 0x5a1   : > { %20569 = vst [vmem:[#allocation31_spill] sm:$0xff] %v16654_v43  ;;  %20570 = vst [vmem:[#allocation106_spill] sm:$0xff] %v16657_v26  ;;  %v16679_v26 = vpop.f32.mrb[95].mxu0 }
 0x5a2   : > { %20571 = vst [vmem:[#allocation19_spill] sm:$0xff] %v16661_v52  ;;  %20572 = vst [vmem:[#allocation144_spill] sm:$0xff] %v16668_v16  ;;  %v16682_v52 = vld [vmem:[%s10023_s14 + $0x348] sm:$0xff]  ;;  %v16689_v16 = vld [vmem:[%s10023_s14 + $0x160] sm:$0xff]  ;;  %v6754_v17 = vadd.f32 %v16679_v26, %v16128_v9 }
 0x5a3   : > { %20573 = vst [vmem:[#allocation90_spill] sm:$0xff] %v16671_v40  ;;  %20574 = vst [vmem:[#allocation91_spill] sm:$0xff] %v16675_v46  ;;  %v16686_v25 = vmul.f32 %v16682_v52, %v16304_v54  ;;  %v16693_v40 = vmul.f32 %v16689_v16, %v16314_v3  ;;  %v16696_v46 = vld [vmem:[%s10023_s14 + $0x360] sm:$0xff]  ;;  %v16705_v54 = vld [vmem:[%s10023_s14 + $0x168] sm:$0xff] }
 0x5a4   : > { %20575 = vst [vmem:[#allocation95_spill] sm:$0xff] %v16679_v26  ;;  %20576 = vst [vmem:[#allocation53_spill] sm:$0xff] %v16682_v52  ;;  %v16700_v43 = vmul.f32 %v16696_v46, %v16314_v3  ;;  %v16712_v52 = vld [vmem:[%s10023_s14 + $0x368] sm:$0xff]  ;;  %v16726_v26 = vld [vmem:[%s10023_s14 + $0x380] sm:$0xff] }
 0x5a5   : > { %20577 = vst [vmem:[#allocation151_spill] sm:$0xff] %v16686_v25  ;;  %20578 = vst [vmem:[#allocation97_spill] sm:$0xff] %v16689_v16  ;;  %v16709_v25 = vmul.f32 %v16705_v54, %v16320_v53  ;;  %v16719_v16 = vld [vmem:[%s10023_s14 + $0x180] sm:$0xff]  ;;  %v16730_v9 = vmul.f32 %v16726_v26, %v16337_v48 }
 0x5a6   : > { %20579 = vst [vmem:[#allocation73_spill] sm:$0xff] %v16693_v40  ;;  %20580 = vst [vmem:[#allocation34_spill] sm:$0xff] %v16700_v43  ;;  %v16716_v40 = vmul.f32 %v16712_v52, %v16320_v53  ;;  %v16723_v3 = vmul.f32 %v16719_v16, %v16337_v48  ;;  %v16740_v53 = vld [vmem:[%s10023_s14 + $0x388] sm:$0xff] }
 0x5a7   : > { %20581 = vst [vmem:[#allocation114_spill] sm:$0xff] %v16705_v54  ;;  %20582 = vst [vmem:[#allocation112_spill] sm:$0xff] %v16709_v25  ;;  %v16733_v25 = vld [vmem:[%s10023_s14 + $0x188] sm:$0xff]  ;;  %v16813_v54 = vld [vmem:[%s10023_s14 + $0x1e0] sm:$0xff] }
 0x5a8   : > { %20583 = vst [vmem:[#allocation102_spill] sm:$0xff] %v16716_v40  ;;  %20584 = vst [vmem:[#allocation76_spill] sm:$0xff] %v16719_v16  ;;  %v16737_v43 = vmul.f32 %v16733_v25, %v16364_v30  ;;  %v16744_v40 = vmul.f32 %v16740_v53, %v16364_v30  ;;  %v16760_v16 = vpop.f32.mrb[64].mxu1 }
 0x5a9   : > { %20585 = vst [vmem:[#allocation82_spill] sm:$0xff] %v16723_v3  ;;  %20586 = vst [vmem:[#allocation23_spill] sm:$0xff] %v16726_v26  ;;  %v16747_v3 = vld [vmem:[%s10023_s14 + $0x1a0] sm:$0xff]  ;;  %v16763_v26 = vld [vmem:[%s10023_s14 + $0x1a8] sm:$0xff] }
 0x5aa   : > { %20587 = vst [vmem:[#allocation16_spill] sm:$0xff] %v16730_v9  ;;  %20588 = vst [vmem:[#allocation158_spill] sm:$0xff] %v16733_v25  ;;  %v16751_v48 = vmul.f32 %v16747_v3, %v16451_v10  ;;  %v16754_v9 = vld [vmem:[%s10023_s14 + $0x3a0] sm:$0xff]  ;;  %v16767_v30 = vmul.f32 %v16763_v26, %v16478_v29 }
 0x5ab   : > { %20589 = vst [vmem:[#allocation145_spill] sm:$0xff] %v16737_v43  ;;  %20590 = vst [vmem:[#allocation81_spill] sm:$0xff] %v16740_v53  ;;  %v16758_v25 = vmul.f32 %v16754_v9, %v16451_v10  ;;  %v6437_v43 = vpop.f32.mrb[96].mxu0  ;;  %v16782_v53 = vld [vmem:[%s10023_s14 + $0x1c0] sm:$0xff] }
 0x5ac   : > { %20591 = vst [vmem:[#allocation14_spill] sm:$0xff] %v16744_v40  ;;  %20592 = vst [vmem:[#allocation149_spill] sm:$0xff] %v16747_v3  ;;  %v16770_v40 = vld [vmem:[%s10023_s14 + $0x3a8] sm:$0xff]  ;;  %v6757_v10 = vsub.f32 %v6437_v43, %v16052_v37  ;;  %v6695_v3 = vadd.f32 %v16760_v16, %v16130_v55 }
 0x5ad   : > { %20593 = vst [vmem:[#allocation147_spill] sm:$0xff] %v16751_v48  ;;  %20594 = vst [vmem:[#allocation103_spill] sm:$0xff] %v16754_v9  ;;  %v16774_v48 = vmul.f32 %v16770_v40, %v16478_v29  ;;  %v16779_v9 = vpop.f32.mrb[65].mxu1 }
 0x5ae   : > { %20595 = vst [vmem:[#allocation80_spill] sm:$0xff] %v16758_v25  ;;  %20596 = vst [vmem:[#allocation17_spill] sm:$0xff] %v16763_v26  ;;  %v6439_v25 = vpop.f32.mrb[97].mxu0  ;;  %v16789_v26 = vld [vmem:[%s10023_s14 + $0x3c0] sm:$0xff]  ;;  %v6696_v43 = vadd.f32 %v16779_v9, %v16132_v28 }
 0x5af   : > { %20597 = vst [vmem:[#allocation161_spill] sm:$0xff] %v16767_v30  ;;  %20598 = vst [vmem:[#allocation162_spill] sm:$0xff] %v16770_v40  ;;  %v16786_v30 = vmul.f32 %v16782_v53, %v16565_v42  ;;  %v16793_v37 = vmul.f32 %v16789_v26, %v16565_v42  ;;  %v6758_v29 = vsub.f32 %v6439_v25, %v16054_v56  ;;  %v16820_v25 = vld [vmem:[%s10023_s14 + $0x3e0] sm:$0xff] }
 0x5b0   : > { %20599 = vst [vmem:[#allocation163_spill] sm:$0xff] %v16774_v48  ;;  %20600 = vst [vmem:[#allocation164_spill] sm:$0xff] %v16782_v53  ;;  %v16799_v48 = vld [vmem:[%s10023_s14 + $0x1c8] sm:$0xff]  ;;  %v16816_v42 = vmul.f32 %v16813_v54, %v6753_v57  ;;  %v6821_v56 = vadd.f32 %v6757_v10, %v16134_v62  ;;  %v16838_v62 = vpop.f32.mrb[66].mxu1 }
 0x5b1   : > { %20601 = vst [vmem:[#allocation165_spill] sm:$0xff] %v16786_v30  ;;  %20602 = vst [vmem:[#allocation166_spill] sm:$0xff] %v16789_v26  ;;  %v16803_v40 = vmul.f32 %v16799_v48, %v16592_v22  ;;  %v16806_v53 = vld [vmem:[%s10023_s14 + $0x3c8] sm:$0xff] }
 0x5b2   : > { %20603 = vst [vmem:[#allocation167_spill] sm:$0xff] %v16793_v37  ;;  %20604 = vst [vmem:[#allocation168_spill] sm:$0xff] %v16799_v48  ;;  %v16810_v30 = vmul.f32 %v16806_v53, %v16592_v22  ;;  %v16823_v37 = vmul.f32 %v16820_v25, %v6753_v57  ;;  %v16826_v48 = vld [vmem:[%s10023_s14 + $0x1e8] sm:$0xff]  ;;  %v6949_v10 = vmul.f32 %v16342_v58, %v6821_v56 }
 0x5b3   : > { %20605 = vst [vmem:[#allocation169_spill] sm:$0xff] %v16803_v40  ;;  %20606 = vst [vmem:[#allocation170_spill] sm:$0xff] %v16806_v53  ;;  %v16829_v40 = vmul.f32 %v16826_v48, %v6754_v17  ;;  %v16832_v26 = vld [vmem:[%s10023_s14 + $0x3e8] sm:$0xff]  ;;  %v7125_v57 = vmul.f32 %v16329_v50, %v6821_v56  ;;  %v16856_v56 = vld [vmem:[%s10023_s14 + $0x10] sm:$0xff] }
 0x5b4   : > { %20607 = vst [vmem:[#allocation171_spill] sm:$0xff] %v16810_v30  ;;  %20608 = vst [vmem:[#allocation172_spill] sm:$0xff] %v16813_v54  ;;  %v16835_v22 = vmul.f32 %v16832_v26, %v6754_v17  ;;  %v6822_v54 = vadd.f32 %v6758_v29, %v16140_v0  ;;  %v7013_v50 = vadd.f32 %v6949_v10, %v16333_v2  ;;  %v16875_v10 = vld [vmem:[%s10023_s14 + $0x18] sm:$0xff]  ;;  %v20620_v53 = vld [vmem:[#allocation92_spill] sm:$0xff] }
 0x5b5   : > { %20609 = vst [vmem:[#allocation173_spill] sm:$0xff] %v16816_v42  ;;  %20610 = vst [vmem:[#allocation174_spill] sm:$0xff] %v16820_v25  ;;  %v6443_v42 = vpop.f32.mrb[98].mxu0  ;;  %v16845_v25 = vpop.f32.mrb[67].mxu1 }
 0x5b6   : > { %20611 = vst [vmem:[#allocation175_spill] sm:$0xff] %v16823_v37  ;;  %20612 = vst [vmem:[#allocation176_spill] sm:$0xff] %v16826_v48  ;;  %v6761_v37 = vsub.f32 %v6443_v42, %v16058_v60  ;;  %v6445_v48 = vpop.f32.mrb[99].mxu0  ;;  %v6950_v17 = vmul.f32 %v16356_v8, %v6822_v54  ;;  %v7126_v0 = vmul.f32 %v16349_v44, %v6822_v54 }
 0x5b7   : > { %20613 = vst [vmem:[#allocation177_spill] sm:$0xff] %v16829_v40  ;;  %20614 = vst [vmem:[#allocation178_spill] sm:$0xff] %v16832_v26  ;;  %v6699_v40 = vadd.f32 %v16838_v62, %v16146_v11  ;;  %v6762_v29 = vsub.f32 %v6445_v48, %v16060_v4  ;;  %v6700_v58 = vadd.f32 %v16845_v25, %v16148_v14  ;;  %v16864_v4 = vld [vmem:[%s10023_s14 + $0x210] sm:$0xff]  ;;  %v6449_v48 = vpop.f32.mrb[100].mxu0  ;;  %v20618_v26 = vld [vmem:[#allocation148_spill] sm:$0xff] }
 0x5b8   : > { %20615 = vst [vmem:[#allocation179_spill] sm:$0xff] %v16835_v22  ;;  %v7253_v60 = vsub.f32 %v7125_v57, %v16346_v7  ;;  %v6825_v42 = vadd.f32 %v6761_v37, %v16150_v36  ;;  %v16859_v22 = vmul.f32 %v16856_v56, %v6695_v3  ;;  %v7014_v8 = vadd.f32 %v6950_v17, %v16353_v19  ;;  %v16870_v7 = vpop.f32.mrb[68].mxu1  ;;  %v6451_v57 = vpop.f32.mrb[101].mxu0 }
 0x5b9   : > { %v7254_v44 = vsub.f32 %v7126_v0, %v16360_v6  ;;  %v16867_v54 = vmul.f32 %v16864_v4, %v6695_v3  ;;  %v6826_v2 = vadd.f32 %v6762_v29, %v16156_v51  ;;  %20616 = vst [vmem:[#allocation180_spill] sm:$0xff] %v16870_v7  ;;  %v16878_v19 = vmul.f32 %v16875_v10, %v6696_v43  ;;  %v16881_v3 = vpop.f32.mrb[69].mxu1 }
 0x5ba   : > { %v6953_v36 = vmul.f32 %v16376_v1, %v6825_v42  ;;  %v7129_v37 = vmul.f32 %v16369_v41, %v6825_v42  ;;  %v6765_v6 = vsub.f32 %v6449_v48, %v16064_v63  ;;  %20617 = vst [vmem:[#allocation181_spill] sm:$0xff] %v16881_v3  ;;  %v16883_v17 = vadd.f32 %v7014_v8, %v7013_v50  ;;  %v20619_v63 = vld [vmem:[#allocation68_spill] sm:$0xff]  ;;  %v6455_v8 = vpop.f32.mrb[102].mxu0 }
 0x5bb   : > { %v16885_v51 = vadd.f32 %v7254_v44, %v7253_v60  ;;  %v6954_v0 = vmul.f32 %v16390_v5, %v6826_v2  ;;  %v7130_v1 = vmul.f32 %v16383_v61, %v6826_v2  ;;  %v6766_v30 = vsub.f32 %v6451_v57, %v20618_v26  ;;  %v16896_v60 = vld [vmem:[%s10023_s14 + $0x218] sm:$0xff]  ;;  %v20623_v26 = vld [vmem:[#allocation60_spill] sm:$0xff]  ;;  %v20624_v2 = vld [vmem:[#allocation119_spill] sm:$0xff] }
 0x5bc   : > { %v7017_v41 = vadd.f32 %v6953_v36, %v16373_v15  ;;  %v7257_v29 = vsub.f32 %v7129_v37, %v16380_v12  ;;  %v6829_v42 = vadd.f32 %v6765_v6, %v16166_v27  ;;  %v16899_v5 = vmul.f32 %v16896_v60, %v6696_v43  ;;  %v20621_v61 = vld [vmem:[#allocation62_spill] sm:$0xff]  ;;  %v16903_v12 = vpop.f32.mrb[70].mxu1  ;;  %v6457_v6 = vpop.f32.mrb[103].mxu0 }
 0x5bd   : > { %v7018_v48 = vadd.f32 %v6954_v0, %v20619_v63  ;;  %v7258_v50 = vsub.f32 %v7130_v1, %v20620_v53  ;;  %v6703_v15 = vadd.f32 %v16870_v7, %v20621_v61  ;;  %20622 = vst [vmem:[#allocation148_spill] sm:$0xff] %v16903_v12  ;;  %v6830_v36 = vadd.f32 %v6766_v30, %v20624_v2  ;;  %v20625_v53 = vld [vmem:[#allocation35_spill] sm:$0xff]  ;;  %v16910_v43 = vpop.f32.mrb[71].mxu1  ;;  %v16917_v1 = vld [vmem:[%s10023_s14 + $0x30] sm:$0xff] }
 0x5be   : > { %v6957_v27 = vmul.f32 %v16406_v13, %v6829_v42  ;;  %v7133_v44 = vmul.f32 %v20623_v26, %v6829_v42  ;;  %v6704_v37 = vadd.f32 %v16881_v3, %v20625_v53  ;;  %20626 = vst [vmem:[#allocation68_spill] sm:$0xff] %v16910_v43  ;;  %v16920_v13 = vmul.f32 %v16917_v1, %v6699_v40  ;;  %v16923_v63 = vld [vmem:[%s10023_s14 + $0x230] sm:$0xff]  ;;  %v20632_v2 = vld [vmem:[#allocation15_spill] sm:$0xff]  ;;  %v16939_v53 = vld [vmem:[%s10023_s14 + $0x238] sm:$0xff] }
 0x5bf   : > { %v16912_v57 = vadd.f32 %v7018_v48, %v7017_v41  ;;  %v16914_v0 = vadd.f32 %v7258_v50, %v7257_v29  ;;  %v16926_v30 = vmul.f32 %v16923_v63, %v6699_v40  ;;  %v20631_v42 = vld [vmem:[#allocation93_spill] sm:$0xff]  ;;  %v6958_v7 = vmul.f32 %v16420_v35, %v6830_v36  ;;  %v16933_v48 = vld [vmem:[%s10023_s14 + $0x38] sm:$0xff]  ;;  %v16947_v35 = vpop.f32.mrb[72].mxu1 }
 0x5c0   : > { %20629 = vst [vmem:[#allocation119_spill] sm:$0xff] %v16920_v13  ;;  %v7021_v26 = vadd.f32 %v6957_v27, %v20631_v42  ;;  %v7261_v3 = vsub.f32 %v7133_v44, %v20632_v2  ;;  %v20633_v41 = vld [vmem:[#allocation109_spill] sm:$0xff]  ;;  %20634 = vst [vmem:[#allocation93_spill] sm:$0xff] %v16933_v48  ;;  %v16936_v50 = vmul.f32 %v16933_v48, %v6700_v58  ;;  %v20639_v42 = vld [vmem:[#allocation118_spill] sm:$0xff] }
 0x5c1   : > { %20627 = vst [vmem:[#allocation92_spill] sm:$0xff] %v16912_v57  ;;  %20628 = vst [vmem:[#allocation60_spill] sm:$0xff] %v16914_v0  ;;  %v7134_v29 = vmul.f32 %v20633_v41, %v6830_v36  ;;  %v16942_v40 = vmul.f32 %v16939_v53, %v6700_v58  ;;  %v20638_v0 = vld [vmem:[#allocation157_spill] sm:$0xff]  ;;  %v6707_v44 = vadd.f32 %v16903_v12, %v20639_v42  ;;  %v6461_v36 = vpop.f32.mrb[104].mxu0  ;;  %v20641_v2 = vld [vmem:[#allocation138_spill] sm:$0xff] }
 0x5c2   : > { %20630 = vst [vmem:[#allocation182_spill] sm:$0xff] %v16926_v30  ;;  %20635 = vst [vmem:[#allocation15_spill] sm:$0xff] %v16936_v50  ;;  %v6769_v27 = vsub.f32 %v6455_v8, %v20638_v0  ;;  %v7022_v41 = vadd.f32 %v6958_v7, %v20641_v2  ;;  %v20642_v57 = vld [vmem:[#allocation128_spill] sm:$0xff]  ;;  %v20643_v30 = vld [vmem:[#allocation26_spill] sm:$0xff]  ;;  %v6463_v8 = vpop.f32.mrb[105].mxu0 }
 0x5c3   : > { %20636 = vst [vmem:[#allocation109_spill] sm:$0xff] %v16939_v53  ;;  %20637 = vst [vmem:[#allocation183_spill] sm:$0xff] %v16942_v40  ;;  %v7262_v61 = vsub.f32 %v7134_v29, %v20642_v57  ;;  %v6770_v50 = vsub.f32 %v6457_v6, %v20643_v30  ;;  %v20644_v13 = vld [vmem:[#allocation127_spill] sm:$0xff]  ;;  %v16954_v40 = vpop.f32.mrb[73].mxu1  ;;  %v16957_v0 = vld [vmem:[%s10023_s14 + $0x50] sm:$0xff] }
 0x5c4   : > { %20640 = vst [vmem:[#allocation157_spill] sm:$0xff] %v16947_v35  ;;  %v6708_v58 = vadd.f32 %v16910_v43, %v20644_v13  ;;  %20645 = vst [vmem:[#allocation138_spill] sm:$0xff] %v16954_v40  ;;  %v16960_v12 = vmul.f32 %v16957_v0, %v6703_v15  ;;  %v16963_v42 = vld [vmem:[%s10023_s14 + $0x250] sm:$0xff]  ;;  %v20650_v30 = vld [vmem:[#allocation135_spill] sm:$0xff]  ;;  %v16971_v2 = vadd.f32 %v7022_v41, %v7021_v26  ;;  %v16998_v41 = vpop.f32.mrb[106].mxu0 }
 0x5c5   : > { %20646 = vst [vmem:[#allocation128_spill] sm:$0xff] %v16957_v0  ;;  %v16966_v7 = vmul.f32 %v16963_v42, %v6703_v15  ;;  %v20649_v57 = vld [vmem:[#allocation133_spill] sm:$0xff]  ;;  %v6711_v29 = vadd.f32 %v16947_v35, %v20650_v30  ;;  %v16973_v43 = vadd.f32 %v7262_v61, %v7261_v3  ;;  %v16976_v13 = vld [vmem:[%s10023_s14 + $0x58] sm:$0xff]  ;;  %v16996_v61 = vpop.f32.mrb[74].mxu1 }
 0x5c6   : > { %20647 = vst [vmem:[#allocation26_spill] sm:$0xff] %v16960_v12  ;;  %v6833_v6 = vadd.f32 %v6769_v27, %v20649_v57  ;;  %20651 = vst [vmem:[#allocation133_spill] sm:$0xff] %v16971_v2  ;;  %v16979_v0 = vmul.f32 %v16976_v13, %v6704_v37  ;;  %v20655_v12 = vld [vmem:[#allocation115_spill] sm:$0xff]  ;;  %v16983_v53 = vld [vmem:[%s10023_s14 + $0x258] sm:$0xff] }
 0x5c7   : > { %20648 = vst [vmem:[#allocation184_spill] sm:$0xff] %v16966_v7  ;;  %20652 = vst [vmem:[#allocation185_spill] sm:$0xff] %v16973_v43  ;;  %v6834_v48 = vadd.f32 %v6770_v50, %v20655_v12  ;;  %v16986_v15 = vmul.f32 %v16983_v53, %v6704_v37  ;;  %v20658_v57 = vld [vmem:[#allocation42_spill] sm:$0xff]  ;;  %v16991_v26 = vld [vmem:[%s10023_s14 + $0x70] sm:$0xff] }
 0x5c8   : > { %20653 = vst [vmem:[#allocation186_spill] sm:$0xff] %v16976_v13  ;;  %20654 = vst [vmem:[#allocation187_spill] sm:$0xff] %v16979_v0  ;;  %v6961_v27 = vmul.f32 %v16436_v18, %v6833_v6  ;;  %v7137_v35 = vmul.f32 %v20658_v57, %v6833_v6  ;;  %v16994_v3 = vmul.f32 %v16991_v26, %v6707_v44  ;;  %v17001_v12 = vld [vmem:[%s10023_s14 + $0x270] sm:$0xff]  ;;  %v20664_v50 = vld [vmem:[#allocation132_spill] sm:$0xff] }
 0x5c9   : > { %20656 = vst [vmem:[#allocation115_spill] sm:$0xff] %v16983_v53  ;;  %20657 = vst [vmem:[#allocation188_spill] sm:$0xff] %v16986_v15  ;;  %v17004_v37 = vmul.f32 %v17001_v12, %v6707_v44  ;;  %v6962_v18 = vmul.f32 %v16456_v33, %v6834_v48  ;;  %v7138_v6 = vmul.f32 %v20664_v50, %v6834_v48  ;;  %v20665_v57 = vld [vmem:[#allocation107_spill] sm:$0xff]  ;;  %v20668_v15 = vld [vmem:[#allocation124_spill] sm:$0xff] }
 0x5ca   : > { %20659 = vst [vmem:[#allocation42_spill] sm:$0xff] %v16991_v26  ;;  %20660 = vst [vmem:[#allocation189_spill] sm:$0xff] %v16994_v3  ;;  %v6712_v30 = vadd.f32 %v16954_v40, %v20665_v57  ;;  %v17010_v3 = vpop.f32.mrb[75].mxu1  ;;  %v17012_v26 = vpop.f32.mrb[107].mxu0  ;;  %v20667_v43 = vld [vmem:[#allocation143_spill] sm:$0xff]  ;;  %v7265_v0 = vsub.f32 %v7137_v35, %v20668_v15  ;;  %v20669_v7 = vld [vmem:[#allocation105_spill] sm:$0xff] }
 0x5cb   : > { %20661 = vst [vmem:[#allocation190_spill] sm:$0xff] %v16996_v61  ;;  %20662 = vst [vmem:[#allocation191_spill] sm:$0xff] %v17001_v12  ;;  %v7025_v2 = vadd.f32 %v6961_v27, %v20667_v43  ;;  %v6773_v44 = vsub.f32 %v6461_v36, %v20669_v7  ;;  %v20671_v33 = vld [vmem:[#allocation22_spill] sm:$0xff]  ;;  %v20672_v48 = vld [vmem:[#allocation41_spill] sm:$0xff] }
 0x5cc   : > { %20663 = vst [vmem:[#allocation192_spill] sm:$0xff] %v17004_v37  ;;  %20666 = vst [vmem:[#allocation132_spill] sm:$0xff] %v17010_v3  ;;  %v20670_v37 = vld [vmem:[#allocation37_spill] sm:$0xff]  ;;  %v7026_v13 = vadd.f32 %v6962_v18, %v20671_v33  ;;  %v7266_v50 = vsub.f32 %v7138_v6, %v20672_v48  ;;  %v17022_v53 = vld [vmem:[%s10023_s14 + $0x78] sm:$0xff]  ;;  %v17047_v48 = vpop.f32.mrb[76].mxu1 }
 0x5cd   : > { %v6715_v12 = vadd.f32 %v16996_v61, %v20670_v37  ;;  %v17025_v40 = vmul.f32 %v17022_v53, %v6708_v58  ;;  %v17028_v57 = vld [vmem:[%s10023_s14 + $0x278] sm:$0xff]  ;;  %v17034_v35 = vld [vmem:[%s10023_s14 + $0x90] sm:$0xff] }
 0x5ce   : > { %v17031_v43 = vmul.f32 %v17028_v57, %v6708_v58  ;;  %20675 = vst [vmem:[#allocation105_spill] sm:$0xff] %v17034_v35  ;;  %v17037_v36 = vmul.f32 %v17034_v35, %v6711_v29  ;;  %v17040_v7 = vld [vmem:[%s10023_s14 + $0x290] sm:$0xff]  ;;  %v6473_v58 = vpop.f32.mrb[108].mxu0  ;;  %v17049_v61 = vadd.f32 %v7026_v13, %v7025_v2  ;;  %v17051_v37 = vadd.f32 %v7266_v50, %v7265_v0  ;;  %v20688_v2 = vld [vmem:[#allocation40_spill] sm:$0xff]  ;;  %v17067_v50 = vld [vmem:[%s10023_s14 + $0x98] sm:$0xff] }
 0x5cf   : > { %20673 = vst [vmem:[#allocation143_spill] sm:$0xff] %v17025_v40  ;;  %20677 = vst [vmem:[#allocation41_spill] sm:$0xff] %v17040_v7  ;;  %v17043_v15 = vmul.f32 %v17040_v7, %v6711_v29  ;;  %v20679_v27 = vld [vmem:[#allocation141_spill] sm:$0xff]  ;;  %v20687_v7 = vld [vmem:[#allocation126_spill] sm:$0xff] }
 0x5d0   : > { %20674 = vst [vmem:[#allocation124_spill] sm:$0xff] %v17031_v43  ;;  %20676 = vst [vmem:[#allocation22_spill] sm:$0xff] %v17037_v36  ;;  %v6837_v18 = vadd.f32 %v6773_v44, %v20679_v27  ;;  %v20680_v6 = vld [vmem:[#allocation153_spill] sm:$0xff]  ;;  %v20684_v43 = vld [vmem:[#allocation28_spill] sm:$0xff]  ;;  %v17059_v44 = vpop.f32.mrb[109].mxu0 }
 0x5d1   : > { %20678 = vst [vmem:[#allocation193_spill] sm:$0xff] %v17043_v15  ;;  %v6774_v33 = vsub.f32 %v6463_v8, %v20680_v6  ;;  %20681 = vst [vmem:[#allocation141_spill] sm:$0xff] %v17047_v48  ;;  %v20683_v36 = vld [vmem:[#allocation9_spill] sm:$0xff]  ;;  %v6719_v29 = vadd.f32 %v17047_v48, %v20684_v43  ;;  %v17057_v15 = vpop.f32.mrb[77].mxu1  ;;  %v20686_v27 = vld [vmem:[#allocation75_spill] sm:$0xff] }
 0x5d2   : > { %20682 = vst [vmem:[#allocation153_spill] sm:$0xff] %v17051_v37  ;;  %v6716_v35 = vadd.f32 %v17010_v3, %v20683_v36  ;;  %20685 = vst [vmem:[#allocation194_spill] sm:$0xff] %v17057_v15  ;;  %v6965_v8 = vmul.f32 %v16470_v21, %v6837_v18  ;;  %v7141_v6 = vmul.f32 %v20686_v27, %v6837_v18  ;;  %v17073_v48 = vld [vmem:[%s10023_s14 + $0x298] sm:$0xff]  ;;  %v17079_v21 = vld [vmem:[%s10023_s14 + $0xb0] sm:$0xff] }
 0x5d3   : > { %v6838_v13 = vadd.f32 %v6774_v33, %v20687_v7  ;;  %v6720_v0 = vadd.f32 %v17057_v15, %v20688_v2  ;;  %20689 = vst [vmem:[#allocation75_spill] sm:$0xff] %v17067_v50  ;;  %v17070_v3 = vmul.f32 %v17067_v50, %v6712_v30  ;;  %20691 = vst [vmem:[#allocation195_spill] sm:$0xff] %v17073_v48  ;;  %v17085_v7 = vld [vmem:[%s10023_s14 + $0x2b0] sm:$0xff]  ;;  %v20697_v27 = vld [vmem:[#allocation150_spill] sm:$0xff] }
 0x5d4   : > { %v17076_v43 = vmul.f32 %v17073_v48, %v6712_v30  ;;  %20693 = vst [vmem:[#allocation197_spill] sm:$0xff] %v17079_v21  ;;  %v17082_v18 = vmul.f32 %v17079_v21, %v6715_v12  ;;  %20695 = vst [vmem:[#allocation199_spill] sm:$0xff] %v17085_v7  ;;  %v17088_v33 = vmul.f32 %v17085_v7, %v6715_v12  ;;  %v20698_v2 = vld [vmem:[#allocation58_spill] sm:$0xff]  ;;  %v20699_v50 = vld [vmem:[#allocation56_spill] sm:$0xff]  ;;  %v17096_v48 = vpop.f32.mrb[110].mxu0 }
 0x5d5   : > { %20690 = vst [vmem:[#allocation126_spill] sm:$0xff] %v17070_v3  ;;  %v7029_v15 = vadd.f32 %v6965_v8, %v20697_v27  ;;  %v7269_v36 = vsub.f32 %v7141_v6, %v20698_v2  ;;  %v6966_v3 = vmul.f32 %v16490_v38, %v6838_v13  ;;  %v7142_v30 = vmul.f32 %v20699_v50, %v6838_v13  ;;  %v17105_v12 = vld [vmem:[%s10023_s14 + $0x2b8] sm:$0xff]  ;;  %v20705_v6 = vld [vmem:[#allocation123_spill] sm:$0xff]  ;;  %v20706_v2 = vld [vmem:[#allocation152_spill] sm:$0xff]  ;;  %v17116_v27 = vpop.f32.mrb[111].mxu0 }
 0x5d6   : > { %20692 = vst [vmem:[#allocation196_spill] sm:$0xff] %v17076_v43  ;;  %20694 = vst [vmem:[#allocation198_spill] sm:$0xff] %v17082_v18  ;;  %v17094_v43 = vpop.f32.mrb[78].mxu1  ;;  %v17099_v18 = vld [vmem:[%s10023_s14 + $0xb8] sm:$0xff]  ;;  %v17108_v8 = vmul.f32 %v17105_v12, %v6716_v35  ;;  %v6777_v38 = vsub.f32 %v16998_v41, %v20705_v6  ;;  %v20710_v40 = vld [vmem:[#allocation83_spill] sm:$0xff] }
 0x5d7   : > { %20696 = vst [vmem:[#allocation200_spill] sm:$0xff] %v17088_v33  ;;  %20700 = vst [vmem:[#allocation150_spill] sm:$0xff] %v17094_v43  ;;  %v17102_v21 = vmul.f32 %v17099_v18, %v6716_v35  ;;  %v6723_v13 = vadd.f32 %v17094_v43, %v20706_v2  ;;  %v17114_v50 = vpop.f32.mrb[79].mxu1  ;;  %v20708_v33 = vld [vmem:[#allocation30_spill] sm:$0xff]  ;;  %v6778_v35 = vsub.f32 %v17012_v26, %v20710_v40  ;;  %v17125_v41 = vld [vmem:[%s10023_s14 + $0xd0] sm:$0xff] }
 0x5d8   : > { %20701 = vst [vmem:[#allocation58_spill] sm:$0xff] %v17099_v18  ;;  %20703 = vst [vmem:[#allocation201_spill] sm:$0xff] %v17105_v12  ;;  %v7030_v7 = vadd.f32 %v6966_v3, %v20708_v33  ;;  %v20709_v18 = vld [vmem:[#allocation38_spill] sm:$0xff]  ;;  %v17128_v6 = vmul.f32 %v17125_v41, %v6719_v29  ;;  %v17131_v43 = vld [vmem:[%s10023_s14 + $0x2d0] sm:$0xff] }
 0x5d9   : > { %20702 = vst [vmem:[#allocation56_spill] sm:$0xff] %v17102_v21  ;;  %20704 = vst [vmem:[#allocation202_spill] sm:$0xff] %v17108_v8  ;;  %v7270_v21 = vsub.f32 %v7142_v30, %v20709_v18  ;;  %v20711_v8 = vld [vmem:[#allocation125_spill] sm:$0xff]  ;;  %v17134_v2 = vmul.f32 %v17131_v43, %v6719_v29  ;;  %v20717_v18 = vld [vmem:[#allocation156_spill] sm:$0xff]  ;;  %v17151_v29 = vpop.f32.mrb[112].mxu0 }
 0x5da   : > { %20707 = vst [vmem:[#allocation123_spill] sm:$0xff] %v17114_v50  ;;  %v6724_v12 = vadd.f32 %v17114_v50, %v20711_v8  ;;  %20712 = vst [vmem:[#allocation30_spill] sm:$0xff] %v17125_v41  ;;  %v20716_v3 = vld [vmem:[#allocation137_spill] sm:$0xff]  ;;  %v6781_v30 = vsub.f32 %v6473_v58, %v20717_v18  ;;  %v17138_v37 = vadd.f32 %v7030_v7, %v7029_v15  ;;  %v17143_v26 = vld [vmem:[%s10023_s14 + $0xd8] sm:$0xff]  ;;  %v17149_v8 = vpop.f32.mrb[80].mxu1 }
 0x5db   : > { %20713 = vst [vmem:[#allocation38_spill] sm:$0xff] %v17128_v6  ;;  %20714 = vst [vmem:[#allocation83_spill] sm:$0xff] %v17131_v43  ;;  %v6841_v33 = vadd.f32 %v6777_v38, %v20716_v3  ;;  %v17140_v40 = vadd.f32 %v7270_v21, %v7269_v36  ;;  %v17146_v50 = vmul.f32 %v17143_v26, %v6720_v0  ;;  %v20722_v41 = vld [vmem:[#allocation146_spill] sm:$0xff]  ;;  %v20726_v58 = vld [vmem:[#allocation7_spill] sm:$0xff] }
 0x5dc   : > { %20715 = vst [vmem:[#allocation203_spill] sm:$0xff] %v17134_v2  ;;  %20718 = vst [vmem:[#allocation137_spill] sm:$0xff] %v17138_v37  ;;  %v6842_v6 = vadd.f32 %v6778_v35, %v20722_v41  ;;  %v17154_v38 = vld [vmem:[%s10023_s14 + $0x2d8] sm:$0xff]  ;;  %v17163_v35 = vpop.f32.mrb[81].mxu1  ;;  %v17165_v41 = vpop.f32.mrb[113].mxu0  ;;  %v20739_v37 = vld [vmem:[#allocation51_spill] sm:$0xff] }
 0x5dd   : > { %20719 = vst [vmem:[#allocation156_spill] sm:$0xff] %v17140_v40  ;;  %20720 = vst [vmem:[#allocation204_spill] sm:$0xff] %v17143_v26  ;;  %v17157_v15 = vmul.f32 %v17154_v38, %v6720_v0  ;;  %v6969_v36 = vmul.f32 %v16504_v49, %v6841_v33  ;;  %v7145_v21 = vmul.f32 %v20726_v58, %v6841_v33  ;;  %v20727_v7 = vld [vmem:[#allocation154_spill] sm:$0xff]  ;;  %v20730_v26 = vld [vmem:[#allocation85_spill] sm:$0xff] }
 0x5de   : > { %20721 = vst [vmem:[#allocation205_spill] sm:$0xff] %v17146_v50  ;;  %20723 = vst [vmem:[#allocation146_spill] sm:$0xff] %v17149_v8  ;;  %v6727_v3 = vadd.f32 %v17149_v8, %v20727_v7  ;;  %v6970_v18 = vmul.f32 %v16520_v24, %v6842_v6  ;;  %v20729_v50 = vld [vmem:[#allocation87_spill] sm:$0xff]  ;;  %v6728_v0 = vadd.f32 %v17163_v35, %v20730_v26  ;;  %v20733_v58 = vld [vmem:[#allocation57_spill] sm:$0xff] }
 0x5df   : > { %20724 = vst [vmem:[#allocation206_spill] sm:$0xff] %v17154_v38  ;;  %20725 = vst [vmem:[#allocation207_spill] sm:$0xff] %v17157_v15  ;;  %v7146_v2 = vmul.f32 %v20729_v50, %v6842_v6  ;;  %v20731_v15 = vld [vmem:[#allocation47_spill] sm:$0xff]  ;;  %v20732_v38 = vld [vmem:[#allocation74_spill] sm:$0xff]  ;;  %v7273_v43 = vsub.f32 %v7145_v21, %v20733_v58 }
 0x5e0   : > { %20728 = vst [vmem:[#allocation7_spill] sm:$0xff] %v17163_v35  ;;  %v6845_v49 = vadd.f32 %v6781_v30, %v20731_v15  ;;  %v7033_v33 = vadd.f32 %v6969_v36, %v20732_v38  ;;  %v17175_v40 = vld [vmem:[%s10023_s14 + $0xf0] sm:$0xff]  ;;  %v20738_v50 = vld [vmem:[#allocation79_spill] sm:$0xff]  ;;  %v17189_v26 = vld [vmem:[%s10023_s14 + $0xf8] sm:$0xff]  ;;  %v17200_v36 = vpop.f32.mrb[82].mxu1 }
 0x5e1   : > { %20734 = vst [vmem:[#allocation87_spill] sm:$0xff] %v17175_v40  ;;  %v17178_v8 = vmul.f32 %v17175_v40, %v6723_v13  ;;  %v17181_v7 = vld [vmem:[%s10023_s14 + $0x2f0] sm:$0xff]  ;;  %v7034_v6 = vadd.f32 %v6970_v18, %v20738_v50  ;;  %v7274_v35 = vsub.f32 %v7146_v2, %v20739_v37  ;;  %20740 = vst [vmem:[#allocation79_spill] sm:$0xff] %v17189_v26  ;;  %v17195_v38 = vld [vmem:[%s10023_s14 + $0x2f8] sm:$0xff] }
 0x5e2   : > { %20736 = vst [vmem:[#allocation74_spill] sm:$0xff] %v17181_v7  ;;  %v17184_v24 = vmul.f32 %v17181_v7, %v6723_v13  ;;  %v17192_v30 = vmul.f32 %v17189_v26, %v6724_v12  ;;  %20742 = vst [vmem:[#allocation208_spill] sm:$0xff] %v17195_v38  ;;  %v17198_v15 = vmul.f32 %v17195_v38, %v6724_v12  ;;  %v17202_v13 = vpop.f32.mrb[114].mxu0  ;;  %v20745_v18 = vld [vmem:[#allocation69_spill] sm:$0xff]  ;;  %v20747_v50 = vld [vmem:[#allocation122_spill] sm:$0xff] }
 0x5e3   : > { %20735 = vst [vmem:[#allocation47_spill] sm:$0xff] %v17178_v8  ;;  %20744 = vst [vmem:[#allocation210_spill] sm:$0xff] %v17200_v36  ;;  %v6973_v21 = vmul.f32 %v16534_v20, %v6845_v49  ;;  %v7149_v37 = vmul.f32 %v20745_v18, %v6845_v49  ;;  %v20746_v2 = vld [vmem:[#allocation29_spill] sm:$0xff]  ;;  %v17212_v12 = vpop.f32.mrb[115].mxu0  ;;  %v17216_v8 = vadd.f32 %v7274_v35, %v7273_v43  ;;  %v20750_v26 = vld [vmem:[#allocation48_spill] sm:$0xff] }
 0x5e4   : > { %20737 = vst [vmem:[#allocation57_spill] sm:$0xff] %v17184_v24  ;;  %20741 = vst [vmem:[#allocation51_spill] sm:$0xff] %v17192_v30  ;;  %v6731_v58 = vadd.f32 %v17200_v36, %v20746_v2  ;;  %v6782_v30 = vsub.f32 %v17059_v44, %v20747_v50  ;;  %v17210_v24 = vpop.f32.mrb[83].mxu1  ;;  %v20751_v38 = vld [vmem:[#allocation120_spill] sm:$0xff]  ;;  %v17223_v18 = vld [vmem:[%s10023_s14 + $0x110] sm:$0xff] }
 0x5e5   : > { %20743 = vst [vmem:[#allocation209_spill] sm:$0xff] %v17198_v15  ;;  %20748 = vst [vmem:[#allocation69_spill] sm:$0xff] %v17210_v24  ;;  %v17214_v15 = vadd.f32 %v7034_v6, %v7033_v33  ;;  %v6732_v20 = vadd.f32 %v17210_v24, %v20750_v26  ;;  %v6785_v49 = vsub.f32 %v17096_v48, %v20751_v38  ;;  %v17229_v44 = vld [vmem:[%s10023_s14 + $0x310] sm:$0xff]  ;;  %v20757_v43 = vld [vmem:[#allocation99_spill] sm:$0xff] }
 0x5e6   : > { %20749 = vst [vmem:[#allocation122_spill] sm:$0xff] %v17216_v8  ;;  %20752 = vst [vmem:[#allocation120_spill] sm:$0xff] %v17223_v18  ;;  %v17226_v36 = vmul.f32 %v17223_v18, %v6727_v3  ;;  %v17232_v50 = vmul.f32 %v17229_v44, %v6727_v3  ;;  %v20756_v33 = vld [vmem:[#allocation129_spill] sm:$0xff]  ;;  %v7277_v35 = vsub.f32 %v7149_v37, %v20757_v43  ;;  %v17237_v2 = vld [vmem:[%s10023_s14 + $0x118] sm:$0xff]  ;;  %v17249_v3 = vpop.f32.mrb[84].mxu1 }
 0x5e7   : > { %20754 = vst [vmem:[#allocation212_spill] sm:$0xff] %v17229_v44  ;;  %v7037_v6 = vadd.f32 %v6973_v21, %v20756_v33  ;;  %20758 = vst [vmem:[#allocation129_spill] sm:$0xff] %v17237_v2  ;;  %v17240_v24 = vmul.f32 %v17237_v2, %v6728_v0  ;;  %v17243_v48 = vld [vmem:[%s10023_s14 + $0x318] sm:$0xff]  ;;  %v20762_v26 = vld [vmem:[#allocation121_spill] sm:$0xff]  ;;  %v17252_v33 = vpop.f32.mrb[116].mxu0  ;;  %v17256_v2 = vpop.f32.mrb[85].mxu1 }
 0x5e8   : > { %20753 = vst [vmem:[#allocation211_spill] sm:$0xff] %v17226_v36  ;;  %20755 = vst [vmem:[#allocation213_spill] sm:$0xff] %v17232_v50  ;;  %v17246_v38 = vmul.f32 %v17243_v48, %v6728_v0  ;;  %v6846_v36 = vadd.f32 %v6782_v30, %v20762_v26  ;;  %v20764_v50 = vld [vmem:[#allocation46_spill] sm:$0xff]  ;;  %v20768_v44 = vld [vmem:[#allocation4_spill] sm:$0xff] }
 0x5e9   : > { %20759 = vst [vmem:[#allocation99_spill] sm:$0xff] %v17240_v24  ;;  %20760 = vst [vmem:[#allocation214_spill] sm:$0xff] %v17243_v48  ;;  %v6849_v21 = vadd.f32 %v6785_v49, %v20764_v50  ;;  %v20765_v37 = vld [vmem:[#allocation50_spill] sm:$0xff]  ;;  %v20767_v24 = vld [vmem:[#allocation27_spill] sm:$0xff]  ;;  %v6789_v0 = vsub.f32 %v17151_v29, %v20768_v44 }
 0x5ea   : > { %20761 = vst [vmem:[#allocation215_spill] sm:$0xff] %v17246_v38  ;;  %20763 = vst [vmem:[#allocation121_spill] sm:$0xff] %v17249_v3  ;;  %v6735_v43 = vadd.f32 %v17249_v3, %v20765_v37  ;;  %v6786_v18 = vsub.f32 %v17116_v27, %v20767_v24  ;;  %v20769_v26 = vld [vmem:[#allocation160_spill] sm:$0xff]  ;;  %v17264_v38 = vpop.f32.mrb[117].mxu0  ;;  %v6974_v49 = vmul.f32 %v16550_v39, %v6846_v36  ;;  %v20770_v50 = vld [vmem:[#allocation63_spill] sm:$0xff] }
 0x5eb   : > { %20766 = vst [vmem:[#allocation46_spill] sm:$0xff] %v17256_v2  ;;  %v6790_v30 = vsub.f32 %v17165_v41, %v20769_v26  ;;  %v7150_v48 = vmul.f32 %v20770_v50, %v6846_v36  ;;  %v20771_v3 = vld [vmem:[#allocation67_spill] sm:$0xff]  ;;  %v6977_v40 = vmul.f32 %v16570_v59, %v6849_v21  ;;  %v17272_v27 = vld [vmem:[%s10023_s14 + $0x130] sm:$0xff]  ;;  %v20776_v44 = vld [vmem:[#allocation116_spill] sm:$0xff] }
 0x5ec   : > { %v6736_v37 = vadd.f32 %v17256_v2, %v20771_v3  ;;  %20772 = vst [vmem:[#allocation27_spill] sm:$0xff] %v17272_v27  ;;  %v17275_v24 = vmul.f32 %v17272_v27, %v6731_v58  ;;  %v17278_v29 = vld [vmem:[%s10023_s14 + $0x330] sm:$0xff]  ;;  %v7153_v26 = vmul.f32 %v20776_v44, %v6849_v21  ;;  %v20777_v39 = vld [vmem:[#allocation104_spill] sm:$0xff]  ;;  %v20778_v36 = vld [vmem:[#allocation130_spill] sm:$0xff]  ;;  %v17301_v21 = vpop.f32.mrb[118].mxu0 }
 0x5ed   : > { %20774 = vst [vmem:[#allocation160_spill] sm:$0xff] %v17278_v29  ;;  %v17281_v41 = vmul.f32 %v17278_v29, %v6731_v58  ;;  %v6850_v7 = vadd.f32 %v6786_v18, %v20777_v39  ;;  %v7038_v50 = vadd.f32 %v6974_v49, %v20778_v36  ;;  %v20779_v8 = vld [vmem:[#allocation36_spill] sm:$0xff]  ;;  %v17288_v3 = vld [vmem:[%s10023_s14 + $0x138] sm:$0xff] }
 0x5ee   : > { %20773 = vst [vmem:[#allocation4_spill] sm:$0xff] %v17275_v24  ;;  %v7278_v2 = vsub.f32 %v7150_v48, %v20779_v8  ;;  %20780 = vst [vmem:[#allocation116_spill] sm:$0xff] %v17288_v3  ;;  %v17291_v59 = vmul.f32 %v17288_v3, %v6732_v20  ;;  %v17294_v24 = vld [vmem:[%s10023_s14 + $0x338] sm:$0xff]  ;;  %v20785_v18 = vld [vmem:[#allocation20_spill] sm:$0xff]  ;;  %v17310_v3 = vpop.f32.mrb[119].mxu0 }
 0x5ef   : > { %20775 = vst [vmem:[#allocation63_spill] sm:$0xff] %v17281_v41  ;;  %20782 = vst [vmem:[#allocation130_spill] sm:$0xff] %v17294_v24  ;;  %v17297_v58 = vmul.f32 %v17294_v24, %v6732_v20  ;;  %v17299_v41 = vpop.f32.mrb[86].mxu1  ;;  %v7041_v49 = vadd.f32 %v6977_v40, %v20785_v18  ;;  %v20786_v44 = vld [vmem:[#allocation18_spill] sm:$0xff]  ;;  %v20787_v48 = vld [vmem:[#allocation131_spill] sm:$0xff]  ;;  %v6978_v36 = vmul.f32 %v16584_v32, %v6850_v7 }
 0x5f0   : > { %20781 = vst [vmem:[#allocation104_spill] sm:$0xff] %v17291_v59  ;;  %20784 = vst [vmem:[#allocation216_spill] sm:$0xff] %v17299_v41  ;;  %v7281_v8 = vsub.f32 %v7153_v26, %v20786_v44  ;;  %v6739_v39 = vadd.f32 %v17299_v41, %v20787_v48  ;;  %v17308_v59 = vpop.f32.mrb[87].mxu1  ;;  %v17312_v20 = vadd.f32 %v7038_v50, %v7037_v6  ;;  %v20789_v24 = vld [vmem:[#allocation89_spill] sm:$0xff]  ;;  %v20790_v40 = vld [vmem:[#allocation39_spill] sm:$0xff] }
 0x5f1   : > { %20783 = vst [vmem:[#allocation36_spill] sm:$0xff] %v17297_v58  ;;  %20788 = vst [vmem:[#allocation20_spill] sm:$0xff] %v17308_v59  ;;  %v17314_v58 = vadd.f32 %v7278_v2, %v7277_v35  ;;  %v7154_v27 = vmul.f32 %v20789_v24, %v6850_v7  ;;  %v6740_v18 = vadd.f32 %v17308_v59, %v20790_v40  ;;  %v17320_v26 = vld [vmem:[%s10023_s14 + $0x150] sm:$0xff]  ;;  %v20795_v29 = vld [vmem:[#allocation52_spill] sm:$0xff] }
 0x5f2   : > { %20791 = vst [vmem:[#allocation18_spill] sm:$0xff] %v17320_v26  ;;  %v17323_v44 = vmul.f32 %v17320_v26, %v6735_v43  ;;  %v17326_v41 = vld [vmem:[%s10023_s14 + $0x350] sm:$0xff]  ;;  %v7042_v6 = vadd.f32 %v6978_v36, %v20795_v29  ;;  %v17334_v35 = vld [vmem:[%s10023_s14 + $0x158] sm:$0xff]  ;;  %v17349_v36 = vpop.f32.mrb[120].mxu0 }
 0x5f3   : > { %20793 = vst [vmem:[#allocation217_spill] sm:$0xff] %v17326_v41  ;;  %v17329_v32 = vmul.f32 %v17326_v41, %v6735_v43  ;;  %v20796_v50 = vld [vmem:[#allocation5_spill] sm:$0xff]  ;;  %20797 = vst [vmem:[#allocation52_spill] sm:$0xff] %v17334_v35  ;;  %v17337_v7 = vmul.f32 %v17334_v35, %v6736_v37  ;;  %v17340_v24 = vld [vmem:[%s10023_s14 + $0x358] sm:$0xff]  ;;  %v17346_v43 = vpop.f32.mrb[88].mxu1 }
 0x5f4   : > { %20792 = vst [vmem:[#allocation89_spill] sm:$0xff] %v17323_v44  ;;  %v6853_v2 = vadd.f32 %v6789_v0, %v20796_v50  ;;  %20799 = vst [vmem:[#allocation219_spill] sm:$0xff] %v17340_v24  ;;  %v17343_v26 = vmul.f32 %v17340_v24, %v6736_v37  ;;  %v20801_v44 = vld [vmem:[#allocation24_spill] sm:$0xff]  ;;  %v17351_v0 = vadd.f32 %v7042_v6, %v7041_v49  ;;  %v20804_v50 = vld [vmem:[#allocation155_spill] sm:$0xff]  ;;  %v17355_v35 = vpop.f32.mrb[89].mxu1 }
 0x5f5   : > { %20794 = vst [vmem:[#allocation218_spill] sm:$0xff] %v17329_v32  ;;  %20798 = vst [vmem:[#allocation5_spill] sm:$0xff] %v17337_v7  ;;  %v7282_v59 = vsub.f32 %v7154_v27, %v20801_v44  ;;  %v20803_v32 = vld [vmem:[#allocation49_spill] sm:$0xff]  ;;  %v6743_v7 = vadd.f32 %v17346_v43, %v20804_v50  ;;  %v17359_v44 = vpop.f32.mrb[121].mxu0  ;;  %v20808_v6 = vld [vmem:[#allocation84_spill] sm:$0xff] }
 0x5f6   : > { %20800 = vst [vmem:[#allocation220_spill] sm:$0xff] %v17343_v26  ;;  %20802 = vst [vmem:[#allocation24_spill] sm:$0xff] %v17346_v43  ;;  %v6854_v29 = vadd.f32 %v6790_v30, %v20803_v32  ;;  %v6981_v37 = vmul.f32 %v16604_v47, %v6853_v2  ;;  %v20806_v26 = vld [vmem:[#allocation94_spill] sm:$0xff]  ;;  %v20807_v30 = vld [vmem:[#allocation100_spill] sm:$0xff] }
 0x5f7   : > { %20805 = vst [vmem:[#allocation49_spill] sm:$0xff] %v17355_v35  ;;  %v7157_v27 = vmul.f32 %v20806_v26, %v6853_v2  ;;  %v17361_v24 = vadd.f32 %v7282_v59, %v7281_v8  ;;  %v6744_v32 = vadd.f32 %v17355_v35, %v20807_v30  ;;  %v17368_v40 = vld [vmem:[%s10023_s14 + $0x170] sm:$0xff]  ;;  %v20813_v26 = vld [vmem:[#allocation6_spill] sm:$0xff]  ;;  %v17393_v35 = vpop.f32.mrb[90].mxu1 }
 0x5f8   : > { %v6982_v49 = vmul.f32 %v16618_v23, %v6854_v29  ;;  %v7158_v41 = vmul.f32 %v20808_v6, %v6854_v29  ;;  %20809 = vst [vmem:[#allocation94_spill] sm:$0xff] %v17368_v40  ;;  %v17371_v43 = vmul.f32 %v17368_v40, %v6739_v39  ;;  %v17374_v50 = vld [vmem:[%s10023_s14 + $0x370] sm:$0xff]  ;;  %v7045_v59 = vadd.f32 %v6981_v37, %v20813_v26  ;;  %v17382_v48 = vld [vmem:[%s10023_s14 + $0x178] sm:$0xff]  ;;  %v17397_v26 = vpop.f32.mrb[122].mxu0  ;;  %v20830_v40 = vld [vmem:[#allocation43_spill] sm:$0xff] }
 0x5f9   : > { %20811 = vst [vmem:[#allocation221_spill] sm:$0xff] %v17374_v50  ;;  %v17377_v47 = vmul.f32 %v17374_v50, %v6739_v39  ;;  %v20814_v8 = vld [vmem:[#allocation25_spill] sm:$0xff]  ;;  %20815 = vst [vmem:[#allocation6_spill] sm:$0xff] %v17382_v48  ;;  %v17385_v23 = vmul.f32 %v17382_v48, %v6740_v18  ;;  %v17388_v29 = vld [vmem:[%s10023_s14 + $0x378] sm:$0xff]  ;;  %v6798_v50 = vsub.f32 %v17264_v38, %v20830_v40 }
 0x5fa   : > { %20810 = vst [vmem:[#allocation84_spill] sm:$0xff] %v17371_v43  ;;  %v7285_v2 = vsub.f32 %v7157_v27, %v20814_v8  ;;  %20817 = vst [vmem:[#allocation223_spill] sm:$0xff] %v17388_v29  ;;  %v17391_v6 = vmul.f32 %v17388_v29, %v6740_v18  ;;  %v20820_v30 = vld [vmem:[#allocation21_spill] sm:$0xff]  ;;  %v20822_v27 = vld [vmem:[#allocation111_spill] sm:$0xff] }
 0x5fb   : > { %20812 = vst [vmem:[#allocation222_spill] sm:$0xff] %v17377_v47  ;;  %20816 = vst [vmem:[#allocation25_spill] sm:$0xff] %v17385_v23  ;;  %v7046_v39 = vadd.f32 %v6982_v49, %v20820_v30  ;;  %v20821_v47 = vld [vmem:[#allocation71_spill] sm:$0xff]  ;;  %v6747_v8 = vadd.f32 %v17393_v35, %v20822_v27  ;;  %v17401_v23 = vpop.f32.mrb[91].mxu1  ;;  %v20824_v48 = vld [vmem:[#allocation77_spill] sm:$0xff]  ;;  %v17409_v49 = vpop.f32.mrb[123].mxu0 }
 0x5fc   : > { %20818 = vst [vmem:[#allocation224_spill] sm:$0xff] %v17391_v6  ;;  %20819 = vst [vmem:[#allocation225_spill] sm:$0xff] %v17393_v35  ;;  %v7286_v37 = vsub.f32 %v7158_v41, %v20821_v47  ;;  %v6793_v43 = vsub.f32 %v17202_v13, %v20824_v48  ;;  %v20825_v18 = vld [vmem:[#allocation78_spill] sm:$0xff]  ;;  %v20826_v29 = vld [vmem:[#allocation140_spill] sm:$0xff] }
 0x5fd   : > { %20823 = vst [vmem:[#allocation21_spill] sm:$0xff] %v17401_v23  ;;  %v6794_v6 = vsub.f32 %v17212_v12, %v20825_v18  ;;  %v6797_v30 = vsub.f32 %v17252_v33, %v20826_v29  ;;  %v17411_v41 = vadd.f32 %v7046_v39, %v7045_v59  ;;  %v20829_v35 = vld [vmem:[#allocation33_spill] sm:$0xff]  ;;  %v17440_v38 = vld [vmem:[%s10023_s14 + $0x398] sm:$0xff] }
 0x5fe   : > { %v17413_v47 = vadd.f32 %v7286_v37, %v7285_v2  ;;  %v6748_v27 = vadd.f32 %v17401_v23, %v20829_v35  ;;  %v17420_v13 = vld [vmem:[%s10023_s14 + $0x190] sm:$0xff]  ;;  %v20836_v2 = vld [vmem:[#allocation8_spill] sm:$0xff]  ;;  %v17434_v37 = vld [vmem:[%s10023_s14 + $0x198] sm:$0xff]  ;;  %20839 = vst [vmem:[#allocation227_spill] sm:$0xff] %v17440_v38  ;;  %v17443_v40 = vmul.f32 %v17440_v38, %v6744_v32 }
 0x5ff   : > { %20827 = vst [vmem:[#allocation71_spill] sm:$0xff] %v17411_v41  ;;  %20831 = vst [vmem:[#allocation78_spill] sm:$0xff] %v17420_v13  ;;  %v17423_v48 = vmul.f32 %v17420_v13, %v6743_v7  ;;  %v17426_v12 = vld [vmem:[%s10023_s14 + $0x390] sm:$0xff]  ;;  %v6858_v39 = vadd.f32 %v6794_v6, %v20836_v2  ;;  %v17437_v18 = vmul.f32 %v17434_v37, %v6744_v32  ;;  %v20842_v23 = vld [vmem:[#allocation10_spill] sm:$0xff] }
 0x600   : > { %20828 = vst [vmem:[#allocation77_spill] sm:$0xff] %v17413_v47  ;;  %20833 = vst [vmem:[#allocation43_spill] sm:$0xff] %v17426_v12  ;;  %v17429_v33 = vmul.f32 %v17426_v12, %v6743_v7  ;;  %v20835_v59 = vld [vmem:[#allocation101_spill] sm:$0xff]  ;;  %v6861_v7 = vadd.f32 %v6797_v30, %v20842_v23  ;;  %v20844_v6 = vld [vmem:[#allocation32_spill] sm:$0xff] }
 0x601   : > { %20832 = vst [vmem:[#allocation140_spill] sm:$0xff] %v17423_v48  ;;  %v6857_v29 = vadd.f32 %v6793_v43, %v20835_v59  ;;  %20837 = vst [vmem:[#allocation101_spill] sm:$0xff] %v17434_v37  ;;  %v17445_v48 = vpop.f32.mrb[92].mxu1  ;;  %v17449_v59 = vpop.f32.mrb[124].mxu0  ;;  %v20846_v13 = vld [vmem:[#allocation12_spill] sm:$0xff]  ;;  %v20847_v23 = vld [vmem:[#allocation61_spill] sm:$0xff] }
 0x602   : > { %20834 = vst [vmem:[#allocation226_spill] sm:$0xff] %v17429_v33  ;;  %20838 = vst [vmem:[#allocation8_spill] sm:$0xff] %v17437_v18  ;;  %v20843_v33 = vld [vmem:[#allocation110_spill] sm:$0xff]  ;;  %v6751_v2 = vadd.f32 %v17445_v48, %v20844_v6  ;;  %v17453_v18 = vpop.f32.mrb[93].mxu1  ;;  %v17458_v38 = vpop.f32.mrb[125].mxu0  ;;  %v6989_v12 = vmul.f32 %v16664_v34, %v6861_v7  ;;  %v17466_v35 = vld [vmem:[%s10023_s14 + $0x1b0] sm:$0xff] }
 0x603   : > { %20840 = vst [vmem:[#allocation228_spill] sm:$0xff] %v17443_v40  ;;  %20841 = vst [vmem:[#allocation229_spill] sm:$0xff] %v17445_v48  ;;  %v6862_v43 = vadd.f32 %v6798_v50, %v20843_v33  ;;  %v6985_v37 = vmul.f32 %v16634_v45, %v6857_v29  ;;  %v7161_v32 = vmul.f32 %v20846_v13, %v6857_v29  ;;  %v20848_v30 = vld [vmem:[#allocation70_spill] sm:$0xff]  ;;  %v17472_v47 = vld [vmem:[%s10023_s14 + $0x3b0] sm:$0xff] }
 0x604   : > { %20845 = vst [vmem:[#allocation10_spill] sm:$0xff] %v17453_v18  ;;  %v6986_v40 = vmul.f32 %v16648_v31, %v6858_v39  ;;  %v6752_v50 = vadd.f32 %v17453_v18, %v20847_v23  ;;  %v7162_v33 = vmul.f32 %v20848_v30, %v6858_v39  ;;  %v20849_v48 = vld [vmem:[#allocation106_spill] sm:$0xff]  ;;  %20850 = vst [vmem:[#allocation110_spill] sm:$0xff] %v17466_v35  ;;  %v20854_v13 = vld [vmem:[#allocation72_spill] sm:$0xff] }
 0x605   : > { %v7165_v6 = vmul.f32 %v20849_v48, %v6861_v7  ;;  %v17469_v45 = vmul.f32 %v17466_v35, %v6747_v8  ;;  %20852 = vst [vmem:[#allocation70_spill] sm:$0xff] %v17472_v47  ;;  %v17475_v31 = vmul.f32 %v17472_v47, %v6747_v8  ;;  %v7049_v29 = vadd.f32 %v6985_v37, %v20854_v13  ;;  %v20855_v41 = vld [vmem:[#allocation98_spill] sm:$0xff]  ;;  %v17491_v7 = vpop.f32.mrb[94].mxu1  ;;  %v20861_v30 = vld [vmem:[#allocation65_spill] sm:$0xff]  ;;  %v17495_v13 = vpop.f32.mrb[126].mxu0 }
 0x606   : > { %v7289_v18 = vsub.f32 %v7161_v32, %v20855_v41  ;;  %v17480_v23 = vld [vmem:[%s10023_s14 + $0x1b8] sm:$0xff]  ;;  %20860 = vst [vmem:[#allocation232_spill] sm:$0xff] %v17491_v7  ;;  %v7050_v8 = vadd.f32 %v6986_v40, %v20861_v30  ;;  %v20863_v41 = vld [vmem:[#allocation117_spill] sm:$0xff]  ;;  %v17506_v47 = vpop.f32.mrb[127].mxu0 }
 0x607   : > { %20851 = vst [vmem:[#allocation12_spill] sm:$0xff] %v17469_v45  ;;  %20853 = vst [vmem:[#allocation106_spill] sm:$0xff] %v17475_v31  ;;  %v17483_v34 = vmul.f32 %v17480_v23, %v6748_v27  ;;  %v17486_v48 = vld [vmem:[%s10023_s14 + $0x3b8] sm:$0xff]  ;;  %v20862_v31 = vld [vmem:[#allocation59_spill] sm:$0xff]  ;;  %v17499_v32 = vadd.f32 %v17491_v7, %v20863_v41 }
 0x608   : > { %20856 = vst [vmem:[#allocation72_spill] sm:$0xff] %v17480_v23  ;;  %20858 = vst [vmem:[#allocation230_spill] sm:$0xff] %v17486_v48  ;;  %v17489_v39 = vmul.f32 %v17486_v48, %v6748_v27  ;;  %v7290_v37 = vsub.f32 %v7162_v33, %v20862_v31  ;;  %v20866_v45 = vld [vmem:[#allocation19_spill] sm:$0xff]  ;;  %v20867_v27 = vld [vmem:[#allocation144_spill] sm:$0xff]  ;;  %v17508_v40 = vadd.f32 %v7050_v8, %v7049_v29 }
 0x609   : > { %20857 = vst [vmem:[#allocation98_spill] sm:$0xff] %v17483_v34  ;;  %20864 = vst [vmem:[#allocation65_spill] sm:$0xff] %v17499_v32  ;;  %v17501_v34 = vpop.f32.mrb[95].mxu1  ;;  %v7053_v23 = vadd.f32 %v6989_v12, %v20866_v45  ;;  %v20868_v48 = vld [vmem:[#allocation53_spill] sm:$0xff]  ;;  %v20869_v31 = vld [vmem:[#allocation142_spill] sm:$0xff] }
 0x60a   : > { %20859 = vst [vmem:[#allocation231_spill] sm:$0xff] %v17489_v39  ;;  %20865 = vst [vmem:[#allocation59_spill] sm:$0xff] %v17501_v34  ;;  %v7293_v39 = vsub.f32 %v7165_v6, %v20867_v27  ;;  %v6990_v35 = vmul.f32 %v20868_v48, %v6862_v43  ;;  %v17510_v33 = vadd.f32 %v7290_v37, %v7289_v18  ;;  %v20871_v32 = vld [vmem:[#allocation90_spill] sm:$0xff]  ;;  %v17518_v41 = vld [vmem:[%s10023_s14 + $0x1d0] sm:$0xff] }
 0x60b   : > { %v17514_v30 = vadd.f32 %v17501_v34, %v20869_v31  ;;  %v7166_v7 = vmul.f32 %v20871_v32, %v6862_v43  ;;  %20872 = vst [vmem:[#allocation144_spill] sm:$0xff] %v17518_v41  ;;  %v17521_v12 = vmul.f32 %v17518_v41, %v6751_v2  ;;  %v17524_v6 = vld [vmem:[%s10023_s14 + $0x3d0] sm:$0xff]  ;;  %v20875_v29 = vld [vmem:[#allocation91_spill] sm:$0xff]  ;;  %v17533_v37 = vld [vmem:[%s10023_s14 + $0x1d8] sm:$0xff] }
 0x60c   : > { %v17527_v45 = vmul.f32 %v17524_v6, %v6751_v2  ;;  %v7054_v48 = vadd.f32 %v6990_v35, %v20875_v29  ;;  %v20876_v18 = vld [vmem:[#allocation113_spill] sm:$0xff]  ;;  %20877 = vst [vmem:[#allocation91_spill] sm:$0xff] %v17533_v37  ;;  %v17536_v27 = vmul.f32 %v17533_v37, %v6752_v50  ;;  %v17539_v43 = vld [vmem:[%s10023_s14 + $0x3d8] sm:$0xff]  ;;  %v20881_v34 = vld [vmem:[#allocation151_spill] sm:$0xff] }
 0x60d   : > { %20870 = vst [vmem:[#allocation19_spill] sm:$0xff] %v17514_v30  ;;  %20873 = vst [vmem:[#allocation53_spill] sm:$0xff] %v17521_v12  ;;  %v6801_v8 = vsub.f32 %v17301_v21, %v20876_v18  ;;  %v17542_v32 = vmul.f32 %v17539_v43, %v6752_v50  ;;  %v6598_v30 = vpop.f32.mrb[96].mxu1  ;;  %v7294_v31 = vsub.f32 %v7166_v7, %v20881_v34  ;;  %v20882_v2 = vld [vmem:[#allocation3_spill] sm:$0xff]  ;;  %v20886_v34 = vld [vmem:[#allocation64_spill] sm:$0xff] }
 0x60e   : > { %20874 = vst [vmem:[#allocation90_spill] sm:$0xff] %v17527_v45  ;;  %20878 = vst [vmem:[#allocation113_spill] sm:$0xff] %v17536_v27  ;;  %v6802_v45 = vsub.f32 %v17310_v3, %v20882_v2  ;;  %v6759_v35 = vsub.f32 %v6598_v30, %v16130_v55  ;;  %v6600_v29 = vpop.f32.mrb[97].mxu1  ;;  %v17548_v21 = vadd.f32 %v7054_v48, %v7053_v23  ;;  %v20883_v18 = vld [vmem:[#allocation11_spill] sm:$0xff]  ;;  %v20887_v23 = vld [vmem:[#allocation97_spill] sm:$0xff] }
 0x60f   : > { %20879 = vst [vmem:[#allocation233_spill] sm:$0xff] %v17539_v43  ;;  %20880 = vst [vmem:[#allocation234_spill] sm:$0xff] %v17542_v32  ;;  %v6865_v12 = vadd.f32 %v6801_v8, %v20883_v18  ;;  %v20884_v37 = vld [vmem:[#allocation139_spill] sm:$0xff]  ;;  %v6760_v41 = vsub.f32 %v6600_v29, %v16132_v28  ;;  %v17554_v50 = vadd.f32 %v7294_v31, %v7293_v39  ;;  %v20888_v48 = vld [vmem:[#allocation44_spill] sm:$0xff] }
 0x610   : > { %v6805_v27 = vsub.f32 %v17349_v36, %v20884_v37  ;;  %v20885_v32 = vld [vmem:[#allocation55_spill] sm:$0xff]  ;;  %v6806_v7 = vsub.f32 %v17359_v44, %v20886_v34  ;;  %v6823_v3 = vadd.f32 %v6759_v35, %v16760_v16  ;;  %v6604_v36 = vpop.f32.mrb[98].mxu1  ;;  %v20889_v39 = vld [vmem:[#allocation114_spill] sm:$0xff]  ;;  %v20893_v18 = vld [vmem:[#allocation112_spill] sm:$0xff] }
 0x611   : > { %v6866_v43 = vadd.f32 %v6802_v45, %v20885_v32  ;;  %v6993_v55 = vmul.f32 %v16696_v46, %v6865_v12  ;;  %v7169_v30 = vmul.f32 %v20887_v23, %v6865_v12  ;;  %v6824_v2 = vadd.f32 %v6760_v41, %v16779_v9  ;;  %v20890_v37 = vld [vmem:[#allocation159_spill] sm:$0xff]  ;;  %v20891_v46 = vld [vmem:[#allocation73_spill] sm:$0xff]  ;;  %v6606_v12 = vpop.f32.mrb[99].mxu1  ;;  %v20892_v41 = vld [vmem:[#allocation34_spill] sm:$0xff] }
 0x612   : > { %v6869_v8 = vadd.f32 %v6805_v27, %v20888_v48  ;;  %v6870_v45 = vadd.f32 %v6806_v7, %v20890_v37  ;;  %v6951_v32 = vmul.f32 %v16864_v4, %v6823_v3  ;;  %v7127_v44 = vmul.f32 %v16856_v56, %v6823_v3  ;;  %v20900_v37 = vld [vmem:[#allocation183_spill] sm:$0xff] }
 0x613   : > { %v6994_v28 = vmul.f32 %v16712_v52, %v6866_v43  ;;  %v7170_v31 = vmul.f32 %v20889_v39, %v6866_v43  ;;  %v6763_v16 = vsub.f32 %v6604_v36, %v16146_v11  ;;  %v7057_v35 = vadd.f32 %v6993_v55, %v20891_v46  ;;  %v6610_v55 = vpop.f32.mrb[100].mxu1  ;;  %v20898_v36 = vld [vmem:[#allocation182_spill] sm:$0xff]  ;;  %v20899_v39 = vld [vmem:[#allocation15_spill] sm:$0xff] }
 0x614   : > { %v6952_v27 = vmul.f32 %v16896_v60, %v6824_v2  ;;  %v7128_v9 = vmul.f32 %v16875_v10, %v6824_v2  ;;  %v7297_v29 = vsub.f32 %v7169_v30, %v20892_v41  ;;  %v6764_v52 = vsub.f32 %v6606_v12, %v16148_v14  ;;  %v20894_v10 = vld [vmem:[#allocation102_spill] sm:$0xff]  ;;  %v20902_v46 = vld [vmem:[#allocation23_spill] sm:$0xff]  ;;  %v20904_v41 = vld [vmem:[#allocation60_spill] sm:$0xff] }
 0x615   : > { %v7015_v43 = vadd.f32 %v6951_v32, %v16859_v22  ;;  %v7255_v4 = vsub.f32 %v7127_v44, %v16867_v54  ;;  %v6827_v56 = vadd.f32 %v6763_v16, %v16838_v62  ;;  %v7058_v11 = vadd.f32 %v6994_v28, %v20893_v18  ;;  %v6612_v62 = vpop.f32.mrb[101].mxu1  ;;  %v20901_v44 = vld [vmem:[#allocation62_spill] sm:$0xff] }
 0x616   : > { %v7016_v34 = vadd.f32 %v6952_v27, %v16878_v19  ;;  %v7256_v7 = vsub.f32 %v7128_v9, %v16899_v5  ;;  %v6828_v60 = vadd.f32 %v6764_v52, %v16845_v25  ;;  %v7298_v3 = vsub.f32 %v7170_v31, %v20894_v10  ;;  %v20895_v19 = vld [vmem:[#allocation109_spill] sm:$0xff]  ;;  %v6616_v27 = vpop.f32.mrb[102].mxu1  ;;  %v20905_v52 = vld [vmem:[#allocation76_spill] sm:$0xff] }
 0x617   : > { %v7093_v23 = vadd.f32 %v16883_v17, %v7015_v43  ;;  %v7333_v14 = vadd.f32 %v16885_v51, %v7255_v4  ;;  %v6955_v22 = vmul.f32 %v16923_v63, %v6827_v56  ;;  %v7131_v54 = vmul.f32 %v16917_v1, %v6827_v56  ;;  %v20896_v5 = vld [vmem:[#allocation93_spill] sm:$0xff]  ;;  %v20897_v1 = vld [vmem:[#allocation119_spill] sm:$0xff]  ;;  %v6618_v18 = vpop.f32.mrb[103].mxu1 }
 0x618   : > { %v6956_v25 = vmul.f32 %v20895_v19, %v6828_v60  ;;  %v7132_v30 = vmul.f32 %v20896_v5, %v6828_v60  ;;  %v17596_v17 = vadd.f32 %v7058_v11, %v7057_v35  ;;  %v17598_v51 = vadd.f32 %v7298_v3, %v7297_v29  ;;  %v20903_v35 = vld [vmem:[#allocation92_spill] sm:$0xff]  ;;  %v20906_v4 = vld [vmem:[#allocation35_spill] sm:$0xff]  ;;  %v20909_v10 = vld [vmem:[#allocation81_spill] sm:$0xff] }
 0x619   : > { %v7109_v63 = vadd.f32 %v7093_v23, %v7016_v34  ;;  %v7349_v48 = vadd.f32 %v7333_v14, %v7256_v7  ;;  %v7019_v2 = vadd.f32 %v6955_v22, %v20897_v1  ;;  %v7259_v28 = vsub.f32 %v7131_v54, %v20898_v36  ;;  %v20907_v11 = vld [vmem:[#allocation180_spill] sm:$0xff]  ;;  %v20908_v7 = vld [vmem:[#allocation82_spill] sm:$0xff]  ;;  %v6622_v36 = vpop.f32.mrb[104].mxu1 }
 0x61a   : > { %v7020_v31 = vadd.f32 %v6956_v25, %v20899_v39  ;;  %v7260_v32 = vsub.f32 %v7132_v30, %v20900_v37  ;;  %v6767_v16 = vsub.f32 %v6610_v55, %v20901_v44  ;;  %v6997_v12 = vmul.f32 %v20902_v46, %v6869_v8  ;;  %v20910_v55 = vld [vmem:[#allocation158_spill] sm:$0xff]  ;;  %v20911_v54 = vld [vmem:[#allocation16_spill] sm:$0xff]  ;;  %v20912_v25 = vld [vmem:[#allocation181_spill] sm:$0xff]  ;;  %v6624_v46 = vpop.f32.mrb[105].mxu1 }
 0x61b   : > { %7522 = vst [vmem:[%s17592_s17] sm:$0xff] %v7109_v63  ;;  %7849 = vst [vmem:[%s17592_s17 + $0x80] sm:$0xff] %v7349_v48  ;;  %v7094_v9 = vadd.f32 %v20903_v35, %v7019_v2  ;;  %v7334_v29 = vadd.f32 %v20904_v41, %v7259_v28  ;;  %v7173_v43 = vmul.f32 %v20905_v52, %v6869_v8  ;;  %v20913_v30 = vld [vmem:[#allocation128_spill] sm:$0xff]  ;;  %v20914_v63 = vld [vmem:[#allocation145_spill] sm:$0xff] }
 0x61c   : > { %v6768_v56 = vsub.f32 %v6612_v62, %v20906_v4  ;;  %v6831_v34 = vadd.f32 %v6767_v16, %v20907_v11  ;;  %v7061_v60 = vadd.f32 %v6997_v12, %v20908_v7  ;;  %v6998_v3 = vmul.f32 %v20909_v10, %v6870_v45  ;;  %v20915_v1 = vld [vmem:[#allocation14_spill] sm:$0xff]  ;;  %v20916_v28 = vld [vmem:[#allocation115_spill] sm:$0xff]  ;;  %v20919_v44 = vld [vmem:[#allocation96_spill] sm:$0xff] }
 0x61d   : > { %v7174_v23 = vmul.f32 %v20910_v55, %v6870_v45  ;;  %v7110_v14 = vadd.f32 %v7094_v9, %v7020_v31  ;;  %v7350_v22 = vadd.f32 %v7334_v29, %v7260_v32  ;;  %v7301_v19 = vsub.f32 %v7173_v43, %v20911_v54  ;;  %v20917_v45 = vld [vmem:[#allocation186_spill] sm:$0xff]  ;;  %v20921_v35 = vld [vmem:[#allocation184_spill] sm:$0xff]  ;;  %v20922_v52 = vld [vmem:[#allocation187_spill] sm:$0xff]  ;;  %v6628_v54 = vpop.f32.mrb[106].mxu1 }
 0x61e   : > { %v6832_v5 = vadd.f32 %v6768_v56, %v20912_v25  ;;  %v6959_v8 = vmul.f32 %v16963_v42, %v6831_v34  ;;  %v7135_v62 = vmul.f32 %v20913_v30, %v6831_v34  ;;  %v7062_v48 = vadd.f32 %v6998_v3, %v20914_v63  ;;  %v20918_v37 = vld [vmem:[#allocation118_spill] sm:$0xff]  ;;  %v20923_v4 = vld [vmem:[#allocation188_spill] sm:$0xff]  ;;  %v20926_v10 = vld [vmem:[#allocation133_spill] sm:$0xff] }
 0x61f   : > { %v7302_v2 = vsub.f32 %v7174_v23, %v20915_v1  ;;  %7523 = vst [vmem:[%s17592_s17 + $0x8] sm:$0xff] %v7110_v14  ;;  %7850 = vst [vmem:[%s17592_s17 + $0x88] sm:$0xff] %v7350_v22  ;;  %v6771_v32 = vsub.f32 %v6616_v27, %v20918_v37  ;;  %v6809_v16 = vsub.f32 %v17397_v26, %v20919_v44  ;;  %v20920_v42 = vld [vmem:[#allocation26_spill] sm:$0xff]  ;;  %v20924_v11 = vld [vmem:[#allocation148_spill] sm:$0xff]  ;;  %v17648_v1 = vpop.f32.mrb[107].mxu1 }
 0x620   : > { %v6960_v39 = vmul.f32 %v20916_v28, %v6832_v5  ;;  %v7136_v31 = vmul.f32 %v20917_v45, %v6832_v5  ;;  %v7023_v12 = vadd.f32 %v6959_v8, %v20920_v42  ;;  %v7263_v9 = vsub.f32 %v7135_v62, %v20921_v35  ;;  %v20925_v7 = vld [vmem:[#allocation134_spill] sm:$0xff]  ;;  %v20927_v26 = vld [vmem:[#allocation185_spill] sm:$0xff]  ;;  %v20928_v23 = vld [vmem:[#allocation127_spill] sm:$0xff] }
 0x621   : > { %v17631_v41 = vadd.f32 %v7062_v48, %v7061_v60  ;;  %v17633_v29 = vadd.f32 %v7302_v2, %v7301_v19  ;;  %v6835_v34 = vadd.f32 %v6771_v32, %v20924_v11  ;;  %v6873_v27 = vadd.f32 %v6809_v16, %v20925_v7  ;;  %v20929_v22 = vld [vmem:[#allocation108_spill] sm:$0xff]  ;;  %v20930_v19 = vld [vmem:[#allocation191_spill] sm:$0xff]  ;;  %v20931_v5 = vld [vmem:[#allocation42_spill] sm:$0xff] }
 0x622   : > { %v7024_v43 = vadd.f32 %v6960_v39, %v20922_v52  ;;  %v7264_v56 = vsub.f32 %v7136_v31, %v20923_v4  ;;  %v7095_v3 = vadd.f32 %v20926_v10, %v7023_v12  ;;  %v7335_v55 = vadd.f32 %v20927_v26, %v7263_v9  ;;  %v20932_v30 = vld [vmem:[#allocation103_spill] sm:$0xff]  ;;  %v20933_v63 = vld [vmem:[#allocation149_spill] sm:$0xff]  ;;  %v20934_v39 = vld [vmem:[#allocation68_spill] sm:$0xff] }
 0x623   : > { %v6772_v14 = vsub.f32 %v6618_v18, %v20928_v23  ;;  %v6810_v60 = vsub.f32 %v17409_v49, %v20929_v22  ;;  %v6963_v25 = vmul.f32 %v20930_v19, %v6835_v34  ;;  %v7139_v8 = vmul.f32 %v20931_v5, %v6835_v34  ;;  %v20935_v45 = vld [vmem:[#allocation13_spill] sm:$0xff]  ;;  %v20937_v32 = vld [vmem:[#allocation192_spill] sm:$0xff]  ;;  %v20938_v16 = vld [vmem:[#allocation147_spill] sm:$0xff]  ;;  %v17662_v34 = vpop.f32.mrb[108].mxu1 }
 0x624   : > { %v7001_v62 = vmul.f32 %v20932_v30, %v6873_v27  ;;  %v7177_v48 = vmul.f32 %v20933_v63, %v6873_v27  ;;  %v7111_v2 = vadd.f32 %v7095_v3, %v7024_v43  ;;  %v7351_v28 = vadd.f32 %v7335_v55, %v7264_v56  ;;  %v20936_v37 = vld [vmem:[#allocation189_spill] sm:$0xff]  ;;  %v20939_v12 = vld [vmem:[#allocation80_spill] sm:$0xff]  ;;  %v20940_v43 = vld [vmem:[#allocation162_spill] sm:$0xff] }
 0x625   : > { %v6836_v18 = vadd.f32 %v6772_v14, %v20934_v39  ;;  %v6874_v31 = vadd.f32 %v6810_v60, %v20935_v45  ;;  %v7027_v49 = vadd.f32 %v6963_v25, %v20936_v37  ;;  %v7267_v44 = vsub.f32 %v7139_v8, %v20937_v32  ;;  %v20941_v56 = vld [vmem:[#allocation17_spill] sm:$0xff]  ;;  %v20943_v3 = vld [vmem:[#allocation135_spill] sm:$0xff]  ;;  %v20944_v55 = vld [vmem:[#allocation54_spill] sm:$0xff]  ;;  %v17669_v14 = vpop.f32.mrb[109].mxu1 }
 0x626   : > { %v7065_v42 = vadd.f32 %v7001_v62, %v20938_v16  ;;  %v7305_v35 = vsub.f32 %v7177_v48, %v20939_v12  ;;  %7524 = vst [vmem:[%s17592_s17 + $0x10] sm:$0xff] %v7111_v2  ;;  %7851 = vst [vmem:[%s17592_s17 + $0x90] sm:$0xff] %v7351_v28  ;;  %v20942_v27 = vld [vmem:[#allocation153_spill] sm:$0xff]  ;;  %v6775_v26 = vsub.f32 %v6622_v36, %v20943_v3  ;;  %v20948_v5 = vld [vmem:[#allocation163_spill] sm:$0xff] }
 0x627   : > { %v6964_v9 = vmul.f32 %v17028_v57, %v6836_v18  ;;  %v7140_v52 = vmul.f32 %v17022_v53, %v6836_v18  ;;  %v7002_v4 = vmul.f32 %v20940_v43, %v6874_v31  ;;  %v7178_v11 = vmul.f32 %v20941_v56, %v6874_v31  ;;  %v20945_v57 = vld [vmem:[#allocation143_spill] sm:$0xff]  ;;  %v20946_v53 = vld [vmem:[#allocation124_spill] sm:$0xff]  ;;  %v20947_v19 = vld [vmem:[#allocation161_spill] sm:$0xff]  ;;  %v6640_v31 = vpop.f32.mrb[110].mxu1 }
 0x628   : > { %v7096_v7 = vadd.f32 %v17049_v61, %v7027_v49  ;;  %v7336_v10 = vadd.f32 %v20942_v27, %v7267_v44  ;;  %v6813_v23 = vsub.f32 %v17449_v59, %v20944_v55  ;;  %v20949_v30 = vld [vmem:[#allocation157_spill] sm:$0xff]  ;;  %v20951_v36 = vld [vmem:[#allocation107_spill] sm:$0xff]  ;;  %v20952_v2 = vld [vmem:[#allocation86_spill] sm:$0xff]  ;;  %v6642_v43 = vpop.f32.mrb[111].mxu1 }
 0x629   : > { %v7028_v22 = vadd.f32 %v6964_v9, %v20945_v57  ;;  %v7268_v60 = vsub.f32 %v7140_v52, %v20946_v53  ;;  %v7066_v25 = vadd.f32 %v7002_v4, %v20947_v19  ;;  %v7306_v8 = vsub.f32 %v7178_v11, %v20948_v5  ;;  %v20950_v62 = vld [vmem:[#allocation45_spill] sm:$0xff]  ;;  %v20955_v16 = vld [vmem:[#allocation166_spill] sm:$0xff]  ;;  %v20956_v9 = vld [vmem:[#allocation164_spill] sm:$0xff] }
 0x62a   : > { %v6839_v61 = vadd.f32 %v6775_v26, %v20949_v30  ;;  %v6877_v63 = vadd.f32 %v6813_v23, %v20950_v62  ;;  %v6776_v48 = vsub.f32 %v6624_v46, %v20951_v36  ;;  %v6814_v59 = vsub.f32 %v17458_v38, %v20952_v2  ;;  %v20953_v37 = vld [vmem:[#allocation41_spill] sm:$0xff]  ;;  %v20957_v46 = vld [vmem:[#allocation138_spill] sm:$0xff]  ;;  %v20958_v4 = vld [vmem:[#allocation136_spill] sm:$0xff] }
 0x62b   : > { %v7112_v28 = vadd.f32 %v7096_v7, %v7028_v22  ;;  %v7352_v39 = vadd.f32 %v7336_v10, %v7268_v60  ;;  %v17680_v18 = vadd.f32 %v7066_v25, %v7065_v42  ;;  %v17682_v45 = vadd.f32 %v7306_v8, %v7305_v35  ;;  %v20954_v32 = vld [vmem:[#allocation105_spill] sm:$0xff]  ;;  %v20960_v35 = vld [vmem:[#allocation88_spill] sm:$0xff]  ;;  %v20961_v27 = vld [vmem:[#allocation22_spill] sm:$0xff] }
 0x62c   : > { %v6967_v49 = vmul.f32 %v20953_v37, %v6839_v61  ;;  %v7143_v44 = vmul.f32 %v20954_v32, %v6839_v61  ;;  %v7005_v12 = vmul.f32 %v20955_v16, %v6877_v63  ;;  %v7181_v52 = vmul.f32 %v20956_v9, %v6877_v63  ;;  %v20959_v42 = vld [vmem:[#allocation37_spill] sm:$0xff]  ;;  %v20964_v57 = vld [vmem:[#allocation167_spill] sm:$0xff]  ;;  %v20967_v5 = vld [vmem:[#allocation170_spill] sm:$0xff] }
 0x62d   : > { %7525 = vst [vmem:[%s17592_s17 + $0x18] sm:$0xff] %v7112_v28  ;;  %7852 = vst [vmem:[%s17592_s17 + $0x98] sm:$0xff] %v7352_v39  ;;  %v6840_v38 = vadd.f32 %v6776_v48, %v20957_v46  ;;  %v6878_v56 = vadd.f32 %v6814_v59, %v20958_v4  ;;  %v6779_v11 = vsub.f32 %v6628_v54, %v20959_v42  ;;  %v20962_v3 = vld [vmem:[#allocation193_spill] sm:$0xff]  ;;  %v20965_v53 = vld [vmem:[#allocation195_spill] sm:$0xff]  ;;  %v17703_v54 = vpop.f32.mrb[112].mxu1 }
 0x62e   : > { %v6817_v7 = vsub.f32 %v17495_v13, %v20960_v35  ;;  %v7031_v10 = vadd.f32 %v6967_v49, %v20961_v27  ;;  %v7271_v26 = vsub.f32 %v7143_v44, %v20962_v3  ;;  %v20963_v55 = vld [vmem:[#allocation165_spill] sm:$0xff]  ;;  %v7309_v22 = vsub.f32 %v7181_v52, %v20964_v57  ;;  %v20966_v19 = vld [vmem:[#allocation75_spill] sm:$0xff]  ;;  %v20968_v30 = vld [vmem:[#allocation168_spill] sm:$0xff]  ;;  %v17709_v39 = vpop.f32.mrb[113].mxu1 }
 0x62f   : > { %v7069_v23 = vadd.f32 %v7005_v12, %v20963_v55  ;;  %v6968_v60 = vmul.f32 %v20965_v53, %v6840_v38  ;;  %v7144_v25 = vmul.f32 %v20966_v19, %v6840_v38  ;;  %v7006_v8 = vmul.f32 %v20967_v5, %v6878_v56  ;;  %v20969_v62 = vld [vmem:[#allocation137_spill] sm:$0xff]  ;;  %v20970_v63 = vld [vmem:[#allocation156_spill] sm:$0xff]  ;;  %v20971_v48 = vld [vmem:[#allocation190_spill] sm:$0xff]  ;;  %v17723_v55 = vpop.f32.mrb[114].mxu1 }
 0x630   : > { %v7182_v61 = vmul.f32 %v20968_v30, %v6878_v56  ;;  %v7097_v13 = vadd.f32 %v20969_v62, %v7031_v10  ;;  %v7337_v36 = vadd.f32 %v20970_v63, %v7271_v26  ;;  %v6843_v2 = vadd.f32 %v6779_v11, %v20971_v48  ;;  %v20972_v59 = vld [vmem:[#allocation31_spill] sm:$0xff]  ;;  %v20973_v37 = vld [vmem:[#allocation126_spill] sm:$0xff]  ;;  %v20974_v32 = vld [vmem:[#allocation196_spill] sm:$0xff] }
 0x631   : > { %v6881_v28 = vadd.f32 %v6817_v7, %v20972_v59  ;;  %v7032_v49 = vadd.f32 %v6968_v60, %v20973_v37  ;;  %v7272_v44 = vsub.f32 %v7144_v25, %v20974_v32  ;;  %v20975_v16 = vld [vmem:[#allocation169_spill] sm:$0xff]  ;;  %v20976_v9 = vld [vmem:[#allocation171_spill] sm:$0xff]  ;;  %v20979_v42 = vld [vmem:[#allocation174_spill] sm:$0xff] }
 0x632   : > { %v7070_v12 = vadd.f32 %v7006_v8, %v20975_v16  ;;  %v7310_v52 = vsub.f32 %v7182_v61, %v20976_v9  ;;  %v20977_v46 = vld [vmem:[#allocation199_spill] sm:$0xff]  ;;  %v20978_v4 = vld [vmem:[#allocation197_spill] sm:$0xff]  ;;  %v20980_v35 = vld [vmem:[#allocation172_spill] sm:$0xff]  ;;  %v17729_v61 = vpop.f32.mrb[115].mxu1 }
 0x633   : > { %v6971_v38 = vmul.f32 %v20977_v46, %v6843_v2  ;;  %v7147_v56 = vmul.f32 %v20978_v4, %v6843_v2  ;;  %v7009_v11 = vmul.f32 %v20979_v42, %v6881_v28  ;;  %v7185_v7 = vmul.f32 %v20980_v35, %v6881_v28  ;;  %v20981_v57 = vld [vmem:[#allocation198_spill] sm:$0xff]  ;;  %v20982_v60 = vld [vmem:[#allocation200_spill] sm:$0xff]  ;;  %v20983_v25 = vld [vmem:[#allocation173_spill] sm:$0xff] }
 0x634   : > { %v7113_v27 = vadd.f32 %v7097_v13, %v7032_v49  ;;  %v7353_v10 = vadd.f32 %v7337_v36, %v7272_v44  ;;  %v17719_v3 = vadd.f32 %v7070_v12, %v7069_v23  ;;  %v17721_v26 = vadd.f32 %v7310_v52, %v7309_v22  ;;  %v20984_v8 = vld [vmem:[#allocation175_spill] sm:$0xff]  ;;  %v20985_v62 = vld [vmem:[#allocation9_spill] sm:$0xff]  ;;  %v20986_v13 = vld [vmem:[#allocation66_spill] sm:$0xff] }
 0x635   : > { %v7035_v53 = vadd.f32 %v6971_v38, %v20981_v57  ;;  %v7275_v19 = vsub.f32 %v7147_v56, %v20982_v60  ;;  %v7073_v5 = vadd.f32 %v7009_v11, %v20983_v25  ;;  %v7313_v30 = vsub.f32 %v7185_v7, %v20984_v8  ;;  %v20987_v63 = vld [vmem:[#allocation28_spill] sm:$0xff]  ;;  %v20989_v28 = vld [vmem:[#allocation122_spill] sm:$0xff]  ;;  %v20991_v44 = vld [vmem:[#allocation125_spill] sm:$0xff] }
 0x636   : > { %7526 = vst [vmem:[%s17592_s17 + $0x20] sm:$0xff] %v7113_v27  ;;  %7853 = vst [vmem:[%s17592_s17 + $0xa0] sm:$0xff] %v7353_v10  ;;  %v6780_v23 = vsub.f32 %v17648_v1, %v20985_v62  ;;  %v6818_v22 = vsub.f32 %v17506_v47, %v20986_v13  ;;  %v6783_v36 = vsub.f32 %v17662_v34, %v20987_v63  ;;  %v20988_v48 = vld [vmem:[#allocation40_spill] sm:$0xff]  ;;  %v20993_v1 = vld [vmem:[#allocation95_spill] sm:$0xff]  ;;  %v17749_v34 = vpop.f32.mrb[116].mxu1 }
 0x637   : > { %v6784_v2 = vsub.f32 %v17669_v14, %v20988_v48  ;;  %v7098_v59 = vadd.f32 %v17214_v15, %v7035_v53  ;;  %v7338_v37 = vadd.f32 %v20989_v28, %v7275_v19  ;;  %v20990_v49 = vld [vmem:[#allocation152_spill] sm:$0xff]  ;;  %v6788_v16 = vsub.f32 %v6642_v43, %v20991_v44  ;;  %v20994_v46 = vld [vmem:[#allocation141_spill] sm:$0xff]  ;;  %v20995_v38 = vld [vmem:[#allocation194_spill] sm:$0xff]  ;;  %v17757_v7 = vpop.f32.mrb[117].mxu1 }
 0x638   : > { %v6787_v32 = vsub.f32 %v6640_v31, %v20990_v49  ;;  %v20992_v12 = vld [vmem:[#allocation132_spill] sm:$0xff]  ;;  %v6882_v52 = vadd.f32 %v6818_v22, %v20993_v1  ;;  %v6847_v47 = vadd.f32 %v6783_v36, %v20994_v46  ;;  %v20996_v56 = vld [vmem:[#allocation150_spill] sm:$0xff]  ;;  %v20997_v42 = vld [vmem:[#allocation123_spill] sm:$0xff] }
 0x639   : > { %v6844_v9 = vadd.f32 %v6780_v23, %v20992_v12  ;;  %v6848_v4 = vadd.f32 %v6784_v2, %v20995_v38  ;;  %v6852_v15 = vadd.f32 %v6788_v16, %v20997_v42  ;;  %v20998_v11 = vld [vmem:[#allocation154_spill] sm:$0xff]  ;;  %v20999_v31 = vld [vmem:[#allocation85_spill] sm:$0xff]  ;;  %v21003_v25 = vld [vmem:[#allocation176_spill] sm:$0xff] }
 0x63a   : > { %v6851_v14 = vadd.f32 %v6787_v32, %v20996_v56  ;;  %v6791_v35 = vsub.f32 %v17703_v54, %v20998_v11  ;;  %v6792_v43 = vsub.f32 %v17709_v39, %v20999_v31  ;;  %v21000_v27 = vld [vmem:[#allocation201_spill] sm:$0xff]  ;;  %v21001_v57 = vld [vmem:[#allocation58_spill] sm:$0xff]  ;;  %v7186_v8 = vmul.f32 %v21003_v25, %v6882_v52  ;;  %v21004_v62 = vld [vmem:[#allocation83_spill] sm:$0xff] }
 0x63b   : > { %v6972_v10 = vmul.f32 %v21000_v27, %v6844_v9  ;;  %v7148_v53 = vmul.f32 %v21001_v57, %v6844_v9  ;;  %v21002_v60 = vld [vmem:[#allocation178_spill] sm:$0xff]  ;;  %v6975_v23 = vmul.f32 %v21004_v62, %v6847_v47  ;;  %v21007_v54 = vld [vmem:[#allocation204_spill] sm:$0xff]  ;;  %v21010_v32 = vld [vmem:[#allocation177_spill] sm:$0xff]  ;;  %v17771_v9 = vpop.f32.mrb[118].mxu1 }
 0x63c   : > { %v7010_v19 = vmul.f32 %v21002_v60, %v6882_v52  ;;  %v21005_v13 = vld [vmem:[#allocation30_spill] sm:$0xff]  ;;  %v7152_v48 = vmul.f32 %v21007_v54, %v6848_v4  ;;  %v21008_v2 = vld [vmem:[#allocation56_spill] sm:$0xff]  ;;  %v21011_v16 = vld [vmem:[#allocation179_spill] sm:$0xff]  ;;  %v17777_v11 = vpop.f32.mrb[119].mxu1 }
 0x63d   : > { %v7151_v22 = vmul.f32 %v21005_v13, %v6847_v47  ;;  %v21006_v63 = vld [vmem:[#allocation206_spill] sm:$0xff]  ;;  %v7036_v39 = vadd.f32 %v6972_v10, %v21008_v2  ;;  %v7314_v12 = vsub.f32 %v7186_v8, %v21011_v16  ;;  %v21013_v46 = vld [vmem:[#allocation203_spill] sm:$0xff]  ;;  %v21014_v38 = vld [vmem:[#allocation205_spill] sm:$0xff] }
 0x63e   : > { %v6976_v36 = vmul.f32 %v21006_v63, %v6848_v4  ;;  %v21009_v28 = vld [vmem:[#allocation202_spill] sm:$0xff]  ;;  %v7074_v44 = vadd.f32 %v7010_v19, %v21010_v32  ;;  %v21015_v42 = vld [vmem:[#allocation207_spill] sm:$0xff]  ;;  %v21023_v2 = vld [vmem:[#allocation57_spill] sm:$0xff] }
 0x63f   : > { %v7276_v49 = vsub.f32 %v7148_v53, %v21009_v28  ;;  %v21012_v1 = vld [vmem:[#allocation38_spill] sm:$0xff]  ;;  %v7279_v47 = vsub.f32 %v7151_v22, %v21013_v46  ;;  %v7280_v4 = vsub.f32 %v7152_v48, %v21015_v42  ;;  %v7114_v31 = vadd.f32 %v7098_v59, %v7036_v39  ;;  %v21017_v8 = vld [vmem:[#allocation87_spill] sm:$0xff]  ;;  %v21025_v32 = vld [vmem:[#allocation209_spill] sm:$0xff] }
 0x640   : > { %v7039_v52 = vadd.f32 %v6975_v23, %v21012_v1  ;;  %v7040_v56 = vadd.f32 %v6976_v36, %v21014_v38  ;;  %v17779_v10 = vadd.f32 %v7074_v44, %v7073_v5  ;;  %v17781_v57 = vadd.f32 %v7314_v12, %v7313_v30  ;;  %v21016_v19 = vld [vmem:[#allocation74_spill] sm:$0xff]  ;;  %v21018_v23 = vld [vmem:[#allocation208_spill] sm:$0xff]  ;;  %v21019_v59 = vld [vmem:[#allocation79_spill] sm:$0xff]  ;;  %v17793_v36 = vpop.f32.mrb[120].mxu1 }
 0x641   : > { %v7354_v27 = vadd.f32 %v7338_v37, %v7276_v49  ;;  %v7339_v60 = vadd.f32 %v17314_v58, %v7279_v47  ;;  %v6979_v25 = vmul.f32 %v21016_v19, %v6851_v14  ;;  %v7155_v62 = vmul.f32 %v21017_v8, %v6851_v14  ;;  %7527 = vst [vmem:[%s17592_s17 + $0x28] sm:$0xff] %v7114_v31  ;;  %v21020_v5 = vld [vmem:[#allocation146_spill] sm:$0xff]  ;;  %v21021_v30 = vld [vmem:[#allocation7_spill] sm:$0xff]  ;;  %v17797_v39 = vpop.f32.mrb[121].mxu1  ;;  %v21026_v16 = vld [vmem:[#allocation212_spill] sm:$0xff] }
 0x642   : > { %v7099_v53 = vadd.f32 %v17312_v20, %v7039_v52  ;;  %v6980_v13 = vmul.f32 %v21018_v23, %v6852_v15  ;;  %v7156_v37 = vmul.f32 %v21019_v59, %v6852_v15  ;;  %v6855_v22 = vadd.f32 %v6791_v35, %v21020_v5  ;;  %v21022_v54 = vld [vmem:[#allocation47_spill] sm:$0xff]  ;;  %v21027_v12 = vld [vmem:[#allocation120_spill] sm:$0xff]  ;;  %v21028_v52 = vld [vmem:[#allocation214_spill] sm:$0xff] }
 0x643   : > { %7854 = vst [vmem:[%s17592_s17 + $0xa8] sm:$0xff] %v7354_v27  ;;  %v6856_v63 = vadd.f32 %v6792_v43, %v21021_v30  ;;  %v7355_v58 = vadd.f32 %v7339_v60, %v7280_v4  ;;  %v7043_v48 = vadd.f32 %v6979_v25, %v21022_v54  ;;  %v7283_v14 = vsub.f32 %v7155_v62, %v21023_v2  ;;  %v21024_v28 = vld [vmem:[#allocation51_spill] sm:$0xff]  ;;  %v21029_v47 = vld [vmem:[#allocation129_spill] sm:$0xff]  ;;  %v21033_v60 = vld [vmem:[#allocation48_spill] sm:$0xff]  ;;  %v17815_v25 = vpop.f32.mrb[122].mxu1 }
 0x644   : > { %v7115_v20 = vadd.f32 %v7099_v53, %v7040_v56  ;;  %v7044_v49 = vadd.f32 %v6980_v13, %v21024_v28  ;;  %v7284_v44 = vsub.f32 %v7156_v37, %v21025_v32  ;;  %v6983_v15 = vmul.f32 %v21026_v16, %v6855_v22  ;;  %v21030_v56 = vld [vmem:[#allocation211_spill] sm:$0xff]  ;;  %v21031_v4 = vld [vmem:[#allocation213_spill] sm:$0xff]  ;;  %v17819_v59 = vpop.f32.mrb[123].mxu1 }
 0x645   : > { %v7159_v35 = vmul.f32 %v21027_v12, %v6855_v22  ;;  %7855 = vst [vmem:[%s17592_s17 + $0xb0] sm:$0xff] %v7355_v58  ;;  %v7100_v43 = vadd.f32 %v17351_v0, %v7043_v48  ;;  %v7340_v1 = vadd.f32 %v17361_v24, %v7283_v14  ;;  %v6984_v46 = vmul.f32 %v21028_v52, %v6856_v63  ;;  %v21032_v27 = vld [vmem:[#allocation29_spill] sm:$0xff]  ;;  %v21034_v8 = vld [vmem:[#allocation99_spill] sm:$0xff]  ;;  %v21046_v52 = vld [vmem:[#allocation130_spill] sm:$0xff] }
 0x646   : > { %7528 = vst [vmem:[%s17592_s17 + $0x30] sm:$0xff] %v7115_v20  ;;  %v7160_v38 = vmul.f32 %v21029_v47, %v6856_v63  ;;  %v7047_v42 = vadd.f32 %v6983_v15, %v21030_v56  ;;  %v6795_v53 = vsub.f32 %v17723_v55, %v21032_v27  ;;  %v6796_v19 = vsub.f32 %v17729_v61, %v21033_v60  ;;  %v21035_v23 = vld [vmem:[#allocation215_spill] sm:$0xff]  ;;  %v21037_v22 = vld [vmem:[#allocation77_spill] sm:$0xff]  ;;  %v21038_v63 = vld [vmem:[#allocation210_spill] sm:$0xff] }
 0x647   : > { %v7287_v31 = vsub.f32 %v7159_v35, %v21031_v4  ;;  %v7116_v0 = vadd.f32 %v7100_v43, %v7044_v49  ;;  %v7356_v24 = vadd.f32 %v7340_v1, %v7284_v44  ;;  %v7048_v62 = vadd.f32 %v6984_v46, %v21034_v8  ;;  %v21036_v37 = vld [vmem:[#allocation71_spill] sm:$0xff]  ;;  %v21039_v55 = vld [vmem:[#allocation69_spill] sm:$0xff]  ;;  %v21040_v61 = vld [vmem:[#allocation50_spill] sm:$0xff]  ;;  %v17837_v1 = vpop.f32.mrb[124].mxu1 }
 0x648   : > { %v7288_v13 = vsub.f32 %v7160_v38, %v21035_v23  ;;  %v7101_v5 = vadd.f32 %v21036_v37, %v7047_v42  ;;  %v6859_v20 = vadd.f32 %v6795_v53, %v21038_v63  ;;  %v6860_v58 = vadd.f32 %v6796_v19, %v21039_v55  ;;  %v21041_v48 = vld [vmem:[#allocation67_spill] sm:$0xff]  ;;  %v21044_v15 = vld [vmem:[#allocation160_spill] sm:$0xff]  ;;  %v21048_v38 = vld [vmem:[#allocation121_spill] sm:$0xff] }
 0x649   : > { %v7341_v30 = vadd.f32 %v21037_v22, %v7287_v31  ;;  %7529 = vst [vmem:[%s17592_s17 + $0x38] sm:$0xff] %v7116_v0  ;;  %7856 = vst [vmem:[%s17592_s17 + $0xb8] sm:$0xff] %v7356_v24  ;;  %v6799_v54 = vsub.f32 %v17749_v34, %v21040_v61  ;;  %v6800_v2 = vsub.f32 %v17757_v7, %v21041_v48  ;;  %v21042_v14 = vld [vmem:[#allocation131_spill] sm:$0xff]  ;;  %v21047_v34 = vld [vmem:[#allocation116_spill] sm:$0xff] }
 0x64a   : > { %v6803_v28 = vsub.f32 %v17771_v9, %v21042_v14  ;;  %v21043_v49 = vld [vmem:[#allocation39_spill] sm:$0xff]  ;;  %v7117_v44 = vadd.f32 %v7101_v5, %v7048_v62  ;;  %v6987_v12 = vmul.f32 %v21044_v15, %v6859_v20  ;;  %v6988_v46 = vmul.f32 %v21046_v52, %v6860_v58  ;;  %v21049_v56 = vld [vmem:[#allocation46_spill] sm:$0xff]  ;;  %v17843_v9 = vpop.f32.mrb[125].mxu1  ;;  %v21052_v53 = vld [vmem:[#allocation216_spill] sm:$0xff] }
 0x64b   : > { %v6804_v32 = vsub.f32 %v17777_v11, %v21043_v49  ;;  %v7357_v16 = vadd.f32 %v7341_v30, %v7288_v13  ;;  %v21045_v35 = vld [vmem:[#allocation27_spill] sm:$0xff]  ;;  %v7164_v47 = vmul.f32 %v21047_v34, %v6860_v58  ;;  %v6863_v7 = vadd.f32 %v6799_v54, %v21048_v38  ;;  %v21050_v11 = vld [vmem:[#allocation4_spill] sm:$0xff]  ;;  %v21056_v13 = vld [vmem:[#allocation217_spill] sm:$0xff]  ;;  %v17859_v54 = vpop.f32.mrb[126].mxu1 }
 0x64c   : > { %v7163_v43 = vmul.f32 %v21045_v35, %v6859_v20  ;;  %v6864_v42 = vadd.f32 %v6800_v2, %v21049_v56  ;;  %7530 = vst [vmem:[%s17592_s17 + $0x40] sm:$0xff] %v7117_v44  ;;  %v7051_v4 = vadd.f32 %v6987_v12, %v21050_v11  ;;  %v21051_v31 = vld [vmem:[#allocation63_spill] sm:$0xff]  ;;  %v6867_v60 = vadd.f32 %v6803_v28, %v21052_v53  ;;  %v21053_v19 = vld [vmem:[#allocation20_spill] sm:$0xff]  ;;  %v21057_v5 = vld [vmem:[#allocation18_spill] sm:$0xff]  ;;  %v17865_v15 = vpop.f32.mrb[127].mxu1 }
 0x64d   : > { %7857 = vst [vmem:[%s17592_s17 + $0xc0] sm:$0xff] %v7357_v16  ;;  %v6868_v0 = vadd.f32 %v6804_v32, %v21053_v19  ;;  %v21054_v24 = vld [vmem:[#allocation104_spill] sm:$0xff]  ;;  %v6991_v37 = vmul.f32 %v21056_v13, %v6863_v7  ;;  %v7167_v22 = vmul.f32 %v21057_v5, %v6863_v7  ;;  %v21058_v20 = vld [vmem:[#allocation219_spill] sm:$0xff]  ;;  %v21060_v48 = vld [vmem:[#allocation89_spill] sm:$0xff] }
 0x64e   : > { %v7291_v27 = vsub.f32 %v7163_v43, %v21051_v31  ;;  %v7052_v8 = vadd.f32 %v6988_v46, %v21054_v24  ;;  %v21055_v62 = vld [vmem:[#allocation36_spill] sm:$0xff]  ;;  %v7102_v30 = vadd.f32 %v17508_v40, %v7051_v4  ;;  %v6992_v55 = vmul.f32 %v21058_v20, %v6864_v42  ;;  %v21061_v14 = vld [vmem:[#allocation218_spill] sm:$0xff]  ;;  %v21062_v49 = vld [vmem:[#allocation221_spill] sm:$0xff] }
 0x64f   : > { %v7292_v23 = vsub.f32 %v7164_v47, %v21055_v62  ;;  %v21059_v58 = vld [vmem:[#allocation52_spill] sm:$0xff]  ;;  %v7055_v2 = vadd.f32 %v6991_v37, %v21060_v48  ;;  %v7295_v28 = vsub.f32 %v7167_v22, %v21061_v14  ;;  %v6995_v32 = vmul.f32 %v21062_v49, %v6867_v60  ;;  %v21063_v44 = vld [vmem:[#allocation94_spill] sm:$0xff]  ;;  %v21064_v12 = vld [vmem:[#allocation5_spill] sm:$0xff] }
 0x650   : > { %v7342_v63 = vadd.f32 %v17510_v33, %v7291_v27  ;;  %v7168_v61 = vmul.f32 %v21059_v58, %v6864_v42  ;;  %v7171_v16 = vmul.f32 %v21063_v44, %v6867_v60  ;;  %v7118_v40 = vadd.f32 %v7102_v30, %v7052_v8  ;;  %v21065_v43 = vld [vmem:[#allocation220_spill] sm:$0xff]  ;;  %v21067_v7 = vld [vmem:[#allocation222_spill] sm:$0xff]  ;;  %v21068_v42 = vld [vmem:[#allocation223_spill] sm:$0xff] }
 0x651   : > { %v7056_v35 = vadd.f32 %v6992_v55, %v21064_v12  ;;  %v7103_v46 = vadd.f32 %v17548_v21, %v7055_v2  ;;  %v7343_v34 = vadd.f32 %v17554_v50, %v7295_v28  ;;  %v21066_v47 = vld [vmem:[#allocation84_spill] sm:$0xff]  ;;  %v6996_v11 = vmul.f32 %v21068_v42, %v6868_v0  ;;  %v21069_v4 = vld [vmem:[#allocation6_spill] sm:$0xff]  ;;  %v21070_v27 = vld [vmem:[#allocation155_spill] sm:$0xff] }
 0x652   : > { %v7358_v33 = vadd.f32 %v7342_v63, %v7292_v23  ;;  %v7296_v52 = vsub.f32 %v7168_v61, %v21065_v43  ;;  %v7059_v38 = vadd.f32 %v6995_v32, %v21066_v47  ;;  %v7299_v56 = vsub.f32 %v7171_v16, %v21067_v7  ;;  %7531 = vst [vmem:[%s17592_s17 + $0x48] sm:$0xff] %v7118_v40  ;;  %v21071_v60 = vld [vmem:[#allocation100_spill] sm:$0xff]  ;;  %v21072_v62 = vld [vmem:[#allocation25_spill] sm:$0xff]  ;;  %v21080_v2 = vld [vmem:[#allocation43_spill] sm:$0xff] }
 0x653   : > { %v7172_v31 = vmul.f32 %v21069_v4, %v6868_v0  ;;  %v6807_v53 = vsub.f32 %v17793_v36, %v21070_v27  ;;  %v6808_v21 = vsub.f32 %v17797_v39, %v21071_v60  ;;  %v7119_v19 = vadd.f32 %v7103_v46, %v7056_v35  ;;  %v21073_v13 = vld [vmem:[#allocation224_spill] sm:$0xff]  ;;  %v21075_v30 = vld [vmem:[#allocation49_spill] sm:$0xff]  ;;  %v21076_v36 = vld [vmem:[#allocation111_spill] sm:$0xff] }
 0x654   : > { %7858 = vst [vmem:[%s17592_s17 + $0xc8] sm:$0xff] %v7358_v33  ;;  %v7359_v50 = vadd.f32 %v7343_v34, %v7296_v52  ;;  %v7104_v24 = vadd.f32 %v17596_v17, %v7059_v38  ;;  %v7344_v8 = vadd.f32 %v17598_v51, %v7299_v56  ;;  %v7060_v23 = vadd.f32 %v6996_v11, %v21072_v62  ;;  %v21074_v5 = vld [vmem:[#allocation24_spill] sm:$0xff]  ;;  %v21077_v63 = vld [vmem:[#allocation33_spill] sm:$0xff]  ;;  %v21081_v28 = vld [vmem:[#allocation78_spill] sm:$0xff] }
 0x655   : > { %v7300_v37 = vsub.f32 %v7172_v31, %v21073_v13  ;;  %v6871_v22 = vadd.f32 %v6807_v53, %v21074_v5  ;;  %v6872_v0 = vadd.f32 %v6808_v21, %v21075_v30  ;;  %7532 = vst [vmem:[%s17592_s17 + $0x50] sm:$0xff] %v7119_v19  ;;  %v6811_v39 = vsub.f32 %v17815_v25, %v21076_v36  ;;  %v21078_v20 = vld [vmem:[#allocation32_spill] sm:$0xff]  ;;  %v21079_v55 = vld [vmem:[#allocation61_spill] sm:$0xff]  ;;  %v21082_v32 = vld [vmem:[#allocation227_spill] sm:$0xff] }
 0x656   : > { %7859 = vst [vmem:[%s17592_s17 + $0xd0] sm:$0xff] %v7359_v50  ;;  %v6812_v17 = vsub.f32 %v17819_v59, %v21077_v63  ;;  %v6815_v51 = vsub.f32 %v17837_v1, %v21078_v20  ;;  %v6816_v58 = vsub.f32 %v17843_v9, %v21079_v55  ;;  %v7120_v61 = vadd.f32 %v7104_v24, %v7060_v23  ;;  %v21083_v16 = vld [vmem:[#allocation101_spill] sm:$0xff]  ;;  %v21086_v1 = vld [vmem:[#allocation140_spill] sm:$0xff]  ;;  %v21087_v43 = vld [vmem:[#allocation226_spill] sm:$0xff] }
 0x657   : > { %v7360_v48 = vadd.f32 %v7344_v8, %v7300_v37  ;;  %v6999_v14 = vmul.f32 %v21080_v2, %v6871_v22  ;;  %v7175_v49 = vmul.f32 %v21081_v28, %v6871_v22  ;;  %v7000_v44 = vmul.f32 %v21082_v32, %v6872_v0  ;;  %v21084_v25 = vld [vmem:[#allocation225_spill] sm:$0xff]  ;;  %v21089_v34 = vld [vmem:[#allocation10_spill] sm:$0xff]  ;;  %v21090_v38 = vld [vmem:[#allocation8_spill] sm:$0xff] }
 0x658   : > { %v7176_v40 = vmul.f32 %v21083_v16, %v6872_v0  ;;  %v6875_v33 = vadd.f32 %v6811_v39, %v21084_v25  ;;  %v21085_v12 = vld [vmem:[#allocation21_spill] sm:$0xff]  ;;  %7533 = vst [vmem:[%s17592_s17 + $0x58] sm:$0xff] %v7120_v61  ;;  %v6880_v47 = vadd.f32 %v6816_v58, %v21089_v34  ;;  %v21091_v56 = vld [vmem:[#allocation228_spill] sm:$0xff]  ;;  %v21092_v11 = vld [vmem:[#allocation70_spill] sm:$0xff] }
 0x659   : > { %v6876_v59 = vadd.f32 %v6812_v17, %v21085_v12  ;;  %7860 = vst [vmem:[%s17592_s17 + $0xd8] sm:$0xff] %v7360_v48  ;;  %v7063_v35 = vadd.f32 %v6999_v14, %v21086_v1  ;;  %v7303_v9 = vsub.f32 %v7175_v49, %v21087_v43  ;;  %v21088_v52 = vld [vmem:[#allocation229_spill] sm:$0xff]  ;;  %v7064_v7 = vadd.f32 %v7000_v44, %v21090_v38  ;;  %v21093_v31 = vld [vmem:[#allocation110_spill] sm:$0xff]  ;;  %v21095_v50 = vld [vmem:[#allocation72_spill] sm:$0xff] }
 0x65a   : > { %v6879_v46 = vadd.f32 %v6815_v51, %v21088_v52  ;;  %v7304_v42 = vsub.f32 %v7176_v40, %v21091_v56  ;;  %v7003_v4 = vmul.f32 %v21092_v11, %v6875_v33  ;;  %v7179_v27 = vmul.f32 %v21093_v31, %v6875_v33  ;;  %v21094_v21 = vld [vmem:[#allocation230_spill] sm:$0xff]  ;;  %v21096_v8 = vld [vmem:[#allocation12_spill] sm:$0xff]  ;;  %v21100_v39 = vld [vmem:[#allocation231_spill] sm:$0xff] }
 0x65b   : > { %v7105_v53 = vadd.f32 %v17631_v41, %v7063_v35  ;;  %v7345_v60 = vadd.f32 %v17633_v29, %v7303_v9  ;;  %v7004_v19 = vmul.f32 %v21094_v21, %v6876_v59  ;;  %v7180_v24 = vmul.f32 %v21095_v50, %v6876_v59  ;;  %v21097_v23 = vld [vmem:[#allocation106_spill] sm:$0xff]  ;;  %v21098_v5 = vld [vmem:[#allocation144_spill] sm:$0xff]  ;;  %v21101_v20 = vld [vmem:[#allocation53_spill] sm:$0xff] }
 0x65c   : > { %v7067_v62 = vadd.f32 %v7003_v4, %v21096_v8  ;;  %v7307_v13 = vsub.f32 %v7179_v27, %v21097_v23  ;;  %v7007_v37 = vmul.f32 %v17524_v6, %v6879_v46  ;;  %v7183_v22 = vmul.f32 %v21098_v5, %v6879_v46  ;;  %v21099_v36 = vld [vmem:[#allocation98_spill] sm:$0xff]  ;;  %v21103_v6 = vld [vmem:[#allocation233_spill] sm:$0xff]  ;;  %v21104_v48 = vld [vmem:[#allocation91_spill] sm:$0xff] }
 0x65d   : > { %v7121_v30 = vadd.f32 %v7105_v53, %v7064_v7  ;;  %v7361_v0 = vadd.f32 %v7345_v60, %v7304_v42  ;;  %v7068_v41 = vadd.f32 %v7004_v19, %v21099_v36  ;;  %v7308_v63 = vsub.f32 %v7180_v24, %v21100_v39  ;;  %v21102_v55 = vld [vmem:[#allocation90_spill] sm:$0xff]  ;;  %v21105_v14 = vld [vmem:[#allocation117_spill] sm:$0xff]  ;;  %v21109_v59 = vld [vmem:[#allocation232_spill] sm:$0xff] }
 0x65e   : > { %v7106_v29 = vadd.f32 %v17680_v18, %v7067_v62  ;;  %v7346_v17 = vadd.f32 %v17682_v45, %v7307_v13  ;;  %v7071_v51 = vadd.f32 %v7007_v37, %v21101_v20  ;;  %v7311_v58 = vsub.f32 %v7183_v22, %v21102_v55  ;;  %v21106_v18 = vld [vmem:[#allocation142_spill] sm:$0xff]  ;;  %v21107_v40 = vld [vmem:[#allocation113_spill] sm:$0xff]  ;;  %v21110_v35 = vld [vmem:[#allocation59_spill] sm:$0xff] }
 0x65f   : > { %7534 = vst [vmem:[%s17592_s17 + $0x60] sm:$0xff] %v7121_v30  ;;  %7861 = vst [vmem:[%s17592_s17 + $0xe0] sm:$0xff] %v7361_v0  ;;  %v7008_v61 = vmul.f32 %v21103_v6, %v6880_v47  ;;  %v7184_v2 = vmul.f32 %v21104_v48, %v6880_v47  ;;  %v6819_v28 = vsub.f32 %v17859_v54, %v21105_v14  ;;  %v21108_v33 = vld [vmem:[#allocation234_spill] sm:$0xff]  ;;  %v9893_v54 = vld [vmem:[%s10023_s14 + $0x1f0] sm:$0xff] }
 0x660   : > { %v6820_v45 = vsub.f32 %v17865_v15, %v21106_v18  ;;  %v7122_v49 = vadd.f32 %v7106_v29, %v7068_v41  ;;  %v7362_v32 = vadd.f32 %v7346_v17, %v7308_v63  ;;  %v7107_v44 = vadd.f32 %v17719_v3, %v7071_v51  ;;  %v21111_v9 = vld [vmem:[#allocation65_spill] sm:$0xff]  ;;  %v9895_v38 = vld [vmem:[%s10023_s14 + $0x1f8] sm:$0xff]  ;;  %v21112_v7 = vld [vmem:[#allocation19_spill] sm:$0xff] }
 0x661   : > { %v7347_v16 = vadd.f32 %v17721_v26, %v7311_v58  ;;  %v7072_v25 = vadd.f32 %v7008_v61, %v21107_v40  ;;  %v7312_v12 = vsub.f32 %v7184_v2, %v21108_v33  ;;  %v6883_v1 = vadd.f32 %v6819_v28, %v21109_v59  ;;  %v9894_v52 = vld [vmem:[%s10023_s14 + $0x3f0] sm:$0xff]  ;;  %v9896_v42 = vld [vmem:[%s10023_s14 + $0x3f8] sm:$0xff] }
 0x662   : > { %v6884_v43 = vadd.f32 %v6820_v45, %v21110_v35  ;;  %v6947_v15 = vmul.f32 %v9893_v54, %v21111_v9  ;;  %v7251_v3 = vmul.f32 %v9894_v52, %v21111_v9  ;;  %7535 = vst [vmem:[%s17592_s17 + $0x68] sm:$0xff] %v7122_v49  ;;  %7862 = vst [vmem:[%s17592_s17 + $0xe8] sm:$0xff] %v7362_v32 }
 0x663   : > { %v7123_v26 = vadd.f32 %v7107_v44, %v7072_v25  ;;  %v7363_v46 = vadd.f32 %v7347_v16, %v7312_v12  ;;  %v7011_v34 = vmul.f32 %v9894_v52, %v6883_v1  ;;  %v7187_v47 = vmul.f32 %v9893_v54, %v6883_v1 }
 0x664   : > { %v6948_v56 = vmul.f32 %v9895_v38, %v21112_v7  ;;  %v7252_v11 = vmul.f32 %v9896_v42, %v21112_v7  ;;  %v7012_v4 = vmul.f32 %v9896_v42, %v6884_v43  ;;  %v7188_v31 = vmul.f32 %v9895_v38, %v6884_v43 }
 0x665   : > { %7536 = vst [vmem:[%s17592_s17 + $0x70] sm:$0xff] %v7123_v26  ;;  %7863 = vst [vmem:[%s17592_s17 + $0xf0] sm:$0xff] %v7363_v46  ;;  %v7075_v27 = vadd.f32 %v7011_v34, %v6947_v15  ;;  %v7315_v53 = vsub.f32 %v7187_v47, %v7251_v3 }
 0x666   : > { %v7076_v60 = vadd.f32 %v7012_v4, %v6948_v56  ;;  %v7316_v21 = vsub.f32 %v7188_v31, %v7252_v11 }
 0x667   : > { %v7108_v19 = vadd.f32 %v17779_v10, %v7075_v27  ;;  %v7348_v50 = vadd.f32 %v17781_v57, %v7315_v53 }
 0x669   : > { %v7124_v24 = vadd.f32 %v7108_v19, %v7076_v60  ;;  %v7364_v8 = vadd.f32 %v7348_v50, %v7316_v21 }
 0x66b   : > { %7537 = vst [vmem:[%s17592_s17 + $0x78] sm:$0xff] %v7124_v24  ;;  %7864 = vst [vmem:[%s17592_s17 + $0xf8] sm:$0xff] %v7364_v8 }
 0x66c PF: > { %s22_s23 = sadd.s32 1, %s9919_s23   ;;  %s21113_s21 = smov %s9915_s22 }
 0x66d   : > { %p19_p5 = scmp.ge.s32.totalorder %s22_s23, 4   ;;  %s21114_s22 = smov %s21116_s24 }
 0x66f   :  { %21 = sbr.rel (!%p19_p5) target bundleno = 2 (0x2), region = 126 }

</bundles_post_ra>
